<compile_context>
chip_gen: v5e
topology: v5e:2x2
jax: 0.10.0
libtpu: 0.0.40
codegen_flags: <defaults>
</compile_context>

<pallas_src>
import functools

import jax
import jax.numpy as jnp
from jax.experimental import pallas as pl
from jax.experimental.pallas import tpu as pltpu

# ----------------------------- model geometry ------------------------------

_DIMS_RAW = [63, 1000, 1000, 500, 200, 50, 3]        # PyTorch layer dims
_DIMS_PAD = [128, 1024, 1024, 512, 256, 128, 128]    # lane-padded dims
_HAS_BN = [True, True, True, True, False, False]
_HAS_RELU = [True, True, True, True, True, False]
_BN_EPS = 1e-5
_NUM_LAYERS = 6
_MAXPAD = max(_DIMS_PAD[1:])     # 1024
_AFFINE_ROWS = 16                # rows 0..5: dequant scale_i, rows 6..11: shift_i
_MAX_TILE_B = 256                # batch tile for large batches (MXU M-dim fill)


# ------------------------------ fused kernel -------------------------------

def _mlp_kernel(x_ref, *rest, dims_pad, has_relu):
    """Fused 6-layer MLP forward for one batch tile.

    rest = (w_0..w_5, affine_ref, o_ref)
      x_ref:   (TB, 128)      f32, zero-padded input rows
      w_i:     (Kp_i, Np_i)   int8, BN scale folded in, per-out-channel quant
      affine:  (16, 1024)     f32; row i = scale_i, row 6+i = shift_i
      o_ref:   (TB, 128)      f32, lane-dense output slab
    Intermediates stay in VMEM/vregs; only the final slab is written out.
    """
    w_refs = rest[:_NUM_LAYERS]
    affine_ref = rest[_NUM_LAYERS]
    o_ref = rest[_NUM_LAYERS + 1]

    h = x_ref[...].astype(jnp.bfloat16)
    y = None
    for i in range(_NUM_LAYERS):
        n = dims_pad[i + 1]
        w = w_refs[i][...].astype(jnp.bfloat16)           # int8 -> bf16 MXU feed
        y = jnp.dot(h, w, preferred_element_type=jnp.float32)
        scale = affine_ref[i:i + 1, 0:n]                  # (1, n) f32, static slice
        shift = affine_ref[_NUM_LAYERS + i:_NUM_LAYERS + i + 1, 0:n]
        y = y * scale + shift                             # dequant + folded bias/BN
        if has_relu[i]:
            y = jnp.maximum(y, 0.0)
        if i < _NUM_LAYERS - 1:
            h = y.astype(jnp.bfloat16)                    # bf16 feed for next matmul
    o_ref[...] = y


# ----------------------- parameter construction ----------------------------

def init_params(key):
    """Deterministic init mimicking PyTorch defaults, eval-mode BN folded,
    weights quantized to int8 with a per-output-channel scale.

    Linear: W, b ~ U(-1/sqrt(fan_in), 1/sqrt(fan_in))
    BatchNorm1d (eval): gamma=1, beta=0, running_mean=0, running_var=1.
    Fold: bn(x@W + b) = x @ (W*s) + (b*s + beta - mean*s), s = gamma/sqrt(var+eps).
    Quantize: Wq = round((W*s)/scale), scale = max|W*s| per column / 127.
    Returns: (list of int8 (pin,pout) weights, (16,1024) f32 affine array).
    """
    ws = []
    affine = jnp.zeros((_AFFINE_ROWS, _MAXPAD), jnp.float32)
    for i in range(_NUM_LAYERS):
        fan_in, fan_out = _DIMS_RAW[i], _DIMS_RAW[i + 1]
        pin, pout = _DIMS_PAD[i], _DIMS_PAD[i + 1]

        key, kw, kb = jax.random.split(key, 3)
        bound = 1.0 / jnp.sqrt(float(fan_in))
        w = jax.random.uniform(kw, (fan_in, fan_out), jnp.float32, -bound, bound)
        b = jax.random.uniform(kb, (fan_out,), jnp.float32, -bound, bound)

        if _HAS_BN[i]:
            gamma = jnp.ones((fan_out,), jnp.float32)
            beta = jnp.zeros((fan_out,), jnp.float32)
            running_mean = jnp.zeros((fan_out,), jnp.float32)
            running_var = jnp.ones((fan_out,), jnp.float32)
            s = gamma / jnp.sqrt(running_var + _BN_EPS)
            shift = b * s + beta - running_mean * s
        else:
            s = jnp.ones((fan_out,), jnp.float32)
            shift = b

        w_folded = w * s[None, :]
        absmax = jnp.max(jnp.abs(w_folded), axis=0)
        scale = jnp.where(absmax > 0.0, absmax / 127.0, 1.0)
        w_q = jnp.clip(jnp.round(w_folded / scale[None, :]), -127.0, 127.0)
        w_q = w_q.astype(jnp.int8)

        w_pad = jnp.zeros((pin, pout), jnp.int8).at[:fan_in, :fan_out].set(w_q)
        ws.append(w_pad)
        # Padded columns keep scale=0, shift=0 -> those outputs stay exactly 0.
        affine = affine.at[i, :fan_out].set(scale)
        affine = affine.at[_NUM_LAYERS + i, :fan_out].set(shift)
    return ws, affine


# --------------------------------- wrapper ----------------------------------

def forward(params, x):
    """x: (B, 63) f32 -> (B, 3) f32.  One fused pallas_call, 1-D grid over B."""
    ws, affine = params
    B, F = x.shape
    assert F == _DIMS_RAW[0], F

    # Batch padded to a multiple of 16 (bf16 sublane packing); tile in chunks
    # of _MAX_TILE_B rows once batches get large (weights stay VMEM-resident).
    if B <= _MAX_TILE_B:
        tile_b = max(16, ((B + 15) // 16) * 16)
        Bp = tile_b
    else:
        tile_b = _MAX_TILE_B
        Bp = ((B + tile_b - 1) // tile_b) * tile_b
    num_tiles = Bp // tile_b

    xp = jnp.zeros((Bp, _DIMS_PAD[0]), jnp.float32).at[:B, :F].set(x)

    in_specs = [pl.BlockSpec((tile_b, _DIMS_PAD[0]), lambda i: (i, 0))]
    for li in range(_NUM_LAYERS):
        in_specs.append(
            pl.BlockSpec((_DIMS_PAD[li], _DIMS_PAD[li + 1]), lambda i: (0, 0)))
    in_specs.append(pl.BlockSpec((_AFFINE_ROWS, _MAXPAD), lambda i: (0, 0)))
    out_spec = pl.BlockSpec((tile_b, _DIMS_PAD[-1]), lambda i: (i, 0))

    flops = 2 * Bp * sum(_DIMS_PAD[i] * _DIMS_PAD[i + 1]
                         for i in range(_NUM_LAYERS))
    w_bytes = sum(_DIMS_PAD[i] * _DIMS_PAD[i + 1] for i in range(_NUM_LAYERS))
    bytes_accessed = (w_bytes                                   # int8 weights
                      + _AFFINE_ROWS * _MAXPAD * 4              # affine
                      + Bp * _DIMS_PAD[0] * 4                   # input
                      + Bp * _DIMS_PAD[-1] * 4)                 # output
    cost = pl.CostEstimate(flops=flops, transcendentals=0,
                           bytes_accessed=bytes_accessed)

    out = pl.pallas_call(
        functools.partial(_mlp_kernel,
                          dims_pad=tuple(_DIMS_PAD),
                          has_relu=tuple(_HAS_RELU)),
        out_shape=jax.ShapeDtypeStruct((Bp, _DIMS_PAD[-1]), jnp.float32),
        grid=(num_tiles,),
        in_specs=in_specs,
        out_specs=out_spec,
        compiler_params=pltpu.CompilerParams(
            dimension_semantics=("parallel",),
            vmem_limit_bytes=16 << 20),
        cost_estimate=cost,
    )(xp, *ws, affine)

    return out[:B, :_DIMS_RAW[-1]]


def _forward_ref(params, x):
    """Pure-JAX reference of the identical (folded, int8-quantized, bf16) math."""
    ws, affine = params
    B, F = x.shape
    h = jnp.zeros((B, _DIMS_PAD[0]), jnp.float32).at[:, :F].set(x)
    h = h.astype(jnp.bfloat16)
    y = None
    for i in range(_NUM_LAYERS):
        n = _DIMS_PAD[i + 1]
        w = ws[i].astype(jnp.bfloat16)
        y = jnp.dot(h, w, preferred_element_type=jnp.float32)
        y = y * affine[i:i + 1, :n] + affine[_NUM_LAYERS + i:_NUM_LAYERS + i + 1, :n]
        if _HAS_RELU[i]:
            y = jnp.maximum(y, 0.0)
        if i < _NUM_LAYERS - 1:
            h = y.astype(jnp.bfloat16)
    return y[:, :_DIMS_RAW[-1]]


if __name__ == "__main__":
    key = jax.random.PRNGKey(0)
    key_params, key_x = jax.random.split(key)

    params = init_params(key_params)

    batch = 8
    x = jax.random.normal(key_x, (batch, 63), dtype=jnp.float32)

    y = jax.block_until_ready(forward(params, x))
    assert y.shape == (batch, 3), y.shape

    y_ref = jax.block_until_ready(_forward_ref(params, x))
    assert jnp.allclose(y, y_ref, rtol=1e-2, atol=1e-2), (y, y_ref)

    print("KERNEL_OK")
</pallas_src>

<mosaic_0001>
module attributes {stable_mosaic.version = 11 : i64} {
  func.func @_mlp_kernel(%arg0: i32, %arg1: memref<16x128xf32, #tpu.memory_space<vmem>>, %arg2: memref<128x1024xi8, #tpu.memory_space<vmem>>, %arg3: memref<1024x1024xi8, #tpu.memory_space<vmem>>, %arg4: memref<1024x512xi8, #tpu.memory_space<vmem>>, %arg5: memref<512x256xi8, #tpu.memory_space<vmem>>, %arg6: memref<256x128xi8, #tpu.memory_space<vmem>>, %arg7: memref<128x128xi8, #tpu.memory_space<vmem>>, %arg8: memref<16x1024xf32, #tpu.memory_space<vmem>>, %arg9: memref<16x128xf32, #tpu.memory_space<vmem>>) attributes {dimension_semantics = [#tpu.dimension_semantics<parallel>], iteration_bounds = array<i64: 1>, scalar_prefetch = 0 : i64, scratch_operands = 0 : i64, tpu.core_type = #tpu.core_type<tc>, window_params = [{transform_indices = @transform_0, window_bounds = array<i64: 16, 128>}, {pipeline_mode = #tpu.pipeline_mode<synchronous>, transform_indices = @transform_1, window_bounds = array<i64: 128, 1024>}, {pipeline_mode = #tpu.pipeline_mode<synchronous>, transform_indices = @transform_2, window_bounds = array<i64: 1024, 1024>}, {pipeline_mode = #tpu.pipeline_mode<synchronous>, transform_indices = @transform_3, window_bounds = array<i64: 1024, 512>}, {pipeline_mode = #tpu.pipeline_mode<synchronous>, transform_indices = @transform_4, window_bounds = array<i64: 512, 256>}, {pipeline_mode = #tpu.pipeline_mode<synchronous>, transform_indices = @transform_5, window_bounds = array<i64: 256, 128>}, {pipeline_mode = #tpu.pipeline_mode<synchronous>, transform_indices = @transform_6, window_bounds = array<i64: 128, 128>}, {pipeline_mode = #tpu.pipeline_mode<synchronous>, transform_indices = @transform_7, window_bounds = array<i64: 16, 1024>}, {transform_indices = @transform_8, window_bounds = array<i64: 16, 128>}]} {
    %c0 = arith.constant 0 : index
    %c0_0 = arith.constant 0 : index
    %0 = vector.load %arg1[%c0, %c0_0] : memref<16x128xf32, #tpu.memory_space<vmem>>, vector<16x128xf32>
    %1 = arith.truncf %0 : vector<16x128xf32> to vector<16x128xbf16>
    %c0_1 = arith.constant 0 : index
    %c0_2 = arith.constant 0 : index
    %2 = vector.load %arg2[%c0_1, %c0_2] : memref<128x1024xi8, #tpu.memory_space<vmem>>, vector<128x1024xi8>
    %3 = arith.sitofp %2 : vector<128x1024xi8> to vector<128x1024xbf16>
    %cst = arith.constant dense<0.000000e+00> : vector<16x1024xf32>
    %4 = tpu.matmul %1, %3, %cst {dimension_numbers = #tpu.dot_dimension_numbers<[1], [0], [0], [1], [0, 0, 1, 1], [], []>} : vector<16x128xbf16>, vector<128x1024xbf16>, vector<16x1024xf32> -> vector<16x1024xf32>
    %c0_3 = arith.constant 0 : index
    %c0_4 = arith.constant 0 : index
    %5 = vector.load %arg8[%c0_3, %c0_4] : memref<16x1024xf32, #tpu.memory_space<vmem>>, vector<1x1024xf32>
    %c6 = arith.constant 6 : index
    %c0_5 = arith.constant 0 : index
    %6 = vector.load %arg8[%c6, %c0_5] : memref<16x1024xf32, #tpu.memory_space<vmem>>, vector<1x1024xf32>
    %7 = vector.broadcast %5 : vector<1x1024xf32> to vector<16x1024xf32>
    %8 = arith.mulf %4, %7 : vector<16x1024xf32>
    %9 = vector.broadcast %6 : vector<1x1024xf32> to vector<16x1024xf32>
    %10 = arith.addf %8, %9 : vector<16x1024xf32>
    %cst_6 = arith.constant 0.000000e+00 : f32
    %11 = vector.broadcast %cst_6 : f32 to vector<16x1024xf32>
    %12 = arith.maximumf %10, %11 : vector<16x1024xf32>
    %13 = arith.truncf %12 : vector<16x1024xf32> to vector<16x1024xbf16>
    %c0_7 = arith.constant 0 : index
    %c0_8 = arith.constant 0 : index
    %14 = vector.load %arg3[%c0_7, %c0_8] : memref<1024x1024xi8, #tpu.memory_space<vmem>>, vector<1024x1024xi8>
    %15 = arith.sitofp %14 : vector<1024x1024xi8> to vector<1024x1024xbf16>
    %cst_9 = arith.constant dense<0.000000e+00> : vector<16x1024xf32>
    %16 = tpu.matmul %13, %15, %cst_9 {dimension_numbers = #tpu.dot_dimension_numbers<[1], [0], [0], [1], [0, 0, 1, 1], [], []>} : vector<16x1024xbf16>, vector<1024x1024xbf16>, vector<16x1024xf32> -> vector<16x1024xf32>
    %c1 = arith.constant 1 : index
    %c0_10 = arith.constant 0 : index
    %17 = vector.load %arg8[%c1, %c0_10] : memref<16x1024xf32, #tpu.memory_space<vmem>>, vector<1x1024xf32>
    %c7 = arith.constant 7 : index
    %c0_11 = arith.constant 0 : index
    %18 = vector.load %arg8[%c7, %c0_11] : memref<16x1024xf32, #tpu.memory_space<vmem>>, vector<1x1024xf32>
    %19 = vector.broadcast %17 : vector<1x1024xf32> to vector<16x1024xf32>
    %20 = arith.mulf %16, %19 : vector<16x1024xf32>
    %21 = vector.broadcast %18 : vector<1x1024xf32> to vector<16x1024xf32>
    %22 = arith.addf %20, %21 : vector<16x1024xf32>
    %cst_12 = arith.constant 0.000000e+00 : f32
    %23 = vector.broadcast %cst_12 : f32 to vector<16x1024xf32>
    %24 = arith.maximumf %22, %23 : vector<16x1024xf32>
    %25 = arith.truncf %24 : vector<16x1024xf32> to vector<16x1024xbf16>
    %c0_13 = arith.constant 0 : index
    %c0_14 = arith.constant 0 : index
    %26 = vector.load %arg4[%c0_13, %c0_14] : memref<1024x512xi8, #tpu.memory_space<vmem>>, vector<1024x512xi8>
    %27 = arith.sitofp %26 : vector<1024x512xi8> to vector<1024x512xbf16>
    %cst_15 = arith.constant dense<0.000000e+00> : vector<16x512xf32>
    %28 = tpu.matmul %25, %27, %cst_15 {dimension_numbers = #tpu.dot_dimension_numbers<[1], [0], [0], [1], [0, 0, 1, 1], [], []>} : vector<16x1024xbf16>, vector<1024x512xbf16>, vector<16x512xf32> -> vector<16x512xf32>
    %c2 = arith.constant 2 : index
    %c0_16 = arith.constant 0 : index
    %29 = vector.load %arg8[%c2, %c0_16] : memref<16x1024xf32, #tpu.memory_space<vmem>>, vector<1x512xf32>
    %c8 = arith.constant 8 : index
    %c0_17 = arith.constant 0 : index
    %30 = vector.load %arg8[%c8, %c0_17] : memref<16x1024xf32, #tpu.memory_space<vmem>>, vector<1x512xf32>
    %31 = vector.broadcast %29 : vector<1x512xf32> to vector<16x512xf32>
    %32 = arith.mulf %28, %31 : vector<16x512xf32>
    %33 = vector.broadcast %30 : vector<1x512xf32> to vector<16x512xf32>
    %34 = arith.addf %32, %33 : vector<16x512xf32>
    %cst_18 = arith.constant 0.000000e+00 : f32
    %35 = vector.broadcast %cst_18 : f32 to vector<16x512xf32>
    %36 = arith.maximumf %34, %35 : vector<16x512xf32>
    %37 = arith.truncf %36 : vector<16x512xf32> to vector<16x512xbf16>
    %c0_19 = arith.constant 0 : index
    %c0_20 = arith.constant 0 : index
    %38 = vector.load %arg5[%c0_19, %c0_20] : memref<512x256xi8, #tpu.memory_space<vmem>>, vector<512x256xi8>
    %39 = arith.sitofp %38 : vector<512x256xi8> to vector<512x256xbf16>
    %cst_21 = arith.constant dense<0.000000e+00> : vector<16x256xf32>
    %40 = tpu.matmul %37, %39, %cst_21 {dimension_numbers = #tpu.dot_dimension_numbers<[1], [0], [0], [1], [0, 0, 1, 1], [], []>} : vector<16x512xbf16>, vector<512x256xbf16>, vector<16x256xf32> -> vector<16x256xf32>
    %c3 = arith.constant 3 : index
    %c0_22 = arith.constant 0 : index
    %41 = vector.load %arg8[%c3, %c0_22] : memref<16x1024xf32, #tpu.memory_space<vmem>>, vector<1x256xf32>
    %c9 = arith.constant 9 : index
    %c0_23 = arith.constant 0 : index
    %42 = vector.load %arg8[%c9, %c0_23] : memref<16x1024xf32, #tpu.memory_space<vmem>>, vector<1x256xf32>
    %43 = vector.broadcast %41 : vector<1x256xf32> to vector<16x256xf32>
    %44 = arith.mulf %40, %43 : vector<16x256xf32>
    %45 = vector.broadcast %42 : vector<1x256xf32> to vector<16x256xf32>
    %46 = arith.addf %44, %45 : vector<16x256xf32>
    %cst_24 = arith.constant 0.000000e+00 : f32
    %47 = vector.broadcast %cst_24 : f32 to vector<16x256xf32>
    %48 = arith.maximumf %46, %47 : vector<16x256xf32>
    %49 = arith.truncf %48 : vector<16x256xf32> to vector<16x256xbf16>
    %c0_25 = arith.constant 0 : index
    %c0_26 = arith.constant 0 : index
    %50 = vector.load %arg6[%c0_25, %c0_26] : memref<256x128xi8, #tpu.memory_space<vmem>>, vector<256x128xi8>
    %51 = arith.sitofp %50 : vector<256x128xi8> to vector<256x128xbf16>
    %cst_27 = arith.constant dense<0.000000e+00> : vector<16x128xf32>
    %52 = tpu.matmul %49, %51, %cst_27 {dimension_numbers = #tpu.dot_dimension_numbers<[1], [0], [0], [1], [0, 0, 1, 1], [], []>} : vector<16x256xbf16>, vector<256x128xbf16>, vector<16x128xf32> -> vector<16x128xf32>
    %c4 = arith.constant 4 : index
    %c0_28 = arith.constant 0 : index
    %53 = vector.load %arg8[%c4, %c0_28] : memref<16x1024xf32, #tpu.memory_space<vmem>>, vector<1x128xf32>
    %c10 = arith.constant 10 : index
    %c0_29 = arith.constant 0 : index
    %54 = vector.load %arg8[%c10, %c0_29] : memref<16x1024xf32, #tpu.memory_space<vmem>>, vector<1x128xf32>
    %55 = vector.broadcast %53 : vector<1x128xf32> to vector<16x128xf32>
    %56 = arith.mulf %52, %55 : vector<16x128xf32>
    %57 = vector.broadcast %54 : vector<1x128xf32> to vector<16x128xf32>
    %58 = arith.addf %56, %57 : vector<16x128xf32>
    %cst_30 = arith.constant 0.000000e+00 : f32
    %59 = vector.broadcast %cst_30 : f32 to vector<16x128xf32>
    %60 = arith.maximumf %58, %59 : vector<16x128xf32>
    %61 = arith.truncf %60 : vector<16x128xf32> to vector<16x128xbf16>
    %c0_31 = arith.constant 0 : index
    %c0_32 = arith.constant 0 : index
    %62 = vector.load %arg7[%c0_31, %c0_32] : memref<128x128xi8, #tpu.memory_space<vmem>>, vector<128x128xi8>
    %63 = arith.sitofp %62 : vector<128x128xi8> to vector<128x128xbf16>
    %cst_33 = arith.constant dense<0.000000e+00> : vector<16x128xf32>
    %64 = tpu.matmul %61, %63, %cst_33 {dimension_numbers = #tpu.dot_dimension_numbers<[1], [0], [0], [1], [0, 0, 1, 1], [], []>} : vector<16x128xbf16>, vector<128x128xbf16>, vector<16x128xf32> -> vector<16x128xf32>
    %c5 = arith.constant 5 : index
    %c0_34 = arith.constant 0 : index
    %65 = vector.load %arg8[%c5, %c0_34] : memref<16x1024xf32, #tpu.memory_space<vmem>>, vector<1x128xf32>
    %c11 = arith.constant 11 : index
    %c0_35 = arith.constant 0 : index
    %66 = vector.load %arg8[%c11, %c0_35] : memref<16x1024xf32, #tpu.memory_space<vmem>>, vector<1x128xf32>
    %67 = vector.broadcast %65 : vector<1x128xf32> to vector<16x128xf32>
    %68 = arith.mulf %64, %67 : vector<16x128xf32>
    %69 = vector.broadcast %66 : vector<1x128xf32> to vector<16x128xf32>
    %70 = arith.addf %68, %69 : vector<16x128xf32>
    %c0_36 = arith.constant 0 : index
    %c0_37 = arith.constant 0 : index
    %71 = vector.load %arg9[%c0_36, %c0_37] : memref<16x128xf32, #tpu.memory_space<vmem>>, vector<16x128xf32>
    tpu.vector_store %arg9[%c0_36, %c0_37], %70 {strides = array<i32>} : memref<16x128xf32, #tpu.memory_space<vmem>>, vector<16x128xf32>,
    return
  }
  func.func @transform_0(%arg0: i32) -> (i32, i32) {
    %c0_i32 = arith.constant 0 : i32
    %c0_i32_0 = arith.constant 0 : i32
    return %arg0, %c0_i32 : i32, i32
  }
  func.func @transform_1(%arg0: i32) -> (i32, i32) {
    %c0_i32 = arith.constant 0 : i32
    %c0_i32_0 = arith.constant 0 : i32
    %c0_i32_1 = arith.constant 0 : i32
    return %c0_i32, %c0_i32_0 : i32, i32
  }
  func.func @transform_2(%arg0: i32) -> (i32, i32) {
    %c0_i32 = arith.constant 0 : i32
    %c0_i32_0 = arith.constant 0 : i32
    %c0_i32_1 = arith.constant 0 : i32
    return %c0_i32, %c0_i32_0 : i32, i32
  }
  func.func @transform_3(%arg0: i32) -> (i32, i32) {
    %c0_i32 = arith.constant 0 : i32
    %c0_i32_0 = arith.constant 0 : i32
    %c0_i32_1 = arith.constant 0 : i32
    return %c0_i32, %c0_i32_0 : i32, i32
  }
  func.func @transform_4(%arg0: i32) -> (i32, i32) {
    %c0_i32 = arith.constant 0 : i32
    %c0_i32_0 = arith.constant 0 : i32
    %c0_i32_1 = arith.constant 0 : i32
    return %c0_i32, %c0_i32_0 : i32, i32
  }
  func.func @transform_5(%arg0: i32) -> (i32, i32) {
    %c0_i32 = arith.constant 0 : i32
    %c0_i32_0 = arith.constant 0 : i32
    %c0_i32_1 = arith.constant 0 : i32
    return %c0_i32, %c0_i32_0 : i32, i32
  }
  func.func @transform_6(%arg0: i32) -> (i32, i32) {
    %c0_i32 = arith.constant 0 : i32
    %c0_i32_0 = arith.constant 0 : i32
    %c0_i32_1 = arith.constant 0 : i32
    return %c0_i32, %c0_i32_0 : i32, i32
  }
  func.func @transform_7(%arg0: i32) -> (i32, i32) {
    %c0_i32 = arith.constant 0 : i32
    %c0_i32_0 = arith.constant 0 : i32
    %c0_i32_1 = arith.constant 0 : i32
    return %c0_i32, %c0_i32_0 : i32, i32
  }
  func.func @transform_8(%arg0: i32) -> (i32, i32) {
    %c0_i32 = arith.constant 0 : i32
    %c0_i32_0 = arith.constant 0 : i32
    return %arg0, %c0_i32 : i32, i32
  }
}

</mosaic_0001>

<bundles_post_ra>
// kernel: tpu_custom_call.1
= control target key start
LH: loop header
LB: loop body
LE: loop exit
PB: predicated region body
PF: predicated region fallthrough
CT: control target
= control target key end

     0   :  { %13 = vsyncpa [#allocation3], 0  ;;  %s8338_s0 = inlined_call_operand.hbm [shape: f32[16,128], index: 0, kind: input, shape index: {}]   ;;  %s8339_s1 = inlined_call_operand.hbm [shape: s8[128,1024], index: 1, kind: input, shape index: {}]   ;;  %s8340_s2 = inlined_call_operand.hbm [shape: s8[1024,1024], index: 2, kind: input, shape index: {}]   ;;  %s8341_s3 = inlined_call_operand.hbm [shape: s8[1024,512], index: 3, kind: input, shape index: {}]   ;;  %s8342_s4 = inlined_call_operand.hbm [shape: s8[512,256], index: 4, kind: input, shape index: {}]   ;;  %s8343_s5 = inlined_call_operand.hbm [shape: s8[256,128], index: 5, kind: input, shape index: {}]   ;;  %s8344_s6 = inlined_call_operand.hbm [shape: s8[128,128], index: 6, kind: input, shape index: {}]   ;;  %s8345_s7 = inlined_call_operand.hbm [shape: f32[16,1024], index: 7, kind: input, shape index: {}]   ;;  %s8346_s8 = inlined_call_operand.hbm [shape: f32[16,128], index: 8, kind: output, shape index: {}]  }
   0x1   :  { %14 = vsyncpa [#allocation6], 0 }
   0x2   :  { %15 = vsyncpa [#allocation9], 0 }
   0x3   :  { %16 = vsyncpa [#allocation12], 0 }
   0x4   :  { %17 = vsyncpa [#allocation15], 0  ;;  %s36_s29 = sshll.u32 %s8339_s1, 4  ;;  %s37_s29 = int_to_ptr.hbm [resolvable:$true] %s36_s29 }
   0x5   :  { %18 = vsyncpa [#allocation4], 0  ;;  %s7388_s30 = smov [#allocation5]   ;;  %s62_s12 = sshll.u32 %s8341_s3, 4  ;;  %s63_s12 = int_to_ptr.hbm [resolvable:$true] %s62_s12 }
   0x6   :  { %s38_s9 = sshll.u32 %s7388_s30, 4  ;;  %s7389_s13 = smov 1024   ;;  %s39_s9 = int_to_ptr.vmem [resolvable:$true] %s38_s9 }
   0x7   :  { %s7390_s14 = smov 64   ;;  %s7391_s15 = smov [#allocation8]  }
   0x8   :  { %44 = dma.hbm_to_vmem [thread:$0]  %s37_s29, 4096, %s39_s9, [#allocation6], %s7389_s13, %s7389_s13, %s7390_s14  }
   0x9   :  { %s64_s16 = sshll.u32 %s7391_s15, 4  ;;  %s7392_s1 = smov 512   ;;  %s65_s16 = int_to_ptr.vmem [resolvable:$true] %s64_s16 }
   0xa   :  { %s7393_s17 = smov 32   ;;  %s88_s20 = sshll.u32 %s8343_s5, 4  ;;  %s89_s20 = int_to_ptr.hbm [resolvable:$true] %s88_s20 }
   0xb   :  { %70 = dma.hbm_to_vmem [thread:$0]  %s63_s12, 16384, %s65_s16, [#allocation9], %s7392_s1, %s7392_s1, %s7393_s17  }
   0xc   :  { %s7394_s21 = smov [#allocation11]   ;;  %s23_s24 = sshll.u32 %s8338_s0, 4  ;;  %s24_s24 = int_to_ptr.hbm [resolvable:$true] %s23_s24 }
   0xd   :  { %s90_s3 = sshll.u32 %s7394_s21, 4  ;;  %s7395_s25 = smov 128   ;;  %s91_s3 = int_to_ptr.vmem [resolvable:$true] %s90_s3 }
   0xe   :  { %s7396_s26 = smov 8   ;;  %s7397_s27 = smov [#allocation2]  }
   0xf   :  { %96 = dma.hbm_to_vmem [thread:$0]  %s89_s20, 1024, %s91_s3, [#allocation12], %s7395_s25, %s7395_s25, %s7396_s26  }
  0x10   :  { %s25_s28 = sshll.u32 %s7397_s27, 4  ;;  %s49_s5 = sshll.u32 %s8340_s2, 4  ;;  %s26_s28 = int_to_ptr.vmem [resolvable:$true] %s25_s28  ;;  %s50_s5 = int_to_ptr.hbm [resolvable:$true] %s49_s5 }
  0x11   :  { %31 = dma.hbm_to_vmem [thread:$0]  %s24_s24, 256, %s26_s28, [#allocation3], %s7395_s25, %s7395_s25, %s7396_s26  }
  0x12   :  { %s75_s10 = sshll.u32 %s8342_s4, 4  ;;  %s7398_s11 = smov [#allocation7]   ;;  %s76_s10 = int_to_ptr.hbm [resolvable:$true] %s75_s10 }
  0x13   :  { %s51_s12 = sshll.u32 %s7398_s11, 4  ;;  %s7399_s15 = smov [#allocation10]   ;;  %s52_s12 = int_to_ptr.vmem [resolvable:$true] %s51_s12 }
  0x14   :  { %57 = dma.hbm_to_vmem [thread:$0]  %s50_s5, 32768, %s52_s12, [#allocation6], %s7389_s13, %s7389_s13, %s7390_s14  }
  0x15   :  { %s77_s2 = sshll.u32 %s7399_s15, 4  ;;  %s7400_s16 = smov 256   ;;  %s78_s2 = int_to_ptr.vmem [resolvable:$true] %s77_s2 }
  0x16   :  { %s7401_s1 = smov 16   ;;  %s101_s19 = sshll.u32 %s8344_s6, 4  ;;  %s102_s19 = int_to_ptr.hbm [resolvable:$true] %s101_s19 }
  0x17   :  { %83 = dma.hbm_to_vmem [thread:$0]  %s76_s10, 4096, %s78_s2, [#allocation9], %s7400_s16, %s7400_s16, %s7401_s1  }
  0x18   :  { %s7402_s4 = smov [#allocation13]   ;;  %s114_s22 = sshll.u32 %s8345_s7, 4  ;;  %s115_s22 = int_to_ptr.hbm [resolvable:$true] %s114_s22 }
  0x19   :  { %s103_s20 = sshll.u32 %s7402_s4, 4  ;;  %s7403_s23 = smov [#allocation14]   ;;  %s104_s20 = int_to_ptr.vmem [resolvable:$true] %s103_s20 }
  0x1a   :  { %109 = dma.hbm_to_vmem [thread:$0]  %s102_s19, 512, %s104_s20, [#allocation12], %s7395_s25, %s7395_s25, %s7396_s26  }
  0x1b   :  { %s116_s24 = sshll.u32 %s7403_s23, 4  ;;  %s117_s24 = int_to_ptr.vmem [resolvable:$true] %s116_s24 }
  0x1c   :  { %122 = dma.hbm_to_vmem [thread:$0]  %s115_s22, 2048, %s117_s24, [#allocation15], %s7389_s13, %s7389_s13, %s7390_s14  }
  0x1d   :  { %7376 = dma.done.wait [#allocation3], 256  }
  0x1e   :  { %7377 = vsyncadd [#allocation3], 4294967040 }
  0x1f   :  { %7378 = dma.done.wait [#allocation6], 36864  }
  0x20   :  { %7379 = vsyncadd [#allocation6], 4294930432 }
  0x21   :  { %7380 = dma.done.wait [#allocation9], 20480  }
  0x22   :  { %7381 = vsyncadd [#allocation9], 4294946816 }
  0x23   :  { %7382 = dma.done.wait [#allocation12], 1536  }
  0x24   :  { %7383 = vsyncadd [#allocation12], 4294965760 }
  0x25   :  { %7384 = dma.done.wait [#allocation15], 2048  }
  0x26   :  { %7385 = vsyncadd [#allocation15], 4294965248  ;;  %v182_v0 = vld [vmem:[#allocation5 + $0xc0] sm:$0xff]  ;;  %v183_v1 = vld [vmem:[#allocation5 + $0xc8] sm:$0xff]  ;;  %s7404_s6 = smov [#allocation16]   ;;  %s7124_s27 = sshll.u32 %s8346_s8, 4  ;;  %s7125_s27 = int_to_ptr.hbm [resolvable:$true] %s7124_s27 }
  0x27   :  { %v184_v2 = vld [vmem:[#allocation5 + $0xd0] sm:$0xff]  ;;  %v302_v3 = vunpack.c.2.s8 %v182_v0  ;;  %v310_v4 = vunpack.c.3.s8 %v182_v0  ;;  %v303_v5 = vunpack.c.2.s8 %v183_v1  ;;  %v311_v6 = vunpack.c.3.s8 %v183_v1  ;;  %v185_v7 = vld [vmem:[#allocation5 + $0xd8] sm:$0xff]  ;;  %v174_v28 = vld [vmem:[#allocation5 + $0x80] sm:$0xff]  ;;  %s7122_s7 = sshll.u32 %s7404_s6, 4  ;;  %s7123_s7 = int_to_ptr.vmem [resolvable:$true] %s7122_s7 }
  0x28   :  { %v304_v8 = vunpack.c.2.s8 %v184_v2  ;;  %v312_v9 = vunpack.c.3.s8 %v184_v2  ;;  %v305_v10 = vunpack.c.2.s8 %v185_v7  ;;  %v313_v11 = vunpack.c.3.s8 %v185_v7  ;;  %v175_v37 = vld [vmem:[#allocation5 + $0x88] sm:$0xff]  ;;  %v176_v42 = vld [vmem:[#allocation5 + $0x90] sm:$0xff]  ;;  %v177_v47 = vld [vmem:[#allocation5 + $0x98] sm:$0xff] }
  0x29   :  { %v430_v12 = vcvt.s32.f32 %v302_v3  ;;  %v438_v13 = vcvt.s32.f32 %v310_v4  ;;  %v431_v14 = vcvt.s32.f32 %v303_v5  ;;  %v439_v15 = vcvt.s32.f32 %v311_v6 }
  0x2a   :  { %v432_v16 = vcvt.s32.f32 %v304_v8  ;;  %v440_v17 = vcvt.s32.f32 %v312_v9  ;;  %v433_v18 = vcvt.s32.f32 %v305_v10  ;;  %v441_v19 = vcvt.s32.f32 %v313_v11  ;;  %v166_v8 = vld [vmem:[#allocation5 + $0x40] sm:$0xff] }
  0x2b   :  { %v502_v20 = vpack.c.bf16 %v438_v13, %v430_v12  ;;  %v503_v21 = vpack.c.bf16 %v439_v15, %v431_v14  ;;  %v286_v22 = vunpack.c.0.s8 %v182_v0  ;;  %v294_v23 = vunpack.c.1.s8 %v182_v0 }
  0x2c   :  { %v504_v24 = vpack.c.bf16 %v440_v17, %v432_v16  ;;  %v505_v25 = vpack.c.bf16 %v441_v19, %v433_v18  ;;  %v287_v26 = vunpack.c.0.s8 %v183_v1  ;;  %v295_v27 = vunpack.c.1.s8 %v183_v1  ;;  %v167_v17 = vld [vmem:[#allocation5 + $0x48] sm:$0xff] }
  0x2d   :  { %510 = vmatpush.bf16.msra.mxu0 %v502_v20  ;;  %524 = vmatpush.bf16.msra.mxu1 %v503_v21  ;;  %v414_v29 = vcvt.s32.f32 %v286_v22  ;;  %v422_v30 = vcvt.s32.f32 %v294_v23  ;;  %v288_v31 = vunpack.c.0.s8 %v184_v2  ;;  %v296_v32 = vunpack.c.1.s8 %v184_v2  ;;  %v168_v22 = vld [vmem:[#allocation5 + $0x50] sm:$0xff] }
  0x2e   :  { %538 = vmatpush.bf16.msra.mxu2 %v504_v24  ;;  %552 = vmatpush.bf16.msra.mxu3 %v505_v25  ;;  %v415_v33 = vcvt.s32.f32 %v287_v26  ;;  %v423_v34 = vcvt.s32.f32 %v295_v27  ;;  %v289_v35 = vunpack.c.0.s8 %v185_v7  ;;  %v297_v36 = vunpack.c.1.s8 %v185_v7  ;;  %v169_v27 = vld [vmem:[#allocation5 + $0x58] sm:$0xff] }
  0x2f   :  { %v494_v38 = vpack.c.bf16 %v422_v30, %v414_v29  ;;  %v416_v39 = vcvt.s32.f32 %v288_v31  ;;  %v424_v40 = vcvt.s32.f32 %v296_v32  ;;  %v270_v41 = vunpack.c.2.s8 %v174_v28 }
  0x30   :  { %v495_v43 = vpack.c.bf16 %v423_v34, %v415_v33  ;;  %v417_v44 = vcvt.s32.f32 %v289_v35  ;;  %v425_v45 = vcvt.s32.f32 %v297_v36  ;;  %v278_v46 = vunpack.c.3.s8 %v174_v28 }
  0x31   :  { %511 = vmatpush.bf16.msra.mxu0 %v494_v38  ;;  %v496_v48 = vpack.c.bf16 %v424_v40, %v416_v39  ;;  %v398_v49 = vcvt.s32.f32 %v270_v41  ;;  %v271_v50 = vunpack.c.2.s8 %v175_v37  ;;  %v279_v51 = vunpack.c.3.s8 %v175_v37 }
  0x32   :  { %525 = vmatpush.bf16.msra.mxu1 %v495_v43  ;;  %v497_v52 = vpack.c.bf16 %v425_v45, %v417_v44  ;;  %v406_v53 = vcvt.s32.f32 %v278_v46  ;;  %v272_v54 = vunpack.c.2.s8 %v176_v42  ;;  %v280_v55 = vunpack.c.3.s8 %v176_v42 }
  0x33   :  { %539 = vmatpush.bf16.msra.mxu2 %v496_v48  ;;  %v399_v56 = vcvt.s32.f32 %v271_v50  ;;  %v407_v57 = vcvt.s32.f32 %v279_v51  ;;  %v273_v58 = vunpack.c.2.s8 %v177_v47  ;;  %v281_v59 = vunpack.c.3.s8 %v177_v47 }
  0x34   :  { %553 = vmatpush.bf16.msra.mxu3 %v497_v52  ;;  %v486_v60 = vpack.c.bf16 %v406_v53, %v398_v49  ;;  %v400_v61 = vcvt.s32.f32 %v272_v54  ;;  %v408_v62 = vcvt.s32.f32 %v280_v55  ;;  %v254_v63 = vunpack.c.0.s8 %v174_v28  ;;  %v158_v52 = vld [vmem:[#allocation5] sm:$0xff] }
  0x35   :  { %v487_v0 = vpack.c.bf16 %v407_v57, %v399_v56  ;;  %v401_v1 = vcvt.s32.f32 %v273_v58  ;;  %v409_v2 = vcvt.s32.f32 %v281_v59  ;;  %v262_v3 = vunpack.c.1.s8 %v174_v28 }
  0x36   :  { %512 = vmatpush.bf16.msra.mxu0 %v486_v60  ;;  %v488_v4 = vpack.c.bf16 %v408_v62, %v400_v61  ;;  %v382_v5 = vcvt.s32.f32 %v254_v63  ;;  %v255_v6 = vunpack.c.0.s8 %v175_v37  ;;  %v263_v7 = vunpack.c.1.s8 %v175_v37  ;;  %v159_v61 = vld [vmem:[#allocation5 + $0x8] sm:$0xff] }
  0x37   :  { %526 = vmatpush.bf16.msra.mxu1 %v487_v0  ;;  %v489_v9 = vpack.c.bf16 %v409_v2, %v401_v1  ;;  %v390_v10 = vcvt.s32.f32 %v262_v3  ;;  %v256_v11 = vunpack.c.0.s8 %v176_v42  ;;  %v264_v12 = vunpack.c.1.s8 %v176_v42  ;;  %v160_v2 = vld [vmem:[#allocation5 + $0x10] sm:$0xff] }
  0x38   :  { %540 = vmatpush.bf16.msra.mxu2 %v488_v4  ;;  %v383_v13 = vcvt.s32.f32 %v255_v6  ;;  %v391_v14 = vcvt.s32.f32 %v263_v7  ;;  %v257_v15 = vunpack.c.0.s8 %v177_v47  ;;  %v265_v16 = vunpack.c.1.s8 %v177_v47  ;;  %v161_v7 = vld [vmem:[#allocation5 + $0x18] sm:$0xff] }
  0x39   :  { %554 = vmatpush.bf16.msra.mxu3 %v489_v9  ;;  %v478_v18 = vpack.c.bf16 %v390_v10, %v382_v5  ;;  %v384_v19 = vcvt.s32.f32 %v256_v11  ;;  %v392_v20 = vcvt.s32.f32 %v264_v12  ;;  %v238_v21 = vunpack.c.2.s8 %v166_v8 }
  0x3a   :  { %v479_v23 = vpack.c.bf16 %v391_v14, %v383_v13  ;;  %v385_v24 = vcvt.s32.f32 %v257_v15  ;;  %v393_v25 = vcvt.s32.f32 %v265_v16  ;;  %v246_v26 = vunpack.c.3.s8 %v166_v8 }
  0x3b   :  { %513 = vmatpush.bf16.msra.mxu0 %v478_v18  ;;  %v480_v28 = vpack.c.bf16 %v392_v20, %v384_v19  ;;  %v366_v29 = vcvt.s32.f32 %v238_v21  ;;  %v239_v30 = vunpack.c.2.s8 %v167_v17  ;;  %v247_v31 = vunpack.c.3.s8 %v167_v17 }
  0x3c   :  { %527 = vmatpush.bf16.msra.mxu1 %v479_v23  ;;  %v481_v32 = vpack.c.bf16 %v393_v25, %v385_v24  ;;  %v374_v33 = vcvt.s32.f32 %v246_v26  ;;  %v240_v34 = vunpack.c.2.s8 %v168_v22  ;;  %v248_v35 = vunpack.c.3.s8 %v168_v22 }
  0x3d   :  { %541 = vmatpush.bf16.msra.mxu2 %v480_v28  ;;  %v367_v36 = vcvt.s32.f32 %v239_v30  ;;  %v375_v37 = vcvt.s32.f32 %v247_v31  ;;  %v241_v38 = vunpack.c.2.s8 %v169_v27  ;;  %v249_v39 = vunpack.c.3.s8 %v169_v27 }
  0x3e   :  { %555 = vmatpush.bf16.msra.mxu3 %v481_v32  ;;  %v470_v40 = vpack.c.bf16 %v374_v33, %v366_v29  ;;  %v368_v41 = vcvt.s32.f32 %v240_v34  ;;  %v376_v42 = vcvt.s32.f32 %v248_v35  ;;  %v222_v43 = vunpack.c.0.s8 %v166_v8  ;;  %v7492_v32 = vld [vmem:[#allocation5 + $0xe0] sm:$0xff] }
  0x3f   :  { %v471_v44 = vpack.c.bf16 %v375_v37, %v367_v36  ;;  %v369_v45 = vcvt.s32.f32 %v241_v38  ;;  %v377_v46 = vcvt.s32.f32 %v249_v39  ;;  %v230_v47 = vunpack.c.1.s8 %v166_v8 }
  0x40   :  { %514 = vmatpush.bf16.msra.mxu0 %v470_v40  ;;  %v472_v48 = vpack.c.bf16 %v376_v42, %v368_v41  ;;  %v350_v49 = vcvt.s32.f32 %v222_v43  ;;  %v223_v50 = vunpack.c.0.s8 %v167_v17  ;;  %v231_v51 = vunpack.c.1.s8 %v167_v17  ;;  %v187_v41 = vld [vmem:[#allocation5 + $0xe8] sm:$0xff] }
  0x41   :  { %528 = vmatpush.bf16.msra.mxu1 %v471_v44  ;;  %v473_v53 = vpack.c.bf16 %v377_v46, %v369_v45  ;;  %v358_v54 = vcvt.s32.f32 %v230_v47  ;;  %v224_v55 = vunpack.c.0.s8 %v168_v22  ;;  %v232_v56 = vunpack.c.1.s8 %v168_v22  ;;  %v188_v46 = vld [vmem:[#allocation5 + $0xf0] sm:$0xff] }
  0x42   :  { %542 = vmatpush.bf16.msra.mxu2 %v472_v48  ;;  %v351_v57 = vcvt.s32.f32 %v223_v50  ;;  %v359_v58 = vcvt.s32.f32 %v231_v51  ;;  %v225_v59 = vunpack.c.0.s8 %v169_v27  ;;  %v233_v60 = vunpack.c.1.s8 %v169_v27  ;;  %v189_v51 = vld [vmem:[#allocation5 + $0xf8] sm:$0xff] }
  0x43   :  { %556 = vmatpush.bf16.msra.mxu3 %v473_v53  ;;  %v462_v62 = vpack.c.bf16 %v358_v54, %v350_v49  ;;  %v352_v63 = vcvt.s32.f32 %v224_v55  ;;  %v360_v0 = vcvt.s32.f32 %v232_v56  ;;  %v206_v1 = vunpack.c.2.s8 %v158_v52  ;;  %v155_v56 = vld [vmem:[#allocation2] sm:$0xff] }
  0x44   :  { %v463_v3 = vpack.c.bf16 %v359_v58, %v351_v57  ;;  %v353_v4 = vcvt.s32.f32 %v225_v59  ;;  %v361_v5 = vcvt.s32.f32 %v233_v60  ;;  %v214_v6 = vunpack.c.3.s8 %v158_v52  ;;  %v156_v57 = vld [vmem:[#allocation2 + $0x8] sm:$0xff] }
  0x45   :  { %515 = vmatpush.bf16.msra.mxu0 %v462_v62  ;;  %v464_v8 = vpack.c.bf16 %v360_v0, %v352_v63  ;;  %v334_v9 = vcvt.s32.f32 %v206_v1  ;;  %v207_v10 = vunpack.c.2.s8 %v159_v61  ;;  %v215_v11 = vunpack.c.3.s8 %v159_v61 }
  0x46   :  { %529 = vmatpush.bf16.msra.mxu1 %v463_v3  ;;  %v465_v12 = vpack.c.bf16 %v361_v5, %v353_v4  ;;  %v342_v13 = vcvt.s32.f32 %v214_v6  ;;  %v208_v14 = vunpack.c.2.s8 %v160_v2  ;;  %v216_v15 = vunpack.c.3.s8 %v160_v2 }
  0x47   :  { %543 = vmatpush.bf16.msra.mxu2 %v464_v8  ;;  %v335_v16 = vcvt.s32.f32 %v207_v10  ;;  %v343_v17 = vcvt.s32.f32 %v215_v11  ;;  %v209_v18 = vunpack.c.2.s8 %v161_v7  ;;  %v217_v19 = vunpack.c.3.s8 %v161_v7 }
  0x48   :  { %557 = vmatpush.bf16.msra.mxu3 %v465_v12  ;;  %v454_v20 = vpack.c.bf16 %v342_v13, %v334_v9  ;;  %v336_v21 = vcvt.s32.f32 %v208_v14  ;;  %v344_v22 = vcvt.s32.f32 %v216_v15  ;;  %v190_v23 = vunpack.c.0.s8 %v158_v52  ;;  %v178_v14 = vld [vmem:[#allocation5 + $0xa0] sm:$0xff] }
  0x49   :  { %v455_v24 = vpack.c.bf16 %v343_v17, %v335_v16  ;;  %v337_v25 = vcvt.s32.f32 %v209_v18  ;;  %v345_v26 = vcvt.s32.f32 %v217_v19  ;;  %v198_v27 = vunpack.c.1.s8 %v158_v52 }
  0x4a   :  { %516 = vmatpush.bf16.msra.mxu0 %v454_v20  ;;  %v456_v28 = vpack.c.bf16 %v344_v22, %v336_v21  ;;  %v318_v29 = vcvt.s32.f32 %v190_v23  ;;  %v191_v30 = vunpack.c.0.s8 %v159_v61  ;;  %v199_v31 = vunpack.c.1.s8 %v159_v61  ;;  %v179_v23 = vld [vmem:[#allocation5 + $0xa8] sm:$0xff] }
  0x4b   :  { %530 = vmatpush.bf16.msra.mxu1 %v455_v24  ;;  %v457_v33 = vpack.c.bf16 %v345_v26, %v337_v25  ;;  %v326_v34 = vcvt.s32.f32 %v198_v27  ;;  %v192_v35 = vunpack.c.0.s8 %v160_v2  ;;  %v200_v36 = vunpack.c.1.s8 %v160_v2 }
  0x4c   :  { %544 = vmatpush.bf16.msra.mxu2 %v456_v28  ;;  %v319_v37 = vcvt.s32.f32 %v191_v30  ;;  %v327_v38 = vcvt.s32.f32 %v199_v31  ;;  %v193_v39 = vunpack.c.0.s8 %v161_v7  ;;  %v201_v40 = vunpack.c.1.s8 %v161_v7  ;;  %v180_v28 = vld [vmem:[#allocation5 + $0xb0] sm:$0xff] }
  0x4d   :  { %558 = vmatpush.bf16.msra.mxu3 %v457_v33  ;;  %v446_v42 = vpack.c.bf16 %v326_v34, %v318_v29  ;;  %v320_v43 = vcvt.s32.f32 %v192_v35  ;;  %v328_v44 = vcvt.s32.f32 %v200_v36  ;;  %v306_v45 = vunpack.c.2.s8 %v7492_v32  ;;  %v181_v33 = vld [vmem:[#allocation5 + $0xb8] sm:$0xff] }
  0x4e   :  { %v447_v47 = vpack.c.bf16 %v327_v38, %v319_v37  ;;  %v321_v48 = vcvt.s32.f32 %v193_v39  ;;  %v329_v49 = vcvt.s32.f32 %v201_v40  ;;  %v314_v50 = vunpack.c.3.s8 %v7492_v32 }
  0x4f   :  { %517 = vmatpush.bf16.msra.mxu0 %v446_v42  ;;  %v448_v52 = vpack.c.bf16 %v328_v44, %v320_v43  ;;  %v434_v53 = vcvt.s32.f32 %v306_v45  ;;  %v307_v54 = vunpack.c.2.s8 %v187_v41  ;;  %v315_v55 = vunpack.c.3.s8 %v187_v41 }
  0x50   :  { %531 = vmatpush.bf16.msra.mxu1 %v447_v47  ;;  %v449_v58 = vpack.c.bf16 %v329_v49, %v321_v48  ;;  %v442_v59 = vcvt.s32.f32 %v314_v50  ;;  %v308_v60 = vunpack.c.2.s8 %v188_v46  ;;  %v316_v61 = vunpack.c.3.s8 %v188_v46 }
  0x51   :  { %545 = vmatpush.bf16.msra.mxu2 %v448_v52  ;;  %v435_v62 = vcvt.s32.f32 %v307_v54  ;;  %v443_v63 = vcvt.s32.f32 %v315_v55  ;;  %v309_v0 = vunpack.c.2.s8 %v189_v51  ;;  %v317_v1 = vunpack.c.3.s8 %v189_v51 }
  0x52   :  { %559 = vmatpush.bf16.msra.mxu3 %v449_v58  ;;  %v506_v2 = vpack.c.bf16 %v442_v59, %v434_v53  ;;  %v436_v3 = vcvt.s32.f32 %v308_v60  ;;  %v444_v4 = vcvt.s32.f32 %v316_v61  ;;  %v7496_v5 = vpack.c.bf16 %v156_v57, %v155_v56  ;;  %v170_v58 = vld [vmem:[#allocation5 + $0x60] sm:$0xff] }
  0x53   :  { %v507_v6 = vpack.c.bf16 %v443_v63, %v435_v62  ;;  %v437_v7 = vcvt.s32.f32 %v309_v0  ;;  %v445_v8 = vcvt.s32.f32 %v317_v1  ;;  %v290_v9 = vunpack.c.0.s8 %v7492_v32 }
  0x54   :  { %566 = vmatpush.bf16.msrb.mxu0 %v506_v2  ;;  %v508_v10 = vpack.c.bf16 %v444_v4, %v436_v3  ;;  %532 = vmatmul.bf16.vlgmr.msra.gmra.mxu1 %v7496_v5  ;;  %v298_v11 = vunpack.c.1.s8 %v7492_v32  ;;  %v291_v12 = vunpack.c.0.s8 %v187_v41  ;;  %v299_v13 = vunpack.c.1.s8 %v187_v41  ;;  %v171_v3 = vld [vmem:[#allocation5 + $0x68] sm:$0xff] }
  0x55   :  { %580 = vmatpush.bf16.msrb.mxu1 %v507_v6  ;;  %v509_v15 = vpack.c.bf16 %v445_v8, %v437_v7  ;;  %518 = vmatmul.bf16.vlgmr.msra.gmra.mxu0 %v7496_v5  ;;  %v418_v16 = vcvt.s32.f32 %v290_v9  ;;  %v292_v17 = vunpack.c.0.s8 %v188_v46  ;;  %v300_v18 = vunpack.c.1.s8 %v188_v46  ;;  %v172_v9 = vld [vmem:[#allocation5 + $0x70] sm:$0xff] }
  0x56   :  { %594 = vmatpush.bf16.msrb.mxu2 %v508_v10  ;;  %560 = vmatmul.bf16.vlgmr.msra.gmra.mxu3 %v7496_v5  ;;  %v426_v19 = vcvt.s32.f32 %v298_v11  ;;  %v419_v20 = vcvt.s32.f32 %v291_v12  ;;  %v427_v21 = vcvt.s32.f32 %v299_v13  ;;  %v293_v22 = vunpack.c.0.s8 %v189_v51 }
  0x57   :  { %608 = vmatpush.bf16.msrb.mxu3 %v509_v15  ;;  %546 = vmatmul.bf16.vlgmr.msra.gmra.mxu2 %v7496_v5  ;;  %v420_v24 = vcvt.s32.f32 %v292_v17  ;;  %v428_v25 = vcvt.s32.f32 %v300_v18  ;;  %v301_v26 = vunpack.c.1.s8 %v189_v51  ;;  %v274_v27 = vunpack.c.2.s8 %v178_v14 }
  0x58   :  { %v498_v29 = vpack.c.bf16 %v426_v19, %v418_v16  ;;  %v499_v30 = vpack.c.bf16 %v427_v21, %v419_v20  ;;  %v421_v31 = vcvt.s32.f32 %v293_v22  ;;  %v282_v32 = vunpack.c.3.s8 %v178_v14 }
  0x59   :  { %v500_v34 = vpack.c.bf16 %v428_v25, %v420_v24  ;;  %v429_v35 = vcvt.s32.f32 %v301_v26  ;;  %v402_v36 = vcvt.s32.f32 %v274_v27  ;;  %v275_v37 = vunpack.c.2.s8 %v179_v23 }
  0x5a   :  { %567 = vmatpush.bf16.msrb.mxu0 %v498_v29  ;;  %581 = vmatpush.bf16.msrb.mxu1 %v499_v30  ;;  %v410_v38 = vcvt.s32.f32 %v282_v32  ;;  %v283_v39 = vunpack.c.3.s8 %v179_v23  ;;  %v276_v40 = vunpack.c.2.s8 %v180_v28  ;;  %v284_v41 = vunpack.c.3.s8 %v180_v28 }
  0x5b   :  { %595 = vmatpush.bf16.msrb.mxu2 %v500_v34  ;;  %v501_v42 = vpack.c.bf16 %v429_v35, %v421_v31  ;;  %v403_v43 = vcvt.s32.f32 %v275_v37  ;;  %v277_v44 = vunpack.c.2.s8 %v181_v33  ;;  %v285_v45 = vunpack.c.3.s8 %v181_v33 }
  0x5c   :  { %v490_v46 = vpack.c.bf16 %v410_v38, %v402_v36  ;;  %v411_v47 = vcvt.s32.f32 %v283_v39  ;;  %v404_v48 = vcvt.s32.f32 %v276_v40  ;;  %v412_v49 = vcvt.s32.f32 %v284_v41 }
  0x5d   :  { %609 = vmatpush.bf16.msrb.mxu3 %v501_v42  ;;  %v405_v50 = vcvt.s32.f32 %v277_v44  ;;  %v413_v51 = vcvt.s32.f32 %v285_v45  ;;  %v258_v52 = vunpack.c.0.s8 %v178_v14  ;;  %v266_v53 = vunpack.c.1.s8 %v178_v14  ;;  %v173_v14 = vld [vmem:[#allocation5 + $0x78] sm:$0xff] }
  0x5e   :  { %568 = vmatpush.bf16.msrb.mxu0 %v490_v46  ;;  %v491_v54 = vpack.c.bf16 %v411_v47, %v403_v43  ;;  %v492_v55 = vpack.c.bf16 %v412_v49, %v404_v48  ;;  %v259_v56 = vunpack.c.0.s8 %v179_v23  ;;  %v267_v57 = vunpack.c.1.s8 %v179_v23  ;;  %v162_v43 = vld [vmem:[#allocation5 + $0x20] sm:$0xff]  ;;  %v163_v48 = vld [vmem:[#allocation5 + $0x28] sm:$0xff] }
  0x5f   :  { %v493_v59 = vpack.c.bf16 %v413_v51, %v405_v50  ;;  %v386_v60 = vcvt.s32.f32 %v258_v52  ;;  %v394_v61 = vcvt.s32.f32 %v266_v53  ;;  %v260_v62 = vunpack.c.0.s8 %v180_v28  ;;  %v164_v53 = vld [vmem:[#allocation5 + $0x30] sm:$0xff] }
  0x60   :  { %582 = vmatpush.bf16.msrb.mxu1 %v491_v54  ;;  %596 = vmatpush.bf16.msrb.mxu2 %v492_v55  ;;  %v387_v63 = vcvt.s32.f32 %v259_v56  ;;  %v395_v0 = vcvt.s32.f32 %v267_v57  ;;  %v268_v1 = vunpack.c.1.s8 %v180_v28  ;;  %v261_v2 = vunpack.c.0.s8 %v181_v33 }
  0x61   :  { %610 = vmatpush.bf16.msrb.mxu3 %v493_v59  ;;  %v482_v4 = vpack.c.bf16 %v394_v61, %v386_v60  ;;  %v388_v6 = vcvt.s32.f32 %v260_v62  ;;  %v269_v7 = vunpack.c.1.s8 %v181_v33  ;;  %v242_v8 = vunpack.c.2.s8 %v170_v58 }
  0x62   :  { %v483_v10 = vpack.c.bf16 %v395_v0, %v387_v63  ;;  %v396_v11 = vcvt.s32.f32 %v268_v1  ;;  %v389_v12 = vcvt.s32.f32 %v261_v2  ;;  %v250_v13 = vunpack.c.3.s8 %v170_v58 }
  0x63   :  { %569 = vmatpush.bf16.msrb.mxu0 %v482_v4  ;;  %v397_v15 = vcvt.s32.f32 %v269_v7  ;;  %v370_v16 = vcvt.s32.f32 %v242_v8  ;;  %v243_v17 = vunpack.c.2.s8 %v171_v3  ;;  %v251_v18 = vunpack.c.3.s8 %v171_v3 }
  0x64   :  { %583 = vmatpush.bf16.msrb.mxu1 %v483_v10  ;;  %v484_v19 = vpack.c.bf16 %v396_v11, %v388_v6  ;;  %v378_v20 = vcvt.s32.f32 %v250_v13  ;;  %v244_v21 = vunpack.c.2.s8 %v172_v9  ;;  %v252_v22 = vunpack.c.3.s8 %v172_v9 }
  0x65   :  { %v485_v23 = vpack.c.bf16 %v397_v15, %v389_v12  ;;  %v371_v24 = vcvt.s32.f32 %v243_v17  ;;  %v379_v25 = vcvt.s32.f32 %v251_v18  ;;  %v245_v26 = vunpack.c.2.s8 %v173_v14 }
  0x66   :  { %597 = vmatpush.bf16.msrb.mxu2 %v484_v19  ;;  %v474_v27 = vpack.c.bf16 %v378_v20, %v370_v16  ;;  %v372_v28 = vcvt.s32.f32 %v244_v21  ;;  %v380_v29 = vcvt.s32.f32 %v252_v22  ;;  %v253_v30 = vunpack.c.3.s8 %v173_v14 }
  0x67   :  { %611 = vmatpush.bf16.msrb.mxu3 %v485_v23  ;;  %v475_v31 = vpack.c.bf16 %v379_v25, %v371_v24  ;;  %v373_v32 = vcvt.s32.f32 %v245_v26  ;;  %v226_v33 = vunpack.c.0.s8 %v170_v58  ;;  %v234_v34 = vunpack.c.1.s8 %v170_v58  ;;  %v165_v58 = vld [vmem:[#allocation5 + $0x38] sm:$0xff]  ;;  %v743_v24 = vld [vmem:[#allocation7 + $0xc0] sm:$0xff] }
  0x68   :  { %570 = vmatpush.bf16.msrb.mxu0 %v474_v27  ;;  %v476_v35 = vpack.c.bf16 %v380_v29, %v372_v28  ;;  %v381_v36 = vcvt.s32.f32 %v253_v30  ;;  %v227_v37 = vunpack.c.0.s8 %v171_v3  ;;  %v235_v38 = vunpack.c.1.s8 %v171_v3  ;;  %v775_v29 = vld [vmem:[#allocation7 + $0x1c0] sm:$0xff] }
  0x69   :  { %584 = vmatpush.bf16.msrb.mxu1 %v475_v31  ;;  %v354_v39 = vcvt.s32.f32 %v226_v33  ;;  %v362_v40 = vcvt.s32.f32 %v234_v34  ;;  %v228_v41 = vunpack.c.0.s8 %v172_v9  ;;  %v236_v42 = vunpack.c.1.s8 %v172_v9 }
  0x6a   :  { %598 = vmatpush.bf16.msrb.mxu2 %v476_v35  ;;  %v477_v44 = vpack.c.bf16 %v381_v36, %v373_v32  ;;  %v355_v45 = vcvt.s32.f32 %v227_v37  ;;  %v363_v46 = vcvt.s32.f32 %v235_v38  ;;  %v229_v47 = vunpack.c.0.s8 %v173_v14 }
  0x6b   :  { %v466_v49 = vpack.c.bf16 %v362_v40, %v354_v39  ;;  %v356_v50 = vcvt.s32.f32 %v228_v41  ;;  %v364_v51 = vcvt.s32.f32 %v236_v42  ;;  %v237_v52 = vunpack.c.1.s8 %v173_v14 }
  0x6c   :  { %612 = vmatpush.bf16.msrb.mxu3 %v477_v44  ;;  %v467_v54 = vpack.c.bf16 %v363_v46, %v355_v45  ;;  %v357_v55 = vcvt.s32.f32 %v229_v47  ;;  %v210_v56 = vunpack.c.2.s8 %v162_v43  ;;  %v218_v57 = vunpack.c.3.s8 %v162_v43  ;;  %v807_v46 = vld [vmem:[#allocation7 + $0x2c0] sm:$0xff] }
  0x6d   :  { %571 = vmatpush.bf16.msrb.mxu0 %v466_v49  ;;  %v468_v59 = vpack.c.bf16 %v364_v51, %v356_v50  ;;  %v365_v60 = vcvt.s32.f32 %v237_v52  ;;  %v211_v61 = vunpack.c.2.s8 %v163_v48  ;;  %v219_v62 = vunpack.c.3.s8 %v163_v48  ;;  %v839_v51 = vld [vmem:[#allocation7 + $0x3c0] sm:$0xff] }
  0x6e   :  { %585 = vmatpush.bf16.msrb.mxu1 %v467_v54  ;;  %v338_v63 = vcvt.s32.f32 %v210_v56  ;;  %v346_v0 = vcvt.s32.f32 %v218_v57  ;;  %v212_v1 = vunpack.c.2.s8 %v164_v53  ;;  %v220_v2 = vunpack.c.3.s8 %v164_v53  ;;  %v735_v56 = vld [vmem:[#allocation7 + $0x80] sm:$0xff] }
  0x6f   :  { %599 = vmatpush.bf16.msrb.mxu2 %v468_v59  ;;  %v469_v3 = vpack.c.bf16 %v365_v60, %v357_v55  ;;  %v339_v4 = vcvt.s32.f32 %v211_v61  ;;  %v347_v6 = vcvt.s32.f32 %v219_v62  ;;  %v213_v7 = vunpack.c.2.s8 %v165_v58  ;;  %v767_v61 = vld [vmem:[#allocation7 + $0x180] sm:$0xff] }
  0x70   :  { %v458_v8 = vpack.c.bf16 %v346_v0, %v338_v63  ;;  %v340_v9 = vcvt.s32.f32 %v212_v1  ;;  %v348_v10 = vcvt.s32.f32 %v220_v2  ;;  %v221_v11 = vunpack.c.3.s8 %v165_v58 }
  0x71   :  { %613 = vmatpush.bf16.msrb.mxu3 %v469_v3  ;;  %v459_v12 = vpack.c.bf16 %v347_v6, %v339_v4  ;;  %v341_v13 = vcvt.s32.f32 %v213_v7  ;;  %v194_v14 = vunpack.c.0.s8 %v162_v43  ;;  %v202_v15 = vunpack.c.1.s8 %v162_v43 }
  0x72   :  { %572 = vmatpush.bf16.msrb.mxu0 %v458_v8  ;;  %v460_v16 = vpack.c.bf16 %v348_v10, %v340_v9  ;;  %v349_v17 = vcvt.s32.f32 %v221_v11  ;;  %v195_v18 = vunpack.c.0.s8 %v163_v48  ;;  %v203_v19 = vunpack.c.1.s8 %v163_v48 }
  0x73   :  { %586 = vmatpush.bf16.msrb.mxu1 %v459_v12  ;;  %v322_v20 = vcvt.s32.f32 %v194_v14  ;;  %v330_v21 = vcvt.s32.f32 %v202_v15  ;;  %v196_v22 = vunpack.c.0.s8 %v164_v53  ;;  %v204_v23 = vunpack.c.1.s8 %v164_v53 }
  0x74   :  { %600 = vmatpush.bf16.msrb.mxu2 %v460_v16  ;;  %v461_v25 = vpack.c.bf16 %v349_v17, %v341_v13  ;;  %v323_v26 = vcvt.s32.f32 %v195_v18  ;;  %v331_v27 = vcvt.s32.f32 %v203_v19  ;;  %v197_v28 = vunpack.c.0.s8 %v165_v58 }
  0x75   :  { %v450_v30 = vpack.c.bf16 %v330_v21, %v322_v20  ;;  %v324_v31 = vcvt.s32.f32 %v196_v22  ;;  %v332_v32 = vcvt.s32.f32 %v204_v23  ;;  %v205_v33 = vunpack.c.1.s8 %v165_v58 }
  0x76   :  { %614 = vmatpush.bf16.msrb.mxu3 %v461_v25  ;;  %v451_v34 = vpack.c.bf16 %v331_v27, %v323_v26  ;;  %v325_v35 = vcvt.s32.f32 %v197_v28  ;;  %v1087_v36 = vunpack.c.2.s8 %v743_v24  ;;  %v1095_v37 = vunpack.c.3.s8 %v743_v24  ;;  %v799_v26 = vld [vmem:[#allocation7 + $0x280] sm:$0xff] }
  0x77   :  { %573 = vmatpush.bf16.msrb.mxu0 %v450_v30  ;;  %v452_v38 = vpack.c.bf16 %v332_v32, %v324_v31  ;;  %v333_v39 = vcvt.s32.f32 %v205_v33  ;;  %v1215_v40 = vunpack.c.2.s8 %v775_v29  ;;  %v1223_v41 = vunpack.c.3.s8 %v775_v29  ;;  %v831_v31 = vld [vmem:[#allocation7 + $0x380] sm:$0xff] }
  0x78   :  { %587 = vmatpush.bf16.msrb.mxu1 %v451_v34  ;;  %v2111_v42 = vcvt.s32.f32 %v1087_v36  ;;  %v2119_v43 = vcvt.s32.f32 %v1095_v37  ;;  %v1071_v44 = vunpack.c.0.s8 %v743_v24  ;;  %v1079_v45 = vunpack.c.1.s8 %v743_v24  ;;  %v727_v36 = vld [vmem:[#allocation7 + $0x40] sm:$0xff] }
  0x79   :  { %601 = vmatpush.bf16.msrb.mxu2 %v452_v38  ;;  %v453_v47 = vpack.c.bf16 %v333_v39, %v325_v35  ;;  %v2239_v48 = vcvt.s32.f32 %v1215_v40  ;;  %v2247_v49 = vcvt.s32.f32 %v1223_v41  ;;  %v1199_v50 = vunpack.c.0.s8 %v775_v29  ;;  %v759_v41 = vld [vmem:[#allocation7 + $0x140] sm:$0xff] }
  0x7a   :  { %574 = vmatmul.bf16.vlgmr.msrb.gmra.mxu0 %v7496_v5  ;;  %v3079_v52 = vpack.c.bf16 %v2119_v43, %v2111_v42  ;;  %v2095_v53 = vcvt.s32.f32 %v1071_v44  ;;  %v2103_v54 = vcvt.s32.f32 %v1079_v45  ;;  %v1207_v55 = vunpack.c.1.s8 %v775_v29 }
  0x7b   :  { %615 = vmatpush.bf16.msrb.mxu3 %v453_v47  ;;  %588 = vmatmul.bf16.vlgmr.msrb.gmra.mxu1 %v7496_v5  ;;  %v3143_v57 = vpack.c.bf16 %v2247_v49, %v2239_v48  ;;  %v2223_v58 = vcvt.s32.f32 %v1199_v50  ;;  %v1343_v59 = vunpack.c.2.s8 %v807_v46  ;;  %v1351_v60 = vunpack.c.3.s8 %v807_v46 }
  0x7c   :  { %602 = vmatmul.bf16.vlgmr.msrb.gmra.mxu2 %v7496_v5  ;;  %3535 = vmatpush.bf16.msra.mxu0 %v3079_v52  ;;  %v3071_v62 = vpack.c.bf16 %v2103_v54, %v2095_v53  ;;  %v2231_v63 = vcvt.s32.f32 %v1207_v55  ;;  %v1471_v0 = vunpack.c.2.s8 %v839_v51  ;;  %v1479_v1 = vunpack.c.3.s8 %v839_v51 }
  0x7d   :  { %3549 = vmatpush.bf16.msra.mxu1 %v3143_v57  ;;  %v2367_v2 = vcvt.s32.f32 %v1343_v59  ;;  %v2375_v3 = vcvt.s32.f32 %v1351_v60  ;;  %v1055_v4 = vunpack.c.2.s8 %v735_v56  ;;  %v1063_v6 = vunpack.c.3.s8 %v735_v56 }
  0x7e   :  { %616 = vmatmul.bf16.vlgmr.msrb.gmra.mxu3 %v7496_v5  ;;  %v3135_v7 = vpack.c.bf16 %v2231_v63, %v2223_v58  ;;  %v2495_v8 = vcvt.s32.f32 %v1471_v0  ;;  %v2503_v9 = vcvt.s32.f32 %v1479_v1  ;;  %v1183_v10 = vunpack.c.2.s8 %v767_v61 }
  0x7f   :  { %v3207_v11 = vpack.c.bf16 %v2375_v3, %v2367_v2  ;;  %v2079_v12 = vcvt.s32.f32 %v1055_v4  ;;  %v2087_v13 = vcvt.s32.f32 %v1063_v6  ;;  %v1191_v14 = vunpack.c.3.s8 %v767_v61 }
  0x80   :  { %3536 = vmatpush.bf16.msra.mxu0 %v3071_v62  ;;  %v3271_v15 = vpack.c.bf16 %v2503_v9, %v2495_v8  ;;  %v2207_v16 = vcvt.s32.f32 %v1183_v10  ;;  %v1327_v17 = vunpack.c.0.s8 %v807_v46  ;;  %v1335_v18 = vunpack.c.1.s8 %v807_v46 }
  0x81   :  { %3550 = vmatpush.bf16.msra.mxu1 %v3135_v7  ;;  %3563 = vmatpush.bf16.msra.mxu2 %v3207_v11  ;;  %v3063_v19 = vpack.c.bf16 %v2087_v13, %v2079_v12  ;;  %v2215_v20 = vcvt.s32.f32 %v1191_v14  ;;  %v1455_v21 = vunpack.c.0.s8 %v839_v51  ;;  %v1463_v22 = vunpack.c.1.s8 %v839_v51  ;;  %v791_v7 = vld [vmem:[#allocation7 + $0x240] sm:$0xff] }
  0x82   :  { %3577 = vmatpush.bf16.msra.mxu3 %v3271_v15  ;;  %v2351_v5 = vcvt.s32.f32 %v1327_v17  ;;  %v2359_v23 = vcvt.s32.f32 %v1335_v18  ;;  %v1039_v24 = vunpack.c.0.s8 %v735_v56  ;;  %v1047_v25 = vunpack.c.1.s8 %v735_v56  ;;  %v823_v12 = vld [vmem:[#allocation7 + $0x340] sm:$0xff] }
  0x83   :  { %v3127_v27 = vpack.c.bf16 %v2215_v20, %v2207_v16  ;;  %v2479_v28 = vcvt.s32.f32 %v1455_v21  ;;  %v2487_v29 = vcvt.s32.f32 %v1463_v22  ;;  %v1167_v30 = vunpack.c.0.s8 %v767_v61  ;;  %v719_v17 = vld [vmem:[#allocation7] sm:$0xff] }
  0x84   :  { %3537 = vmatpush.bf16.msra.mxu0 %v3063_v19  ;;  %v3199_v32 = vpack.c.bf16 %v2359_v23, %v2351_v5  ;;  %v2063_v33 = vcvt.s32.f32 %v1039_v24  ;;  %v2071_v34 = vcvt.s32.f32 %v1047_v25  ;;  %v1175_v35 = vunpack.c.1.s8 %v767_v61  ;;  %v751_v22 = vld [vmem:[#allocation7 + $0x100] sm:$0xff] }
  0x85   :  { %3551 = vmatpush.bf16.msra.mxu1 %v3127_v27  ;;  %v3263_v37 = vpack.c.bf16 %v2487_v29, %v2479_v28  ;;  %v2191_v38 = vcvt.s32.f32 %v1167_v30  ;;  %v1311_v39 = vunpack.c.2.s8 %v799_v26  ;;  %v1319_v40 = vunpack.c.3.s8 %v799_v26 }
  0x86   :  { %3564 = vmatpush.bf16.msra.mxu2 %v3199_v32  ;;  %v3055_v42 = vpack.c.bf16 %v2071_v34, %v2063_v33  ;;  %v2199_v43 = vcvt.s32.f32 %v1175_v35  ;;  %v1439_v44 = vunpack.c.2.s8 %v831_v31  ;;  %v1447_v45 = vunpack.c.3.s8 %v831_v31 }
  0x87   :  { %3578 = vmatpush.bf16.msra.mxu3 %v3263_v37  ;;  %v2335_v46 = vcvt.s32.f32 %v1311_v39  ;;  %v2343_v47 = vcvt.s32.f32 %v1319_v40  ;;  %v1023_v48 = vunpack.c.2.s8 %v727_v36  ;;  %v1031_v49 = vunpack.c.3.s8 %v727_v36 }
  0x88   :  { %3538 = vmatpush.bf16.msra.mxu0 %v3055_v42  ;;  %v3119_v50 = vpack.c.bf16 %v2199_v43, %v2191_v38  ;;  %v2463_v51 = vcvt.s32.f32 %v1439_v44  ;;  %v2471_v52 = vcvt.s32.f32 %v1447_v45  ;;  %v1151_v53 = vunpack.c.2.s8 %v759_v41 }
  0x89   :  { %v3191_v54 = vpack.c.bf16 %v2343_v47, %v2335_v46  ;;  %v2047_v55 = vcvt.s32.f32 %v1023_v48  ;;  %v2055_v56 = vcvt.s32.f32 %v1031_v49  ;;  %v1159_v57 = vunpack.c.3.s8 %v759_v41 }
  0x8a   :  { %3552 = vmatpush.bf16.msra.mxu1 %v3119_v50  ;;  %v3255_v58 = vpack.c.bf16 %v2471_v52, %v2463_v51  ;;  %v2175_v59 = vcvt.s32.f32 %v1151_v53  ;;  %v1295_v60 = vunpack.c.0.s8 %v799_v26  ;;  %v1303_v61 = vunpack.c.1.s8 %v799_v26  ;;  %v871_v50 = vld [vmem:[#allocation7 + $0x4c0] sm:$0xff] }
  0x8b   :  { %3565 = vmatpush.bf16.msra.mxu2 %v3191_v54  ;;  %v3047_v62 = vpack.c.bf16 %v2055_v56, %v2047_v55  ;;  %v2183_v63 = vcvt.s32.f32 %v1159_v57  ;;  %v1423_v0 = vunpack.c.0.s8 %v831_v31  ;;  %v1431_v1 = vunpack.c.1.s8 %v831_v31  ;;  %v903_v55 = vld [vmem:[#allocation7 + $0x5c0] sm:$0xff] }
  0x8c   :  { %3579 = vmatpush.bf16.msra.mxu3 %v3255_v58  ;;  %v2319_v2 = vcvt.s32.f32 %v1295_v60  ;;  %v2327_v3 = vcvt.s32.f32 %v1303_v61  ;;  %v1007_v4 = vunpack.c.0.s8 %v727_v36  ;;  %v1015_v6 = vunpack.c.1.s8 %v727_v36  ;;  %v783_v60 = vld [vmem:[#allocation7 + $0x200] sm:$0xff] }
  0x8d   :  { %3539 = vmatpush.bf16.msra.mxu0 %v3047_v62  ;;  %v3111_v8 = vpack.c.bf16 %v2183_v63, %v2175_v59  ;;  %v2447_v9 = vcvt.s32.f32 %v1423_v0  ;;  %v2455_v10 = vcvt.s32.f32 %v1431_v1  ;;  %v1135_v11 = vunpack.c.0.s8 %v759_v41  ;;  %v815_v1 = vld [vmem:[#allocation7 + $0x300] sm:$0xff] }
  0x8e   :  { %v3183_v13 = vpack.c.bf16 %v2327_v3, %v2319_v2  ;;  %v2031_v14 = vcvt.s32.f32 %v1007_v4  ;;  %v2039_v15 = vcvt.s32.f32 %v1015_v6  ;;  %v1143_v16 = vunpack.c.1.s8 %v759_v41 }
  0x8f   :  { %3553 = vmatpush.bf16.msra.mxu1 %v3111_v8  ;;  %v3247_v18 = vpack.c.bf16 %v2455_v10, %v2447_v9  ;;  %v2159_v19 = vcvt.s32.f32 %v1135_v11  ;;  %v1279_v20 = vunpack.c.2.s8 %v791_v7  ;;  %v1287_v21 = vunpack.c.3.s8 %v791_v7 }
  0x90   :  { %3566 = vmatpush.bf16.msra.mxu2 %v3183_v13  ;;  %v3039_v5 = vpack.c.bf16 %v2039_v15, %v2031_v14  ;;  %v2167_v23 = vcvt.s32.f32 %v1143_v16  ;;  %v1407_v24 = vunpack.c.2.s8 %v823_v12  ;;  %v1415_v25 = vunpack.c.3.s8 %v823_v12 }
  0x91   :  { %3580 = vmatpush.bf16.msra.mxu3 %v3247_v18  ;;  %v2303_v26 = vcvt.s32.f32 %v1279_v20  ;;  %v2311_v27 = vcvt.s32.f32 %v1287_v21  ;;  %v991_v28 = vunpack.c.2.s8 %v719_v17  ;;  %v999_v29 = vunpack.c.3.s8 %v719_v17 }
  0x92   :  { %3540 = vmatpush.bf16.msra.mxu0 %v3039_v5  ;;  %v3103_v30 = vpack.c.bf16 %v2167_v23, %v2159_v19  ;;  %v2431_v31 = vcvt.s32.f32 %v1407_v24  ;;  %v2439_v32 = vcvt.s32.f32 %v1415_v25  ;;  %v1119_v33 = vunpack.c.2.s8 %v751_v22 }
  0x93   :  { %v3175_v34 = vpack.c.bf16 %v2311_v27, %v2303_v26  ;;  %v2015_v35 = vcvt.s32.f32 %v991_v28  ;;  %v2023_v36 = vcvt.s32.f32 %v999_v29  ;;  %v1127_v37 = vunpack.c.3.s8 %v751_v22 }
  0x94   :  { %3554 = vmatpush.bf16.msra.mxu1 %v3103_v30  ;;  %v3239_v38 = vpack.c.bf16 %v2439_v32, %v2431_v31  ;;  %v2143_v39 = vcvt.s32.f32 %v1119_v33  ;;  %v1263_v40 = vunpack.c.0.s8 %v791_v7  ;;  %v1271_v41 = vunpack.c.1.s8 %v791_v7  ;;  %v935_v30 = vld [vmem:[#allocation7 + $0x6c0] sm:$0xff] }
  0x95   :  { %3567 = vmatpush.bf16.msra.mxu2 %v3175_v34  ;;  %v3031_v42 = vpack.c.bf16 %v2023_v36, %v2015_v35  ;;  %v2151_v43 = vcvt.s32.f32 %v1127_v37  ;;  %v1391_v44 = vunpack.c.0.s8 %v823_v12  ;;  %v1399_v45 = vunpack.c.1.s8 %v823_v12  ;;  %v967_v35 = vld [vmem:[#allocation7 + $0x7c0] sm:$0xff] }
  0x96   :  { %3581 = vmatpush.bf16.msra.mxu3 %v3239_v38  ;;  %v2287_v46 = vcvt.s32.f32 %v1263_v40  ;;  %v2295_v47 = vcvt.s32.f32 %v1271_v41  ;;  %v975_v48 = vunpack.c.0.s8 %v719_v17  ;;  %v983_v49 = vunpack.c.1.s8 %v719_v17  ;;  %v7508_v40 = vld [vmem:[#allocation7 + $0x480] sm:$0xff] }
  0x97   :  { %3541 = vmatpush.bf16.msra.mxu0 %v3031_v42  ;;  %v3095_v51 = vpack.c.bf16 %v2151_v43, %v2143_v39  ;;  %v2415_v52 = vcvt.s32.f32 %v1391_v44  ;;  %v2423_v53 = vcvt.s32.f32 %v1399_v45  ;;  %v1103_v54 = vunpack.c.0.s8 %v751_v22  ;;  %v7510_v45 = vld [vmem:[#allocation7 + $0x580] sm:$0xff] }
  0x98   :  { %v3167_v56 = vpack.c.bf16 %v2295_v47, %v2287_v46  ;;  %v1999_v57 = vcvt.s32.f32 %v975_v48  ;;  %v2007_v58 = vcvt.s32.f32 %v983_v49  ;;  %v1111_v59 = vunpack.c.1.s8 %v751_v22 }
  0x99   :  { %3555 = vmatpush.bf16.msra.mxu1 %v3095_v51  ;;  %v3231_v61 = vpack.c.bf16 %v2423_v53, %v2415_v52  ;;  %v2127_v62 = vcvt.s32.f32 %v1103_v54  ;;  %v1599_v63 = vunpack.c.2.s8 %v871_v50  ;;  %v1607_v0 = vunpack.c.3.s8 %v871_v50 }
  0x9a   :  { %3568 = vmatpush.bf16.msra.mxu2 %v3167_v56  ;;  %v3023_v2 = vpack.c.bf16 %v2007_v58, %v1999_v57  ;;  %v2135_v3 = vcvt.s32.f32 %v1111_v59  ;;  %v1727_v4 = vunpack.c.2.s8 %v903_v55  ;;  %v1735_v6 = vunpack.c.3.s8 %v903_v55 }
  0x9b   :  { %3582 = vmatpush.bf16.msra.mxu3 %v3231_v61  ;;  %v2623_v7 = vcvt.s32.f32 %v1599_v63  ;;  %v2631_v8 = vcvt.s32.f32 %v1607_v0  ;;  %v1247_v9 = vunpack.c.2.s8 %v783_v60  ;;  %v1255_v10 = vunpack.c.3.s8 %v783_v60 }
  0x9c   :  { %3542 = vmatpush.bf16.msra.mxu0 %v3023_v2  ;;  %v3087_v11 = vpack.c.bf16 %v2135_v3, %v2127_v62  ;;  %v2751_v12 = vcvt.s32.f32 %v1727_v4  ;;  %v2759_v13 = vcvt.s32.f32 %v1735_v6  ;;  %v1375_v14 = vunpack.c.2.s8 %v815_v1 }
  0x9d   :  { %v3335_v15 = vpack.c.bf16 %v2631_v8, %v2623_v7  ;;  %v2271_v16 = vcvt.s32.f32 %v1247_v9  ;;  %v2279_v17 = vcvt.s32.f32 %v1255_v10  ;;  %v1383_v18 = vunpack.c.3.s8 %v815_v1 }
  0x9e   :  { %3556 = vmatpush.bf16.msra.mxu1 %v3087_v11  ;;  %v3399_v19 = vpack.c.bf16 %v2759_v13, %v2751_v12  ;;  %v2399_v20 = vcvt.s32.f32 %v1375_v14  ;;  %v1583_v21 = vunpack.c.0.s8 %v871_v50  ;;  %v1591_v22 = vunpack.c.1.s8 %v871_v50  ;;  %v622_v14 = vld [vmem:[#allocation14] ss:$8 sm:$0xf] }
  0x9f   :  { %v3159_v5 = vpack.c.bf16 %v2279_v17, %v2271_v16  ;;  %v2407_v23 = vcvt.s32.f32 %v1383_v18  ;;  %v1711_v24 = vunpack.c.0.s8 %v903_v55  ;;  %v1719_v25 = vunpack.c.1.s8 %v903_v55  ;;  %v626_v16 = vld [vmem:[#allocation14 + $0x6] ss:$8 sm:$0xf] }
  0xa0   :  { %3591 = vmatpush.bf16.msrb.mxu0 %v3335_v15  ;;  %v2607_v26 = vcvt.s32.f32 %v1583_v21  ;;  %v2615_v27 = vcvt.s32.f32 %v1591_v22  ;;  %v1231_v28 = vunpack.c.0.s8 %v783_v60  ;;  %v1239_v29 = vunpack.c.1.s8 %v783_v60  ;;  %v623_v15 = vld [vmem:[#allocation14] ss:$8 sm:$0xf0]  ;;  %v627_v17 = vld [vmem:[#allocation14 + $0x6] ss:$8 sm:$0xf0] }
  0xa1   :  { %3569 = vmatpush.bf16.msra.mxu2 %v3159_v5  ;;  %v3223_v31 = vpack.c.bf16 %v2407_v23, %v2399_v20  ;;  %v2735_v32 = vcvt.s32.f32 %v1711_v24  ;;  %v2743_v33 = vcvt.s32.f32 %v1719_v25  ;;  %v1359_v34 = vunpack.c.0.s8 %v815_v1  ;;  %v927_v25 = vld [vmem:[#allocation7 + $0x680] sm:$0xff] }
  0xa2   :  { %3605 = vmatpush.bf16.msrb.mxu1 %v3399_v19  ;;  %v3327_v36 = vpack.c.bf16 %v2615_v27, %v2607_v26  ;;  %v2255_v37 = vcvt.s32.f32 %v1231_v28  ;;  %v2263_v38 = vcvt.s32.f32 %v1239_v29  ;;  %v1367_v39 = vunpack.c.1.s8 %v815_v1  ;;  %v959_v26 = vld [vmem:[#allocation7 + $0x780] sm:$0xff] }
  0xa3   :  { %3583 = vmatpush.bf16.msra.mxu3 %v3223_v31  ;;  %v3391_v41 = vpack.c.bf16 %v2743_v33, %v2735_v32  ;;  %v2383_v42 = vcvt.s32.f32 %v1359_v34  ;;  %v1855_v43 = vunpack.c.2.s8 %v935_v30  ;;  %v1863_v44 = vunpack.c.3.s8 %v935_v30  ;;  %v855_v31 = vld [vmem:[#allocation7 + $0x440] sm:$0xff] }
  0xa4   :  { %3592 = vmatpush.bf16.msrb.mxu0 %v3327_v36  ;;  %v3151_v46 = vpack.c.bf16 %v2263_v38, %v2255_v37  ;;  %v2391_v47 = vcvt.s32.f32 %v1367_v39  ;;  %v1983_v48 = vunpack.c.2.s8 %v967_v35  ;;  %v1991_v49 = vunpack.c.3.s8 %v967_v35  ;;  %v887_v36 = vld [vmem:[#allocation7 + $0x540] sm:$0xff] }
  0xa5   :  { %v2879_v50 = vcvt.s32.f32 %v1855_v43  ;;  %v2887_v51 = vcvt.s32.f32 %v1863_v44  ;;  %v1567_v52 = vunpack.c.2.s8 %v7508_v40  ;;  %v1575_v53 = vunpack.c.3.s8 %v7508_v40 }
  0xa6   :  { %3606 = vmatpush.bf16.msrb.mxu1 %v3391_v41  ;;  %3570 = vmatpush.bf16.msra.mxu2 %v3151_v46  ;;  %v3215_v54 = vpack.c.bf16 %v2391_v47, %v2383_v42  ;;  %v3007_v55 = vcvt.s32.f32 %v1983_v48  ;;  %v3015_v56 = vcvt.s32.f32 %v1991_v49  ;;  %v1695_v57 = vunpack.c.2.s8 %v7510_v45 }
  0xa7   :  { %v3463_v58 = vpack.c.bf16 %v2887_v51, %v2879_v50  ;;  %v2591_v59 = vcvt.s32.f32 %v1567_v52  ;;  %v2599_v60 = vcvt.s32.f32 %v1575_v53  ;;  %v1703_v61 = vunpack.c.3.s8 %v7510_v45 }
  0xa8   :  { %3584 = vmatpush.bf16.msra.mxu3 %v3215_v54  ;;  %v3527_v62 = vpack.c.bf16 %v3015_v56, %v3007_v55  ;;  %v2719_v63 = vcvt.s32.f32 %v1695_v57  ;;  %v1839_v0 = vunpack.c.0.s8 %v935_v30  ;;  %v1847_v1 = vunpack.c.1.s8 %v935_v30 }
  0xa9   :  { %v3319_v2 = vpack.c.bf16 %v2599_v60, %v2591_v59  ;;  %v2727_v3 = vcvt.s32.f32 %v1703_v61  ;;  %v1967_v4 = vunpack.c.0.s8 %v967_v35  ;;  %v1975_v6 = vunpack.c.1.s8 %v967_v35 }
  0xaa   :  { %3619 = vmatpush.bf16.msrb.mxu2 %v3463_v58  ;;  %v2863_v7 = vcvt.s32.f32 %v1839_v0  ;;  %v2871_v8 = vcvt.s32.f32 %v1847_v1  ;;  %v7516_v18 = vor.u32 %v623_v15, %v622_v14  ;;  %v7518_v19 = vor.u32 %v627_v17, %v626_v16  ;;  %v847_v16 = vld [vmem:[#allocation7 + $0x400] sm:$0xff] }
  0xab   :  { %3593 = vmatpush.bf16.msrb.mxu0 %v3319_v2  ;;  %v3383_v9 = vpack.c.bf16 %v2727_v3, %v2719_v63  ;;  %v2991_v10 = vcvt.s32.f32 %v1967_v4  ;;  %v2999_v11 = vcvt.s32.f32 %v1975_v6  ;;  %v1551_v23 = vunpack.c.0.s8 %v7508_v40  ;;  %v919_v6 = vld [vmem:[#allocation7 + $0x640] sm:$0xff] }
  0xac   :  { %3633 = vmatpush.bf16.msrb.mxu3 %v3527_v62  ;;  %v3455_v12 = vpack.c.bf16 %v2871_v8, %v2863_v7  ;;  %v630_v20 = vperm.slane %v7516_v18, 0  ;;  %v663_v21 = vperm.slane %v7518_v19, 0  ;;  %v631_v22 = vperm.slane %v7516_v18, 1 }
  0xad   :  { %3607 = vmatpush.bf16.msrb.mxu1 %v3383_v9  ;;  %v3519_v13 = vpack.c.bf16 %v2999_v11, %v2991_v10  ;;  %v664_v5 = vperm.slane %v7518_v19, 1  ;;  %v1559_v24 = vunpack.c.1.s8 %v7508_v40  ;;  %v1679_v27 = vunpack.c.0.s8 %v7510_v45  ;;  %v951_v11 = vld [vmem:[#allocation7 + $0x740] sm:$0xff] }
  0xae   :  { %3620 = vmatpush.bf16.msrb.mxu2 %v3455_v12  ;;  %v1687_v28 = vunpack.c.1.s8 %v7510_v45  ;;  %v1823_v29 = vunpack.c.2.s8 %v927_v25  ;;  %v1831_v30 = vunpack.c.3.s8 %v927_v25  ;;  %v2575_v32 = vcvt.s32.f32 %v1551_v23 }
  0xaf   :  { %v2583_v33 = vcvt.s32.f32 %v1559_v24  ;;  %v1951_v34 = vunpack.c.2.s8 %v959_v26  ;;  %v1959_v35 = vunpack.c.3.s8 %v959_v26  ;;  %v2703_v37 = vcvt.s32.f32 %v1679_v27 }
  0xb0   :  { %3634 = vmatpush.bf16.msrb.mxu3 %v3519_v13  ;;  %v2711_v38 = vcvt.s32.f32 %v1687_v28  ;;  %v2847_v39 = vcvt.s32.f32 %v1823_v29  ;;  %v2855_v41 = vcvt.s32.f32 %v1831_v30  ;;  %v1535_v44 = vunpack.c.2.s8 %v855_v31 }
  0xb1   :  { %v3311_v42 = vpack.c.bf16 %v2583_v33, %v2575_v32  ;;  %v2975_v40 = vcvt.s32.f32 %v1951_v34  ;;  %v2983_v43 = vcvt.s32.f32 %v1959_v35  ;;  %v1543_v48 = vunpack.c.3.s8 %v855_v31 }
  0xb2   :  { %v3375_v46 = vpack.c.bf16 %v2711_v38, %v2703_v37  ;;  %v3447_v47 = vpack.c.bf16 %v2855_v41, %v2847_v39  ;;  %v1663_v45 = vunpack.c.2.s8 %v887_v36  ;;  %v2559_v50 = vcvt.s32.f32 %v1535_v44 }
  0xb3   :  { %3594 = vmatpush.bf16.msrb.mxu0 %v3311_v42  ;;  %v3511_v49 = vpack.c.bf16 %v2983_v43, %v2975_v40  ;;  %v1671_v51 = vunpack.c.3.s8 %v887_v36  ;;  %v632_v52 = vperm.slane %v7516_v18, 2  ;;  %v2567_v53 = vcvt.s32.f32 %v1543_v48 }
  0xb4   :  { %3608 = vmatpush.bf16.msrb.mxu1 %v3375_v46  ;;  %3621 = vmatpush.bf16.msrb.mxu2 %v3447_v47  ;;  %v2687_v54 = vcvt.s32.f32 %v1663_v45  ;;  %v665_v55 = vperm.slane %v7518_v19, 2  ;;  %v1807_v56 = vunpack.c.0.s8 %v927_v25  ;;  %v633_v58 = vperm.slane %v7516_v18, 3 }
  0xb5   :  { %3635 = vmatpush.bf16.msrb.mxu3 %v3511_v49  ;;  %v2695_v57 = vcvt.s32.f32 %v1671_v51  ;;  %v666_v59 = vperm.slane %v7518_v19, 3  ;;  %v1815_v60 = vunpack.c.1.s8 %v927_v25  ;;  %v3303_v61 = vpack.c.bf16 %v2567_v53, %v2559_v50  ;;  %v744_v51 = vld [vmem:[#allocation7 + $0xc8] sm:$0xff] }
  0xb6   :  { %v2831_v62 = vcvt.s32.f32 %v1807_v56  ;;  %v1935_v63 = vunpack.c.0.s8 %v959_v26  ;;  %v1943_v0 = vunpack.c.1.s8 %v959_v26  ;;  %v1519_v3 = vunpack.c.0.s8 %v855_v31  ;;  %v879_v26 = vld [vmem:[#allocation7 + $0x500] sm:$0xff] }
  0xb7   :  { %v3367_v1 = vpack.c.bf16 %v2695_v57, %v2687_v54  ;;  %v2839_v2 = vcvt.s32.f32 %v1815_v60  ;;  %v1527_v4 = vunpack.c.1.s8 %v855_v31  ;;  %3595 = vmatpush.bf16.msrb.mxu0 %v3303_v61  ;;  %v1647_v9 = vunpack.c.0.s8 %v887_v36 }
  0xb8   :  { %v2959_v7 = vcvt.s32.f32 %v1935_v63  ;;  %v2967_v8 = vcvt.s32.f32 %v1943_v0  ;;  %v1655_v10 = vunpack.c.1.s8 %v887_v36  ;;  %v2543_v13 = vcvt.s32.f32 %v1519_v3  ;;  %v776_v0 = vld [vmem:[#allocation7 + $0x1c8] sm:$0xff] }
  0xb9   :  { %3609 = vmatpush.bf16.msrb.mxu1 %v3367_v1  ;;  %v3439_v12 = vpack.c.bf16 %v2839_v2, %v2831_v62  ;;  %v2551_v14 = vcvt.s32.f32 %v1527_v4  ;;  %v1791_v15 = vunpack.c.2.s8 %v919_v6  ;;  %v2671_v23 = vcvt.s32.f32 %v1647_v9 }
  0xba   :  { %v3503_v17 = vpack.c.bf16 %v2967_v8, %v2959_v7  ;;  %v2679_v24 = vcvt.s32.f32 %v1655_v10  ;;  %v1799_v25 = vunpack.c.3.s8 %v919_v6  ;;  %v1919_v29 = vunpack.c.2.s8 %v951_v11 }
  0xbb   :  { %3622 = vmatpush.bf16.msrb.mxu2 %v3439_v12  ;;  %v3295_v27 = vpack.c.bf16 %v2551_v14, %v2543_v13  ;;  %v2815_v28 = vcvt.s32.f32 %v1791_v15  ;;  %v1927_v30 = vunpack.c.3.s8 %v951_v11  ;;  %v1503_v33 = vunpack.c.2.s8 %v847_v16 }
  0xbc   :  { %3636 = vmatpush.bf16.msrb.mxu3 %v3503_v17  ;;  %v3359_v31 = vpack.c.bf16 %v2679_v24, %v2671_v23  ;;  %v2823_v32 = vcvt.s32.f32 %v1799_v25  ;;  %v1511_v34 = vunpack.c.3.s8 %v847_v16  ;;  %v2943_v35 = vcvt.s32.f32 %v1919_v29 }
  0xbd   :  { %3596 = vmatpush.bf16.msrb.mxu0 %v3295_v27  ;;  %v2951_v36 = vcvt.s32.f32 %v1927_v30  ;;  %v1631_v37 = vunpack.c.2.s8 %v879_v26  ;;  %v1639_v38 = vunpack.c.3.s8 %v879_v26  ;;  %v2527_v41 = vcvt.s32.f32 %v1503_v33 }
  0xbe   :  { %3610 = vmatpush.bf16.msrb.mxu1 %v3359_v31  ;;  %v3431_v39 = vpack.c.bf16 %v2823_v32, %v2815_v28  ;;  %v2535_v42 = vcvt.s32.f32 %v1511_v34  ;;  %v1775_v40 = vunpack.c.0.s8 %v919_v6  ;;  %v1783_v47 = vunpack.c.1.s8 %v919_v6  ;;  %v911_v6 = vld [vmem:[#allocation7 + $0x600] sm:$0xff] }
  0xbf   :  { %v3495_v43 = vpack.c.bf16 %v2951_v36, %v2943_v35  ;;  %v2655_v44 = vcvt.s32.f32 %v1631_v37  ;;  %v2663_v46 = vcvt.s32.f32 %v1639_v38  ;;  %v1903_v49 = vunpack.c.0.s8 %v951_v11 }
  0xc0   :  { %3623 = vmatpush.bf16.msrb.mxu2 %v3431_v39  ;;  %v3287_v48 = vpack.c.bf16 %v2535_v42, %v2527_v41  ;;  %v2799_v45 = vcvt.s32.f32 %v1775_v40  ;;  %v1911_v50 = vunpack.c.1.s8 %v951_v11  ;;  %v2807_v54 = vcvt.s32.f32 %v1783_v47  ;;  %v943_v11 = vld [vmem:[#allocation7 + $0x700] sm:$0xff] }
  0xc1   :  { %3637 = vmatpush.bf16.msrb.mxu3 %v3495_v43  ;;  %v3351_v53 = vpack.c.bf16 %v2663_v46, %v2655_v44  ;;  %v1487_v56 = vunpack.c.0.s8 %v847_v16  ;;  %v1495_v57 = vunpack.c.1.s8 %v847_v16  ;;  %v2927_v60 = vcvt.s32.f32 %v1903_v49 }
  0xc2   :  { %3597 = vmatpush.bf16.msrb.mxu0 %v3287_v48  ;;  %v2935_v61 = vcvt.s32.f32 %v1911_v50  ;;  %v1615_v62 = vunpack.c.0.s8 %v879_v26  ;;  %v1623_v63 = vunpack.c.1.s8 %v879_v26  ;;  %v3423_v1 = vpack.c.bf16 %v2807_v54, %v2799_v45 }
  0xc3   :  { %3611 = vmatpush.bf16.msrb.mxu1 %v3351_v53  ;;  %v2511_v2 = vcvt.s32.f32 %v1487_v56  ;;  %v2519_v3 = vcvt.s32.f32 %v1495_v57  ;;  %v1088_v4 = vunpack.c.2.s8 %v744_v51  ;;  %v1096_v10 = vunpack.c.3.s8 %v744_v51  ;;  %v7556_v53 = vld [vmem:[#allocation7 + $0x2c8] sm:$0xff] }
  0xc4   :  { %v3487_v7 = vpack.c.bf16 %v2935_v61, %v2927_v60  ;;  %v2639_v8 = vcvt.s32.f32 %v1615_v62  ;;  %v2647_v9 = vcvt.s32.f32 %v1623_v63  ;;  %3624 = vmatpush.bf16.msrb.mxu2 %v3423_v1  ;;  %v1216_v14 = vunpack.c.2.s8 %v776_v0 }
  0xc5   :  { %v3279_v12 = vpack.c.bf16 %v2519_v3, %v2511_v2  ;;  %v7532_v13 = vcvt.s32.f32 %v1088_v4  ;;  %v1224_v15 = vunpack.c.3.s8 %v776_v0  ;;  %v7534_v17 = vcvt.s32.f32 %v1096_v10 }
  0xc6   :  { %3638 = vmatpush.bf16.msrb.mxu3 %v3487_v7  ;;  %v3343_v16 = vpack.c.bf16 %v2647_v9, %v2639_v8  ;;  %v1759_v23 = vunpack.c.2.s8 %v911_v6  ;;  %v1767_v24 = vunpack.c.3.s8 %v911_v6  ;;  %v7536_v26 = vcvt.s32.f32 %v1216_v14  ;;  %v840_v14 = vld [vmem:[#allocation7 + $0x3c8] sm:$0xff] }
  0xc7   :  { %3598 = vmatpush.bf16.msrb.mxu0 %v3279_v12  ;;  %v7538_v27 = vcvt.s32.f32 %v1224_v15  ;;  %v1887_v28 = vunpack.c.2.s8 %v943_v11  ;;  %v1895_v29 = vunpack.c.3.s8 %v943_v11  ;;  %v3080_v32 = vpack.c.bf16 %v7534_v17, %v7532_v13 }
  0xc8   :  { %3612 = vmatpush.bf16.msrb.mxu1 %v3343_v16  ;;  %v2783_v33 = vcvt.s32.f32 %v1759_v23  ;;  %v2791_v34 = vcvt.s32.f32 %v1767_v24  ;;  %v1072_v42 = vunpack.c.0.s8 %v744_v51  ;;  %v1080_v40 = vunpack.c.1.s8 %v744_v51 }
  0xc9   :  { %v3144_v36 = vpack.c.bf16 %v7538_v27, %v7536_v26  ;;  %v2911_v37 = vcvt.s32.f32 %v1887_v28  ;;  %v2919_v38 = vcvt.s32.f32 %v1895_v29  ;;  %v1200_v46 = vunpack.c.0.s8 %v776_v0 }
  0xca   :  { %v3415_v41 = vpack.c.bf16 %v2791_v34, %v2783_v33  ;;  %v1208_v47 = vunpack.c.1.s8 %v776_v0  ;;  %v7552_v45 = vcvt.s32.f32 %v1072_v42  ;;  %v7554_v49 = vcvt.s32.f32 %v1080_v40 }
  0xcb   :  { %v3479_v44 = vpack.c.bf16 %v2919_v38, %v2911_v37  ;;  %v1743_v50 = vunpack.c.0.s8 %v911_v6  ;;  %v7558_v56 = vcvt.s32.f32 %v1200_v46  ;;  %v1751_v57 = vunpack.c.1.s8 %v911_v6 }
  0xcc   :  { %3625 = vmatpush.bf16.msrb.mxu2 %v3415_v41  ;;  %v7560_v51 = vcvt.s32.f32 %v1208_v47  ;;  %v3072_v60 = vpack.c.bf16 %v7554_v49, %v7552_v45  ;;  %v1871_v62 = vunpack.c.0.s8 %v943_v11  ;;  %v1879_v63 = vunpack.c.1.s8 %v943_v11 }
  0xcd   :  { %3639 = vmatpush.bf16.msrb.mxu3 %v3479_v44  ;;  %v2767_v61 = vcvt.s32.f32 %v1743_v50  ;;  %v2775_v3 = vcvt.s32.f32 %v1751_v57  ;;  %v1344_v4 = vunpack.c.2.s8 %v7556_v53  ;;  %v1352_v7 = vunpack.c.3.s8 %v7556_v53 }
  0xce   :  { %v3136_v2 = vpack.c.bf16 %v7560_v51, %v7558_v56  ;;  %v2895_v12 = vcvt.s32.f32 %v1871_v62  ;;  %v2903_v11 = vcvt.s32.f32 %v1879_v63  ;;  %v1472_v33 = vunpack.c.2.s8 %v840_v14  ;;  %v728_v51 = vld [vmem:[#allocation7 + $0x48] sm:$0xff] }
  0xcf   :  { %v3407_v23 = vpack.c.bf16 %v2775_v3, %v2767_v61  ;;  %v7576_v24 = vcvt.s32.f32 %v1344_v4  ;;  %v1480_v34 = vunpack.c.3.s8 %v840_v14  ;;  %v1328_v63 = vunpack.c.0.s8 %v7556_v53 }
  0xd0   :  { %v3471_v29 = vpack.c.bf16 %v2903_v11, %v2895_v12  ;;  %v2496_v40 = vcvt.s32.f32 %v1472_v33  ;;  %v1336_v4 = vunpack.c.1.s8 %v7556_v53  ;;  %v634_v27 = vperm.slane %v7516_v18, 4 }
  0xd1   :  { %v533_v25 = vpop.f32.mrf.mxu1  ;;  %3626 = vmatpush.bf16.msrb.mxu2 %v3407_v23  ;;  %v635_v17 = vperm.slane %v7516_v18, 5 }
  0xd2   :  { %v519_v30 = vpop.f32.mrf.mxu0  ;;  %v647_v31 = vmul.f32 %v631_v22, %v533_v25  ;;  %v7578_v25 = vld [vmem:[#allocation7 + $0x88] sm:$0xff]  ;;  %3640 = vmatpush.bf16.msrb.mxu3 %v3471_v29 }
  0xd3   :  { %v646_v35 = vmul.f32 %v630_v20, %v519_v30  ;;  %v7584_v30 = vcvt.s32.f32 %v1352_v7 }
  0xd4   :  { %v680_v39 = vadd.f32 %v664_v5, %v647_v31 }
  0xd5   :  { %v679_v43 = vadd.f32 %v663_v21, %v646_v35  ;;  %v7592_v35 = vld [vmem:[#allocation7 + $0x188] sm:$0xff] }
  0xd6   :  { %v696_v48 = vmax.f32 %v680_v39, 0.0  ;;  %v1056_v39 = vunpack.c.2.s8 %v7578_v25  ;;  %v1184_v47 = vunpack.c.2.s8 %v7592_v35  ;;  %v1192_v62 = vunpack.c.3.s8 %v7592_v35 }
  0xd7   :  { %v695_v54 = vmax.f32 %v679_v43, 0.0  ;;  %v2504_v43 = vcvt.s32.f32 %v1480_v34  ;;  %v1168_v56 = vunpack.c.0.s8 %v7592_v35 }
  0xd8   :  { %v2080_v46 = vcvt.s32.f32 %v1056_v39  ;;  %v2208_v3 = vcvt.s32.f32 %v1184_v47  ;;  %v2216_v7 = vcvt.s32.f32 %v1192_v62 }
  0xd9   :  { %v561_v0 = vpop.f32.mrf.mxu3  ;;  %v535_v1 = vpop.f32.mrf.mxu1  ;;  %v3272_v61 = vpack.c.bf16 %v2504_v43, %v2496_v40  ;;  %v2192_v34 = vcvt.s32.f32 %v1168_v56  ;;  %v1032_v40 = vunpack.c.3.s8 %v728_v51 }
  0xda   :  { %v547_v8 = vpop.f32.mrf.mxu2  ;;  %v649_v6 = vmul.f32 %v633_v58, %v561_v0  ;;  %v521_v9 = vpop.f32.mrf.mxu0  ;;  %v655_v10 = vmul.f32 %v631_v22, %v535_v1  ;;  %v3128_v12 = vpack.c.bf16 %v2216_v7, %v2208_v3  ;;  %v670_v3 = vperm.slane %v7518_v19, 7 }
  0xdb   :  { %v648_v15 = vmul.f32 %v632_v52, %v547_v8  ;;  %v654_v16 = vmul.f32 %v630_v20, %v521_v9  ;;  %v7616_v8 = vcvt.s32.f32 %v1328_v63  ;;  %v2360_v9 = vcvt.s32.f32 %v1336_v4 }
  0xdc   :  { %v682_v28 = vadd.f32 %v666_v59, %v649_v6  ;;  %v688_v22 = vadd.f32 %v664_v5, %v655_v10  ;;  %v3208_v5 = vpack.c.bf16 %v7584_v30, %v7576_v24  ;;  %v1456_v6 = vunpack.c.0.s8 %v840_v14 }
  0xdd   :  { %v7588_v31 = vadd.f32 %v665_v55, %v648_v15  ;;  %v687_v20 = vadd.f32 %v663_v21, %v654_v16  ;;  %v1064_v21 = vunpack.c.3.s8 %v7578_v25  ;;  %v3200_v11 = vpack.c.bf16 %v2360_v9, %v7616_v8  ;;  %v7628_v16 = vld [vmem:[#allocation7 + $0x288] sm:$0xff] }
  0xde   :  { %v698_v37 = vmax.f32 %v682_v28, 0.0  ;;  %v704_v38 = vmax.f32 %v688_v22, 0.0  ;;  %v2480_v26 = vcvt.s32.f32 %v1456_v6  ;;  %v1048_v22 = vunpack.c.1.s8 %v7578_v25 }
  0xdf   :  { %v697_v41 = vmax.f32 %v7588_v31, 0.0  ;;  %v703_v42 = vmax.f32 %v687_v20, 0.0  ;;  %v1176_v31 = vunpack.c.1.s8 %v7592_v35  ;;  %v1312_v20 = vunpack.c.2.s8 %v7628_v16 }
  0xe0   :  { %v7598_v44 = vpack.c.bf16 %v704_v38, %v696_v48  ;;  %v2088_v48 = vcvt.s32.f32 %v1064_v21  ;;  %v2072_v33 = vcvt.s32.f32 %v1048_v22  ;;  %v1320_v45 = vunpack.c.3.s8 %v7628_v16 }
  0xe1   :  { %v7602_v50 = vpack.c.bf16 %v703_v42, %v695_v54  ;;  %v563_v57 = vpop.f32.mrf.mxu3  ;;  %v1024_v35 = vunpack.c.2.s8 %v728_v51  ;;  %v636_v63 = vperm.slane %v7516_v18, 6  ;;  %v1296_v4 = vunpack.c.0.s8 %v7628_v16 }
  0xe2   :  { %v549_v0 = vpop.f32.mrf.mxu2  ;;  %v657_v1 = vmul.f32 %v633_v58, %v563_v57  ;;  %3557 = vmatmul.bf16.vlgmr.msra.gmra.mxu1 %v7598_v44  ;;  %v3064_v53 = vpack.c.bf16 %v2088_v48, %v2080_v46  ;;  %v1008_v6 = vunpack.c.0.s8 %v728_v51 }
  0xe3   :  { %v656_v54 = vmul.f32 %v632_v52, %v549_v0  ;;  %3543 = vmatmul.bf16.vlgmr.msra.gmra.mxu0 %v7602_v50  ;;  %3661 = vmatpush.bf16.msra.mxu1 %v3144_v36  ;;  %v1464_v52 = vunpack.c.1.s8 %v840_v14  ;;  %v7636_v14 = vld [vmem:[#allocation7 + $0x388] sm:$0xff]  ;;  %v2048_v46 = vcvt.s32.f32 %v1024_v35  ;;  %v637_v0 = vperm.slane %v7516_v18, 7 }
  0xe4   :  { %v690_v58 = vadd.f32 %v666_v59, %v657_v1  ;;  %3647 = vmatpush.bf16.msra.mxu0 %v3080_v32  ;;  %v667_v59 = vperm.slane %v7518_v19, 4  ;;  %v1040_v32 = vunpack.c.0.s8 %v7578_v25  ;;  %v1440_v49 = vunpack.c.2.s8 %v7636_v14 }
  0xe5   :  { %v689_v10 = vadd.f32 %v665_v55, %v656_v54  ;;  %v2488_v15 = vcvt.s32.f32 %v1464_v52  ;;  %v668_v55 = vperm.slane %v7518_v19, 5  ;;  %v2200_v25 = vcvt.s32.f32 %v1176_v31  ;;  %v7677_v31 = vld [vmem:[#allocation7 + $0x108] sm:$0xff] }
  0xe6   :  { %v706_v36 = vmax.f32 %v690_v58, 0.0  ;;  %v2064_v29 = vcvt.s32.f32 %v1040_v32  ;;  %v1448_v38 = vunpack.c.3.s8 %v7636_v14  ;;  %v2464_v42 = vcvt.s32.f32 %v1440_v49  ;;  %v7669_v58 = vld [vmem:[#allocation7 + $0x248] sm:$0xff] }
  0xe7   :  { %v705_v13 = vmax.f32 %v689_v10, 0.0  ;;  %3662 = vmatpush.bf16.msra.mxu1 %v3136_v2  ;;  %v3264_v28 = vpack.c.bf16 %v2488_v15, %v2480_v26  ;;  %v3120_v43 = vpack.c.bf16 %v2200_v25, %v2192_v34  ;;  %v1304_v54 = vunpack.c.1.s8 %v7628_v16 }
  0xe8   :  { %v7638_v23 = vpack.c.bf16 %v706_v36, %v698_v37  ;;  %3648 = vmatpush.bf16.msra.mxu0 %v3072_v60  ;;  %v7652_v60 = vld [vmem:[#allocation7 + $0x148] sm:$0xff]  ;;  %v2336_v37 = vcvt.s32.f32 %v1312_v20  ;;  %v3056_v39 = vpack.c.bf16 %v2072_v33, %v2064_v29  ;;  %v2472_v21 = vcvt.s32.f32 %v1448_v38 }
  0xe9   :  { %v7645_v2 = vpack.c.bf16 %v705_v13, %v697_v41  ;;  %v2344_v41 = vcvt.s32.f32 %v1320_v45  ;;  %v1152_v47 = vunpack.c.2.s8 %v7652_v60  ;;  %v1160_v62 = vunpack.c.3.s8 %v7652_v60 }
  0xea   :  { %3585 = vmatmul.bf16.vlgmr.msra.gmra.mxu3 %v7638_v23  ;;  %v3256_v24 = vpack.c.bf16 %v2472_v21, %v2464_v42  ;;  %v1424_v7 = vunpack.c.0.s8 %v7636_v14  ;;  %v1432_v8 = vunpack.c.1.s8 %v7636_v14  ;;  %v2320_v9 = vcvt.s32.f32 %v1296_v4 }
  0xeb   :  { %3571 = vmatmul.bf16.vlgmr.msra.gmra.mxu2 %v7645_v2  ;;  %3689 = vmatpush.bf16.msra.mxu3 %v3272_v61  ;;  %v3192_v57 = vpack.c.bf16 %v2344_v41, %v2336_v37  ;;  %v2056_v61 = vcvt.s32.f32 %v1032_v40  ;;  %v2176_v30 = vcvt.s32.f32 %v1152_v47  ;;  %v2184_v48 = vcvt.s32.f32 %v1160_v62 }
  0xec   :  { %3675 = vmatpush.bf16.msra.mxu2 %v3208_v5  ;;  %3649 = vmatpush.bf16.msra.mxu0 %v3064_v53  ;;  %v669_v5 = vperm.slane %v7518_v19, 6  ;;  %v1016_v52 = vunpack.c.1.s8 %v728_v51  ;;  %v1136_v10 = vunpack.c.0.s8 %v7652_v60  ;;  %v2328_v26 = vcvt.s32.f32 %v1304_v54 }
  0xed   :  { %3663 = vmatpush.bf16.msra.mxu1 %v3128_v12  ;;  %v3048_v1 = vpack.c.bf16 %v2056_v61, %v2048_v46  ;;  %v3112_v53 = vpack.c.bf16 %v2184_v48, %v2176_v30  ;;  %v824_v12 = vld [vmem:[#allocation7 + $0x348] sm:$0xff]  ;;  %v2448_v36 = vcvt.s32.f32 %v1424_v7  ;;  %v2032_v15 = vcvt.s32.f32 %v1008_v6 }
  0xee   :  { %v2040_v16 = vcvt.s32.f32 %v1016_v52  ;;  %v1144_v13 = vunpack.c.1.s8 %v7652_v60  ;;  %v2160_v32 = vcvt.s32.f32 %v1136_v10  ;;  %v1280_v14 = vunpack.c.2.s8 %v7669_v58 }
  0xef   :  { %3690 = vmatpush.bf16.msra.mxu3 %v3264_v28  ;;  %v7674_v28 = vld [vmem:[#allocation7 + $0x8] sm:$0xff]  ;;  %v3184_v22 = vpack.c.bf16 %v2328_v26, %v2320_v9  ;;  %v1288_v51 = vunpack.c.3.s8 %v7669_v58  ;;  %v1408_v29 = vunpack.c.2.s8 %v824_v12  ;;  %v1416_v45 = vunpack.c.3.s8 %v824_v12 }
  0xf0   :  { %3676 = vmatpush.bf16.msra.mxu2 %v3200_v11  ;;  %3650 = vmatpush.bf16.msra.mxu0 %v3056_v39  ;;  %v2456_v11 = vcvt.s32.f32 %v1432_v8  ;;  %v3040_v20 = vpack.c.bf16 %v2040_v16, %v2032_v15  ;;  %v2168_v33 = vcvt.s32.f32 %v1144_v13  ;;  %v2304_v34 = vcvt.s32.f32 %v1280_v14 }
  0xf1   :  { %3664 = vmatpush.bf16.msra.mxu1 %v3120_v43  ;;  %v2312_v60 = vcvt.s32.f32 %v1288_v51  ;;  %v2432_v25 = vcvt.s32.f32 %v1408_v29  ;;  %v992_v37 = vunpack.c.2.s8 %v7674_v28  ;;  %v1000_v38 = vunpack.c.3.s8 %v7674_v28 }
  0xf2   :  { %v3248_v56 = vpack.c.bf16 %v2456_v11, %v2448_v36  ;;  %v3104_v41 = vpack.c.bf16 %v2168_v33, %v2160_v32  ;;  %v2440_v42 = vcvt.s32.f32 %v1416_v45  ;;  %v1120_v40 = vunpack.c.2.s8 %v7677_v31 }
  0xf3   :  { %3691 = vmatpush.bf16.msra.mxu3 %v3256_v24  ;;  %v3176_v21 = vpack.c.bf16 %v2312_v60, %v2304_v34  ;;  %v2016_v46 = vcvt.s32.f32 %v992_v37  ;;  %v2024_v47 = vcvt.s32.f32 %v1000_v38  ;;  %v1128_v62 = vunpack.c.3.s8 %v7677_v31 }
  0xf4   :  { %3677 = vmatpush.bf16.msra.mxu2 %v3192_v57  ;;  %3651 = vmatpush.bf16.msra.mxu0 %v3048_v1  ;;  %v3240_v61 = vpack.c.bf16 %v2440_v42, %v2432_v25  ;;  %v2144_v24 = vcvt.s32.f32 %v1120_v40  ;;  %v1264_v48 = vunpack.c.0.s8 %v7669_v58  ;;  %v1272_v4 = vunpack.c.1.s8 %v7669_v58  ;;  %v7701_v58 = vld [vmem:[#allocation7 + $0x4c8] sm:$0xff] }
  0xf5   :  { %3665 = vmatpush.bf16.msra.mxu1 %v3112_v53  ;;  %v3032_v1 = vpack.c.bf16 %v2024_v47, %v2016_v46  ;;  %v2152_v7 = vcvt.s32.f32 %v1128_v62  ;;  %v1392_v8 = vunpack.c.0.s8 %v824_v12  ;;  %v1400_v6 = vunpack.c.1.s8 %v824_v12 }
  0xf6   :  { %v2288_v9 = vcvt.s32.f32 %v1264_v48  ;;  %v2296_v52 = vcvt.s32.f32 %v1272_v4  ;;  %v976_v10 = vunpack.c.0.s8 %v7674_v28  ;;  %v984_v15 = vunpack.c.1.s8 %v7674_v28 }
  0xf7   :  { %v575_v49 = vpop.f32.mrf.mxu0  ;;  %3692 = vmatpush.bf16.msra.mxu3 %v3248_v56  ;;  %v3096_v26 = vpack.c.bf16 %v2152_v7, %v2144_v24  ;;  %v2416_v36 = vcvt.s32.f32 %v1392_v8  ;;  %v2424_v11 = vcvt.s32.f32 %v1400_v6  ;;  %v1104_v12 = vunpack.c.0.s8 %v7677_v31 }
  0xf8   :  { %v650_v35 = vmul.f32 %v634_v27, %v575_v49  ;;  %v589_v39 = vpop.f32.mrf.mxu1  ;;  %3678 = vmatpush.bf16.msra.mxu2 %v3184_v22  ;;  %3652 = vmatpush.bf16.msra.mxu0 %v3040_v20  ;;  %v3168_v32 = vpack.c.bf16 %v2296_v52, %v2288_v9  ;;  %v2000_v14 = vcvt.s32.f32 %v976_v10  ;;  %v1112_v22 = vunpack.c.1.s8 %v7677_v31  ;;  %v904_v31 = vld [vmem:[#allocation7 + $0x5c8] sm:$0xff] }
  0xf9   :  { %v651_v43 = vmul.f32 %v635_v17, %v589_v39  ;;  %3666 = vmatpush.bf16.msra.mxu1 %v3104_v41  ;;  %v3232_v20 = vpack.c.bf16 %v2424_v11, %v2416_v36  ;;  %v2008_v28 = vcvt.s32.f32 %v984_v15  ;;  %v2128_v45 = vcvt.s32.f32 %v1104_v12 }
  0xfa   :  { %v7688_v57 = vadd.f32 %v667_v59, %v650_v35  ;;  %v2136_v49 = vcvt.s32.f32 %v1112_v22  ;;  %v1600_v60 = vunpack.c.2.s8 %v7701_v58  ;;  %v7720_v35 = vld [vmem:[#allocation7 + $0x208] sm:$0xff]  ;;  %v1608_v41 = vunpack.c.3.s8 %v7701_v58 }
  0xfb   :  { %v7693_v30 = vadd.f32 %v668_v55, %v651_v43  ;;  %3693 = vmatpush.bf16.msra.mxu3 %v3240_v61  ;;  %v3024_v38 = vpack.c.bf16 %v2008_v28, %v2000_v14  ;;  %v1248_v61 = vunpack.c.2.s8 %v7720_v35  ;;  %v1592_v11 = vunpack.c.1.s8 %v7701_v58  ;;  %v936_v28 = vld [vmem:[#allocation7 + $0x6c8] sm:$0xff] }
  0xfc   :  { %v699_v54 = vmax.f32 %v7688_v57, 0.0  ;;  %3679 = vmatpush.bf16.msra.mxu2 %v3176_v21  ;;  %3653 = vmatpush.bf16.msra.mxu0 %v3032_v1  ;;  %v3088_v39 = vpack.c.bf16 %v2136_v49, %v2128_v45  ;;  %v2624_v42 = vcvt.s32.f32 %v1600_v60  ;;  %v2632_v47 = vcvt.s32.f32 %v1608_v41  ;;  %v896_v41 = vld [vmem:[#allocation7 + $0x588] sm:$0xff] }
  0xfd   :  { %v700_v53 = vmax.f32 %v7693_v30, 0.0  ;;  %3667 = vmatpush.bf16.msra.mxu1 %v3096_v26  ;;  %v1736_v57 = vunpack.c.3.s8 %v904_v31  ;;  %v1256_v1 = vunpack.c.3.s8 %v7720_v35  ;;  %v2272_v6 = vcvt.s32.f32 %v1248_v61 }
  0xfe   :  { %v3336_v7 = vpack.c.bf16 %v2632_v47, %v2624_v42  ;;  %v1712_v15 = vunpack.c.0.s8 %v904_v31  ;;  %v2616_v22 = vcvt.s32.f32 %v1592_v11  ;;  %v928_v11 = vld [vmem:[#allocation7 + $0x688] sm:$0xff] }
  0xff   :  { %v603_v16 = vpop.f32.mrf.mxu2  ;;  %v577_v13 = vpop.f32.mrf.mxu0  ;;  %3694 = vmatpush.bf16.msra.mxu3 %v3232_v20  ;;  %v2760_v8 = vcvt.s32.f32 %v1736_v57  ;;  %v2280_v52 = vcvt.s32.f32 %v1256_v1  ;;  %v1232_v20 = vunpack.c.0.s8 %v7720_v35 }
 0x100   :  { %v652_v56 = vmul.f32 %v636_v63, %v603_v16  ;;  %v658_v51 = vmul.f32 %v634_v27, %v577_v13  ;;  %v591_v29 = vpop.f32.mrf.mxu1  ;;  %3680 = vmatpush.bf16.msra.mxu2 %v3168_v32  ;;  %3654 = vmatpush.bf16.msra.mxu0 %v3024_v38 }
 0x101   :  { %v617_v33 = vpop.f32.mrf.mxu3  ;;  %v659_v34 = vmul.f32 %v635_v17, %v591_v29  ;;  %3668 = vmatpush.bf16.msra.mxu1 %v3088_v39  ;;  %v3160_v13 = vpack.c.bf16 %v2280_v52, %v2272_v6  ;;  %v2256_v60 = vcvt.s32.f32 %v1232_v20  ;;  %v1864_v39 = vunpack.c.3.s8 %v936_v28 }
 0x102   :  { %v7714_v25 = vadd.f32 %v669_v5, %v652_v56  ;;  %v653_v27 = vmul.f32 %v637_v0, %v617_v33  ;;  %v691_v37 = vadd.f32 %v667_v59, %v658_v51  ;;  %v1728_v59 = vunpack.c.2.s8 %v904_v31 }
 0x103   :  { %v692_v17 = vadd.f32 %v668_v55, %v659_v34  ;;  %v816_v55 = vld [vmem:[#allocation7 + $0x308] sm:$0xff]  ;;  %v1720_v56 = vunpack.c.1.s8 %v904_v31  ;;  %v1824_v20 = vunpack.c.2.s8 %v928_v11 }
 0x104   :  { %v701_v40 = vmax.f32 %v7714_v25, 0.0  ;;  %v7728_v43 = vadd.f32 %v670_v3, %v653_v27  ;;  %v707_v21 = vmax.f32 %v691_v37, 0.0  ;;  %v2752_v30 = vcvt.s32.f32 %v1728_v59  ;;  %3681 = vmatpush.bf16.msra.mxu2 %v3160_v13  ;;  %v968_v34 = vld [vmem:[#allocation7 + $0x7c8] sm:$0xff] }
 0x105   :  { %v708_v46 = vmax.f32 %v692_v17, 0.0  ;;  %v1376_v10 = vunpack.c.2.s8 %v816_v55  ;;  %v1384_v26 = vunpack.c.3.s8 %v816_v55  ;;  %v2744_v18 = vcvt.s32.f32 %v1720_v56  ;;  %v864_v37 = vld [vmem:[#allocation7 + $0x488] sm:$0xff] }
 0x106   :  { %v702_v62 = vmax.f32 %v7728_v43, 0.0  ;;  %v7732_v24 = vpack.c.bf16 %v707_v21, %v699_v54  ;;  %v3400_v54 = vpack.c.bf16 %v2760_v8, %v2752_v30  ;;  %v1360_v31 = vunpack.c.0.s8 %v816_v55  ;;  %v960_v56 = vld [vmem:[#allocation7 + $0x788] sm:$0xff] }
 0x107   :  { %v7735_v48 = vpack.c.bf16 %v708_v46, %v700_v53  ;;  %v605_v4 = vpop.f32.mrf.mxu2  ;;  %v1584_v53 = vunpack.c.0.s8 %v7701_v58  ;;  %v2400_v32 = vcvt.s32.f32 %v1376_v10  ;;  %v2408_v14 = vcvt.s32.f32 %v1384_v26 }
 0x108   :  { %v660_v9 = vmul.f32 %v636_v63, %v605_v4  ;;  %3599 = vmatmul.bf16.vlgmr.msrb.gmra.mxu0 %v7732_v24  ;;  %v2736_v58 = vcvt.s32.f32 %v1712_v15  ;;  %v1368_v25 = vunpack.c.1.s8 %v816_v55  ;;  %v1856_v27 = vunpack.c.2.s8 %v936_v28 }
 0x109   :  { %v619_v36 = vpop.f32.mrf.mxu3  ;;  %3613 = vmatmul.bf16.vlgmr.msrb.gmra.mxu1 %v7735_v48  ;;  %3703 = vmatpush.bf16.msrb.mxu0 %v3336_v7  ;;  %v2608_v12 = vcvt.s32.f32 %v1584_v53  ;;  %v2384_v17 = vcvt.s32.f32 %v1360_v31  ;;  %v1992_v21 = vunpack.c.3.s8 %v968_v34  ;;  %v2888_v59 = vcvt.s32.f32 %v1864_v39 }
 0x10a   :  { %v693_v16 = vadd.f32 %v669_v5, %v660_v9  ;;  %v661_v63 = vmul.f32 %v637_v0, %v619_v36  ;;  %3717 = vmatpush.bf16.msrb.mxu1 %v3400_v54  ;;  %v3224_v5 = vpack.c.bf16 %v2408_v14, %v2400_v32  ;;  %v1240_v0 = vunpack.c.1.s8 %v7720_v35 }
 0x10b   :  { %v3328_v33 = vpack.c.bf16 %v2616_v22, %v2608_v12  ;;  %v3392_v19 = vpack.c.bf16 %v2744_v18, %v2736_v58  ;;  %v1984_v35 = vunpack.c.2.s8 %v968_v34  ;;  %v2880_v43 = vcvt.s32.f32 %v1856_v27 }
 0x10c   :  { %v709_v51 = vmax.f32 %v693_v16, 0.0  ;;  %v694_v29 = vadd.f32 %v670_v3, %v661_v63  ;;  %3695 = vmatpush.bf16.msra.mxu3 %v3224_v5  ;;  %v2264_v3 = vcvt.s32.f32 %v1240_v0  ;;  %v1568_v47 = vunpack.c.2.s8 %v864_v37 }
 0x10d   :  { %3704 = vmatpush.bf16.msrb.mxu0 %v3328_v33  ;;  %v3008_v46 = vcvt.s32.f32 %v1984_v35  ;;  %v1576_v57 = vunpack.c.3.s8 %v864_v37  ;;  %v3016_v55 = vcvt.s32.f32 %v1992_v21  ;;  %v1704_v30 = vunpack.c.3.s8 %v896_v41 }
 0x10e   :  { %v7751_v45 = vpack.c.bf16 %v709_v51, %v701_v40  ;;  %v710_v49 = vmax.f32 %v694_v29, 0.0  ;;  %3718 = vmatpush.bf16.msrb.mxu1 %v3392_v19  ;;  %v3152_v42 = vpack.c.bf16 %v2264_v3, %v2256_v60  ;;  %v2392_v40 = vcvt.s32.f32 %v1368_v25 }
 0x10f   :  { %v3464_v1 = vpack.c.bf16 %v2888_v59, %v2880_v43  ;;  %v2592_v4 = vcvt.s32.f32 %v1568_v47  ;;  %v2600_v7 = vcvt.s32.f32 %v1576_v57  ;;  %v1840_v8 = vunpack.c.0.s8 %v936_v28 }
 0x110   :  { %v7753_v38 = vpack.c.bf16 %v710_v49, %v702_v62  ;;  %3627 = vmatmul.bf16.vlgmr.msrb.gmra.mxu2 %v7751_v45  ;;  %v3216_v61 = vpack.c.bf16 %v2392_v40, %v2384_v17  ;;  %v1696_v62 = vunpack.c.2.s8 %v896_v41  ;;  %v3528_v6 = vpack.c.bf16 %v3016_v55, %v3008_v46 }
 0x111   :  { %3682 = vmatpush.bf16.msra.mxu2 %v3152_v42  ;;  %v2728_v52 = vcvt.s32.f32 %v1704_v30  ;;  %v1848_v10 = vunpack.c.1.s8 %v936_v28  ;;  %v3320_v26 = vpack.c.bf16 %v2600_v7, %v2592_v4  ;;  %v2864_v36 = vcvt.s32.f32 %v1840_v8  ;;  %v856_v28 = vld [vmem:[#allocation7 + $0x448] sm:$0xff] }
 0x112   :  { %3641 = vmatmul.bf16.vlgmr.msrb.gmra.mxu3 %v7753_v38  ;;  %v2720_v9 = vcvt.s32.f32 %v1696_v62  ;;  %v1968_v54 = vunpack.c.0.s8 %v968_v34  ;;  %v1976_v53 = vunpack.c.1.s8 %v968_v34  ;;  %v1552_v63 = vunpack.c.0.s8 %v864_v37  ;;  %v888_v34 = vld [vmem:[#allocation7 + $0x548] sm:$0xff] }
 0x113   :  { %3696 = vmatpush.bf16.msra.mxu3 %v3216_v61  ;;  %v2872_v16 = vcvt.s32.f32 %v1848_v10  ;;  %v1560_v13 = vunpack.c.1.s8 %v864_v37  ;;  %3705 = vmatpush.bf16.msrb.mxu0 %v3320_v26  ;;  %v1680_v12 = vunpack.c.0.s8 %v896_v41  ;;  %v1688_v22 = vunpack.c.1.s8 %v896_v41 }
 0x114   :  { %v3384_v15 = vpack.c.bf16 %v2728_v52, %v2720_v9  ;;  %v2992_v32 = vcvt.s32.f32 %v1968_v54  ;;  %v3000_v14 = vcvt.s32.f32 %v1976_v53  ;;  %v2576_v29 = vcvt.s32.f32 %v1552_v63 }
 0x115   :  { %3731 = vmatpush.bf16.msrb.mxu2 %v3464_v1  ;;  %v3456_v51 = vpack.c.bf16 %v2872_v16, %v2864_v36  ;;  %v2584_v58 = vcvt.s32.f32 %v1560_v13  ;;  %v2704_v33 = vcvt.s32.f32 %v1680_v12  ;;  %v2712_v18 = vcvt.s32.f32 %v1688_v22  ;;  %v920_v1 = vld [vmem:[#allocation7 + $0x648] sm:$0xff] }
 0x116   :  { %3719 = vmatpush.bf16.msrb.mxu1 %v3384_v15  ;;  %v3520_v5 = vpack.c.bf16 %v3000_v14, %v2992_v32  ;;  %v1832_v0 = vunpack.c.3.s8 %v928_v11  ;;  %v2848_v60 = vcvt.s32.f32 %v1824_v20  ;;  %v1952_v31 = vunpack.c.2.s8 %v960_v56  ;;  %v952_v36 = vld [vmem:[#allocation7 + $0x748] sm:$0xff] }
 0x117   :  { %3745 = vmatpush.bf16.msrb.mxu3 %v3528_v6  ;;  %v3312_v49 = vpack.c.bf16 %v2584_v58, %v2576_v29  ;;  %v1960_v19 = vunpack.c.3.s8 %v960_v56  ;;  %v3376_v3 = vpack.c.bf16 %v2712_v18, %v2704_v33  ;;  %v1536_v27 = vunpack.c.2.s8 %v856_v28  ;;  %v848_v16 = vld [vmem:[#allocation7 + $0x408] sm:$0xff] }
 0x118   :  { %3655 = vmatmul.bf16.vlgmr.msra.gmra.mxu0 %v7602_v50  ;;  %v2856_v25 = vcvt.s32.f32 %v1832_v0  ;;  %v1544_v37 = vunpack.c.3.s8 %v856_v28  ;;  %v2976_v17 = vcvt.s32.f32 %v1952_v31  ;;  %v1664_v35 = vunpack.c.2.s8 %v888_v34  ;;  %v880_v12 = vld [vmem:[#allocation7 + $0x508] sm:$0xff] }
 0x119   :  { %3669 = vmatmul.bf16.vlgmr.msra.gmra.mxu1 %v7598_v44  ;;  %3732 = vmatpush.bf16.msrb.mxu2 %v3456_v51  ;;  %v2984_v39 = vcvt.s32.f32 %v1960_v19  ;;  %v1672_v41 = vunpack.c.3.s8 %v888_v34  ;;  %v2560_v40 = vcvt.s32.f32 %v1536_v27  ;;  %v1808_v21 = vunpack.c.0.s8 %v928_v11 }
 0x11a   :  { %3706 = vmatpush.bf16.msrb.mxu0 %v3312_v49  ;;  %3720 = vmatpush.bf16.msrb.mxu1 %v3376_v3  ;;  %v3448_v42 = vpack.c.bf16 %v2856_v25, %v2848_v60  ;;  %v2568_v43 = vcvt.s32.f32 %v1544_v37  ;;  %v2688_v46 = vcvt.s32.f32 %v1664_v35  ;;  %v1816_v57 = vunpack.c.1.s8 %v928_v11 }
 0x11b   :  { %3746 = vmatpush.bf16.msrb.mxu3 %v3520_v5  ;;  %v3512_v59 = vpack.c.bf16 %v2984_v39, %v2976_v17  ;;  %v2696_v47 = vcvt.s32.f32 %v1672_v41  ;;  %v2832_v55 = vcvt.s32.f32 %v1808_v21  ;;  %v1936_v62 = vunpack.c.0.s8 %v960_v56 }
 0x11c   :  { %v3304_v61 = vpack.c.bf16 %v2568_v43, %v2560_v40  ;;  %v1944_v30 = vunpack.c.1.s8 %v960_v56  ;;  %v2840_v7 = vcvt.s32.f32 %v1816_v57  ;;  %v1520_v8 = vunpack.c.0.s8 %v856_v28 }
 0x11d   :  { %3733 = vmatpush.bf16.msrb.mxu2 %v3448_v42  ;;  %v3368_v4 = vpack.c.bf16 %v2696_v47, %v2688_v46  ;;  %v1528_v6 = vunpack.c.1.s8 %v856_v28  ;;  %v2960_v9 = vcvt.s32.f32 %v1936_v62  ;;  %v1648_v10 = vunpack.c.0.s8 %v888_v34  ;;  %v745_v42 = vld [vmem:[#allocation7 + $0xd0] sm:$0xff] }
 0x11e   :  { %3707 = vmatpush.bf16.msrb.mxu0 %v3304_v61  ;;  %v2968_v52 = vcvt.s32.f32 %v1944_v30  ;;  %v1656_v26 = vunpack.c.1.s8 %v888_v34  ;;  %v3440_v54 = vpack.c.bf16 %v2840_v7, %v2832_v55  ;;  %v2544_v53 = vcvt.s32.f32 %v1520_v8  ;;  %v777_v55 = vld [vmem:[#allocation7 + $0x1d0] sm:$0xff]  ;;  %v912_v7 = vld [vmem:[#allocation7 + $0x608] sm:$0xff] }
 0x11f   :  { %3747 = vmatpush.bf16.msrb.mxu3 %v3512_v59  ;;  %3721 = vmatpush.bf16.msrb.mxu1 %v3368_v4  ;;  %v2552_v11 = vcvt.s32.f32 %v1528_v6  ;;  %v1792_v15 = vunpack.c.2.s8 %v920_v1  ;;  %v2672_v13 = vcvt.s32.f32 %v1648_v10  ;;  %v1800_v14 = vunpack.c.3.s8 %v920_v1  ;;  %v944_v10 = vld [vmem:[#allocation7 + $0x708] sm:$0xff] }
 0x120   :  { %3683 = vmatmul.bf16.vlgmr.msra.gmra.mxu2 %v7645_v2  ;;  %v3504_v63 = vpack.c.bf16 %v2968_v52, %v2960_v9  ;;  %v2680_v32 = vcvt.s32.f32 %v1656_v26  ;;  %v1920_v51 = vunpack.c.2.s8 %v952_v36  ;;  %v1928_v29 = vunpack.c.3.s8 %v952_v36 }
 0x121   :  { %3734 = vmatpush.bf16.msrb.mxu2 %v3440_v54  ;;  %v3296_v22 = vpack.c.bf16 %v2552_v11, %v2544_v53  ;;  %v2816_v56 = vcvt.s32.f32 %v1792_v15  ;;  %v2824_v20 = vcvt.s32.f32 %v1800_v14  ;;  %v1504_v28 = vunpack.c.2.s8 %v848_v16 }
 0x122   :  { %3697 = vmatmul.bf16.vlgmr.msra.gmra.mxu3 %v7638_v23  ;;  %v3360_v58 = vpack.c.bf16 %v2680_v32, %v2672_v13  ;;  %v1512_v5 = vunpack.c.3.s8 %v848_v16  ;;  %v2944_v33 = vcvt.s32.f32 %v1920_v51  ;;  %v2952_v18 = vcvt.s32.f32 %v1928_v29 }
 0x123   :  { %3748 = vmatpush.bf16.msrb.mxu3 %v3504_v63  ;;  %3708 = vmatpush.bf16.msrb.mxu0 %v3296_v22  ;;  %v1632_v0 = vunpack.c.2.s8 %v880_v12  ;;  %v1640_v34 = vunpack.c.3.s8 %v880_v12  ;;  %v3432_v49 = vpack.c.bf16 %v2824_v20, %v2816_v56  ;;  %v2528_v60 = vcvt.s32.f32 %v1504_v28 }
 0x124   :  { %3722 = vmatpush.bf16.msrb.mxu1 %v3360_v58  ;;  %v2536_v31 = vcvt.s32.f32 %v1512_v5  ;;  %v1776_v19 = vunpack.c.0.s8 %v920_v1  ;;  %v3496_v3 = vpack.c.bf16 %v2952_v18, %v2944_v33  ;;  %v1784_v37 = vunpack.c.1.s8 %v920_v1 }
 0x125   :  { %v2656_v25 = vcvt.s32.f32 %v1632_v0  ;;  %v2664_v27 = vcvt.s32.f32 %v1640_v34  ;;  %3735 = vmatpush.bf16.msrb.mxu2 %v3432_v49  ;;  %v1904_v35 = vunpack.c.0.s8 %v952_v36  ;;  %v1912_v41 = vunpack.c.1.s8 %v952_v36  ;;  %v809_v49 = vld [vmem:[#allocation7 + $0x2d0] sm:$0xff] }
 0x126   :  { %v3288_v17 = vpack.c.bf16 %v2536_v31, %v2528_v60  ;;  %v2800_v39 = vcvt.s32.f32 %v1776_v19  ;;  %v2808_v43 = vcvt.s32.f32 %v1784_v37  ;;  %v1488_v21 = vunpack.c.0.s8 %v848_v16 }
 0x127   :  { %3749 = vmatpush.bf16.msrb.mxu3 %v3496_v3  ;;  %v3352_v40 = vpack.c.bf16 %v2664_v27, %v2656_v25  ;;  %v1496_v59 = vunpack.c.1.s8 %v848_v16  ;;  %v2928_v46 = vcvt.s32.f32 %v1904_v35  ;;  %v2936_v47 = vcvt.s32.f32 %v1912_v41 }
 0x128   :  { %3709 = vmatpush.bf16.msrb.mxu0 %v3288_v17  ;;  %v1616_v57 = vunpack.c.0.s8 %v880_v12  ;;  %v1624_v61 = vunpack.c.1.s8 %v880_v12  ;;  %v3424_v62 = vpack.c.bf16 %v2808_v43, %v2800_v39  ;;  %v2512_v30 = vcvt.s32.f32 %v1488_v21  ;;  %v841_v39 = vld [vmem:[#allocation7 + $0x3d0] sm:$0xff] }
 0x129   :  { %3723 = vmatpush.bf16.msrb.mxu1 %v3352_v40  ;;  %v2520_v1 = vcvt.s32.f32 %v1496_v59  ;;  %v1089_v4 = vunpack.c.2.s8 %v745_v42  ;;  %v3488_v8 = vpack.c.bf16 %v2936_v47, %v2928_v46  ;;  %v1097_v52 = vunpack.c.3.s8 %v745_v42  ;;  %v737_v43 = vld [vmem:[#allocation7 + $0x90] sm:$0xff] }
 0x12a   :  { %v2640_v6 = vcvt.s32.f32 %v1616_v57  ;;  %v2648_v9 = vcvt.s32.f32 %v1624_v61  ;;  %3736 = vmatpush.bf16.msrb.mxu2 %v3424_v62  ;;  %v1217_v54 = vunpack.c.2.s8 %v777_v55  ;;  %v1225_v53 = vunpack.c.3.s8 %v777_v55  ;;  %v769_v57 = vld [vmem:[#allocation7 + $0x190] sm:$0xff] }
 0x12b   :  { %v3280_v26 = vpack.c.bf16 %v2520_v1, %v2512_v30  ;;  %v2113_v36 = vcvt.s32.f32 %v1089_v4  ;;  %3750 = vmatpush.bf16.msrb.mxu3 %v3488_v8  ;;  %v2121_v15 = vcvt.s32.f32 %v1097_v52  ;;  %v1760_v16 = vunpack.c.2.s8 %v912_v7 }
 0x12c   :  { %v3344_v11 = vpack.c.bf16 %v2648_v9, %v2640_v6  ;;  %v1768_v63 = vunpack.c.3.s8 %v912_v7  ;;  %v2241_v13 = vcvt.s32.f32 %v1217_v54  ;;  %v2249_v32 = vcvt.s32.f32 %v1225_v53 }
 0x12d   :  { %3710 = vmatpush.bf16.msrb.mxu0 %v3280_v26  ;;  %v1888_v14 = vunpack.c.2.s8 %v944_v10  ;;  %v1896_v12 = vunpack.c.3.s8 %v944_v10  ;;  %v3081_v22 = vpack.c.bf16 %v2121_v15, %v2113_v36  ;;  %v2784_v56 = vcvt.s32.f32 %v1760_v16 }
 0x12e   :  { %3724 = vmatpush.bf16.msrb.mxu1 %v3344_v11  ;;  %v2792_v51 = vcvt.s32.f32 %v1768_v63  ;;  %v1073_v29 = vunpack.c.0.s8 %v745_v42  ;;  %v3145_v58 = vpack.c.bf16 %v2249_v32, %v2241_v13  ;;  %v1081_v5 = vunpack.c.1.s8 %v745_v42 }
 0x12f   :  { %v2912_v20 = vcvt.s32.f32 %v1888_v14  ;;  %v2920_v28 = vcvt.s32.f32 %v1896_v12  ;;  %v1201_v0 = vunpack.c.0.s8 %v777_v55  ;;  %v1209_v34 = vunpack.c.1.s8 %v777_v55 }
 0x130   :  { %v3416_v33 = vpack.c.bf16 %v2792_v51, %v2784_v56  ;;  %v2097_v18 = vcvt.s32.f32 %v1073_v29  ;;  %3711 = vmatmul.bf16.vlgmr.msrb.gmra.mxu0 %v7732_v24  ;;  %v2105_v31 = vcvt.s32.f32 %v1081_v5  ;;  %v1744_v19 = vunpack.c.0.s8 %v912_v7 }
 0x131   :  { %3759 = vmatpush.bf16.msra.mxu0 %v3081_v22  ;;  %v3480_v60 = vpack.c.bf16 %v2920_v28, %v2912_v20  ;;  %v1752_v3 = vunpack.c.1.s8 %v912_v7  ;;  %3725 = vmatmul.bf16.vlgmr.msrb.gmra.mxu1 %v7735_v48  ;;  %v2225_v25 = vcvt.s32.f32 %v1201_v0  ;;  %v2233_v27 = vcvt.s32.f32 %v1209_v34  ;;  %v801_v22 = vld [vmem:[#allocation7 + $0x290] sm:$0xff] }
 0x132   :  { %3773 = vmatpush.bf16.msra.mxu1 %v3145_v58  ;;  %3737 = vmatpush.bf16.msrb.mxu2 %v3416_v33  ;;  %v1872_v37 = vunpack.c.0.s8 %v944_v10  ;;  %v1880_v17 = vunpack.c.1.s8 %v944_v10  ;;  %v3073_v35 = vpack.c.bf16 %v2105_v31, %v2097_v18  ;;  %v2768_v41 = vcvt.s32.f32 %v1744_v19  ;;  %v833_v18 = vld [vmem:[#allocation7 + $0x390] sm:$0xff] }
 0x133   :  { %3751 = vmatpush.bf16.msrb.mxu3 %v3480_v60  ;;  %v2776_v42 = vcvt.s32.f32 %v1752_v3  ;;  %v1345_v40 = vunpack.c.2.s8 %v809_v49  ;;  %v3137_v21 = vpack.c.bf16 %v2233_v27, %v2225_v25  ;;  %v1353_v47 = vunpack.c.3.s8 %v809_v49  ;;  %v729_v31 = vld [vmem:[#allocation7 + $0x50] sm:$0xff] }
 0x134   :  { %v2896_v59 = vcvt.s32.f32 %v1872_v37  ;;  %v2904_v46 = vcvt.s32.f32 %v1880_v17  ;;  %v1473_v62 = vunpack.c.2.s8 %v841_v39  ;;  %v1481_v30 = vunpack.c.3.s8 %v841_v39  ;;  %v761_v37 = vld [vmem:[#allocation7 + $0x150] sm:$0xff] }
 0x135   :  { %3760 = vmatpush.bf16.msra.mxu0 %v3073_v35  ;;  %v3408_v61 = vpack.c.bf16 %v2776_v42, %v2768_v41  ;;  %v2369_v55 = vcvt.s32.f32 %v1345_v40  ;;  %v2377_v4 = vcvt.s32.f32 %v1353_v47  ;;  %v1057_v7 = vunpack.c.2.s8 %v737_v43 }
 0x136   :  { %3774 = vmatpush.bf16.msra.mxu1 %v3137_v21  ;;  %v3472_v1 = vpack.c.bf16 %v2904_v46, %v2896_v59  ;;  %v1065_v8 = vunpack.c.3.s8 %v737_v43  ;;  %v2497_v6 = vcvt.s32.f32 %v1473_v62  ;;  %v2505_v9 = vcvt.s32.f32 %v1481_v30 }
 0x137   :  { %3738 = vmatpush.bf16.msrb.mxu2 %v3408_v61  ;;  %v1185_v52 = vunpack.c.2.s8 %v769_v57  ;;  %v1193_v10 = vunpack.c.3.s8 %v769_v57  ;;  %v3209_v26 = vpack.c.bf16 %v2377_v4, %v2369_v55  ;;  %v2081_v36 = vcvt.s32.f32 %v1057_v7 }
 0x138   :  { %3752 = vmatpush.bf16.msrb.mxu3 %v3472_v1  ;;  %v2089_v54 = vcvt.s32.f32 %v1065_v8  ;;  %v1329_v53 = vunpack.c.0.s8 %v809_v49  ;;  %v3273_v11 = vpack.c.bf16 %v2505_v9, %v2497_v6  ;;  %v1337_v63 = vunpack.c.1.s8 %v809_v49 }
 0x139   :  { %v2209_v15 = vcvt.s32.f32 %v1185_v52  ;;  %v2217_v16 = vcvt.s32.f32 %v1193_v10  ;;  %v1457_v14 = vunpack.c.0.s8 %v841_v39  ;;  %v1465_v12 = vunpack.c.1.s8 %v841_v39 }
 0x13a   :  { %v3065_v13 = vpack.c.bf16 %v2089_v54, %v2081_v36  ;;  %v2353_v32 = vcvt.s32.f32 %v1329_v53  ;;  %3739 = vmatmul.bf16.vlgmr.msrb.gmra.mxu2 %v7751_v45  ;;  %v2361_v51 = vcvt.s32.f32 %v1337_v63  ;;  %v1041_v29 = vunpack.c.0.s8 %v737_v43 }
 0x13b   :  { %3787 = vmatpush.bf16.msra.mxu2 %v3209_v26  ;;  %v3129_v56 = vpack.c.bf16 %v2217_v16, %v2209_v15  ;;  %v1049_v58 = vunpack.c.1.s8 %v737_v43  ;;  %3753 = vmatmul.bf16.vlgmr.msrb.gmra.mxu3 %v7753_v38  ;;  %v2481_v20 = vcvt.s32.f32 %v1457_v14  ;;  %v2489_v28 = vcvt.s32.f32 %v1465_v12  ;;  %v793_v26 = vld [vmem:[#allocation7 + $0x250] sm:$0xff] }
 0x13c   :  { %3801 = vmatpush.bf16.msra.mxu3 %v3273_v11  ;;  %3761 = vmatpush.bf16.msra.mxu0 %v3065_v13  ;;  %v1169_v5 = vunpack.c.0.s8 %v769_v57  ;;  %v1177_v33 = vunpack.c.1.s8 %v769_v57  ;;  %v3201_v0 = vpack.c.bf16 %v2361_v51, %v2353_v32  ;;  %v2065_v34 = vcvt.s32.f32 %v1041_v29  ;;  %v825_v32 = vld [vmem:[#allocation7 + $0x350] sm:$0xff] }
 0x13d   :  { %3775 = vmatpush.bf16.msra.mxu1 %v3129_v56  ;;  %v2073_v49 = vcvt.s32.f32 %v1049_v58  ;;  %v1313_v60 = vunpack.c.2.s8 %v801_v22  ;;  %v3265_v19 = vpack.c.bf16 %v2489_v28, %v2481_v20  ;;  %v1321_v27 = vunpack.c.3.s8 %v801_v22  ;;  %v721_v51 = vld [vmem:[#allocation7 + $0x10] sm:$0xff] }
 0x13e   :  { %v2193_v3 = vcvt.s32.f32 %v1169_v5  ;;  %v2201_v25 = vcvt.s32.f32 %v1177_v33  ;;  %v1441_v35 = vunpack.c.2.s8 %v833_v18  ;;  %v1449_v41 = vunpack.c.3.s8 %v833_v18  ;;  %v753_v5 = vld [vmem:[#allocation7 + $0x110] sm:$0xff] }
 0x13f   :  { %3788 = vmatpush.bf16.msra.mxu2 %v3201_v0  ;;  %v3057_v17 = vpack.c.bf16 %v2073_v49, %v2065_v34  ;;  %v2337_v39 = vcvt.s32.f32 %v1313_v60  ;;  %v2345_v40 = vcvt.s32.f32 %v1321_v27  ;;  %v1025_v43 = vunpack.c.2.s8 %v729_v31 }
 0x140   :  { %3802 = vmatpush.bf16.msra.mxu3 %v3265_v19  ;;  %v3121_v42 = vpack.c.bf16 %v2201_v25, %v2193_v3  ;;  %v1033_v21 = vunpack.c.3.s8 %v729_v31  ;;  %v2465_v59 = vcvt.s32.f32 %v1441_v35  ;;  %v2473_v46 = vcvt.s32.f32 %v1449_v41 }
 0x141   :  { %3762 = vmatpush.bf16.msra.mxu0 %v3057_v17  ;;  %v1153_v47 = vunpack.c.2.s8 %v761_v37  ;;  %v1161_v57 = vunpack.c.3.s8 %v761_v37  ;;  %v3193_v61 = vpack.c.bf16 %v2345_v40, %v2337_v39  ;;  %v2049_v55 = vcvt.s32.f32 %v1025_v43 }
 0x142   :  { %3776 = vmatpush.bf16.msra.mxu1 %v3121_v42  ;;  %v2057_v62 = vcvt.s32.f32 %v1033_v21  ;;  %v1297_v30 = vunpack.c.0.s8 %v801_v22  ;;  %v3257_v1 = vpack.c.bf16 %v2473_v46, %v2465_v59  ;;  %v1305_v8 = vunpack.c.1.s8 %v801_v22 }
 0x143   :  { %v2177_v4 = vcvt.s32.f32 %v1153_v47  ;;  %v2185_v7 = vcvt.s32.f32 %v1161_v57  ;;  %3789 = vmatpush.bf16.msra.mxu2 %v3193_v61  ;;  %v1425_v52 = vunpack.c.0.s8 %v833_v18  ;;  %v1433_v10 = vunpack.c.1.s8 %v833_v18  ;;  %v873_v61 = vld [vmem:[#allocation7 + $0x4d0] sm:$0xff] }
 0x144   :  { %v3049_v6 = vpack.c.bf16 %v2057_v62, %v2049_v55  ;;  %v2321_v9 = vcvt.s32.f32 %v1297_v30  ;;  %3803 = vmatpush.bf16.msra.mxu3 %v3257_v1  ;;  %v2329_v54 = vcvt.s32.f32 %v1305_v8  ;;  %v1009_v53 = vunpack.c.0.s8 %v729_v31 }
 0x145   :  { %v3113_v36 = vpack.c.bf16 %v2185_v7, %v2177_v4  ;;  %v1017_v11 = vunpack.c.1.s8 %v729_v31  ;;  %v2449_v15 = vcvt.s32.f32 %v1425_v52  ;;  %v2457_v16 = vcvt.s32.f32 %v1433_v10 }
 0x146   :  { %3763 = vmatpush.bf16.msra.mxu0 %v3049_v6  ;;  %v1137_v63 = vunpack.c.0.s8 %v761_v37  ;;  %v1145_v13 = vunpack.c.1.s8 %v761_v37  ;;  %v3185_v14 = vpack.c.bf16 %v2329_v54, %v2321_v9  ;;  %v2033_v12 = vcvt.s32.f32 %v1009_v53  ;;  %v905_v9 = vld [vmem:[#allocation7 + $0x5d0] sm:$0xff] }
 0x147   :  { %3777 = vmatpush.bf16.msra.mxu1 %v3113_v36  ;;  %v2041_v22 = vcvt.s32.f32 %v1017_v11  ;;  %v1281_v56 = vunpack.c.2.s8 %v793_v26  ;;  %v3249_v29 = vpack.c.bf16 %v2457_v16, %v2449_v15  ;;  %v1289_v28 = vunpack.c.3.s8 %v793_v26  ;;  %v785_v54 = vld [vmem:[#allocation7 + $0x210] sm:$0xff] }
 0x148   :  { %v2161_v58 = vcvt.s32.f32 %v1137_v63  ;;  %v2169_v20 = vcvt.s32.f32 %v1145_v13  ;;  %3790 = vmatpush.bf16.msra.mxu2 %v3185_v14  ;;  %v1409_v0 = vunpack.c.2.s8 %v825_v32  ;;  %v1417_v34 = vunpack.c.3.s8 %v825_v32  ;;  %v817_v63 = vld [vmem:[#allocation7 + $0x310] sm:$0xff] }
 0x149   :  { %v3041_v33 = vpack.c.bf16 %v2041_v22, %v2033_v12  ;;  %v2305_v18 = vcvt.s32.f32 %v1281_v56  ;;  %3804 = vmatpush.bf16.msra.mxu3 %v3249_v29  ;;  %v2313_v60 = vcvt.s32.f32 %v1289_v28  ;;  %v993_v31 = vunpack.c.2.s8 %v721_v51 }
 0x14a   :  { %v3105_v49 = vpack.c.bf16 %v2169_v20, %v2161_v58  ;;  %v1001_v19 = vunpack.c.3.s8 %v721_v51  ;;  %v2433_v3 = vcvt.s32.f32 %v1409_v0  ;;  %v2441_v25 = vcvt.s32.f32 %v1417_v34 }
 0x14b   :  { %3764 = vmatpush.bf16.msra.mxu0 %v3041_v33  ;;  %v1121_v27 = vunpack.c.2.s8 %v753_v5  ;;  %v1129_v37 = vunpack.c.3.s8 %v753_v5  ;;  %v3177_v17 = vpack.c.bf16 %v2313_v60, %v2305_v18  ;;  %v2017_v39 = vcvt.s32.f32 %v993_v31 }
 0x14c   :  { %3778 = vmatpush.bf16.msra.mxu1 %v3105_v49  ;;  %v2025_v35 = vcvt.s32.f32 %v1001_v19  ;;  %v1265_v41 = vunpack.c.0.s8 %v793_v26  ;;  %v3241_v42 = vpack.c.bf16 %v2441_v25, %v2433_v3  ;;  %v1273_v21 = vunpack.c.1.s8 %v793_v26 }
 0x14d   :  { %v2145_v40 = vcvt.s32.f32 %v1121_v27  ;;  %v2153_v43 = vcvt.s32.f32 %v1129_v37  ;;  %3791 = vmatpush.bf16.msra.mxu2 %v3177_v17  ;;  %v1393_v47 = vunpack.c.0.s8 %v825_v32  ;;  %v1401_v57 = vunpack.c.1.s8 %v825_v32  ;;  %v937_v17 = vld [vmem:[#allocation7 + $0x6d0] sm:$0xff] }
 0x14e   :  { %v3033_v59 = vpack.c.bf16 %v2025_v35, %v2017_v39  ;;  %v2289_v46 = vcvt.s32.f32 %v1265_v41  ;;  %3805 = vmatpush.bf16.msra.mxu3 %v3241_v42  ;;  %v2297_v62 = vcvt.s32.f32 %v1273_v21  ;;  %v977_v30 = vunpack.c.0.s8 %v721_v51 }
 0x14f   :  { %v3097_v55 = vpack.c.bf16 %v2153_v43, %v2145_v40  ;;  %v985_v1 = vunpack.c.1.s8 %v721_v51  ;;  %v2417_v4 = vcvt.s32.f32 %v1393_v47  ;;  %v2425_v7 = vcvt.s32.f32 %v1401_v57 }
 0x150   :  { %3765 = vmatpush.bf16.msra.mxu0 %v3033_v59  ;;  %v1105_v8 = vunpack.c.0.s8 %v753_v5  ;;  %v1113_v6 = vunpack.c.1.s8 %v753_v5  ;;  %v3169_v52 = vpack.c.bf16 %v2297_v62, %v2289_v46  ;;  %v2001_v10 = vcvt.s32.f32 %v977_v30  ;;  %v969_v46 = vld [vmem:[#allocation7 + $0x7d0] sm:$0xff] }
 0x151   :  { %3779 = vmatpush.bf16.msra.mxu1 %v3097_v55  ;;  %v2009_v26 = vcvt.s32.f32 %v985_v1  ;;  %v1601_v36 = vunpack.c.2.s8 %v873_v61  ;;  %v3233_v53 = vpack.c.bf16 %v2425_v7, %v2417_v4  ;;  %v1609_v16 = vunpack.c.3.s8 %v873_v61  ;;  %v865_v62 = vld [vmem:[#allocation7 + $0x490] sm:$0xff] }
 0x152   :  { %v2129_v11 = vcvt.s32.f32 %v1105_v8  ;;  %v2137_v15 = vcvt.s32.f32 %v1113_v6  ;;  %3792 = vmatpush.bf16.msra.mxu2 %v3169_v52  ;;  %v1729_v14 = vunpack.c.2.s8 %v905_v9  ;;  %v1737_v12 = vunpack.c.3.s8 %v905_v9  ;;  %v897_v8 = vld [vmem:[#allocation7 + $0x590] sm:$0xff] }
 0x153   :  { %v3025_v13 = vpack.c.bf16 %v2009_v26, %v2001_v10  ;;  %v2625_v32 = vcvt.s32.f32 %v1601_v36  ;;  %3806 = vmatpush.bf16.msra.mxu3 %v3233_v53  ;;  %v2633_v56 = vcvt.s32.f32 %v1609_v16  ;;  %v1249_v51 = vunpack.c.2.s8 %v785_v54 }
 0x154   :  { %v3089_v22 = vpack.c.bf16 %v2137_v15, %v2129_v11  ;;  %v1257_v29 = vunpack.c.3.s8 %v785_v54  ;;  %v2753_v58 = vcvt.s32.f32 %v1729_v14  ;;  %v2761_v20 = vcvt.s32.f32 %v1737_v12 }
 0x155   :  { %3766 = vmatpush.bf16.msra.mxu0 %v3025_v13  ;;  %v1377_v28 = vunpack.c.2.s8 %v817_v63  ;;  %v1385_v5 = vunpack.c.3.s8 %v817_v63  ;;  %v3337_v33 = vpack.c.bf16 %v2633_v56, %v2625_v32  ;;  %v2273_v18 = vcvt.s32.f32 %v1249_v51 }
 0x156   :  { %3780 = vmatpush.bf16.msra.mxu1 %v3089_v22  ;;  %v2281_v0 = vcvt.s32.f32 %v1257_v29  ;;  %v1585_v34 = vunpack.c.0.s8 %v873_v61  ;;  %v3401_v49 = vpack.c.bf16 %v2761_v20, %v2753_v58  ;;  %v1593_v19 = vunpack.c.1.s8 %v873_v61 }
 0x157   :  { %v2401_v60 = vcvt.s32.f32 %v1377_v28  ;;  %v2409_v31 = vcvt.s32.f32 %v1385_v5  ;;  %v1713_v27 = vunpack.c.0.s8 %v905_v9  ;;  %v1721_v37 = vunpack.c.1.s8 %v905_v9 }
 0x158   :  { %v3161_v3 = vpack.c.bf16 %v2281_v0, %v2273_v18  ;;  %v2609_v25 = vcvt.s32.f32 %v1585_v34  ;;  %3767 = vmatmul.bf16.vlgmr.msra.gmra.mxu0 %v7602_v50  ;;  %v2617_v35 = vcvt.s32.f32 %v1593_v19  ;;  %v1233_v41 = vunpack.c.0.s8 %v785_v54 }
 0x159   :  { %3815 = vmatpush.bf16.msrb.mxu0 %v3337_v33  ;;  %v3225_v39 = vpack.c.bf16 %v2409_v31, %v2401_v60  ;;  %v1241_v42 = vunpack.c.1.s8 %v785_v54  ;;  %3781 = vmatmul.bf16.vlgmr.msra.gmra.mxu1 %v7598_v44  ;;  %v2737_v40 = vcvt.s32.f32 %v1713_v27  ;;  %v2745_v43 = vcvt.s32.f32 %v1721_v37  ;;  %v929_v33 = vld [vmem:[#allocation7 + $0x690] sm:$0xff] }
 0x15a   :  { %3829 = vmatpush.bf16.msrb.mxu1 %v3401_v49  ;;  %3793 = vmatpush.bf16.msra.mxu2 %v3161_v3  ;;  %v1361_v21 = vunpack.c.0.s8 %v817_v63  ;;  %v1369_v59 = vunpack.c.1.s8 %v817_v63  ;;  %v3329_v47 = vpack.c.bf16 %v2617_v35, %v2609_v25  ;;  %v2257_v57 = vcvt.s32.f32 %v1233_v41  ;;  %v961_v25 = vld [vmem:[#allocation7 + $0x790] sm:$0xff] }
 0x15b   :  { %3807 = vmatpush.bf16.msra.mxu3 %v3225_v39  ;;  %v2265_v61 = vcvt.s32.f32 %v1241_v42  ;;  %v1857_v55 = vunpack.c.2.s8 %v937_v17  ;;  %v3393_v30 = vpack.c.bf16 %v2745_v43, %v2737_v40  ;;  %v1865_v7 = vunpack.c.3.s8 %v937_v17  ;;  %v857_v35 = vld [vmem:[#allocation7 + $0x450] sm:$0xff] }
 0x15c   :  { %v2385_v1 = vcvt.s32.f32 %v1361_v21  ;;  %v2393_v4 = vcvt.s32.f32 %v1369_v59  ;;  %v1985_v52 = vunpack.c.2.s8 %v969_v46  ;;  %v1993_v10 = vunpack.c.3.s8 %v969_v46  ;;  %v889_v21 = vld [vmem:[#allocation7 + $0x550] sm:$0xff] }
 0x15d   :  { %3816 = vmatpush.bf16.msrb.mxu0 %v3329_v47  ;;  %v3153_v6 = vpack.c.bf16 %v2265_v61, %v2257_v57  ;;  %v2881_v9 = vcvt.s32.f32 %v1857_v55  ;;  %v2889_v36 = vcvt.s32.f32 %v1865_v7  ;;  %v1569_v54 = vunpack.c.2.s8 %v865_v62 }
 0x15e   :  { %3830 = vmatpush.bf16.msrb.mxu1 %v3393_v30  ;;  %v3217_v26 = vpack.c.bf16 %v2393_v4, %v2385_v1  ;;  %v1577_v53 = vunpack.c.3.s8 %v865_v62  ;;  %v3009_v11 = vcvt.s32.f32 %v1985_v52  ;;  %v3017_v15 = vcvt.s32.f32 %v1993_v10 }
 0x15f   :  { %3794 = vmatpush.bf16.msra.mxu2 %v3153_v6  ;;  %v1697_v16 = vunpack.c.2.s8 %v897_v8  ;;  %v1705_v63 = vunpack.c.3.s8 %v897_v8  ;;  %v3465_v13 = vpack.c.bf16 %v2889_v36, %v2881_v9  ;;  %v2593_v32 = vcvt.s32.f32 %v1569_v54 }
 0x160   :  { %3808 = vmatpush.bf16.msra.mxu3 %v3217_v26  ;;  %v2601_v14 = vcvt.s32.f32 %v1577_v53  ;;  %v1841_v12 = vunpack.c.0.s8 %v937_v17  ;;  %v3529_v22 = vpack.c.bf16 %v3017_v15, %v3009_v11  ;;  %v1849_v29 = vunpack.c.1.s8 %v937_v17 }
 0x161   :  { %v2721_v56 = vcvt.s32.f32 %v1697_v16  ;;  %v2729_v51 = vcvt.s32.f32 %v1705_v63  ;;  %v1969_v28 = vunpack.c.0.s8 %v969_v46  ;;  %v1977_v5 = vunpack.c.1.s8 %v969_v46 }
 0x162   :  { %v3321_v58 = vpack.c.bf16 %v2601_v14, %v2593_v32  ;;  %v2865_v20 = vcvt.s32.f32 %v1841_v12  ;;  %3795 = vmatmul.bf16.vlgmr.msra.gmra.mxu2 %v7645_v2  ;;  %v2873_v0 = vcvt.s32.f32 %v1849_v29  ;;  %v1553_v34 = vunpack.c.0.s8 %v865_v62 }
 0x163   :  { %3843 = vmatpush.bf16.msrb.mxu2 %v3465_v13  ;;  %v3385_v18 = vpack.c.bf16 %v2729_v51, %v2721_v56  ;;  %v1561_v49 = vunpack.c.1.s8 %v865_v62  ;;  %3809 = vmatmul.bf16.vlgmr.msra.gmra.mxu3 %v7638_v23  ;;  %v2993_v60 = vcvt.s32.f32 %v1969_v28  ;;  %v3001_v31 = vcvt.s32.f32 %v1977_v5  ;;  %v921_v13 = vld [vmem:[#allocation7 + $0x650] sm:$0xff] }
 0x164   :  { %3857 = vmatpush.bf16.msrb.mxu3 %v3529_v22  ;;  %3817 = vmatpush.bf16.msrb.mxu0 %v3321_v58  ;;  %v1681_v19 = vunpack.c.0.s8 %v897_v8  ;;  %v1689_v3 = vunpack.c.1.s8 %v897_v8  ;;  %v3457_v27 = vpack.c.bf16 %v2873_v0, %v2865_v20  ;;  %v2577_v37 = vcvt.s32.f32 %v1553_v34  ;;  %v953_v20 = vld [vmem:[#allocation7 + $0x750] sm:$0xff] }
 0x165   :  { %3831 = vmatpush.bf16.msrb.mxu1 %v3385_v18  ;;  %v2585_v17 = vcvt.s32.f32 %v1561_v49  ;;  %v1825_v39 = vunpack.c.2.s8 %v929_v33  ;;  %v3521_v41 = vpack.c.bf16 %v3001_v31, %v2993_v60  ;;  %v1833_v43 = vunpack.c.3.s8 %v929_v33  ;;  %v849_v0 = vld [vmem:[#allocation7 + $0x410] sm:$0xff] }
 0x166   :  { %v2705_v42 = vcvt.s32.f32 %v1681_v19  ;;  %v2713_v40 = vcvt.s32.f32 %v1689_v3  ;;  %v1953_v47 = vunpack.c.2.s8 %v961_v25  ;;  %v1961_v57 = vunpack.c.3.s8 %v961_v25  ;;  %v881_v19 = vld [vmem:[#allocation7 + $0x510] sm:$0xff] }
 0x167   :  { %3844 = vmatpush.bf16.msrb.mxu2 %v3457_v27  ;;  %v3313_v59 = vpack.c.bf16 %v2585_v17, %v2577_v37  ;;  %v2849_v46 = vcvt.s32.f32 %v1825_v39  ;;  %v2857_v55 = vcvt.s32.f32 %v1833_v43  ;;  %v1537_v62 = vunpack.c.2.s8 %v857_v35 }
 0x168   :  { %3858 = vmatpush.bf16.msrb.mxu3 %v3521_v41  ;;  %v3377_v61 = vpack.c.bf16 %v2713_v40, %v2705_v42  ;;  %v1545_v30 = vunpack.c.3.s8 %v857_v35  ;;  %v2977_v1 = vcvt.s32.f32 %v1953_v47  ;;  %v2985_v4 = vcvt.s32.f32 %v1961_v57 }
 0x169   :  { %3818 = vmatpush.bf16.msrb.mxu0 %v3313_v59  ;;  %v1665_v7 = vunpack.c.2.s8 %v889_v21  ;;  %v1673_v8 = vunpack.c.3.s8 %v889_v21  ;;  %v3449_v6 = vpack.c.bf16 %v2857_v55, %v2849_v46  ;;  %v2561_v9 = vcvt.s32.f32 %v1537_v62 }
 0x16a   :  { %3832 = vmatpush.bf16.msrb.mxu1 %v3377_v61  ;;  %v2569_v52 = vcvt.s32.f32 %v1545_v30  ;;  %v1809_v10 = vunpack.c.0.s8 %v929_v33  ;;  %v3513_v26 = vpack.c.bf16 %v2985_v4, %v2977_v1  ;;  %v1817_v53 = vunpack.c.1.s8 %v929_v33 }
 0x16b   :  { %v2689_v36 = vcvt.s32.f32 %v1665_v7  ;;  %v2697_v54 = vcvt.s32.f32 %v1673_v8  ;;  %3845 = vmatpush.bf16.msrb.mxu2 %v3449_v6  ;;  %v1937_v16 = vunpack.c.0.s8 %v961_v25  ;;  %v1945_v63 = vunpack.c.1.s8 %v961_v25  ;;  %v746_v6 = vld [vmem:[#allocation7 + $0xd8] sm:$0xff] }
 0x16c   :  { %v3305_v11 = vpack.c.bf16 %v2569_v52, %v2561_v9  ;;  %v2833_v15 = vcvt.s32.f32 %v1809_v10  ;;  %3859 = vmatpush.bf16.msrb.mxu3 %v3513_v26  ;;  %v2841_v14 = vcvt.s32.f32 %v1817_v53  ;;  %v1521_v12 = vunpack.c.0.s8 %v857_v35 }
 0x16d   :  { %v3369_v32 = vpack.c.bf16 %v2697_v54, %v2689_v36  ;;  %v1529_v22 = vunpack.c.1.s8 %v857_v35  ;;  %v2961_v56 = vcvt.s32.f32 %v1937_v16  ;;  %v2969_v51 = vcvt.s32.f32 %v1945_v63 }
 0x16e   :  { %3819 = vmatpush.bf16.msrb.mxu0 %v3305_v11  ;;  %v1649_v29 = vunpack.c.0.s8 %v889_v21  ;;  %v1657_v58 = vunpack.c.1.s8 %v889_v21  ;;  %v3441_v28 = vpack.c.bf16 %v2841_v14, %v2833_v15  ;;  %v2545_v5 = vcvt.s32.f32 %v1521_v12  ;;  %v778_v15 = vld [vmem:[#allocation7 + $0x1d8] sm:$0xff]  ;;  %v913_v14 = vld [vmem:[#allocation7 + $0x610] sm:$0xff] }
 0x16f   :  { %3833 = vmatpush.bf16.msrb.mxu1 %v3369_v32  ;;  %v2553_v33 = vcvt.s32.f32 %v1529_v22  ;;  %v1793_v18 = vunpack.c.2.s8 %v921_v13  ;;  %v3505_v34 = vpack.c.bf16 %v2969_v51, %v2961_v56  ;;  %v1801_v31 = vunpack.c.3.s8 %v921_v13 }
 0x170   :  { %v2673_v49 = vcvt.s32.f32 %v1649_v29  ;;  %v2681_v60 = vcvt.s32.f32 %v1657_v58  ;;  %3846 = vmatpush.bf16.msrb.mxu2 %v3441_v28  ;;  %v1921_v27 = vunpack.c.2.s8 %v953_v20  ;;  %v1929_v37 = vunpack.c.3.s8 %v953_v20  ;;  %v945_v29 = vld [vmem:[#allocation7 + $0x710] sm:$0xff] }
 0x171   :  { %v3297_v3 = vpack.c.bf16 %v2553_v33, %v2545_v5  ;;  %v2817_v25 = vcvt.s32.f32 %v1793_v18  ;;  %3860 = vmatpush.bf16.msrb.mxu3 %v3505_v34  ;;  %v2825_v39 = vcvt.s32.f32 %v1801_v31  ;;  %v1505_v35 = vunpack.c.2.s8 %v849_v0 }
 0x172   :  { %v3361_v17 = vpack.c.bf16 %v2681_v60, %v2673_v49  ;;  %v1513_v41 = vunpack.c.3.s8 %v849_v0  ;;  %v2945_v42 = vcvt.s32.f32 %v1921_v27  ;;  %v2953_v40 = vcvt.s32.f32 %v1929_v37 }
 0x173   :  { %3820 = vmatpush.bf16.msrb.mxu0 %v3297_v3  ;;  %v1633_v43 = vunpack.c.2.s8 %v881_v19  ;;  %v1641_v21 = vunpack.c.3.s8 %v881_v19  ;;  %v3433_v59 = vpack.c.bf16 %v2825_v39, %v2817_v25  ;;  %v2529_v46 = vcvt.s32.f32 %v1505_v35 }
 0x174   :  { %3834 = vmatpush.bf16.msrb.mxu1 %v3361_v17  ;;  %v2537_v47 = vcvt.s32.f32 %v1513_v41  ;;  %v1777_v57 = vunpack.c.0.s8 %v921_v13  ;;  %v3497_v61 = vpack.c.bf16 %v2953_v40, %v2945_v42  ;;  %v1785_v30 = vunpack.c.1.s8 %v921_v13 }
 0x175   :  { %v2657_v55 = vcvt.s32.f32 %v1633_v43  ;;  %v2665_v62 = vcvt.s32.f32 %v1641_v21  ;;  %3847 = vmatpush.bf16.msrb.mxu2 %v3433_v59  ;;  %v1905_v7 = vunpack.c.0.s8 %v953_v20  ;;  %v1913_v8 = vunpack.c.1.s8 %v953_v20  ;;  %v7769_v59 = vld [vmem:[#allocation7 + $0x2d8] sm:$0xff] }
 0x176   :  { %v3289_v1 = vpack.c.bf16 %v2537_v47, %v2529_v46  ;;  %v2801_v4 = vcvt.s32.f32 %v1777_v57  ;;  %3861 = vmatpush.bf16.msrb.mxu3 %v3497_v61  ;;  %v2809_v52 = vcvt.s32.f32 %v1785_v30  ;;  %v1489_v10 = vunpack.c.0.s8 %v849_v0 }
 0x177   :  { %v3353_v9 = vpack.c.bf16 %v2665_v62, %v2657_v55  ;;  %v1497_v26 = vunpack.c.1.s8 %v849_v0  ;;  %v2929_v36 = vcvt.s32.f32 %v1905_v7  ;;  %v2937_v54 = vcvt.s32.f32 %v1913_v8 }
 0x178   :  { %3821 = vmatpush.bf16.msrb.mxu0 %v3289_v1  ;;  %v1617_v53 = vunpack.c.0.s8 %v881_v19  ;;  %v1625_v11 = vunpack.c.1.s8 %v881_v19  ;;  %v3425_v16 = vpack.c.bf16 %v2809_v52, %v2801_v4  ;;  %v2513_v63 = vcvt.s32.f32 %v1489_v10  ;;  %v842_v4 = vld [vmem:[#allocation7 + $0x3d8] sm:$0xff] }
 0x179   :  { %3835 = vmatpush.bf16.msrb.mxu1 %v3353_v9  ;;  %v2521_v13 = vcvt.s32.f32 %v1497_v26  ;;  %v1090_v32 = vunpack.c.2.s8 %v746_v6  ;;  %v3489_v12 = vpack.c.bf16 %v2937_v54, %v2929_v36  ;;  %v1098_v51 = vunpack.c.3.s8 %v746_v6  ;;  %v738_v52 = vld [vmem:[#allocation7 + $0x98] sm:$0xff] }
 0x17a   :  { %v2641_v22 = vcvt.s32.f32 %v1617_v53  ;;  %v2649_v56 = vcvt.s32.f32 %v1625_v11  ;;  %3848 = vmatpush.bf16.msrb.mxu2 %v3425_v16  ;;  %v1218_v28 = vunpack.c.2.s8 %v778_v15  ;;  %v1226_v5 = vunpack.c.3.s8 %v778_v15  ;;  %v770_v53 = vld [vmem:[#allocation7 + $0x198] sm:$0xff] }
 0x17b   :  { %v3281_v58 = vpack.c.bf16 %v2521_v13, %v2513_v63  ;;  %v2114_v20 = vcvt.s32.f32 %v1090_v32  ;;  %3862 = vmatpush.bf16.msrb.mxu3 %v3489_v12  ;;  %v2122_v18 = vcvt.s32.f32 %v1098_v51  ;;  %v1761_v0 = vunpack.c.2.s8 %v913_v14  ;;  %v3544_v13 = vpop.f32.mrf.mxu0  ;;  %v3558_v32 = vpop.f32.mrf.mxu1 }
 0x17c   :  { %v3345_v33 = vpack.c.bf16 %v2649_v56, %v2641_v22  ;;  %v1769_v34 = vunpack.c.3.s8 %v913_v14  ;;  %v2242_v49 = vcvt.s32.f32 %v1218_v28  ;;  %v2250_v60 = vcvt.s32.f32 %v1226_v5 }
 0x17d   :  { %3822 = vmatpush.bf16.msrb.mxu0 %v3281_v58  ;;  %v1889_v31 = vunpack.c.2.s8 %v945_v29  ;;  %v1897_v19 = vunpack.c.3.s8 %v945_v29  ;;  %v3082_v3 = vpack.c.bf16 %v2122_v18, %v2114_v20  ;;  %v2785_v25 = vcvt.s32.f32 %v1761_v0 }
 0x17e   :  { %3836 = vmatpush.bf16.msrb.mxu1 %v3345_v33  ;;  %v2793_v27 = vcvt.s32.f32 %v1769_v34  ;;  %v1074_v37 = vunpack.c.0.s8 %v746_v6  ;;  %v3146_v17 = vpack.c.bf16 %v2250_v60, %v2242_v49  ;;  %v1082_v41 = vunpack.c.1.s8 %v746_v6 }
 0x17f   :  { %v2913_v39 = vcvt.s32.f32 %v1889_v31  ;;  %v2921_v35 = vcvt.s32.f32 %v1897_v19  ;;  %v1202_v43 = vunpack.c.0.s8 %v778_v15  ;;  %v1210_v21 = vunpack.c.1.s8 %v778_v15 }
 0x180   :  { %v3417_v42 = vpack.c.bf16 %v2793_v27, %v2785_v25  ;;  %v2098_v40 = vcvt.s32.f32 %v1074_v37  ;;  %3823 = vmatmul.bf16.vlgmr.msrb.gmra.mxu0 %v7732_v24  ;;  %v2106_v47 = vcvt.s32.f32 %v1082_v41  ;;  %v1745_v57 = vunpack.c.0.s8 %v913_v14  ;;  %v7779_v27 = vld [vmem:[#allocation7 + $0x298] sm:$0xff] }
 0x181   :  { %3871 = vmatpush.bf16.msra.mxu0 %v3082_v3  ;;  %v3481_v46 = vpack.c.bf16 %v2921_v35, %v2913_v39  ;;  %v1753_v61 = vunpack.c.1.s8 %v913_v14  ;;  %3837 = vmatmul.bf16.vlgmr.msrb.gmra.mxu1 %v7735_v48  ;;  %v2226_v55 = vcvt.s32.f32 %v1202_v43  ;;  %v2234_v62 = vcvt.s32.f32 %v1210_v21  ;;  %v834_v21 = vld [vmem:[#allocation7 + $0x398] sm:$0xff] }
 0x182   :  { %3885 = vmatpush.bf16.msra.mxu1 %v3146_v17  ;;  %3849 = vmatpush.bf16.msrb.mxu2 %v3417_v42  ;;  %v1873_v30 = vunpack.c.0.s8 %v945_v29  ;;  %v1881_v1 = vunpack.c.1.s8 %v945_v29  ;;  %v3074_v7 = vpack.c.bf16 %v2106_v47, %v2098_v40  ;;  %v2769_v8 = vcvt.s32.f32 %v1745_v57 }
 0x183   :  { %3863 = vmatpush.bf16.msrb.mxu3 %v3481_v46  ;;  %v2777_v6 = vcvt.s32.f32 %v1753_v61  ;;  %v1346_v9 = vunpack.c.2.s8 %v7769_v59  ;;  %v3138_v10 = vpack.c.bf16 %v2234_v62, %v2226_v55  ;;  %v1354_v54 = vunpack.c.3.s8 %v7769_v59  ;;  %v730_v61 = vld [vmem:[#allocation7 + $0x58] sm:$0xff] }
 0x184   :  { %v2897_v26 = vcvt.s32.f32 %v1873_v30  ;;  %v2905_v36 = vcvt.s32.f32 %v1881_v1  ;;  %v1474_v16 = vunpack.c.2.s8 %v842_v4  ;;  %v1482_v63 = vunpack.c.3.s8 %v842_v4 }
 0x185   :  { %3872 = vmatpush.bf16.msra.mxu0 %v3074_v7  ;;  %v3409_v11 = vpack.c.bf16 %v2777_v6, %v2769_v8  ;;  %v2370_v15 = vcvt.s32.f32 %v1346_v9  ;;  %v2378_v12 = vcvt.s32.f32 %v1354_v54  ;;  %v1058_v22 = vunpack.c.2.s8 %v738_v52  ;;  %v3546_v54 = vpop.f32.mrf.mxu0 }
 0x186   :  { %3886 = vmatpush.bf16.msra.mxu1 %v3138_v10  ;;  %v3473_v14 = vpack.c.bf16 %v2905_v36, %v2897_v26  ;;  %v1066_v56 = vunpack.c.3.s8 %v738_v52  ;;  %v2498_v51 = vcvt.s32.f32 %v1474_v16  ;;  %v2506_v29 = vcvt.s32.f32 %v1482_v63 }
 0x187   :  { %3850 = vmatpush.bf16.msrb.mxu2 %v3409_v11  ;;  %v1186_v58 = vunpack.c.2.s8 %v770_v53  ;;  %v1194_v20 = vunpack.c.3.s8 %v770_v53  ;;  %v3210_v28 = vpack.c.bf16 %v2378_v12, %v2370_v15  ;;  %v2082_v5 = vcvt.s32.f32 %v1058_v22 }
 0x188   :  { %3864 = vmatpush.bf16.msrb.mxu3 %v3473_v14  ;;  %v2090_v33 = vcvt.s32.f32 %v1066_v56  ;;  %v7775_v18 = vadd.f32 %v3558_v32, %v3544_v13  ;;  %v3274_v0 = vpack.c.bf16 %v2506_v29, %v2498_v51  ;;  %v1330_v60 = vunpack.c.0.s8 %v7769_v59 }
 0x189   :  { %v2210_v34 = vcvt.s32.f32 %v1186_v58  ;;  %v2218_v49 = vcvt.s32.f32 %v1194_v20  ;;  %v1338_v19 = vunpack.c.1.s8 %v7769_v59  ;;  %v1458_v3 = vunpack.c.0.s8 %v842_v4 }
 0x18a   :  { %v3066_v31 = vpack.c.bf16 %v2090_v33, %v2082_v5  ;;  %v1466_v25 = vunpack.c.1.s8 %v842_v4  ;;  %3851 = vmatmul.bf16.vlgmr.msrb.gmra.mxu2 %v7751_v45  ;;  %v2354_v17 = vcvt.s32.f32 %v1330_v60  ;;  %v1042_v39 = vunpack.c.0.s8 %v738_v52  ;;  %v762_v4 = vld [vmem:[#allocation7 + $0x158] sm:$0xff]  ;;  %v3572_v33 = vpop.f32.mrf.mxu2 }
 0x18b   :  { %3899 = vmatpush.bf16.msra.mxu2 %v3210_v28  ;;  %v3130_v37 = vpack.c.bf16 %v2218_v49, %v2210_v34  ;;  %v1050_v35 = vunpack.c.1.s8 %v738_v52  ;;  %3865 = vmatmul.bf16.vlgmr.msrb.gmra.mxu3 %v7753_v38  ;;  %v2362_v41 = vcvt.s32.f32 %v1338_v19  ;;  %v2482_v42 = vcvt.s32.f32 %v1458_v3 }
 0x18c   :  { %3913 = vmatpush.bf16.msra.mxu3 %v3274_v0  ;;  %3873 = vmatpush.bf16.msra.mxu0 %v3066_v31  ;;  %v2490_v40 = vcvt.s32.f32 %v1466_v25  ;;  %v1170_v43 = vunpack.c.0.s8 %v770_v53  ;;  %v2066_v59 = vcvt.s32.f32 %v1042_v39  ;;  %v1178_v47 = vunpack.c.1.s8 %v770_v53  ;;  %v3560_v53 = vpop.f32.mrf.mxu1  ;;  %v794_v31 = vld [vmem:[#allocation7 + $0x258] sm:$0xff] }
 0x18d   :  { %3887 = vmatpush.bf16.msra.mxu1 %v3130_v37  ;;  %v2074_v46 = vcvt.s32.f32 %v1050_v35  ;;  %v1314_v57 = vunpack.c.2.s8 %v7779_v27  ;;  %v3202_v55 = vpack.c.bf16 %v2362_v41, %v2354_v17  ;;  %v1322_v1 = vunpack.c.3.s8 %v7779_v27 }
 0x18e   :  { %v3266_v62 = vpack.c.bf16 %v2490_v40, %v2482_v42  ;;  %v2194_v30 = vcvt.s32.f32 %v1170_v43  ;;  %v2202_v8 = vcvt.s32.f32 %v1178_v47  ;;  %v1442_v9 = vunpack.c.2.s8 %v834_v21 }
 0x18f   :  { %v3058_v7 = vpack.c.bf16 %v2074_v46, %v2066_v59  ;;  %v2338_v6 = vcvt.s32.f32 %v1314_v57  ;;  %3900 = vmatpush.bf16.msra.mxu2 %v3202_v55  ;;  %v2346_v52 = vcvt.s32.f32 %v1322_v1  ;;  %v1450_v10 = vunpack.c.3.s8 %v834_v21  ;;  %v3586_v59 = vpop.f32.mrf.mxu3  ;;  %v722_v46 = vld [vmem:[#allocation7 + $0x18] sm:$0xff] }
 0x190   :  { %3914 = vmatpush.bf16.msra.mxu3 %v3266_v62  ;;  %v1026_v26 = vunpack.c.2.s8 %v730_v61  ;;  %v1034_v36 = vunpack.c.3.s8 %v730_v61  ;;  %v3122_v11 = vpack.c.bf16 %v2202_v8, %v2194_v30  ;;  %v2466_v15 = vcvt.s32.f32 %v1442_v9 }
 0x191   :  { %3874 = vmatpush.bf16.msra.mxu0 %v3058_v7  ;;  %v1154_v16 = vunpack.c.2.s8 %v762_v4  ;;  %v1162_v63 = vunpack.c.3.s8 %v762_v4  ;;  %v3194_v13 = vpack.c.bf16 %v2346_v52, %v2338_v6  ;;  %v2474_v32 = vcvt.s32.f32 %v1450_v10 }
 0x192   :  { %v2050_v14 = vcvt.s32.f32 %v1026_v26  ;;  %v2058_v12 = vcvt.s32.f32 %v1034_v36  ;;  %3888 = vmatpush.bf16.msra.mxu1 %v3122_v11  ;;  %v7785_v51 = vadd.f32 %v3560_v53, %v3546_v54  ;;  %v1298_v29 = vunpack.c.0.s8 %v7779_v27 }
 0x193   :  { %v2178_v22 = vcvt.s32.f32 %v1154_v16  ;;  %v2186_v56 = vcvt.s32.f32 %v1162_v63  ;;  %3901 = vmatpush.bf16.msra.mxu2 %v3194_v13  ;;  %v3258_v58 = vpack.c.bf16 %v2474_v32, %v2466_v15  ;;  %v1306_v28 = vunpack.c.1.s8 %v7779_v27  ;;  %v826_v27 = vld [vmem:[#allocation7 + $0x358] sm:$0xff] }
 0x194   :  { %v3050_v20 = vpack.c.bf16 %v2058_v12, %v2050_v14  ;;  %v1426_v5 = vunpack.c.0.s8 %v834_v21  ;;  %v2322_v34 = vcvt.s32.f32 %v1298_v29  ;;  %v1434_v49 = vunpack.c.1.s8 %v834_v21  ;;  %v3574_v29 = vpop.f32.mrf.mxu2 }
 0x195   :  { %v3114_v0 = vpack.c.bf16 %v2186_v56, %v2178_v22  ;;  %v1010_v60 = vunpack.c.0.s8 %v730_v61  ;;  %3915 = vmatpush.bf16.msra.mxu3 %v3258_v58  ;;  %v2330_v19 = vcvt.s32.f32 %v1306_v28  ;;  %v1018_v25 = vunpack.c.1.s8 %v730_v61  ;;  %v754_v61 = vld [vmem:[#allocation7 + $0x118] sm:$0xff] }
 0x196   :  { %3875 = vmatpush.bf16.msra.mxu0 %v3050_v20  ;;  %v2450_v3 = vcvt.s32.f32 %v1426_v5  ;;  %v1138_v37 = vunpack.c.0.s8 %v762_v4  ;;  %v2458_v17 = vcvt.s32.f32 %v1434_v49  ;;  %v1146_v35 = vunpack.c.1.s8 %v762_v4 }
 0x197   :  { %3889 = vmatpush.bf16.msra.mxu1 %v3114_v0  ;;  %v2034_v39 = vcvt.s32.f32 %v1010_v60  ;;  %v3573_v41 = vadd.f32 %v3572_v33, %v7775_v18  ;;  %v3186_v42 = vpack.c.bf16 %v2330_v19, %v2322_v34  ;;  %v2042_v40 = vcvt.s32.f32 %v1018_v25  ;;  %v874_v33 = vld [vmem:[#allocation7 + $0x4d8] sm:$0xff] }
 0x198   :  { %v2162_v43 = vcvt.s32.f32 %v1138_v37  ;;  %v1282_v21 = vunpack.c.2.s8 %v794_v31  ;;  %v3250_v47 = vpack.c.bf16 %v2458_v17, %v2450_v3  ;;  %v2170_v57 = vcvt.s32.f32 %v1146_v35  ;;  %v906_v19 = vld [vmem:[#allocation7 + $0x5d8] sm:$0xff] }
 0x199   :  { %v7790_v55 = vadd.f32 %v3586_v59, %v3573_v41  ;;  %v1290_v62 = vunpack.c.3.s8 %v794_v31  ;;  %3902 = vmatpush.bf16.msra.mxu2 %v3186_v42  ;;  %v3042_v30 = vpack.c.bf16 %v2042_v40, %v2034_v39  ;;  %v1410_v7 = vunpack.c.2.s8 %v826_v27  ;;  %v786_v17 = vld [vmem:[#allocation7 + $0x218] sm:$0xff] }
 0x19a   :  { %v2306_v1 = vcvt.s32.f32 %v1282_v21  ;;  %v1418_v4 = vunpack.c.3.s8 %v826_v27  ;;  %3916 = vmatpush.bf16.msra.mxu3 %v3250_v47  ;;  %v3106_v18 = vpack.c.bf16 %v2170_v57, %v2162_v43  ;;  %v994_v6 = vunpack.c.2.s8 %v722_v46  ;;  %v818_v40 = vld [vmem:[#allocation7 + $0x318] sm:$0xff] }
 0x19b   :  { %v2314_v8 = vcvt.s32.f32 %v1290_v62  ;;  %v1002_v9 = vunpack.c.3.s8 %v722_v46  ;;  %3876 = vmatpush.bf16.msra.mxu0 %v3042_v30  ;;  %v2434_v52 = vcvt.s32.f32 %v1410_v7  ;;  %v1122_v26 = vunpack.c.2.s8 %v754_v61 }
 0x19c   :  { %v2442_v10 = vcvt.s32.f32 %v1418_v4  ;;  %v1130_v36 = vunpack.c.3.s8 %v754_v61  ;;  %3890 = vmatpush.bf16.msra.mxu1 %v3106_v18  ;;  %v2018_v53 = vcvt.s32.f32 %v994_v6  ;;  %v1266_v15 = vunpack.c.0.s8 %v794_v31 }
 0x19d   :  { %v3178_v54 = vpack.c.bf16 %v2314_v8, %v2306_v1  ;;  %v2026_v11 = vcvt.s32.f32 %v1002_v9  ;;  %v2146_v63 = vcvt.s32.f32 %v1122_v26  ;;  %v1274_v32 = vunpack.c.1.s8 %v794_v31 }
 0x19e   :  { %v3242_v16 = vpack.c.bf16 %v2442_v10, %v2434_v52  ;;  %v2154_v13 = vcvt.s32.f32 %v1130_v36  ;;  %v2290_v12 = vcvt.s32.f32 %v1266_v15  ;;  %v1394_v22 = vunpack.c.0.s8 %v826_v27 }
 0x19f   :  { %3903 = vmatpush.bf16.msra.mxu2 %v3178_v54  ;;  %v3034_v14 = vpack.c.bf16 %v2026_v11, %v2018_v53  ;;  %v1402_v56 = vunpack.c.1.s8 %v826_v27  ;;  %v2298_v20 = vcvt.s32.f32 %v1274_v32  ;;  %v978_v28 = vunpack.c.0.s8 %v722_v46  ;;  %v3588_v27 = vpop.f32.mrf.mxu3  ;;  %v938_v32 = vld [vmem:[#allocation7 + $0x6d8] sm:$0xff] }
 0x1a0   :  { %3917 = vmatpush.bf16.msra.mxu3 %v3242_v16  ;;  %v3098_v58 = vpack.c.bf16 %v2154_v13, %v2146_v63  ;;  %v986_v5 = vunpack.c.1.s8 %v722_v46  ;;  %v2418_v0 = vcvt.s32.f32 %v1394_v22  ;;  %v1106_v49 = vunpack.c.0.s8 %v754_v61 }
 0x1a1   :  { %3877 = vmatpush.bf16.msra.mxu0 %v3034_v14  ;;  %v2426_v34 = vcvt.s32.f32 %v1402_v56  ;;  %v1114_v60 = vunpack.c.1.s8 %v754_v61  ;;  %v3170_v31 = vpack.c.bf16 %v2298_v20, %v2290_v12  ;;  %v2002_v3 = vcvt.s32.f32 %v978_v28 }
 0x1a2   :  { %3891 = vmatpush.bf16.msra.mxu1 %v3098_v58  ;;  %v2010_v25 = vcvt.s32.f32 %v986_v5  ;;  %v3575_v37 = vadd.f32 %v3574_v29, %v7785_v51  ;;  %v2130_v35 = vcvt.s32.f32 %v1106_v49  ;;  %v1602_v42 = vunpack.c.2.s8 %v874_v33  ;;  %v970_v29 = vld [vmem:[#allocation7 + $0x7d8] sm:$0xff] }
 0x1a3   :  { %v3234_v39 = vpack.c.bf16 %v2426_v34, %v2418_v0  ;;  %v2138_v41 = vcvt.s32.f32 %v1114_v60  ;;  %3904 = vmatpush.bf16.msra.mxu2 %v3170_v31  ;;  %v1610_v21 = vunpack.c.3.s8 %v874_v33  ;;  %v1730_v46 = vunpack.c.2.s8 %v906_v19 }
 0x1a4   :  { %v3026_v43 = vpack.c.bf16 %v2010_v25, %v2002_v3  ;;  %v7793_v59 = vadd.f32 %v3588_v27, %v3575_v37  ;;  %v2626_v57 = vcvt.s32.f32 %v1602_v42  ;;  %v1738_v62 = vunpack.c.3.s8 %v906_v19  ;;  %v898_v37 = vld [vmem:[#allocation7 + $0x598] sm:$0xff]  ;;  %v3600_v27 = vpop.f32.mrf.mxu0 }
 0x1a5   :  { %3918 = vmatpush.bf16.msra.mxu3 %v3234_v39  ;;  %v3090_v47 = vpack.c.bf16 %v2138_v41, %v2130_v35  ;;  %v1250_v61 = vunpack.c.2.s8 %v786_v17  ;;  %v2634_v51 = vcvt.s32.f32 %v1610_v21  ;;  %v2754_v30 = vcvt.s32.f32 %v1730_v46 }
 0x1a6   :  { %3878 = vmatpush.bf16.msra.mxu0 %v3026_v43  ;;  %v1258_v1 = vunpack.c.3.s8 %v786_v17  ;;  %v1378_v7 = vunpack.c.2.s8 %v818_v40  ;;  %v2762_v4 = vcvt.s32.f32 %v1738_v62  ;;  %v1386_v8 = vunpack.c.3.s8 %v818_v40 }
 0x1a7   :  { %3892 = vmatpush.bf16.msra.mxu1 %v3090_v47  ;;  %v2274_v18 = vcvt.s32.f32 %v1250_v61  ;;  %v1586_v6 = vunpack.c.0.s8 %v874_v33  ;;  %v3338_v9 = vpack.c.bf16 %v2634_v51, %v2626_v57  ;;  %v1594_v26 = vunpack.c.1.s8 %v874_v33  ;;  %v7797_v33 = vld [vmem:[#allocation7 + $0x498] sm:$0xff] }
 0x1a8   :  { %v2282_v52 = vcvt.s32.f32 %v1258_v1  ;;  %v2402_v10 = vcvt.s32.f32 %v1378_v7  ;;  %v3402_v36 = vpack.c.bf16 %v2762_v4, %v2754_v30  ;;  %v2410_v54 = vcvt.s32.f32 %v1386_v8  ;;  %v3614_v1 = vpop.f32.mrf.mxu1 }
 0x1a9   :  { %3879 = vmatmul.bf16.vlgmr.msra.gmra.mxu0 %v7602_v50  ;;  %v2610_v53 = vcvt.s32.f32 %v1586_v6  ;;  %v1714_v11 = vunpack.c.0.s8 %v906_v19  ;;  %v2618_v16 = vcvt.s32.f32 %v1594_v26  ;;  %v1722_v63 = vunpack.c.1.s8 %v906_v19 }
 0x1aa   :  { %3927 = vmatpush.bf16.msrb.mxu0 %v3338_v9  ;;  %v3162_v15 = vpack.c.bf16 %v2282_v52, %v2274_v18  ;;  %3893 = vmatmul.bf16.vlgmr.msra.gmra.mxu1 %v7598_v44  ;;  %v1234_v13 = vunpack.c.0.s8 %v786_v17  ;;  %v3226_v14 = vpack.c.bf16 %v2410_v54, %v2402_v10  ;;  %v1242_v22 = vunpack.c.1.s8 %v786_v17 }
 0x1ab   :  { %3941 = vmatpush.bf16.msrb.mxu1 %v3402_v36  ;;  %v2738_v12 = vcvt.s32.f32 %v1714_v11  ;;  %v1362_v56 = vunpack.c.0.s8 %v818_v40  ;;  %v3330_v58 = vpack.c.bf16 %v2618_v16, %v2610_v53  ;;  %v2746_v20 = vcvt.s32.f32 %v1722_v63  ;;  %v930_v36 = vld [vmem:[#allocation7 + $0x698] sm:$0xff] }
 0x1ac   :  { %3905 = vmatpush.bf16.msra.mxu2 %v3162_v15  ;;  %v2258_v28 = vcvt.s32.f32 %v1234_v13  ;;  %v1370_v5 = vunpack.c.1.s8 %v818_v40  ;;  %3919 = vmatpush.bf16.msra.mxu3 %v3226_v14  ;;  %v2266_v0 = vcvt.s32.f32 %v1242_v22  ;;  %v1858_v49 = vunpack.c.2.s8 %v938_v32 }
 0x1ad   :  { %v2386_v34 = vcvt.s32.f32 %v1362_v56  ;;  %v1866_v60 = vunpack.c.3.s8 %v938_v32  ;;  %v3394_v19 = vpack.c.bf16 %v2746_v20, %v2738_v12  ;;  %v1986_v3 = vunpack.c.2.s8 %v970_v29 }
 0x1ae   :  { %3928 = vmatpush.bf16.msrb.mxu0 %v3330_v58  ;;  %v2394_v31 = vcvt.s32.f32 %v1370_v5  ;;  %v1994_v25 = vunpack.c.3.s8 %v970_v29  ;;  %v3154_v17 = vpack.c.bf16 %v2266_v0, %v2258_v28  ;;  %v2882_v39 = vcvt.s32.f32 %v1858_v49  ;;  %v890_v0 = vld [vmem:[#allocation7 + $0x558] sm:$0xff] }
 0x1af   :  { %v2890_v35 = vcvt.s32.f32 %v1866_v60  ;;  %v1570_v41 = vunpack.c.2.s8 %v7797_v33  ;;  %3942 = vmatpush.bf16.msrb.mxu1 %v3394_v19  ;;  %v3010_v40 = vcvt.s32.f32 %v1986_v3  ;;  %v1578_v21 = vunpack.c.3.s8 %v7797_v33 }
 0x1b0   :  { %v3218_v42 = vpack.c.bf16 %v2394_v31, %v2386_v34  ;;  %v3018_v43 = vcvt.s32.f32 %v1994_v25  ;;  %3906 = vmatpush.bf16.msra.mxu2 %v3154_v17  ;;  %v1698_v57 = vunpack.c.2.s8 %v898_v37  ;;  %v1706_v62 = vunpack.c.3.s8 %v898_v37 }
 0x1b1   :  { %v3466_v46 = vpack.c.bf16 %v2890_v35, %v2882_v39  ;;  %v2594_v47 = vcvt.s32.f32 %v1570_v41  ;;  %v2602_v51 = vcvt.s32.f32 %v1578_v21  ;;  %v3601_v30 = vadd.f32 %v3600_v27, %v7790_v55  ;;  %v3616_v21 = vpop.f32.mrf.mxu1 }
 0x1b2   :  { %3920 = vmatpush.bf16.msra.mxu3 %v3218_v42  ;;  %v3530_v61 = vpack.c.bf16 %v3018_v43, %v3010_v40  ;;  %v1842_v7 = vunpack.c.0.s8 %v938_v32  ;;  %v2722_v4 = vcvt.s32.f32 %v1698_v57  ;;  %v2730_v18 = vcvt.s32.f32 %v1706_v62 }
 0x1b3   :  { %v1850_v8 = vunpack.c.1.s8 %v938_v32  ;;  %v1970_v6 = vunpack.c.0.s8 %v970_v29  ;;  %3907 = vmatmul.bf16.vlgmr.msra.gmra.mxu2 %v7645_v2  ;;  %v3322_v9 = vpack.c.bf16 %v2602_v51, %v2594_v47  ;;  %v7803_v52 = vadd.f32 %v3614_v1, %v3601_v30  ;;  %v962_v32 = vld [vmem:[#allocation7 + $0x798] sm:$0xff] }
 0x1b4   :  { %3955 = vmatpush.bf16.msrb.mxu2 %v3466_v46  ;;  %v2866_v10 = vcvt.s32.f32 %v1842_v7  ;;  %v1978_v26 = vunpack.c.1.s8 %v970_v29  ;;  %v3386_v54 = vpack.c.bf16 %v2730_v18, %v2722_v4  ;;  %v1554_v11 = vunpack.c.0.s8 %v7797_v33  ;;  %v858_v29 = vld [vmem:[#allocation7 + $0x458] sm:$0xff] }
 0x1b5   :  { %3921 = vmatmul.bf16.vlgmr.msra.gmra.mxu3 %v7638_v23  ;;  %v2874_v55 = vcvt.s32.f32 %v1850_v8  ;;  %v2994_v53 = vcvt.s32.f32 %v1970_v6  ;;  %3929 = vmatpush.bf16.msrb.mxu0 %v3322_v9  ;;  %v1562_v16 = vunpack.c.1.s8 %v7797_v33  ;;  %v1682_v63 = vunpack.c.0.s8 %v898_v37  ;;  %v3602_v33 = vpop.f32.mrf.mxu0  ;;  %v7811_v7 = vld [vmem:[#allocation7 + $0x658] sm:$0xff]  ;;  %v3628_v9 = vpop.f32.mrf.mxu2 }
 0x1b6   :  { %3969 = vmatpush.bf16.msrb.mxu3 %v3530_v61  ;;  %v3002_v15 = vcvt.s32.f32 %v1978_v26  ;;  %v1690_v13 = vunpack.c.1.s8 %v898_v37  ;;  %3943 = vmatpush.bf16.msrb.mxu1 %v3386_v54  ;;  %v2578_v12 = vcvt.s32.f32 %v1554_v11  ;;  %v1826_v22 = vunpack.c.2.s8 %v930_v36  ;;  %v4437_v11 = vld [vmem:[#allocation14 + $0x7] ss:$8 sm:$0xf0] }
 0x1b7   :  { %v3458_v14 = vpack.c.bf16 %v2874_v55, %v2866_v10  ;;  %v1834_v56 = vunpack.c.3.s8 %v930_v36  ;;  %v2586_v20 = vcvt.s32.f32 %v1562_v16  ;;  %v2706_v28 = vcvt.s32.f32 %v1682_v63  ;;  %v4433_v10 = vld [vmem:[#allocation14 + $0x1] ss:$8 sm:$0xf0] }
 0x1b8   :  { %v3522_v58 = vpack.c.bf16 %v3002_v15, %v2994_v53  ;;  %v2714_v5 = vcvt.s32.f32 %v1690_v13  ;;  %v2850_v34 = vcvt.s32.f32 %v1826_v22  ;;  %v1954_v60 = vunpack.c.2.s8 %v962_v32  ;;  %v4436_v53 = vld [vmem:[#allocation14 + $0x7] ss:$8 sm:$0xf] }
 0x1b9   :  { %3956 = vmatpush.bf16.msrb.mxu2 %v3458_v14  ;;  %v2858_v49 = vcvt.s32.f32 %v1834_v56  ;;  %v1962_v19 = vunpack.c.3.s8 %v962_v32  ;;  %v3314_v31 = vpack.c.bf16 %v2586_v20, %v2578_v12  ;;  %v1538_v25 = vunpack.c.2.s8 %v858_v29  ;;  %v954_v56 = vld [vmem:[#allocation7 + $0x758] sm:$0xff] }
 0x1ba   :  { %3970 = vmatpush.bf16.msrb.mxu3 %v3522_v58  ;;  %v3378_v3 = vpack.c.bf16 %v2714_v5, %v2706_v28  ;;  %v1546_v37 = vunpack.c.3.s8 %v858_v29  ;;  %v2978_v39 = vcvt.s32.f32 %v1954_v60  ;;  %v1666_v41 = vunpack.c.2.s8 %v890_v0  ;;  %v3642_v28 = vpop.f32.mrf.mxu3 }
 0x1bb   :  { %v3450_v17 = vpack.c.bf16 %v2858_v49, %v2850_v34  ;;  %v2986_v35 = vcvt.s32.f32 %v1962_v19  ;;  %3930 = vmatpush.bf16.msrb.mxu0 %v3314_v31  ;;  %v2562_v27 = vcvt.s32.f32 %v1538_v25  ;;  %v1674_v40 = vunpack.c.3.s8 %v890_v0  ;;  %v850_v34 = vld [vmem:[#allocation7 + $0x418] sm:$0xff] }
 0x1bc   :  { %3944 = vmatpush.bf16.msrb.mxu1 %v3378_v3  ;;  %v2570_v42 = vcvt.s32.f32 %v1546_v37  ;;  %v3603_v43 = vadd.f32 %v3602_v33, %v7793_v59  ;;  %v2690_v47 = vcvt.s32.f32 %v1666_v41  ;;  %v1810_v57 = vunpack.c.0.s8 %v930_v36  ;;  %v4432_v59 = vld [vmem:[#allocation14 + $0x1] ss:$8 sm:$0xf] }
 0x1bd   :  { %3957 = vmatpush.bf16.msrb.mxu2 %v3450_v17  ;;  %v3514_v46 = vpack.c.bf16 %v2986_v35, %v2978_v39  ;;  %v1818_v62 = vunpack.c.1.s8 %v930_v36  ;;  %v2698_v51 = vcvt.s32.f32 %v1674_v40  ;;  %v1938_v1 = vunpack.c.0.s8 %v962_v32  ;;  %v882_v33 = vld [vmem:[#allocation7 + $0x518] sm:$0xff]  ;;  %v3656_v41 = vpop.f32.mrf.mxu0 }
 0x1be   :  { %v3306_v61 = vpack.c.bf16 %v2570_v42, %v2562_v27  ;;  %v7809_v30 = vadd.f32 %v3616_v21, %v3603_v43  ;;  %v2834_v4 = vcvt.s32.f32 %v1810_v57  ;;  %v1946_v8 = vunpack.c.1.s8 %v962_v32  ;;  %v3670_v27 = vpop.f32.mrf.mxu1 }
 0x1bf   :  { %3971 = vmatpush.bf16.msrb.mxu3 %v3514_v46  ;;  %v2842_v18 = vcvt.s32.f32 %v1818_v62  ;;  %v1522_v6 = vunpack.c.0.s8 %v858_v29  ;;  %v3370_v26 = vpack.c.bf16 %v2698_v51, %v2690_v47  ;;  %v2962_v54 = vcvt.s32.f32 %v1938_v1 }
 0x1c0   :  { %3931 = vmatpush.bf16.msrb.mxu0 %v3306_v61  ;;  %v1530_v55 = vunpack.c.1.s8 %v858_v29  ;;  %v1650_v36 = vunpack.c.0.s8 %v890_v0  ;;  %v2970_v16 = vcvt.s32.f32 %v1946_v8  ;;  %v1658_v13 = vunpack.c.1.s8 %v890_v0 }
 0x1c1   :  { %v3442_v15 = vpack.c.bf16 %v2842_v18, %v2834_v4  ;;  %v2546_v63 = vcvt.s32.f32 %v1522_v6  ;;  %3945 = vmatpush.bf16.msrb.mxu1 %v3370_v26  ;;  %v3629_v32 = vadd.f32 %v3628_v9, %v7803_v52  ;;  %v7814_v22 = vor.u32 %v4433_v10, %v4432_v59 }
 0x1c2   :  { %v2554_v14 = vcvt.s32.f32 %v1530_v55  ;;  %v2674_v12 = vcvt.s32.f32 %v1650_v36  ;;  %v3506_v58 = vpack.c.bf16 %v2970_v16, %v2962_v54  ;;  %v2682_v20 = vcvt.s32.f32 %v1658_v13  ;;  %v3630_v55 = vpop.f32.mrf.mxu2  ;;  %v7833_v16 = vld [vmem:[#allocation7 + $0xe0] sm:$0xff] }
 0x1c3   :  { %3958 = vmatpush.bf16.msrb.mxu2 %v3442_v15  ;;  %v7816_v29 = vor.u32 %v4437_v11, %v4436_v53  ;;  %v1794_v5 = vunpack.c.2.s8 %v7811_v7  ;;  %v3643_v60 = vadd.f32 %v3642_v28, %v3629_v32  ;;  %v4440_v0 = vperm.slane %v7814_v22, 0  ;;  %v779_v32 = vld [vmem:[#allocation7 + $0x1e0] sm:$0xff]  ;;  %v914_v28 = vld [vmem:[#allocation7 + $0x618] sm:$0xff] }
 0x1c4   :  { %v3298_v49 = vpack.c.bf16 %v2554_v14, %v2546_v63  ;;  %v1802_v19 = vunpack.c.3.s8 %v7811_v7  ;;  %3972 = vmatpush.bf16.msrb.mxu3 %v3506_v58  ;;  %v3362_v52 = vpack.c.bf16 %v2682_v20, %v2674_v12  ;;  %v1922_v25 = vunpack.c.2.s8 %v954_v56 }
 0x1c5   :  { %v4473_v31 = vperm.slane %v7816_v29, 0  ;;  %v2818_v3 = vcvt.s32.f32 %v1794_v5  ;;  %v4456_v37 = vmul.f32 %v4440_v0, %v3643_v60  ;;  %v1930_v39 = vunpack.c.3.s8 %v954_v56 }
 0x1c6   :  { %3932 = vmatpush.bf16.msrb.mxu0 %v3298_v49  ;;  %v2826_v17 = vcvt.s32.f32 %v1802_v19  ;;  %v1506_v35 = vunpack.c.2.s8 %v850_v34  ;;  %3946 = vmatpush.bf16.msrb.mxu1 %v3362_v52  ;;  %v2946_v42 = vcvt.s32.f32 %v1922_v25  ;;  %v1514_v40 = vunpack.c.3.s8 %v850_v34  ;;  %v3644_v19 = vpop.f32.mrf.mxu3 }
 0x1c7   :  { %v1634_v43 = vunpack.c.2.s8 %v882_v33  ;;  %v1642_v21 = vunpack.c.3.s8 %v882_v33  ;;  %v7826_v46 = vadd.f32 %v4473_v31, %v4456_v37  ;;  %v2954_v57 = vcvt.s32.f32 %v1930_v39 }
 0x1c8   :  { %v3434_v47 = vpack.c.bf16 %v2826_v17, %v2818_v3  ;;  %v2530_v62 = vcvt.s32.f32 %v1506_v35  ;;  %v2538_v61 = vcvt.s32.f32 %v1514_v40  ;;  %v7828_v4 = vadd.f32 %v3670_v27, %v3656_v41  ;;  %v3672_v27 = vpop.f32.mrf.mxu1 }
 0x1c9   :  { %v2658_v51 = vcvt.s32.f32 %v1634_v43  ;;  %v2666_v1 = vcvt.s32.f32 %v1642_v21  ;;  %v4505_v18 = vmax.f32 %v7826_v46, 0.0  ;;  %v3498_v8 = vpack.c.bf16 %v2954_v57, %v2946_v42 }
 0x1ca   :  { %3959 = vmatpush.bf16.msrb.mxu2 %v3434_v47  ;;  %v1778_v6 = vunpack.c.0.s8 %v7811_v7  ;;  %v1786_v9 = vunpack.c.1.s8 %v7811_v7  ;;  %v3290_v59 = vpack.c.bf16 %v2538_v61, %v2530_v62  ;;  %v1906_v26 = vunpack.c.0.s8 %v954_v56 }
 0x1cb   :  { %v3354_v10 = vpack.c.bf16 %v2666_v1, %v2658_v51  ;;  %v1914_v54 = vunpack.c.1.s8 %v954_v56  ;;  %3973 = vmatpush.bf16.msrb.mxu3 %v3498_v8  ;;  %v1490_v11 = vunpack.c.0.s8 %v850_v34  ;;  %v1498_v15 = vunpack.c.1.s8 %v850_v34 }
 0x1cc   :  { %v2802_v36 = vcvt.s32.f32 %v1778_v6  ;;  %v2810_v53 = vcvt.s32.f32 %v1786_v9  ;;  %3933 = vmatpush.bf16.msrb.mxu0 %v3290_v59  ;;  %v2930_v63 = vcvt.s32.f32 %v1906_v26  ;;  %v1618_v14 = vunpack.c.0.s8 %v882_v33 }
 0x1cd   :  { %3947 = vmatpush.bf16.msrb.mxu1 %v3354_v10  ;;  %v2938_v13 = vcvt.s32.f32 %v1914_v54  ;;  %v1626_v12 = vunpack.c.1.s8 %v882_v33  ;;  %v2514_v58 = vcvt.s32.f32 %v1490_v11  ;;  %v2522_v20 = vcvt.s32.f32 %v1498_v15  ;;  %v946_v33 = vld [vmem:[#allocation7 + $0x718] sm:$0xff] }
 0x1ce   :  { %v3426_v7 = vpack.c.bf16 %v2810_v53, %v2802_v36  ;;  %v3631_v56 = vadd.f32 %v3630_v55, %v7809_v30  ;;  %v2642_v49 = vcvt.s32.f32 %v1618_v14  ;;  %v1091_v34 = vunpack.c.2.s8 %v7833_v16  ;;  %v3658_v30 = vpop.f32.mrf.mxu0 }
 0x1cf   :  { %v3490_v5 = vpack.c.bf16 %v2938_v13, %v2930_v63  ;;  %v2650_v60 = vcvt.s32.f32 %v1626_v12  ;;  %v3282_v52 = vpack.c.bf16 %v2522_v20, %v2514_v58  ;;  %v1099_v25 = vunpack.c.3.s8 %v7833_v16  ;;  %v811_v63 = vld [vmem:[#allocation7 + $0x2e0] sm:$0xff] }
 0x1d0   :  { %3960 = vmatpush.bf16.msrb.mxu2 %v3426_v7  ;;  %v3645_v3 = vadd.f32 %v3644_v19, %v3631_v56  ;;  %v1219_v37 = vunpack.c.2.s8 %v779_v32  ;;  %v2115_v39 = vcvt.s32.f32 %v1091_v34  ;;  %v1227_v35 = vunpack.c.3.s8 %v779_v32  ;;  %v843_v58 = vld [vmem:[#allocation7 + $0x3e0] sm:$0xff]  ;;  %v3684_v34 = vpop.f32.mrf.mxu2 }
 0x1d1   :  { %3974 = vmatpush.bf16.msrb.mxu3 %v3490_v5  ;;  %v3346_v17 = vpack.c.bf16 %v2650_v60, %v2642_v49  ;;  %v1762_v41 = vunpack.c.2.s8 %v914_v28  ;;  %3934 = vmatpush.bf16.msrb.mxu0 %v3282_v52  ;;  %v2123_v40 = vcvt.s32.f32 %v1099_v25  ;;  %v1770_v21 = vunpack.c.3.s8 %v914_v28  ;;  %v739_v52 = vld [vmem:[#allocation7 + $0xa0] sm:$0xff] }
 0x1d2   :  { %v4464_v42 = vmul.f32 %v4440_v0, %v3645_v3  ;;  %v2243_v43 = vcvt.s32.f32 %v1219_v37  ;;  %v2251_v47 = vcvt.s32.f32 %v1227_v35  ;;  %v1890_v62 = vunpack.c.2.s8 %v946_v33  ;;  %v7852_v37 = vld [vmem:[#allocation7 + $0x1a0] sm:$0xff] }
 0x1d3   :  { %3948 = vmatpush.bf16.msrb.mxu1 %v3346_v17  ;;  %v2786_v57 = vcvt.s32.f32 %v1762_v41  ;;  %v1898_v61 = vunpack.c.3.s8 %v946_v33  ;;  %v3083_v1 = vpack.c.bf16 %v2123_v40, %v2115_v39  ;;  %v2794_v8 = vcvt.s32.f32 %v1770_v21 }
 0x1d4   :  { %v4497_v51 = vadd.f32 %v4473_v31, %v4464_v42  ;;  %v7842_v6 = vadd.f32 %v3672_v27, %v3658_v30  ;;  %v3147_v9 = vpack.c.bf16 %v2251_v47, %v2243_v43  ;;  %v2914_v59 = vcvt.s32.f32 %v1890_v62  ;;  %3935 = vmatmul.bf16.vlgmr.msrb.gmra.mxu0 %v7732_v24  ;;  %v3698_v43 = vpop.f32.mrf.mxu3 }
 0x1d5   :  { %v2922_v10 = vcvt.s32.f32 %v1898_v61  ;;  %v1075_v0 = vunpack.c.0.s8 %v7833_v16  ;;  %3983 = vmatpush.bf16.msra.mxu0 %v3083_v1  ;;  %v3418_v54 = vpack.c.bf16 %v2794_v8, %v2786_v57  ;;  %v1083_v55 = vunpack.c.1.s8 %v7833_v16 }
 0x1d6   :  { %v4513_v26 = vmax.f32 %v4497_v51, 0.0  ;;  %3949 = vmatmul.bf16.vlgmr.msrb.gmra.mxu1 %v7735_v48  ;;  %v1203_v36 = vunpack.c.0.s8 %v779_v32  ;;  %v1211_v11 = vunpack.c.1.s8 %v779_v32  ;;  %v1746_v15 = vunpack.c.0.s8 %v914_v28  ;;  %v3712_v1 = vpop.f32.mrf.mxu0 }
 0x1d7   :  { %3997 = vmatpush.bf16.msra.mxu1 %v3147_v9  ;;  %v3482_v31 = vpack.c.bf16 %v2922_v10, %v2914_v59  ;;  %v2099_v53 = vcvt.s32.f32 %v1075_v0  ;;  %3961 = vmatpush.bf16.msrb.mxu2 %v3418_v54  ;;  %v2107_v14 = vcvt.s32.f32 %v1083_v55  ;;  %v1754_v7 = vunpack.c.1.s8 %v914_v28 }
 0x1d8   :  { %v7850_v13 = vpack.c.bf16 %v4513_v26, %v4505_v18  ;;  %v2227_v12 = vcvt.s32.f32 %v1203_v36  ;;  %v2235_v20 = vcvt.s32.f32 %v1211_v11  ;;  %v2770_v56 = vcvt.s32.f32 %v1746_v15  ;;  %v803_v11 = vld [vmem:[#allocation7 + $0x2a0] sm:$0xff] }
 0x1d9   :  { %3975 = vmatpush.bf16.msrb.mxu3 %v3482_v31  ;;  %v1874_v16 = vunpack.c.0.s8 %v946_v33  ;;  %v1882_v5 = vunpack.c.1.s8 %v946_v33  ;;  %v3075_v49 = vpack.c.bf16 %v2107_v14, %v2099_v53  ;;  %v2778_v60 = vcvt.s32.f32 %v1754_v7  ;;  %v3726_v7 = vpop.f32.mrf.mxu1 }
 0x1da   :  { %v1347_v19 = vunpack.c.2.s8 %v811_v63  ;;  %v1355_v32 = vunpack.c.3.s8 %v811_v63  ;;  %v3139_v3 = vpack.c.bf16 %v2235_v20, %v2227_v12  ;;  %v1475_v25 = vunpack.c.2.s8 %v843_v58 }
 0x1db   :  { %v2898_v46 = vcvt.s32.f32 %v1874_v16  ;;  %v2906_v18 = vcvt.s32.f32 %v1882_v5  ;;  %3984 = vmatpush.bf16.msra.mxu0 %v3075_v49  ;;  %v3410_v28 = vpack.c.bf16 %v2778_v60, %v2770_v56  ;;  %v1483_v35 = vunpack.c.3.s8 %v843_v58  ;;  %v3686_v49 = vpop.f32.mrf.mxu2 }
 0x1dc   :  { %v2371_v17 = vcvt.s32.f32 %v1347_v19  ;;  %v2379_v39 = vcvt.s32.f32 %v1355_v32  ;;  %3998 = vmatpush.bf16.msra.mxu1 %v3139_v3  ;;  %v2499_v33 = vcvt.s32.f32 %v1475_v25  ;;  %v3685_v30 = vadd.f32 %v3684_v34, %v7828_v4  ;;  %v731_v3 = vld [vmem:[#allocation7 + $0x60] sm:$0xff] }
 0x1dd   :  { %v3474_v41 = vpack.c.bf16 %v2906_v18, %v2898_v46  ;;  %v1059_v27 = vunpack.c.2.s8 %v739_v52  ;;  %3962 = vmatpush.bf16.msrb.mxu2 %v3410_v28  ;;  %v2507_v40 = vcvt.s32.f32 %v1483_v35  ;;  %v1067_v21 = vunpack.c.3.s8 %v739_v52  ;;  %v763_v28 = vld [vmem:[#allocation7 + $0x160] sm:$0xff] }
 0x1de   :  { %v3211_v42 = vpack.c.bf16 %v2379_v39, %v2371_v17  ;;  %v1187_v47 = vunpack.c.2.s8 %v7852_v37  ;;  %v3699_v57 = vadd.f32 %v3698_v43, %v3685_v30  ;;  %v1195_v61 = vunpack.c.3.s8 %v7852_v37 }
 0x1df   :  { %3976 = vmatpush.bf16.msrb.mxu3 %v3474_v41  ;;  %v2083_v62 = vcvt.s32.f32 %v1059_v27  ;;  %v1331_v51 = vunpack.c.0.s8 %v811_v63  ;;  %v3275_v8 = vpack.c.bf16 %v2507_v40, %v2499_v33  ;;  %v2091_v9 = vcvt.s32.f32 %v1067_v21 }
 0x1e0   :  { %v2211_v59 = vcvt.s32.f32 %v1187_v47  ;;  %v1339_v4 = vunpack.c.1.s8 %v811_v63  ;;  %3963 = vmatmul.bf16.vlgmr.msrb.gmra.mxu2 %v7751_v45  ;;  %v2219_v10 = vcvt.s32.f32 %v1195_v61  ;;  %v1459_v26 = vunpack.c.0.s8 %v843_v58  ;;  %v835_v63 = vld [vmem:[#allocation7 + $0x3a0] sm:$0xff] }
 0x1e1   :  { %4011 = vmatpush.bf16.msra.mxu2 %v3211_v42  ;;  %v2355_v0 = vcvt.s32.f32 %v1331_v51  ;;  %v1467_v54 = vunpack.c.1.s8 %v843_v58  ;;  %v3067_v55 = vpack.c.bf16 %v2091_v9, %v2083_v62  ;;  %v3713_v31 = vadd.f32 %v3712_v1, %v3699_v57  ;;  %v3700_v42 = vpop.f32.mrf.mxu3  ;;  %v3714_v57 = vpop.f32.mrf.mxu0 }
 0x1e2   :  { %v2363_v36 = vcvt.s32.f32 %v1339_v4  ;;  %v1043_v53 = vunpack.c.0.s8 %v739_v52  ;;  %3977 = vmatmul.bf16.vlgmr.msrb.gmra.mxu3 %v7753_v38  ;;  %v3131_v15 = vpack.c.bf16 %v2219_v10, %v2211_v59  ;;  %v2483_v14 = vcvt.s32.f32 %v1459_v26 }
 0x1e3   :  { %4025 = vmatpush.bf16.msra.mxu3 %v3275_v8  ;;  %v2491_v12 = vcvt.s32.f32 %v1467_v54  ;;  %v1051_v20 = vunpack.c.1.s8 %v739_v52  ;;  %3985 = vmatpush.bf16.msra.mxu0 %v3067_v55  ;;  %v7859_v16 = vadd.f32 %v3726_v7, %v3713_v31  ;;  %v1171_v58 = vunpack.c.0.s8 %v7852_v37  ;;  %v3728_v31 = vpop.f32.mrf.mxu1 }
 0x1e4   :  { %v3203_v56 = vpack.c.bf16 %v2363_v36, %v2355_v0  ;;  %v2067_v5 = vcvt.s32.f32 %v1043_v53  ;;  %3999 = vmatpush.bf16.msra.mxu1 %v3131_v15  ;;  %v1179_v32 = vunpack.c.1.s8 %v7852_v37  ;;  %v1315_v34 = vunpack.c.2.s8 %v803_v11  ;;  %v795_v15 = vld [vmem:[#allocation7 + $0x260] sm:$0xff] }
 0x1e5   :  { %v3267_v60 = vpack.c.bf16 %v2491_v12, %v2483_v14  ;;  %v2075_v19 = vcvt.s32.f32 %v1051_v20  ;;  %v2195_v46 = vcvt.s32.f32 %v1171_v58  ;;  %v1323_v18 = vunpack.c.3.s8 %v803_v11 }
 0x1e6   :  { %4012 = vmatpush.bf16.msra.mxu2 %v3203_v56  ;;  %v1443_v52 = vunpack.c.2.s8 %v835_v63  ;;  %v1451_v25 = vunpack.c.3.s8 %v835_v63  ;;  %v2203_v39 = vcvt.s32.f32 %v1179_v32  ;;  %v2339_v35 = vcvt.s32.f32 %v1315_v34  ;;  %v7866_v56 = vld [vmem:[#allocation7 + $0x360] sm:$0xff] }
 0x1e7   :  { %4026 = vmatpush.bf16.msra.mxu3 %v3267_v60  ;;  %v3059_v17 = vpack.c.bf16 %v2075_v19, %v2067_v5  ;;  %v3687_v41 = vadd.f32 %v3686_v49, %v7842_v6  ;;  %v2347_v33 = vcvt.s32.f32 %v1323_v18  ;;  %v1027_v40 = vunpack.c.2.s8 %v731_v3 }
 0x1e8   :  { %v2467_v30 = vcvt.s32.f32 %v1443_v52  ;;  %v2475_v27 = vcvt.s32.f32 %v1451_v25  ;;  %v3123_v37 = vpack.c.bf16 %v2203_v39, %v2195_v46  ;;  %v1035_v21 = vunpack.c.3.s8 %v731_v3 }
 0x1e9   :  { %3986 = vmatpush.bf16.msra.mxu0 %v3059_v17  ;;  %v3701_v43 = vadd.f32 %v3700_v42, %v3687_v41  ;;  %v1155_v47 = vunpack.c.2.s8 %v763_v28  ;;  %v3195_v62 = vpack.c.bf16 %v2347_v33, %v2339_v35  ;;  %v2051_v51 = vcvt.s32.f32 %v1027_v40  ;;  %v723_v41 = vld [vmem:[#allocation7 + $0x20] sm:$0xff]  ;;  %v3754_v42 = vpop.f32.mrf.mxu3 }
 0x1ea   :  { %v3259_v61 = vpack.c.bf16 %v2475_v27, %v2467_v30  ;;  %v1163_v1 = vunpack.c.3.s8 %v763_v28  ;;  %4000 = vmatpush.bf16.msra.mxu1 %v3123_v37  ;;  %v2059_v8 = vcvt.s32.f32 %v1035_v21  ;;  %v1299_v59 = vunpack.c.0.s8 %v803_v11  ;;  %v755_v33 = vld [vmem:[#allocation7 + $0x120] sm:$0xff] }
 0x1eb   :  { %v2179_v9 = vcvt.s32.f32 %v1155_v47  ;;  %v1307_v6 = vunpack.c.1.s8 %v803_v11  ;;  %4013 = vmatpush.bf16.msra.mxu2 %v3195_v62  ;;  %v1427_v10 = vunpack.c.0.s8 %v835_v63  ;;  %v1435_v0 = vunpack.c.1.s8 %v835_v63  ;;  %v3740_v63 = vpop.f32.mrf.mxu2 }
 0x1ec   :  { %4027 = vmatpush.bf16.msra.mxu3 %v3259_v61  ;;  %v2187_v4 = vcvt.s32.f32 %v1163_v1  ;;  %v3715_v26 = vadd.f32 %v3714_v57, %v3701_v43  ;;  %v3051_v54 = vpack.c.bf16 %v2059_v8, %v2051_v51  ;;  %v2323_v55 = vcvt.s32.f32 %v1299_v59 }
 0x1ed   :  { %v2331_v36 = vcvt.s32.f32 %v1307_v6  ;;  %v1011_v53 = vunpack.c.0.s8 %v731_v3  ;;  %v2451_v12 = vcvt.s32.f32 %v1427_v10  ;;  %v2459_v7 = vcvt.s32.f32 %v1435_v0 }
 0x1ee   :  { %v3115_v14 = vpack.c.bf16 %v2187_v4, %v2179_v9  ;;  %v7864_v20 = vadd.f32 %v3728_v31, %v3715_v26  ;;  %3987 = vmatpush.bf16.msra.mxu0 %v3051_v54  ;;  %v1019_v5 = vunpack.c.1.s8 %v731_v3  ;;  %v1139_v49 = vunpack.c.0.s8 %v763_v28 }
 0x1ef   :  { %v3187_v11 = vpack.c.bf16 %v2331_v36, %v2323_v55  ;;  %v2035_v58 = vcvt.s32.f32 %v1011_v53  ;;  %v3251_v60 = vpack.c.bf16 %v2459_v7, %v2451_v12  ;;  %v1147_v19 = vunpack.c.1.s8 %v763_v28  ;;  %v875_v12 = vld [vmem:[#allocation7 + $0x4e0] sm:$0xff] }
 0x1f0   :  { %4001 = vmatpush.bf16.msra.mxu1 %v3115_v14  ;;  %v1283_v32 = vunpack.c.2.s8 %v795_v15  ;;  %v1291_v34 = vunpack.c.3.s8 %v795_v15  ;;  %v2043_v46 = vcvt.s32.f32 %v1019_v5  ;;  %v2163_v18 = vcvt.s32.f32 %v1139_v49 }
 0x1f1   :  { %4014 = vmatpush.bf16.msra.mxu2 %v3187_v11  ;;  %v1411_v52 = vunpack.c.2.s8 %v7866_v56  ;;  %v1419_v25 = vunpack.c.3.s8 %v7866_v56  ;;  %4028 = vmatpush.bf16.msra.mxu3 %v3251_v60  ;;  %v2171_v17 = vcvt.s32.f32 %v1147_v19  ;;  %v3741_v3 = vadd.f32 %v3740_v63, %v7859_v16 }
 0x1f2   :  { %v2307_v39 = vcvt.s32.f32 %v1283_v32  ;;  %v2315_v35 = vcvt.s32.f32 %v1291_v34  ;;  %v3043_v30 = vpack.c.bf16 %v2043_v46, %v2035_v58  ;;  %v4441_v40 = vperm.slane %v7814_v22, 1 }
 0x1f3   :  { %v2435_v27 = vcvt.s32.f32 %v1411_v52  ;;  %v2443_v28 = vcvt.s32.f32 %v1419_v25  ;;  %v3107_v37 = vpack.c.bf16 %v2171_v17, %v2163_v18  ;;  %v3755_v21 = vadd.f32 %v3754_v42, %v3741_v3  ;;  %v787_v18 = vld [vmem:[#allocation7 + $0x220] sm:$0xff]  ;;  %v3742_v3 = vpop.f32.mrf.mxu2 }
 0x1f4   :  { %v3179_v43 = vpack.c.bf16 %v2315_v35, %v2307_v39  ;;  %v4474_v47 = vperm.slane %v7816_v29, 1  ;;  %3988 = vmatpush.bf16.msra.mxu0 %v3043_v30  ;;  %v995_v62 = vunpack.c.2.s8 %v723_v41  ;;  %v1003_v61 = vunpack.c.3.s8 %v723_v41  ;;  %v819_v35 = vld [vmem:[#allocation7 + $0x320] sm:$0xff] }
 0x1f5   :  { %v3243_v57 = vpack.c.bf16 %v2443_v28, %v2435_v27  ;;  %v1123_v51 = vunpack.c.2.s8 %v755_v33  ;;  %4002 = vmatpush.bf16.msra.mxu1 %v3107_v37  ;;  %v4457_v16 = vmul.f32 %v4441_v40, %v3755_v21  ;;  %v1131_v1 = vunpack.c.3.s8 %v755_v33 }
 0x1f6   :  { %4015 = vmatpush.bf16.msra.mxu2 %v3179_v43  ;;  %v1267_v8 = vunpack.c.0.s8 %v795_v15  ;;  %v1275_v9 = vunpack.c.1.s8 %v795_v15  ;;  %v2019_v59 = vcvt.s32.f32 %v995_v62  ;;  %v2027_v6 = vcvt.s32.f32 %v1003_v61  ;;  %v907_v15 = vld [vmem:[#allocation7 + $0x5e0] sm:$0xff] }
 0x1f7   :  { %4029 = vmatpush.bf16.msra.mxu3 %v3243_v57  ;;  %v2147_v4 = vcvt.s32.f32 %v1123_v51  ;;  %v1395_v10 = vunpack.c.0.s8 %v7866_v56  ;;  %v7878_v0 = vadd.f32 %v4474_v47, %v4457_v16  ;;  %v2155_v26 = vcvt.s32.f32 %v1131_v1 }
 0x1f8   :  { %v2291_v54 = vcvt.s32.f32 %v1267_v8  ;;  %v2299_v55 = vcvt.s32.f32 %v1275_v9  ;;  %v3035_v36 = vpack.c.bf16 %v2027_v6, %v2019_v59  ;;  %v1403_v31 = vunpack.c.1.s8 %v7866_v56  ;;  %v3756_v8 = vpop.f32.mrf.mxu3 }
 0x1f9   :  { %v2419_v53 = vcvt.s32.f32 %v1395_v10  ;;  %v979_v14 = vunpack.c.0.s8 %v723_v41  ;;  %v4506_v7 = vmax.f32 %v7878_v0, 0.0  ;;  %v3099_v11 = vpack.c.bf16 %v2155_v26, %v2147_v4 }
 0x1fa   :  { %v3171_v5 = vpack.c.bf16 %v2299_v55, %v2291_v54  ;;  %v987_v58 = vunpack.c.1.s8 %v723_v41  ;;  %3989 = vmatpush.bf16.msra.mxu0 %v3035_v36  ;;  %v2427_v49 = vcvt.s32.f32 %v1403_v31  ;;  %v1107_v60 = vunpack.c.0.s8 %v755_v33 }
 0x1fb   :  { %v2003_v63 = vcvt.s32.f32 %v979_v14  ;;  %v1115_v19 = vunpack.c.1.s8 %v755_v33  ;;  %4003 = vmatpush.bf16.msra.mxu1 %v3099_v11  ;;  %v1603_v34 = vunpack.c.2.s8 %v875_v12  ;;  %v1611_v46 = vunpack.c.3.s8 %v875_v12  ;;  %v939_v11 = vld [vmem:[#allocation7 + $0x6e0] sm:$0xff] }
 0x1fc   :  { %4016 = vmatpush.bf16.msra.mxu2 %v3171_v5  ;;  %v2011_v32 = vcvt.s32.f32 %v987_v58  ;;  %v1731_v56 = vunpack.c.2.s8 %v907_v15  ;;  %v3235_v52 = vpack.c.bf16 %v2427_v49, %v2419_v53  ;;  %v2131_v25 = vcvt.s32.f32 %v1107_v60 }
 0x1fd   :  { %v2139_v17 = vcvt.s32.f32 %v1115_v19  ;;  %v1739_v39 = vunpack.c.3.s8 %v907_v15  ;;  %v2627_v41 = vcvt.s32.f32 %v1603_v34  ;;  %v2635_v27 = vcvt.s32.f32 %v1611_v46  ;;  %v7889_v34 = vld [vmem:[#allocation7 + $0x4a0] sm:$0xff] }
 0x1fe   :  { %v3027_v30 = vpack.c.bf16 %v2011_v32, %v2003_v63  ;;  %v2755_v28 = vcvt.s32.f32 %v1731_v56  ;;  %4030 = vmatpush.bf16.msra.mxu3 %v3235_v52  ;;  %v1251_v37 = vunpack.c.2.s8 %v787_v18  ;;  %v1259_v43 = vunpack.c.3.s8 %v787_v18  ;;  %v971_v63 = vld [vmem:[#allocation7 + $0x7e0] sm:$0xff] }
 0x1ff   :  { %v3091_v42 = vpack.c.bf16 %v2139_v17, %v2131_v25  ;;  %v2763_v33 = vcvt.s32.f32 %v1739_v39  ;;  %v3339_v21 = vpack.c.bf16 %v2635_v27, %v2627_v41  ;;  %v1379_v57 = vunpack.c.2.s8 %v819_v35 }
 0x200   :  { %3990 = vmatpush.bf16.msra.mxu0 %v3027_v30  ;;  %v1387_v62 = vunpack.c.3.s8 %v819_v35  ;;  %v3743_v61 = vadd.f32 %v3742_v3, %v7864_v20  ;;  %v2275_v16 = vcvt.s32.f32 %v1251_v37  ;;  %v2283_v1 = vcvt.s32.f32 %v1259_v43  ;;  %v899_v3 = vld [vmem:[#allocation7 + $0x5a0] sm:$0xff] }
 0x201   :  { %4004 = vmatpush.bf16.msra.mxu1 %v3091_v42  ;;  %v3403_v51 = vpack.c.bf16 %v2763_v33, %v2755_v28  ;;  %v1587_v9 = vunpack.c.0.s8 %v875_v12  ;;  %v2403_v59 = vcvt.s32.f32 %v1379_v57  ;;  %v1595_v10 = vunpack.c.1.s8 %v875_v12 }
 0x202   :  { %v2411_v6 = vcvt.s32.f32 %v1387_v62  ;;  %v3757_v4 = vadd.f32 %v3756_v8, %v3743_v61  ;;  %v3163_v26 = vpack.c.bf16 %v2283_v1, %v2275_v16  ;;  %v1715_v55 = vunpack.c.0.s8 %v907_v15  ;;  %v3768_v1 = vpop.f32.mrf.mxu0  ;;  %v3782_v8 = vpop.f32.mrf.mxu1 }
 0x203   :  { %3991 = vmatmul.bf16.vlgmr.msra.gmra.mxu0 %v7602_v50  ;;  %v2611_v54 = vcvt.s32.f32 %v1587_v9  ;;  %v1723_v36 = vunpack.c.1.s8 %v907_v15  ;;  %v2619_v53 = vcvt.s32.f32 %v1595_v10  ;;  %v1235_v14 = vunpack.c.0.s8 %v787_v18 }
 0x204   :  { %4039 = vmatpush.bf16.msrb.mxu0 %v3339_v21  ;;  %v3227_v31 = vpack.c.bf16 %v2411_v6, %v2403_v59  ;;  %4005 = vmatmul.bf16.vlgmr.msra.gmra.mxu1 %v7598_v44  ;;  %v4465_v20 = vmul.f32 %v4441_v40, %v3757_v4  ;;  %v2739_v5 = vcvt.s32.f32 %v1715_v55  ;;  %v1243_v12 = vunpack.c.1.s8 %v787_v18 }
 0x205   :  { %4053 = vmatpush.bf16.msrb.mxu1 %v3403_v51  ;;  %4017 = vmatpush.bf16.msra.mxu2 %v3163_v26  ;;  %v2747_v58 = vcvt.s32.f32 %v1723_v36  ;;  %v1363_v49 = vunpack.c.0.s8 %v819_v35  ;;  %v3331_v15 = vpack.c.bf16 %v2619_v53, %v2611_v54  ;;  %v2259_v19 = vcvt.s32.f32 %v1235_v14  ;;  %v931_v54 = vld [vmem:[#allocation7 + $0x6a0] sm:$0xff] }
 0x206   :  { %4031 = vmatpush.bf16.msra.mxu3 %v3227_v31  ;;  %v4498_v60 = vadd.f32 %v4474_v47, %v4465_v20  ;;  %v1371_v32 = vunpack.c.1.s8 %v819_v35  ;;  %v2267_v40 = vcvt.s32.f32 %v1243_v12  ;;  %v1859_v52 = vunpack.c.2.s8 %v939_v11  ;;  %v963_v53 = vld [vmem:[#allocation7 + $0x7a0] sm:$0xff] }
 0x207   :  { %v3395_v46 = vpack.c.bf16 %v2747_v58, %v2739_v5  ;;  %v2387_v56 = vcvt.s32.f32 %v1363_v49  ;;  %v1867_v39 = vunpack.c.3.s8 %v939_v11  ;;  %v1987_v18 = vunpack.c.2.s8 %v971_v63 }
 0x208   :  { %v4514_v25 = vmax.f32 %v4498_v60, 0.0  ;;  %4040 = vmatpush.bf16.msrb.mxu0 %v3331_v15  ;;  %v2395_v17 = vcvt.s32.f32 %v1371_v32  ;;  %v3155_v30 = vpack.c.bf16 %v2267_v40, %v2259_v19  ;;  %v2883_v41 = vcvt.s32.f32 %v1859_v52  ;;  %v859_v15 = vld [vmem:[#allocation7 + $0x460] sm:$0xff] }
 0x209   :  { %4054 = vmatpush.bf16.msrb.mxu1 %v3395_v46  ;;  %v1995_v27 = vunpack.c.3.s8 %v971_v63  ;;  %v1571_v47 = vunpack.c.2.s8 %v7889_v34  ;;  %v2891_v42 = vcvt.s32.f32 %v1867_v39  ;;  %v3011_v33 = vcvt.s32.f32 %v1987_v18 }
 0x20a   :  { %v7894_v35 = vpack.c.bf16 %v4514_v25, %v4506_v7  ;;  %v3219_v28 = vpack.c.bf16 %v2395_v17, %v2387_v56  ;;  %4018 = vmatpush.bf16.msra.mxu2 %v3155_v30  ;;  %v1579_v43 = vunpack.c.3.s8 %v7889_v34  ;;  %v1699_v57 = vunpack.c.2.s8 %v899_v3  ;;  %v891_v56 = vld [vmem:[#allocation7 + $0x560] sm:$0xff] }
 0x20b   :  { %v3019_v37 = vcvt.s32.f32 %v1995_v27  ;;  %v2595_v21 = vcvt.s32.f32 %v1571_v47  ;;  %v3467_v62 = vpack.c.bf16 %v2891_v42, %v2883_v41  ;;  %v1707_v61 = vunpack.c.3.s8 %v899_v3 }
 0x20c   :  { %4032 = vmatpush.bf16.msra.mxu3 %v3219_v28  ;;  %v1843_v51 = vunpack.c.0.s8 %v939_v11  ;;  %v1851_v16 = vunpack.c.1.s8 %v939_v11  ;;  %v2603_v0 = vcvt.s32.f32 %v1579_v43  ;;  %v2723_v7 = vcvt.s32.f32 %v1699_v57  ;;  %v3784_v57 = vpop.f32.mrf.mxu1 }
 0x20d   :  { %v3531_v9 = vpack.c.bf16 %v3019_v37, %v3011_v33  ;;  %v1971_v59 = vunpack.c.0.s8 %v971_v63  ;;  %v2731_v6 = vcvt.s32.f32 %v1707_v61  ;;  %v1979_v26 = vunpack.c.1.s8 %v971_v63  ;;  %4019 = vmatmul.bf16.vlgmr.msra.gmra.mxu2 %v7645_v2 }
 0x20e   :  { %4067 = vmatpush.bf16.msrb.mxu2 %v3467_v62  ;;  %v2867_v4 = vcvt.s32.f32 %v1843_v51  ;;  %v2875_v10 = vcvt.s32.f32 %v1851_v16  ;;  %v3323_v55 = vpack.c.bf16 %v2603_v0, %v2595_v21  ;;  %v7898_v31 = vadd.f32 %v3782_v8, %v3768_v1  ;;  %v3770_v21 = vpop.f32.mrf.mxu0 }
 0x20f   :  { %v2995_v36 = vcvt.s32.f32 %v1971_v59  ;;  %v1555_v20 = vunpack.c.0.s8 %v7889_v34  ;;  %4033 = vmatmul.bf16.vlgmr.msra.gmra.mxu3 %v7638_v23  ;;  %v3387_v14 = vpack.c.bf16 %v2731_v6, %v2723_v7  ;;  %v3003_v5 = vcvt.s32.f32 %v1979_v26 }
 0x210   :  { %4081 = vmatpush.bf16.msrb.mxu3 %v3531_v9  ;;  %v3459_v11 = vpack.c.bf16 %v2875_v10, %v2867_v4  ;;  %v1563_v58 = vunpack.c.1.s8 %v7889_v34  ;;  %4041 = vmatpush.bf16.msrb.mxu0 %v3323_v55  ;;  %v1683_v49 = vunpack.c.0.s8 %v899_v3  ;;  %v1691_v63 = vunpack.c.1.s8 %v899_v3  ;;  %v923_v10 = vld [vmem:[#allocation7 + $0x660] sm:$0xff] }
 0x211   :  { %v2579_v12 = vcvt.s32.f32 %v1555_v20  ;;  %v1827_v60 = vunpack.c.2.s8 %v931_v54  ;;  %4055 = vmatpush.bf16.msrb.mxu1 %v3387_v14  ;;  %v3523_v19 = vpack.c.bf16 %v3003_v5, %v2995_v36  ;;  %v1835_v46 = vunpack.c.3.s8 %v931_v54  ;;  %v955_v14 = vld [vmem:[#allocation7 + $0x760] sm:$0xff] }
 0x212   :  { %4068 = vmatpush.bf16.msrb.mxu2 %v3459_v11  ;;  %v2587_v32 = vcvt.s32.f32 %v1563_v58  ;;  %v1955_v40 = vunpack.c.2.s8 %v963_v53  ;;  %v2707_v52 = vcvt.s32.f32 %v1683_v49  ;;  %v2715_v25 = vcvt.s32.f32 %v1691_v63 }
 0x213   :  { %v2851_v17 = vcvt.s32.f32 %v1827_v60  ;;  %v1963_v39 = vunpack.c.3.s8 %v963_v53  ;;  %v2859_v34 = vcvt.s32.f32 %v1835_v46  ;;  %v1539_v41 = vunpack.c.2.s8 %v859_v15 }
 0x214   :  { %4082 = vmatpush.bf16.msrb.mxu3 %v3523_v19  ;;  %v3315_v18 = vpack.c.bf16 %v2587_v32, %v2579_v12  ;;  %v2979_v30 = vcvt.s32.f32 %v1955_v40  ;;  %v3379_v27 = vpack.c.bf16 %v2715_v25, %v2707_v52  ;;  %v1547_v47 = vunpack.c.3.s8 %v859_v15  ;;  %v3796_v12 = vpop.f32.mrf.mxu2  ;;  %v851_v19 = vld [vmem:[#allocation7 + $0x420] sm:$0xff] }
 0x215   :  { %v2987_v3 = vcvt.s32.f32 %v1963_v39  ;;  %v1667_v28 = vunpack.c.2.s8 %v891_v56  ;;  %v3451_v42 = vpack.c.bf16 %v2859_v34, %v2851_v17  ;;  %v2563_v33 = vcvt.s32.f32 %v1539_v41  ;;  %v883_v25 = vld [vmem:[#allocation7 + $0x520] sm:$0xff]  ;;  %v3810_v41 = vpop.f32.mrf.mxu3 }
 0x216   :  { %4042 = vmatpush.bf16.msrb.mxu0 %v3315_v18  ;;  %v1675_v37 = vunpack.c.3.s8 %v891_v56  ;;  %v1811_v43 = vunpack.c.0.s8 %v931_v54  ;;  %4056 = vmatpush.bf16.msrb.mxu1 %v3379_v27  ;;  %v2571_v61 = vcvt.s32.f32 %v1547_v47  ;;  %v1819_v16 = vunpack.c.1.s8 %v931_v54 }
 0x217   :  { %v3515_v62 = vpack.c.bf16 %v2987_v3, %v2979_v30  ;;  %v2691_v51 = vcvt.s32.f32 %v1667_v28  ;;  %4069 = vmatpush.bf16.msrb.mxu2 %v3451_v42  ;;  %v1939_v9 = vunpack.c.0.s8 %v963_v53  ;;  %v1947_v0 = vunpack.c.1.s8 %v963_v53 }
 0x218   :  { %v2699_v1 = vcvt.s32.f32 %v1675_v37  ;;  %v2835_v8 = vcvt.s32.f32 %v1811_v43  ;;  %v3307_v7 = vpack.c.bf16 %v2571_v61, %v2563_v33  ;;  %v2843_v59 = vcvt.s32.f32 %v1819_v16 }
 0x219   :  { %4083 = vmatpush.bf16.msrb.mxu3 %v3515_v62  ;;  %v7903_v6 = vadd.f32 %v3784_v57, %v3770_v21  ;;  %v1523_v4 = vunpack.c.0.s8 %v859_v15  ;;  %v2963_v55 = vcvt.s32.f32 %v1939_v9  ;;  %v2971_v36 = vcvt.s32.f32 %v1947_v0  ;;  %v748_v9 = vld [vmem:[#allocation7 + $0xe8] sm:$0xff] }
 0x21a   :  { %v3371_v26 = vpack.c.bf16 %v2699_v1, %v2691_v51  ;;  %v1531_v20 = vunpack.c.1.s8 %v859_v15  ;;  %4043 = vmatpush.bf16.msrb.mxu0 %v3307_v7  ;;  %v3443_v11 = vpack.c.bf16 %v2843_v59, %v2835_v8  ;;  %v1651_v5 = vunpack.c.0.s8 %v891_v56 }
 0x21b   :  { %v2547_v54 = vcvt.s32.f32 %v1523_v4  ;;  %v1659_v58 = vunpack.c.1.s8 %v891_v56  ;;  %v3507_v53 = vpack.c.bf16 %v2971_v36, %v2963_v55  ;;  %v1795_v63 = vunpack.c.2.s8 %v923_v10 }
 0x21c   :  { %4057 = vmatpush.bf16.msrb.mxu1 %v3371_v26  ;;  %v2555_v49 = vcvt.s32.f32 %v1531_v20  ;;  %v1803_v60 = vunpack.c.3.s8 %v923_v10  ;;  %4070 = vmatpush.bf16.msrb.mxu2 %v3443_v11  ;;  %v2675_v32 = vcvt.s32.f32 %v1651_v5  ;;  %v1923_v40 = vunpack.c.2.s8 %v955_v14  ;;  %v7908_v26 = vld [vmem:[#allocation7 + $0x1e8] sm:$0xff] }
 0x21d   :  { %v2683_v46 = vcvt.s32.f32 %v1659_v58  ;;  %v1931_v52 = vunpack.c.3.s8 %v955_v14  ;;  %4084 = vmatpush.bf16.msrb.mxu3 %v3507_v53  ;;  %v2819_v17 = vcvt.s32.f32 %v1795_v63  ;;  %v3797_v18 = vadd.f32 %v3796_v12, %v7898_v31  ;;  %v915_v12 = vld [vmem:[#allocation7 + $0x620] sm:$0xff] }
 0x21e   :  { %v3299_v15 = vpack.c.bf16 %v2555_v49, %v2547_v54  ;;  %v2827_v39 = vcvt.s32.f32 %v1803_v60  ;;  %v2947_v34 = vcvt.s32.f32 %v1923_v40  ;;  %v1507_v27 = vunpack.c.2.s8 %v851_v19  ;;  %v947_v60 = vld [vmem:[#allocation7 + $0x720] sm:$0xff] }
 0x21f   :  { %v3363_v56 = vpack.c.bf16 %v2683_v46, %v2675_v32  ;;  %v2955_v30 = vcvt.s32.f32 %v1931_v52  ;;  %v7906_v47 = vadd.f32 %v3810_v41, %v3797_v18  ;;  %v1515_v28 = vunpack.c.3.s8 %v851_v19  ;;  %v3798_v52 = vpop.f32.mrf.mxu2 }
 0x220   :  { %4044 = vmatpush.bf16.msrb.mxu0 %v3299_v15  ;;  %v3435_v3 = vpack.c.bf16 %v2827_v39, %v2819_v17  ;;  %v1635_v42 = vunpack.c.2.s8 %v883_v25  ;;  %v2531_v37 = vcvt.s32.f32 %v1507_v27  ;;  %v1643_v43 = vunpack.c.3.s8 %v883_v25 }
 0x221   :  { %4058 = vmatpush.bf16.msrb.mxu1 %v3363_v56  ;;  %v3499_v33 = vpack.c.bf16 %v2955_v30, %v2947_v34  ;;  %v1779_v21 = vunpack.c.0.s8 %v923_v10  ;;  %v2539_v57 = vcvt.s32.f32 %v1515_v28  ;;  %v1787_v31 = vunpack.c.1.s8 %v923_v10 }
 0x222   :  { %4071 = vmatpush.bf16.msrb.mxu2 %v3435_v3  ;;  %v2659_v62 = vcvt.s32.f32 %v1635_v42  ;;  %v1907_v61 = vunpack.c.0.s8 %v955_v14  ;;  %v2667_v51 = vcvt.s32.f32 %v1643_v43  ;;  %v1915_v1 = vunpack.c.1.s8 %v955_v14  ;;  %v3812_v43 = vpop.f32.mrf.mxu3 }
 0x223   :  { %4085 = vmatpush.bf16.msrb.mxu3 %v3499_v33  ;;  %v2803_v16 = vcvt.s32.f32 %v1779_v21  ;;  %v1491_v8 = vunpack.c.0.s8 %v851_v19  ;;  %v3291_v0 = vpack.c.bf16 %v2539_v57, %v2531_v37  ;;  %v2811_v7 = vcvt.s32.f32 %v1787_v31 }
 0x224   :  { %v2931_v59 = vcvt.s32.f32 %v1907_v61  ;;  %v1499_v4 = vunpack.c.1.s8 %v851_v19  ;;  %v3355_v55 = vpack.c.bf16 %v2667_v51, %v2659_v62  ;;  %v2939_v36 = vcvt.s32.f32 %v1915_v1  ;;  %v812_v51 = vld [vmem:[#allocation7 + $0x2e8] sm:$0xff] }
 0x225   :  { %v2515_v20 = vcvt.s32.f32 %v1491_v8  ;;  %v1619_v11 = vunpack.c.0.s8 %v883_v25  ;;  %4045 = vmatpush.bf16.msrb.mxu0 %v3291_v0  ;;  %v3427_v54 = vpack.c.bf16 %v2811_v7, %v2803_v16  ;;  %v1627_v5 = vunpack.c.1.s8 %v883_v25 }
 0x226   :  { %v2523_v10 = vcvt.s32.f32 %v1499_v4  ;;  %v1092_v58 = vunpack.c.2.s8 %v748_v9  ;;  %4059 = vmatpush.bf16.msrb.mxu1 %v3355_v55  ;;  %v3491_v14 = vpack.c.bf16 %v2939_v36, %v2931_v59  ;;  %v1100_v49 = vunpack.c.3.s8 %v748_v9  ;;  %v844_v55 = vld [vmem:[#allocation7 + $0x3e8] sm:$0xff] }
 0x227   :  { %v2643_v53 = vcvt.s32.f32 %v1619_v11  ;;  %v1220_v63 = vunpack.c.2.s8 %v7908_v26  ;;  %4072 = vmatpush.bf16.msrb.mxu2 %v3427_v54  ;;  %v2651_v32 = vcvt.s32.f32 %v1627_v5  ;;  %v1228_v40 = vunpack.c.3.s8 %v7908_v26  ;;  %v740_v54 = vld [vmem:[#allocation7 + $0xa8] sm:$0xff] }
 0x228   :  { %v3283_v19 = vpack.c.bf16 %v2523_v10, %v2515_v20  ;;  %v2116_v46 = vcvt.s32.f32 %v1092_v58  ;;  %4086 = vmatpush.bf16.msrb.mxu3 %v3491_v14  ;;  %v2124_v15 = vcvt.s32.f32 %v1100_v49  ;;  %v1763_v25 = vunpack.c.2.s8 %v915_v12 }
 0x229   :  { %v2244_v17 = vcvt.s32.f32 %v1220_v63  ;;  %v1771_v39 = vunpack.c.3.s8 %v915_v12  ;;  %v3347_v18 = vpack.c.bf16 %v2651_v32, %v2643_v53  ;;  %v2252_v56 = vcvt.s32.f32 %v1228_v40 }
 0x22a   :  { %4046 = vmatpush.bf16.msrb.mxu0 %v3283_v19  ;;  %v1891_v34 = vunpack.c.2.s8 %v947_v60  ;;  %v1899_v30 = vunpack.c.3.s8 %v947_v60  ;;  %v3084_v41 = vpack.c.bf16 %v2124_v15, %v2116_v46  ;;  %v2787_v27 = vcvt.s32.f32 %v1763_v25 }
 0x22b   :  { %v2795_v3 = vcvt.s32.f32 %v1771_v39  ;;  %v3799_v28 = vadd.f32 %v3798_v52, %v7903_v6  ;;  %4060 = vmatpush.bf16.msrb.mxu1 %v3347_v18  ;;  %v3148_v42 = vpack.c.bf16 %v2252_v56, %v2244_v17  ;;  %v1076_v21 = vunpack.c.0.s8 %v748_v9 }
 0x22c   :  { %v2915_v33 = vcvt.s32.f32 %v1891_v34  ;;  %v2923_v37 = vcvt.s32.f32 %v1899_v30  ;;  %v1084_v31 = vunpack.c.1.s8 %v748_v9  ;;  %v1204_v61 = vunpack.c.0.s8 %v7908_v26  ;;  %v3824_v34 = vpop.f32.mrf.mxu0 }
 0x22d   :  { %v3419_v57 = vpack.c.bf16 %v2795_v3, %v2787_v27  ;;  %v7913_v62 = vadd.f32 %v3812_v43, %v3799_v28  ;;  %4047 = vmatmul.bf16.vlgmr.msrb.gmra.mxu0 %v7732_v24  ;;  %v2100_v1 = vcvt.s32.f32 %v1076_v21  ;;  %v1212_v6 = vunpack.c.1.s8 %v7908_v26  ;;  %v7919_v26 = vld [vmem:[#allocation7 + $0x1a8] sm:$0xff] }
 0x22e   :  { %4095 = vmatpush.bf16.msra.mxu0 %v3084_v41  ;;  %v3483_v16 = vpack.c.bf16 %v2923_v37, %v2915_v33  ;;  %v1747_v8 = vunpack.c.0.s8 %v915_v12  ;;  %4061 = vmatmul.bf16.vlgmr.msrb.gmra.mxu1 %v7735_v48  ;;  %v2108_v0 = vcvt.s32.f32 %v1084_v31  ;;  %v2228_v7 = vcvt.s32.f32 %v1204_v61  ;;  %v804_v61 = vld [vmem:[#allocation7 + $0x2a8] sm:$0xff] }
 0x22f   :  { %4109 = vmatpush.bf16.msra.mxu1 %v3148_v42  ;;  %4073 = vmatpush.bf16.msrb.mxu2 %v3419_v57  ;;  %v1755_v59 = vunpack.c.1.s8 %v915_v12  ;;  %v1875_v4 = vunpack.c.0.s8 %v947_v60  ;;  %v2236_v9 = vcvt.s32.f32 %v1212_v6  ;;  %v1883_v20 = vunpack.c.1.s8 %v947_v60 }
 0x230   :  { %4087 = vmatpush.bf16.msrb.mxu3 %v3483_v16  ;;  %v2771_v36 = vcvt.s32.f32 %v1747_v8  ;;  %v1348_v11 = vunpack.c.2.s8 %v812_v51  ;;  %v3076_v10 = vpack.c.bf16 %v2108_v0, %v2100_v1  ;;  %v1356_v14 = vunpack.c.3.s8 %v812_v51  ;;  %v3838_v8 = vpop.f32.mrf.mxu1 }
 0x231   :  { %v2779_v5 = vcvt.s32.f32 %v1755_v59  ;;  %v2899_v58 = vcvt.s32.f32 %v1875_v4  ;;  %v3140_v53 = vpack.c.bf16 %v2236_v9, %v2228_v7  ;;  %v2907_v49 = vcvt.s32.f32 %v1883_v20  ;;  %v732_v9 = vld [vmem:[#allocation7 + $0x68] sm:$0xff] }
 0x232   :  { %v2372_v63 = vcvt.s32.f32 %v1348_v11  ;;  %v1476_v19 = vunpack.c.2.s8 %v844_v55  ;;  %4096 = vmatpush.bf16.msra.mxu0 %v3076_v10  ;;  %v2380_v32 = vcvt.s32.f32 %v1356_v14  ;;  %v1484_v46 = vunpack.c.3.s8 %v844_v55 }
 0x233   :  { %v3411_v12 = vpack.c.bf16 %v2779_v5, %v2771_v36  ;;  %v1060_v40 = vunpack.c.2.s8 %v740_v54  ;;  %4110 = vmatpush.bf16.msra.mxu1 %v3140_v53  ;;  %v3475_v52 = vpack.c.bf16 %v2907_v49, %v2899_v58  ;;  %v1068_v15 = vunpack.c.3.s8 %v740_v54  ;;  %v764_v53 = vld [vmem:[#allocation7 + $0x168] sm:$0xff] }
 0x234   :  { %v2500_v60 = vcvt.s32.f32 %v1476_v19  ;;  %v1188_v17 = vunpack.c.2.s8 %v7919_v26  ;;  %v3212_v25 = vpack.c.bf16 %v2380_v32, %v2372_v63  ;;  %v2508_v39 = vcvt.s32.f32 %v1484_v46 }
 0x235   :  { %4074 = vmatpush.bf16.msrb.mxu2 %v3411_v12  ;;  %v2084_v18 = vcvt.s32.f32 %v1060_v40  ;;  %v1196_v56 = vunpack.c.3.s8 %v7919_v26  ;;  %4088 = vmatpush.bf16.msrb.mxu3 %v3475_v52  ;;  %v2092_v30 = vcvt.s32.f32 %v1068_v15  ;;  %v1332_v27 = vunpack.c.0.s8 %v812_v51 }
 0x236   :  { %v2212_v41 = vcvt.s32.f32 %v1188_v17  ;;  %v1340_v3 = vunpack.c.1.s8 %v812_v51  ;;  %v3276_v28 = vpack.c.bf16 %v2508_v39, %v2500_v60  ;;  %v1460_v33 = vunpack.c.0.s8 %v844_v55  ;;  %v836_v51 = vld [vmem:[#allocation7 + $0x3a8] sm:$0xff] }
 0x237   :  { %v2220_v42 = vcvt.s32.f32 %v1196_v56  ;;  %v1468_v37 = vunpack.c.1.s8 %v844_v55  ;;  %v3068_v43 = vpack.c.bf16 %v2092_v30, %v2084_v18  ;;  %v2356_v21 = vcvt.s32.f32 %v1332_v27  ;;  %v3826_v56 = vpop.f32.mrf.mxu0 }
 0x238   :  { %4075 = vmatmul.bf16.vlgmr.msrb.gmra.mxu2 %v7751_v45  ;;  %v2364_v57 = vcvt.s32.f32 %v1340_v3  ;;  %v3825_v31 = vadd.f32 %v3824_v34, %v7906_v47  ;;  %v2484_v1 = vcvt.s32.f32 %v1460_v33  ;;  %v1044_v0 = vunpack.c.0.s8 %v740_v54  ;;  %4089 = vmatmul.bf16.vlgmr.msrb.gmra.mxu3 %v7753_v38 }
 0x239   :  { %4123 = vmatpush.bf16.msra.mxu2 %v3212_v25  ;;  %4137 = vmatpush.bf16.msra.mxu3 %v3276_v28  ;;  %v3132_v16 = vpack.c.bf16 %v2220_v42, %v2212_v41  ;;  %v2492_v6 = vcvt.s32.f32 %v1468_v37  ;;  %v1052_v4 = vunpack.c.1.s8 %v740_v54  ;;  %v1172_v55 = vunpack.c.0.s8 %v7919_v26 }
 0x23a   :  { %4097 = vmatpush.bf16.msra.mxu0 %v3068_v43  ;;  %v3204_v7 = vpack.c.bf16 %v2364_v57, %v2356_v21  ;;  %v7926_v59 = vadd.f32 %v3838_v8, %v3825_v31  ;;  %v2068_v36 = vcvt.s32.f32 %v1044_v0  ;;  %v1180_v20 = vunpack.c.1.s8 %v7919_v26  ;;  %v796_v31 = vld [vmem:[#allocation7 + $0x268] sm:$0xff] }
 0x23b   :  { %4111 = vmatpush.bf16.msra.mxu1 %v3132_v16  ;;  %v3268_v47 = vpack.c.bf16 %v2492_v6, %v2484_v1  ;;  %v1316_v11 = vunpack.c.2.s8 %v804_v61  ;;  %v2076_v10 = vcvt.s32.f32 %v1052_v4  ;;  %v2196_v5 = vcvt.s32.f32 %v1172_v55  ;;  %v3840_v6 = vpop.f32.mrf.mxu1 }
 0x23c   :  { %v1324_v58 = vunpack.c.3.s8 %v804_v61  ;;  %v1444_v14 = vunpack.c.2.s8 %v836_v51  ;;  %v2204_v49 = vcvt.s32.f32 %v1180_v20  ;;  %v1452_v19 = vunpack.c.3.s8 %v836_v51 }
 0x23d   :  { %4124 = vmatpush.bf16.msra.mxu2 %v3204_v7  ;;  %4138 = vmatpush.bf16.msra.mxu3 %v3268_v47  ;;  %v2340_v63 = vcvt.s32.f32 %v1316_v11  ;;  %v1028_v54 = vunpack.c.2.s8 %v732_v9  ;;  %v3060_v12 = vpack.c.bf16 %v2076_v10, %v2068_v36  ;;  %v1036_v40 = vunpack.c.3.s8 %v732_v9 }
 0x23e   :  { %v2348_v32 = vcvt.s32.f32 %v1324_v58  ;;  %v2468_v46 = vcvt.s32.f32 %v1444_v14  ;;  %v3124_v52 = vpack.c.bf16 %v2204_v49, %v2196_v5  ;;  %v2476_v60 = vcvt.s32.f32 %v1452_v19  ;;  %v724_v49 = vld [vmem:[#allocation7 + $0x28] sm:$0xff] }
 0x23f   :  { %v2052_v15 = vcvt.s32.f32 %v1028_v54  ;;  %v1156_v26 = vunpack.c.2.s8 %v764_v53  ;;  %4098 = vmatpush.bf16.msra.mxu0 %v3060_v12  ;;  %v2060_v25 = vcvt.s32.f32 %v1036_v40  ;;  %v1164_v39 = vunpack.c.3.s8 %v764_v53 }
 0x240   :  { %v3196_v17 = vpack.c.bf16 %v2348_v32, %v2340_v63  ;;  %v1300_v18 = vunpack.c.0.s8 %v804_v61  ;;  %4112 = vmatpush.bf16.msra.mxu1 %v3124_v52  ;;  %v3260_v34 = vpack.c.bf16 %v2476_v60, %v2468_v46  ;;  %v1308_v41 = vunpack.c.1.s8 %v804_v61  ;;  %v828_v61 = vld [vmem:[#allocation7 + $0x368] sm:$0xff]  ;;  %v3866_v52 = vpop.f32.mrf.mxu3 }
 0x241   :  { %v2180_v30 = vcvt.s32.f32 %v1156_v26  ;;  %v1428_v27 = vunpack.c.0.s8 %v836_v51  ;;  %v3052_v3 = vpack.c.bf16 %v2060_v25, %v2052_v15  ;;  %v2188_v28 = vcvt.s32.f32 %v1164_v39 }
 0x242   :  { %4125 = vmatpush.bf16.msra.mxu2 %v3196_v17  ;;  %v2324_v42 = vcvt.s32.f32 %v1300_v18  ;;  %v1436_v33 = vunpack.c.1.s8 %v836_v51  ;;  %4139 = vmatpush.bf16.msra.mxu3 %v3260_v34  ;;  %v2332_v37 = vcvt.s32.f32 %v1308_v41  ;;  %v3827_v21 = vadd.f32 %v3826_v56, %v7913_v62  ;;  %v3852_v51 = vpop.f32.mrf.mxu2 }
 0x243   :  { %v2452_v43 = vcvt.s32.f32 %v1428_v27  ;;  %v1012_v57 = vunpack.c.0.s8 %v732_v9  ;;  %4099 = vmatpush.bf16.msra.mxu0 %v3052_v3  ;;  %v3116_v16 = vpack.c.bf16 %v2188_v28, %v2180_v30  ;;  %v1020_v8 = vunpack.c.1.s8 %v732_v9 }
 0x244   :  { %v2460_v1 = vcvt.s32.f32 %v1436_v33  ;;  %v1140_v0 = vunpack.c.0.s8 %v764_v53  ;;  %v3188_v7 = vpack.c.bf16 %v2332_v37, %v2324_v42  ;;  %v7931_v4 = vadd.f32 %v3840_v6, %v3827_v21 }
 0x245   :  { %v2036_v55 = vcvt.s32.f32 %v1012_v57  ;;  %v1148_v47 = vunpack.c.1.s8 %v764_v53  ;;  %4113 = vmatpush.bf16.msra.mxu1 %v3116_v16  ;;  %v2044_v20 = vcvt.s32.f32 %v1020_v8  ;;  %v1284_v62 = vunpack.c.2.s8 %v796_v31  ;;  %v756_v53 = vld [vmem:[#allocation7 + $0x128] sm:$0xff] }
 0x246   :  { %v3252_v36 = vpack.c.bf16 %v2460_v1, %v2452_v43  ;;  %v2164_v11 = vcvt.s32.f32 %v1140_v0  ;;  %4126 = vmatpush.bf16.msra.mxu2 %v3188_v7  ;;  %v1292_v5 = vunpack.c.3.s8 %v796_v31  ;;  %v1412_v58 = vunpack.c.2.s8 %v828_v61  ;;  %v7942_v57 = vld [vmem:[#allocation7 + $0x4e8] sm:$0xff] }
 0x247   :  { %v2172_v10 = vcvt.s32.f32 %v1148_v47  ;;  %v1420_v14 = vunpack.c.3.s8 %v828_v61  ;;  %v3044_v9 = vpack.c.bf16 %v2044_v20, %v2036_v55  ;;  %v2308_v63 = vcvt.s32.f32 %v1284_v62  ;;  %v908_v47 = vld [vmem:[#allocation7 + $0x5e8] sm:$0xff] }
 0x248   :  { %4140 = vmatpush.bf16.msra.mxu3 %v3252_v36  ;;  %v3853_v19 = vadd.f32 %v3852_v51, %v7926_v59  ;;  %v4442_v54 = vperm.slane %v7814_v22, 2  ;;  %v2316_v32 = vcvt.s32.f32 %v1292_v5  ;;  %v2436_v46 = vcvt.s32.f32 %v1412_v58 }
 0x249   :  { %v3108_v12 = vpack.c.bf16 %v2172_v10, %v2164_v11  ;;  %v2444_v40 = vcvt.s32.f32 %v1420_v14  ;;  %4100 = vmatpush.bf16.msra.mxu0 %v3044_v9  ;;  %v4475_v15 = vperm.slane %v7816_v29, 2  ;;  %v996_v26 = vunpack.c.2.s8 %v724_v49  ;;  %v7947_v14 = vld [vmem:[#allocation7 + $0x328] sm:$0xff] }
 0x24a   :  { %v3867_v60 = vadd.f32 %v3866_v52, %v3853_v19  ;;  %v1004_v17 = vunpack.c.3.s8 %v724_v49  ;;  %v3180_v25 = vpack.c.bf16 %v2316_v32, %v2308_v63  ;;  %v1124_v18 = vunpack.c.2.s8 %v756_v53 }
 0x24b   :  { %4114 = vmatpush.bf16.msra.mxu1 %v3108_v12  ;;  %v3244_v39 = vpack.c.bf16 %v2444_v40, %v2436_v46  ;;  %v1132_v56 = vunpack.c.3.s8 %v756_v53  ;;  %v2020_v34 = vcvt.s32.f32 %v996_v26  ;;  %v1268_v41 = vunpack.c.0.s8 %v796_v31  ;;  %v3854_v40 = vpop.f32.mrf.mxu2 }
 0x24c   :  { %v4458_v59 = vmul.f32 %v4442_v54, %v3867_v60  ;;  %v2028_v30 = vcvt.s32.f32 %v1004_v17  ;;  %4127 = vmatpush.bf16.msra.mxu2 %v3180_v25  ;;  %v2148_v27 = vcvt.s32.f32 %v1124_v18  ;;  %v1276_v28 = vunpack.c.1.s8 %v796_v31 }
 0x24d   :  { %4141 = vmatpush.bf16.msra.mxu3 %v3244_v39  ;;  %v2156_v3 = vcvt.s32.f32 %v1132_v56  ;;  %v1396_v42 = vunpack.c.0.s8 %v828_v61  ;;  %v2292_v43 = vcvt.s32.f32 %v1268_v41  ;;  %v1404_v21 = vunpack.c.1.s8 %v828_v61  ;;  %v788_v61 = vld [vmem:[#allocation7 + $0x228] sm:$0xff] }
 0x24e   :  { %v7940_v33 = vadd.f32 %v4475_v15, %v4458_v59  ;;  %v3036_v37 = vpack.c.bf16 %v2028_v30, %v2020_v34  ;;  %v2300_v1 = vcvt.s32.f32 %v1276_v28  ;;  %v980_v8 = vunpack.c.0.s8 %v724_v49  ;;  %v3868_v28 = vpop.f32.mrf.mxu3 }
 0x24f   :  { %v3100_v16 = vpack.c.bf16 %v2156_v3, %v2148_v27  ;;  %v2420_v6 = vcvt.s32.f32 %v1396_v42  ;;  %v2428_v7 = vcvt.s32.f32 %v1404_v21  ;;  %v988_v55 = vunpack.c.1.s8 %v724_v49 }
 0x250   :  { %v4507_v0 = vmax.f32 %v7940_v33, 0.0  ;;  %4101 = vmatpush.bf16.msra.mxu0 %v3036_v37  ;;  %v1108_v31 = vunpack.c.0.s8 %v756_v53  ;;  %v3172_v51 = vpack.c.bf16 %v2300_v1, %v2292_v43  ;;  %v2004_v36 = vcvt.s32.f32 %v980_v8 }
 0x251   :  { %4115 = vmatpush.bf16.msra.mxu1 %v3100_v16  ;;  %v1116_v20 = vunpack.c.1.s8 %v756_v53  ;;  %v1604_v11 = vunpack.c.2.s8 %v7942_v57  ;;  %v3236_v62 = vpack.c.bf16 %v2428_v7, %v2420_v6  ;;  %v2012_v10 = vcvt.s32.f32 %v988_v55  ;;  %v940_v6 = vld [vmem:[#allocation7 + $0x6e8] sm:$0xff] }
 0x252   :  { %v2132_v5 = vcvt.s32.f32 %v1108_v31  ;;  %v1612_v58 = vunpack.c.3.s8 %v7942_v57  ;;  %4128 = vmatpush.bf16.msra.mxu2 %v3172_v51  ;;  %v1732_v49 = vunpack.c.2.s8 %v908_v47  ;;  %v1740_v19 = vunpack.c.3.s8 %v908_v47 }
 0x253   :  { %v2140_v9 = vcvt.s32.f32 %v1116_v20  ;;  %v2628_v63 = vcvt.s32.f32 %v1604_v11  ;;  %4142 = vmatpush.bf16.msra.mxu3 %v3236_v62  ;;  %v3028_v12 = vpack.c.bf16 %v2012_v10, %v2004_v36  ;;  %v1252_v46 = vunpack.c.2.s8 %v788_v61  ;;  %v972_v20 = vld [vmem:[#allocation7 + $0x7e8] sm:$0xff] }
 0x254   :  { %v2636_v32 = vcvt.s32.f32 %v1612_v58  ;;  %v1260_v53 = vunpack.c.3.s8 %v788_v61  ;;  %v2756_v60 = vcvt.s32.f32 %v1732_v49  ;;  %v2764_v26 = vcvt.s32.f32 %v1740_v19  ;;  %v900_v49 = vld [vmem:[#allocation7 + $0x5a8] sm:$0xff] }
 0x255   :  { %v3092_v52 = vpack.c.bf16 %v2140_v9, %v2132_v5  ;;  %v1380_v17 = vunpack.c.2.s8 %v7947_v14  ;;  %4102 = vmatpush.bf16.msra.mxu0 %v3028_v12  ;;  %v2276_v39 = vcvt.s32.f32 %v1252_v46  ;;  %v1388_v56 = vunpack.c.3.s8 %v7947_v14  ;;  %v868_v5 = vld [vmem:[#allocation7 + $0x4a8] sm:$0xff] }
 0x256   :  { %v3340_v25 = vpack.c.bf16 %v2636_v32, %v2628_v63  ;;  %v2284_v18 = vcvt.s32.f32 %v1260_v53  ;;  %v3404_v59 = vpack.c.bf16 %v2764_v26, %v2756_v60  ;;  %v3855_v30 = vadd.f32 %v3854_v40, %v7931_v4 }
 0x257   :  { %4116 = vmatpush.bf16.msra.mxu1 %v3092_v52  ;;  %v2404_v34 = vcvt.s32.f32 %v1380_v17  ;;  %v1588_v41 = vunpack.c.0.s8 %v7942_v57  ;;  %v2412_v3 = vcvt.s32.f32 %v1388_v56  ;;  %v1596_v42 = vunpack.c.1.s8 %v7942_v57  ;;  %v3880_v56 = vpop.f32.mrf.mxu0 }
 0x258   :  { %v3164_v27 = vpack.c.bf16 %v2284_v18, %v2276_v39  ;;  %v1716_v37 = vunpack.c.0.s8 %v908_v47  ;;  %v3869_v43 = vadd.f32 %v3868_v28, %v3855_v30  ;;  %4103 = vmatmul.bf16.vlgmr.msra.gmra.mxu0 %v7602_v50  ;;  %v1724_v16 = vunpack.c.1.s8 %v908_v47 }
 0x259   :  { %4151 = vmatpush.bf16.msrb.mxu0 %v3340_v25  ;;  %v2612_v21 = vcvt.s32.f32 %v1588_v41  ;;  %v1236_v1 = vunpack.c.0.s8 %v788_v61  ;;  %v3228_v8 = vpack.c.bf16 %v2412_v3, %v2404_v34  ;;  %v2620_v4 = vcvt.s32.f32 %v1596_v42 }
 0x25a   :  { %4129 = vmatpush.bf16.msra.mxu2 %v3164_v27  ;;  %4117 = vmatmul.bf16.vlgmr.msra.gmra.mxu1 %v7598_v44  ;;  %v2740_v7 = vcvt.s32.f32 %v1716_v37  ;;  %v1244_v55 = vunpack.c.1.s8 %v788_v61  ;;  %v4466_v31 = vmul.f32 %v4442_v54, %v3869_v43  ;;  %v2748_v57 = vcvt.s32.f32 %v1724_v16  ;;  %v932_v16 = vld [vmem:[#allocation7 + $0x6a8] sm:$0xff] }
 0x25b   :  { %4165 = vmatpush.bf16.msrb.mxu1 %v3404_v59  ;;  %v2260_v51 = vcvt.s32.f32 %v1236_v1  ;;  %v1364_v36 = vunpack.c.0.s8 %v7947_v14  ;;  %4143 = vmatpush.bf16.msra.mxu3 %v3228_v8  ;;  %v3332_v11 = vpack.c.bf16 %v2620_v4, %v2612_v21  ;;  %v1372_v62 = vunpack.c.1.s8 %v7947_v14  ;;  %v3894_v59 = vpop.f32.mrf.mxu1 }
 0x25c   :  { %v2268_v47 = vcvt.s32.f32 %v1244_v55  ;;  %v1860_v10 = vunpack.c.2.s8 %v940_v6  ;;  %v4499_v58 = vadd.f32 %v4475_v15, %v4466_v31  ;;  %v3396_v9 = vpack.c.bf16 %v2748_v57, %v2740_v7 }
 0x25d   :  { %v2388_v61 = vcvt.s32.f32 %v1364_v36  ;;  %v1868_v63 = vunpack.c.3.s8 %v940_v6  ;;  %4152 = vmatpush.bf16.msrb.mxu0 %v3332_v11  ;;  %v2396_v19 = vcvt.s32.f32 %v1372_v62  ;;  %v1988_v32 = vunpack.c.2.s8 %v972_v20  ;;  %v860_v36 = vld [vmem:[#allocation7 + $0x468] sm:$0xff] }
 0x25e   :  { %v3156_v54 = vpack.c.bf16 %v2268_v47, %v2260_v51  ;;  %v2884_v12 = vcvt.s32.f32 %v1860_v10  ;;  %v4515_v46 = vmax.f32 %v4499_v58, 0.0  ;;  %v1996_v40 = vunpack.c.3.s8 %v972_v20  ;;  %v964_v51 = vld [vmem:[#allocation7 + $0x7a8] sm:$0xff] }
 0x25f   :  { %4166 = vmatpush.bf16.msrb.mxu1 %v3396_v9  ;;  %v2892_v53 = vcvt.s32.f32 %v1868_v63  ;;  %v1572_v52 = vunpack.c.2.s8 %v868_v5  ;;  %v3220_v14 = vpack.c.bf16 %v2396_v19, %v2388_v61  ;;  %v3012_v60 = vcvt.s32.f32 %v1988_v32  ;;  %v892_v63 = vld [vmem:[#allocation7 + $0x568] sm:$0xff] }
 0x260   :  { %4130 = vmatpush.bf16.msra.mxu2 %v3156_v54  ;;  %v1580_v26 = vunpack.c.3.s8 %v868_v5  ;;  %v1700_v17 = vunpack.c.2.s8 %v900_v49  ;;  %v7964_v15 = vpack.c.bf16 %v4515_v46, %v4507_v0  ;;  %v3020_v39 = vcvt.s32.f32 %v1996_v40 }
 0x261   :  { %v3468_v25 = vpack.c.bf16 %v2892_v53, %v2884_v12  ;;  %v2596_v18 = vcvt.s32.f32 %v1572_v52  ;;  %4144 = vmatpush.bf16.msra.mxu3 %v3220_v14  ;;  %v1708_v30 = vunpack.c.3.s8 %v900_v49  ;;  %v1844_v27 = vunpack.c.0.s8 %v940_v6 }
 0x262   :  { %v2604_v34 = vcvt.s32.f32 %v1580_v26  ;;  %v2724_v41 = vcvt.s32.f32 %v1700_v17  ;;  %v3532_v3 = vpack.c.bf16 %v3020_v39, %v3012_v60  ;;  %v1852_v28 = vunpack.c.1.s8 %v940_v6 }
 0x263   :  { %v1972_v42 = vunpack.c.0.s8 %v972_v20  ;;  %v1980_v37 = vunpack.c.1.s8 %v972_v20  ;;  %4131 = vmatmul.bf16.vlgmr.msra.gmra.mxu2 %v7645_v2  ;;  %v2732_v0 = vcvt.s32.f32 %v1708_v30  ;;  %v2868_v43 = vcvt.s32.f32 %v1844_v27 }
 0x264   :  { %4179 = vmatpush.bf16.msrb.mxu2 %v3468_v25  ;;  %v3324_v33 = vpack.c.bf16 %v2604_v34, %v2596_v18  ;;  %v7967_v21 = vadd.f32 %v3894_v59, %v3880_v56  ;;  %v2876_v1 = vcvt.s32.f32 %v1852_v28  ;;  %v1556_v7 = vunpack.c.0.s8 %v868_v5  ;;  %4145 = vmatmul.bf16.vlgmr.msra.gmra.mxu3 %v7638_v23  ;;  %v3882_v18 = vpop.f32.mrf.mxu0  ;;  %v3896_v56 = vpop.f32.mrf.mxu1 }
 0x265   :  { %4193 = vmatpush.bf16.msrb.mxu3 %v3532_v3  ;;  %v2996_v8 = vcvt.s32.f32 %v1972_v42  ;;  %v3004_v4 = vcvt.s32.f32 %v1980_v37  ;;  %v3388_v55 = vpack.c.bf16 %v2732_v0, %v2724_v41  ;;  %v1564_v6 = vunpack.c.1.s8 %v868_v5  ;;  %v924_v37 = vld [vmem:[#allocation7 + $0x668] sm:$0xff] }
 0x266   :  { %4153 = vmatpush.bf16.msrb.mxu0 %v3324_v33  ;;  %v1684_v31 = vunpack.c.0.s8 %v900_v49  ;;  %v1692_v57 = vunpack.c.1.s8 %v900_v49  ;;  %v3460_v20 = vpack.c.bf16 %v2876_v1, %v2868_v43  ;;  %v2580_v47 = vcvt.s32.f32 %v1556_v7 }
 0x267   :  { %v3524_v11 = vpack.c.bf16 %v3004_v4, %v2996_v8  ;;  %v1828_v62 = vunpack.c.2.s8 %v932_v16  ;;  %4167 = vmatpush.bf16.msrb.mxu1 %v3388_v55  ;;  %v2588_v10 = vcvt.s32.f32 %v1564_v6  ;;  %v1836_v61 = vunpack.c.3.s8 %v932_v16  ;;  %v956_v6 = vld [vmem:[#allocation7 + $0x768] sm:$0xff] }
 0x268   :  { %v2708_v58 = vcvt.s32.f32 %v1684_v31  ;;  %v2716_v9 = vcvt.s32.f32 %v1692_v57  ;;  %4180 = vmatpush.bf16.msrb.mxu2 %v3460_v20  ;;  %v1956_v19 = vunpack.c.2.s8 %v964_v51  ;;  %v1964_v12 = vunpack.c.3.s8 %v964_v51 }
 0x269   :  { %4194 = vmatpush.bf16.msrb.mxu3 %v3524_v11  ;;  %v2852_v54 = vcvt.s32.f32 %v1828_v62  ;;  %v1540_v5 = vunpack.c.2.s8 %v860_v36  ;;  %v3316_v32 = vpack.c.bf16 %v2588_v10, %v2580_v47  ;;  %v2860_v46 = vcvt.s32.f32 %v1836_v61  ;;  %v3908_v11 = vpop.f32.mrf.mxu2  ;;  %v852_v47 = vld [vmem:[#allocation7 + $0x428] sm:$0xff] }
 0x26a   :  { %v3380_v49 = vpack.c.bf16 %v2716_v9, %v2708_v58  ;;  %v1548_v53 = vunpack.c.3.s8 %v860_v36  ;;  %v2980_v40 = vcvt.s32.f32 %v1956_v19  ;;  %v2988_v52 = vcvt.s32.f32 %v1964_v12  ;;  %v884_v12 = vld [vmem:[#allocation7 + $0x528] sm:$0xff] }
 0x26b   :  { %v2564_v14 = vcvt.s32.f32 %v1540_v5  ;;  %v1668_v60 = vunpack.c.2.s8 %v892_v63  ;;  %4154 = vmatpush.bf16.msrb.mxu0 %v3316_v32  ;;  %v3452_v26 = vpack.c.bf16 %v2860_v46, %v2852_v54  ;;  %v1676_v25 = vunpack.c.3.s8 %v892_v63 }
 0x26c   :  { %4168 = vmatpush.bf16.msrb.mxu1 %v3380_v49  ;;  %v2572_v17 = vcvt.s32.f32 %v1548_v53  ;;  %v1812_v39 = vunpack.c.0.s8 %v932_v16  ;;  %v3516_v59 = vpack.c.bf16 %v2988_v52, %v2980_v40  ;;  %v1820_v30 = vunpack.c.1.s8 %v932_v16  ;;  %v3922_v40 = vpop.f32.mrf.mxu3 }
 0x26d   :  { %v2692_v34 = vcvt.s32.f32 %v1668_v60  ;;  %v1940_v41 = vunpack.c.0.s8 %v964_v51  ;;  %4181 = vmatpush.bf16.msrb.mxu2 %v3452_v26  ;;  %v2700_v3 = vcvt.s32.f32 %v1676_v25  ;;  %v1948_v42 = vunpack.c.1.s8 %v964_v51 }
 0x26e   :  { %v3308_v27 = vpack.c.bf16 %v2572_v17, %v2564_v14  ;;  %v2836_v28 = vcvt.s32.f32 %v1812_v39  ;;  %4195 = vmatpush.bf16.msrb.mxu3 %v3516_v59  ;;  %v2844_v33 = vcvt.s32.f32 %v1820_v30  ;;  %v7970_v43 = vadd.f32 %v3896_v56, %v3882_v18 }
 0x26f   :  { %v2964_v0 = vcvt.s32.f32 %v1940_v41  ;;  %v1524_v1 = vunpack.c.0.s8 %v860_v36  ;;  %v3372_v8 = vpack.c.bf16 %v2700_v3, %v2692_v34  ;;  %v2972_v4 = vcvt.s32.f32 %v1948_v42  ;;  %v749_v42 = vld [vmem:[#allocation7 + $0xf0] sm:$0xff] }
 0x270   :  { %4155 = vmatpush.bf16.msrb.mxu0 %v3308_v27  ;;  %v1532_v7 = vunpack.c.1.s8 %v860_v36  ;;  %v1652_v55 = vunpack.c.0.s8 %v892_v63  ;;  %v3444_v16 = vpack.c.bf16 %v2844_v33, %v2836_v28  ;;  %v1660_v57 = vunpack.c.1.s8 %v892_v63 }
 0x271   :  { %v2548_v31 = vcvt.s32.f32 %v1524_v1  ;;  %v1796_v20 = vunpack.c.2.s8 %v924_v37  ;;  %4169 = vmatpush.bf16.msrb.mxu1 %v3372_v8  ;;  %v3508_v51 = vpack.c.bf16 %v2972_v4, %v2964_v0  ;;  %v1804_v58 = vunpack.c.3.s8 %v924_v37  ;;  %v7975_v4 = vld [vmem:[#allocation7 + $0x1f0] sm:$0xff] }
 0x272   :  { %v2556_v62 = vcvt.s32.f32 %v1532_v7  ;;  %v2676_v10 = vcvt.s32.f32 %v1652_v55  ;;  %4182 = vmatpush.bf16.msrb.mxu2 %v3444_v16  ;;  %v2684_v9 = vcvt.s32.f32 %v1660_v57  ;;  %v1924_v54 = vunpack.c.2.s8 %v956_v6 }
 0x273   :  { %v2820_v61 = vcvt.s32.f32 %v1796_v20  ;;  %v1932_v19 = vunpack.c.3.s8 %v956_v6  ;;  %4196 = vmatpush.bf16.msrb.mxu3 %v3508_v51  ;;  %v2828_v5 = vcvt.s32.f32 %v1804_v58  ;;  %v3909_v32 = vadd.f32 %v3908_v11, %v7967_v21 }
 0x274   :  { %v3300_v36 = vpack.c.bf16 %v2556_v62, %v2548_v31  ;;  %v1508_v63 = vunpack.c.2.s8 %v852_v47  ;;  %v3364_v49 = vpack.c.bf16 %v2684_v9, %v2676_v10  ;;  %v2948_v46 = vcvt.s32.f32 %v1924_v54  ;;  %v948_v9 = vld [vmem:[#allocation7 + $0x728] sm:$0xff] }
 0x275   :  { %v2956_v53 = vcvt.s32.f32 %v1932_v19  ;;  %v1516_v52 = vunpack.c.3.s8 %v852_v47  ;;  %v3436_v14 = vpack.c.bf16 %v2828_v5, %v2820_v61  ;;  %v7973_v60 = vadd.f32 %v3922_v40, %v3909_v32 }
 0x276   :  { %4156 = vmatpush.bf16.msrb.mxu0 %v3300_v36  ;;  %v2532_v26 = vcvt.s32.f32 %v1508_v63  ;;  %v1636_v17 = vunpack.c.2.s8 %v884_v12  ;;  %4170 = vmatpush.bf16.msrb.mxu1 %v3364_v49  ;;  %v1644_v18 = vunpack.c.3.s8 %v884_v12  ;;  %v1780_v56 = vunpack.c.0.s8 %v924_v37 }
 0x277   :  { %v3500_v25 = vpack.c.bf16 %v2956_v53, %v2948_v46  ;;  %v2540_v39 = vcvt.s32.f32 %v1516_v52  ;;  %4183 = vmatpush.bf16.msrb.mxu2 %v3436_v14  ;;  %v1788_v21 = vunpack.c.1.s8 %v924_v37  ;;  %v1908_v34 = vunpack.c.0.s8 %v956_v6  ;;  %v916_v37 = vld [vmem:[#allocation7 + $0x628] sm:$0xff] }
 0x278   :  { %v2660_v59 = vcvt.s32.f32 %v1636_v17  ;;  %v1916_v30 = vunpack.c.1.s8 %v956_v6  ;;  %v2668_v27 = vcvt.s32.f32 %v1644_v18  ;;  %v2804_v3 = vcvt.s32.f32 %v1780_v56  ;;  %v3924_v56 = vpop.f32.mrf.mxu3 }
 0x279   :  { %4197 = vmatpush.bf16.msrb.mxu3 %v3500_v25  ;;  %v3292_v41 = vpack.c.bf16 %v2540_v39, %v2532_v26  ;;  %v1492_v28 = vunpack.c.0.s8 %v852_v47  ;;  %v2812_v33 = vcvt.s32.f32 %v1788_v21  ;;  %v2932_v0 = vcvt.s32.f32 %v1908_v34 }
 0x27a   :  { %v2940_v1 = vcvt.s32.f32 %v1916_v30  ;;  %v1500_v8 = vunpack.c.1.s8 %v852_v47  ;;  %v3356_v7 = vpack.c.bf16 %v2668_v27, %v2660_v59  ;;  %v1620_v16 = vunpack.c.0.s8 %v884_v12  ;;  %v813_v27 = vld [vmem:[#allocation7 + $0x2f0] sm:$0xff] }
 0x27b   :  { %4157 = vmatpush.bf16.msrb.mxu0 %v3292_v41  ;;  %v2516_v55 = vcvt.s32.f32 %v1492_v28  ;;  %v1628_v31 = vunpack.c.1.s8 %v884_v12  ;;  %v3428_v57 = vpack.c.bf16 %v2812_v33, %v2804_v3  ;;  %v1093_v11 = vunpack.c.2.s8 %v749_v42  ;;  %v3910_v12 = vpop.f32.mrf.mxu2 }
 0x27c   :  { %v3492_v6 = vpack.c.bf16 %v2940_v1, %v2932_v0  ;;  %v2524_v20 = vcvt.s32.f32 %v1500_v8  ;;  %4171 = vmatpush.bf16.msrb.mxu1 %v3356_v7  ;;  %v2644_v51 = vcvt.s32.f32 %v1620_v16  ;;  %v1101_v10 = vunpack.c.3.s8 %v749_v42  ;;  %v845_v7 = vld [vmem:[#allocation7 + $0x3f0] sm:$0xff] }
 0x27d   :  { %v2652_v62 = vcvt.s32.f32 %v1628_v31  ;;  %v1221_v58 = vunpack.c.2.s8 %v7975_v4  ;;  %4184 = vmatpush.bf16.msrb.mxu2 %v3428_v57  ;;  %v2117_v61 = vcvt.s32.f32 %v1093_v11  ;;  %v1229_v54 = vunpack.c.3.s8 %v7975_v4 }
 0x27e   :  { %4198 = vmatpush.bf16.msrb.mxu3 %v3492_v6  ;;  %v3284_v47 = vpack.c.bf16 %v2524_v20, %v2516_v55  ;;  %v1764_v19 = vunpack.c.2.s8 %v916_v37  ;;  %v2125_v5 = vcvt.s32.f32 %v1101_v10  ;;  %v1772_v63 = vunpack.c.3.s8 %v916_v37  ;;  %v741_v6 = vld [vmem:[#allocation7 + $0xb0] sm:$0xff] }
 0x27f   :  { %v3348_v36 = vpack.c.bf16 %v2652_v62, %v2644_v51  ;;  %v2245_v32 = vcvt.s32.f32 %v1221_v58  ;;  %v2253_v49 = vcvt.s32.f32 %v1229_v54  ;;  %v1892_v53 = vunpack.c.2.s8 %v948_v9 }
 0x280   :  { %4158 = vmatpush.bf16.msrb.mxu0 %v3284_v47  ;;  %v2788_v46 = vcvt.s32.f32 %v1764_v19  ;;  %v1900_v40 = vunpack.c.3.s8 %v948_v9  ;;  %v3085_v52 = vpack.c.bf16 %v2125_v5, %v2117_v61  ;;  %v2796_v14 = vcvt.s32.f32 %v1772_v63 }
 0x281   :  { %4172 = vmatpush.bf16.msrb.mxu1 %v3348_v36  ;;  %v3911_v26 = vadd.f32 %v3910_v12, %v7970_v43  ;;  %v1077_v17 = vunpack.c.0.s8 %v749_v42  ;;  %v3149_v25 = vpack.c.bf16 %v2253_v49, %v2245_v32  ;;  %v2916_v39 = vcvt.s32.f32 %v1892_v53 }
 0x282   :  { %v2924_v18 = vcvt.s32.f32 %v1900_v40  ;;  %v1085_v59 = vunpack.c.1.s8 %v749_v42  ;;  %v3420_v21 = vpack.c.bf16 %v2796_v14, %v2788_v46  ;;  %v1205_v41 = vunpack.c.0.s8 %v7975_v4  ;;  %v3936_v40 = vpop.f32.mrf.mxu0 }
 0x283   :  { %v7980_v34 = vadd.f32 %v3924_v56, %v3911_v26  ;;  %v2101_v30 = vcvt.s32.f32 %v1077_v17  ;;  %4159 = vmatmul.bf16.vlgmr.msrb.gmra.mxu0 %v7732_v24  ;;  %v1213_v43 = vunpack.c.1.s8 %v7975_v4  ;;  %v1748_v33 = vunpack.c.0.s8 %v916_v37  ;;  %v7986_v4 = vld [vmem:[#allocation7 + $0x1b0] sm:$0xff] }
 0x284   :  { %4207 = vmatpush.bf16.msra.mxu0 %v3085_v52  ;;  %v3484_v3 = vpack.c.bf16 %v2924_v18, %v2916_v39  ;;  %v2109_v28 = vcvt.s32.f32 %v1085_v59  ;;  %4185 = vmatpush.bf16.msrb.mxu2 %v3420_v21  ;;  %v2229_v42 = vcvt.s32.f32 %v1205_v41  ;;  %v1756_v0 = vunpack.c.1.s8 %v916_v37 }
 0x285   :  { %4221 = vmatpush.bf16.msra.mxu1 %v3149_v25  ;;  %v1876_v1 = vunpack.c.0.s8 %v948_v9  ;;  %v1884_v8 = vunpack.c.1.s8 %v948_v9  ;;  %v2237_v16 = vcvt.s32.f32 %v1213_v43  ;;  %v2772_v31 = vcvt.s32.f32 %v1748_v33 }
 0x286   :  { %4173 = vmatmul.bf16.vlgmr.msrb.gmra.mxu1 %v7735_v48  ;;  %4199 = vmatpush.bf16.msrb.mxu3 %v3484_v3  ;;  %v3077_v55 = vpack.c.bf16 %v2109_v28, %v2101_v30  ;;  %v1349_v57 = vunpack.c.2.s8 %v813_v27  ;;  %v2780_v20 = vcvt.s32.f32 %v1756_v0  ;;  %v1357_v62 = vunpack.c.3.s8 %v813_v27  ;;  %v805_v3 = vld [vmem:[#allocation7 + $0x2b0] sm:$0xff] }
 0x287   :  { %v2900_v11 = vcvt.s32.f32 %v1876_v1  ;;  %v2908_v51 = vcvt.s32.f32 %v1884_v8  ;;  %v3141_v10 = vpack.c.bf16 %v2237_v16, %v2229_v42  ;;  %v1477_v47 = vunpack.c.2.s8 %v845_v7  ;;  %v837_v0 = vld [vmem:[#allocation7 + $0x3b0] sm:$0xff] }
 0x288   :  { %4208 = vmatpush.bf16.msra.mxu0 %v3077_v55  ;;  %v2373_v58 = vcvt.s32.f32 %v1349_v57  ;;  %v1485_v37 = vunpack.c.3.s8 %v845_v7  ;;  %v3412_v61 = vpack.c.bf16 %v2780_v20, %v2772_v31  ;;  %v2381_v54 = vcvt.s32.f32 %v1357_v62  ;;  %v733_v16 = vld [vmem:[#allocation7 + $0x70] sm:$0xff] }
 0x289   :  { %v3476_v9 = vpack.c.bf16 %v2908_v51, %v2900_v11  ;;  %v1061_v19 = vunpack.c.2.s8 %v741_v6  ;;  %4222 = vmatpush.bf16.msra.mxu1 %v3141_v10  ;;  %v2501_v12 = vcvt.s32.f32 %v1477_v47  ;;  %v1069_v5 = vunpack.c.3.s8 %v741_v6  ;;  %v765_v10 = vld [vmem:[#allocation7 + $0x170] sm:$0xff] }
 0x28a   :  { %v2509_v36 = vcvt.s32.f32 %v1485_v37  ;;  %v1189_v32 = vunpack.c.2.s8 %v7986_v4  ;;  %4186 = vmatpush.bf16.msrb.mxu2 %v3412_v61  ;;  %v3213_v63 = vpack.c.bf16 %v2381_v54, %v2373_v58  ;;  %v1197_v46 = vunpack.c.3.s8 %v7986_v4 }
 0x28b   :  { %4200 = vmatpush.bf16.msrb.mxu3 %v3476_v9  ;;  %v2085_v49 = vcvt.s32.f32 %v1061_v19  ;;  %v1333_v53 = vunpack.c.0.s8 %v813_v27  ;;  %v2093_v14 = vcvt.s32.f32 %v1069_v5  ;;  %v1341_v17 = vunpack.c.1.s8 %v813_v27  ;;  %v3950_v27 = vpop.f32.mrf.mxu1 }
 0x28c   :  { %v3277_v52 = vpack.c.bf16 %v2509_v36, %v2501_v12  ;;  %v2213_v26 = vcvt.s32.f32 %v1189_v32  ;;  %v2221_v25 = vcvt.s32.f32 %v1197_v46  ;;  %v1461_v18 = vunpack.c.0.s8 %v845_v7 }
 0x28d   :  { %v2357_v39 = vcvt.s32.f32 %v1333_v53  ;;  %v1469_v56 = vunpack.c.1.s8 %v845_v7  ;;  %4187 = vmatmul.bf16.vlgmr.msrb.gmra.mxu2 %v7751_v45  ;;  %v3069_v59 = vpack.c.bf16 %v2093_v14, %v2085_v49  ;;  %v2365_v21 = vcvt.s32.f32 %v1341_v17 }
 0x28e   :  { %4235 = vmatpush.bf16.msra.mxu2 %v3213_v63  ;;  %v3937_v30 = vadd.f32 %v3936_v40, %v7973_v60  ;;  %v1045_v41 = vunpack.c.0.s8 %v741_v6  ;;  %4201 = vmatmul.bf16.vlgmr.msrb.gmra.mxu3 %v7753_v38  ;;  %v3133_v28 = vpack.c.bf16 %v2221_v25, %v2213_v26  ;;  %v2485_v43 = vcvt.s32.f32 %v1461_v18  ;;  %v3938_v63 = vpop.f32.mrf.mxu0 }
 0x28f   :  { %4249 = vmatpush.bf16.msra.mxu3 %v3277_v52  ;;  %v2493_v33 = vcvt.s32.f32 %v1469_v56  ;;  %v1053_v42 = vunpack.c.1.s8 %v741_v6  ;;  %4209 = vmatpush.bf16.msra.mxu0 %v3069_v59  ;;  %v3205_v1 = vpack.c.bf16 %v2365_v21, %v2357_v39  ;;  %v1173_v55 = vunpack.c.0.s8 %v7986_v4  ;;  %v797_v59 = vld [vmem:[#allocation7 + $0x270] sm:$0xff] }
 0x290   :  { %v7993_v8 = vadd.f32 %v3950_v27, %v3937_v30  ;;  %v2069_v7 = vcvt.s32.f32 %v1045_v41  ;;  %4223 = vmatpush.bf16.msra.mxu1 %v3133_v28  ;;  %v1181_v57 = vunpack.c.1.s8 %v7986_v4  ;;  %v1317_v20 = vunpack.c.2.s8 %v805_v3 }
 0x291   :  { %v3269_v60 = vpack.c.bf16 %v2493_v33, %v2485_v43  ;;  %v2077_v31 = vcvt.s32.f32 %v1053_v42  ;;  %v2197_v11 = vcvt.s32.f32 %v1173_v55  ;;  %v1325_v51 = vunpack.c.3.s8 %v805_v3 }
 0x292   :  { %4236 = vmatpush.bf16.msra.mxu2 %v3205_v1  ;;  %v1445_v62 = vunpack.c.2.s8 %v837_v0  ;;  %v1453_v6 = vunpack.c.3.s8 %v837_v0  ;;  %v2205_v47 = vcvt.s32.f32 %v1181_v57  ;;  %v2341_v37 = vcvt.s32.f32 %v1317_v20  ;;  %v829_v1 = vld [vmem:[#allocation7 + $0x370] sm:$0xff] }
 0x293   :  { %4250 = vmatpush.bf16.msra.mxu3 %v3269_v60  ;;  %v3061_v58 = vpack.c.bf16 %v2077_v31, %v2069_v7  ;;  %v1029_v61 = vunpack.c.2.s8 %v733_v16  ;;  %v2349_v9 = vcvt.s32.f32 %v1325_v51  ;;  %v1037_v12 = vunpack.c.3.s8 %v733_v16  ;;  %v3952_v28 = vpop.f32.mrf.mxu1  ;;  %v3964_v31 = vpop.f32.mrf.mxu2 }
 0x294   :  { %v2469_v54 = vcvt.s32.f32 %v1445_v62  ;;  %v2477_v19 = vcvt.s32.f32 %v1453_v6  ;;  %v3125_v36 = vpack.c.bf16 %v2205_v47, %v2197_v11  ;;  %v1157_v4 = vunpack.c.2.s8 %v765_v10  ;;  %v725_v47 = vld [vmem:[#allocation7 + $0x30] sm:$0xff] }
 0x295   :  { %4210 = vmatpush.bf16.msra.mxu0 %v3061_v58  ;;  %v2053_v5 = vcvt.s32.f32 %v1029_v61  ;;  %v1165_v32 = vunpack.c.3.s8 %v765_v10  ;;  %v3197_v49 = vpack.c.bf16 %v2349_v9, %v2341_v37  ;;  %v2061_v53 = vcvt.s32.f32 %v1037_v12 }
 0x296   :  { %v3261_v46 = vpack.c.bf16 %v2477_v19, %v2469_v54  ;;  %v1301_v40 = vunpack.c.0.s8 %v805_v3  ;;  %4224 = vmatpush.bf16.msra.mxu1 %v3125_v36  ;;  %v2181_v52 = vcvt.s32.f32 %v1157_v4  ;;  %v1309_v26 = vunpack.c.1.s8 %v805_v3  ;;  %v3978_v36 = vpop.f32.mrf.mxu3 }
 0x297   :  { %v2189_v14 = vcvt.s32.f32 %v1165_v32  ;;  %v1429_v17 = vunpack.c.0.s8 %v837_v0  ;;  %4237 = vmatpush.bf16.msra.mxu2 %v3197_v49  ;;  %v3053_v25 = vpack.c.bf16 %v2061_v53, %v2053_v5  ;;  %v1437_v18 = vunpack.c.1.s8 %v837_v0 }
 0x298   :  { %4251 = vmatpush.bf16.msra.mxu3 %v3261_v46  ;;  %v2325_v39 = vcvt.s32.f32 %v1301_v40  ;;  %v3939_v56 = vadd.f32 %v3938_v63, %v7980_v34  ;;  %v2333_v30 = vcvt.s32.f32 %v1309_v26  ;;  %v1013_v43 = vunpack.c.0.s8 %v733_v16 }
 0x299   :  { %v3117_v21 = vpack.c.bf16 %v2189_v14, %v2181_v52  ;;  %v2453_v41 = vcvt.s32.f32 %v1429_v17  ;;  %4211 = vmatpush.bf16.msra.mxu0 %v3053_v25  ;;  %v2461_v33 = vcvt.s32.f32 %v1437_v18  ;;  %v1021_v42 = vunpack.c.1.s8 %v733_v16 }
 0x29a   :  { %v7998_v27 = vadd.f32 %v3952_v28, %v3939_v56  ;;  %v1141_v3 = vunpack.c.0.s8 %v765_v10  ;;  %v3189_v7 = vpack.c.bf16 %v2333_v30, %v2325_v39  ;;  %v2037_v55 = vcvt.s32.f32 %v1013_v43  ;;  %v8009_v43 = vld [vmem:[#allocation7 + $0x4f0] sm:$0xff] }
 0x29b   :  { %4225 = vmatpush.bf16.msra.mxu1 %v3117_v21  ;;  %v1149_v60 = vunpack.c.1.s8 %v765_v10  ;;  %v1285_v0 = vunpack.c.2.s8 %v797_v59  ;;  %v3253_v34 = vpack.c.bf16 %v2461_v33, %v2453_v41  ;;  %v2045_v57 = vcvt.s32.f32 %v1021_v42  ;;  %v757_v10 = vld [vmem:[#allocation7 + $0x130] sm:$0xff] }
 0x29c   :  { %v2165_v20 = vcvt.s32.f32 %v1141_v3  ;;  %v1293_v11 = vunpack.c.3.s8 %v797_v59  ;;  %4238 = vmatpush.bf16.msra.mxu2 %v3189_v7  ;;  %v1413_v6 = vunpack.c.2.s8 %v829_v1  ;;  %v1421_v58 = vunpack.c.3.s8 %v829_v1 }
 0x29d   :  { %v2173_v51 = vcvt.s32.f32 %v1149_v60  ;;  %v2309_v62 = vcvt.s32.f32 %v1285_v0  ;;  %4252 = vmatpush.bf16.msra.mxu3 %v3253_v34  ;;  %v3045_v16 = vpack.c.bf16 %v2045_v57, %v2037_v55  ;;  %v3965_v61 = vadd.f32 %v3964_v31, %v7993_v8  ;;  %v909_v55 = vld [vmem:[#allocation7 + $0x5f0] sm:$0xff] }
 0x29e   :  { %v2317_v37 = vcvt.s32.f32 %v1293_v11  ;;  %v4443_v9 = vperm.slane %v7814_v22, 3  ;;  %v2437_v19 = vcvt.s32.f32 %v1413_v6  ;;  %v2445_v12 = vcvt.s32.f32 %v1421_v58 }
 0x29f   :  { %v3109_v54 = vpack.c.bf16 %v2173_v51, %v2165_v20  ;;  %v4476_v5 = vperm.slane %v7816_v29, 3  ;;  %4212 = vmatpush.bf16.msra.mxu0 %v3045_v16  ;;  %v3979_v32 = vadd.f32 %v3978_v36, %v3965_v61  ;;  %v997_v63 = vunpack.c.2.s8 %v725_v47 }
 0x2a0   :  { %v3181_v4 = vpack.c.bf16 %v2317_v37, %v2309_v62  ;;  %v1005_v49 = vunpack.c.3.s8 %v725_v47  ;;  %v3245_v46 = vpack.c.bf16 %v2445_v12, %v2437_v19  ;;  %v1125_v53 = vunpack.c.2.s8 %v757_v10  ;;  %v3966_v19 = vpop.f32.mrf.mxu2 }
 0x2a1   :  { %4226 = vmatpush.bf16.msra.mxu1 %v3109_v54  ;;  %v1133_v40 = vunpack.c.3.s8 %v757_v10  ;;  %v1269_v52 = vunpack.c.0.s8 %v797_v59  ;;  %v4459_v8 = vmul.f32 %v4443_v9, %v3979_v32  ;;  %v2021_v14 = vcvt.s32.f32 %v997_v63 }
 0x2a2   :  { %4239 = vmatpush.bf16.msra.mxu2 %v3181_v4  ;;  %v2029_v26 = vcvt.s32.f32 %v1005_v49  ;;  %v1277_v17 = vunpack.c.1.s8 %v797_v59  ;;  %4253 = vmatpush.bf16.msra.mxu3 %v3245_v46  ;;  %v2149_v25 = vcvt.s32.f32 %v1125_v53  ;;  %v1397_v56 = vunpack.c.0.s8 %v829_v1 }
 0x2a3   :  { %v2157_v39 = vcvt.s32.f32 %v1133_v40  ;;  %v2293_v18 = vcvt.s32.f32 %v1269_v52  ;;  %v8007_v21 = vadd.f32 %v4476_v5, %v4459_v8  ;;  %v1405_v28 = vunpack.c.1.s8 %v829_v1  ;;  %v789_v1 = vld [vmem:[#allocation7 + $0x230] sm:$0xff] }
 0x2a4   :  { %v3037_v30 = vpack.c.bf16 %v2029_v26, %v2021_v14  ;;  %v2301_v41 = vcvt.s32.f32 %v1277_v17  ;;  %v2421_v42 = vcvt.s32.f32 %v1397_v56  ;;  %v981_v3 = vunpack.c.0.s8 %v725_v47 }
 0x2a5   :  { %v3101_v33 = vpack.c.bf16 %v2157_v39, %v2149_v25  ;;  %v989_v7 = vunpack.c.1.s8 %v725_v47  ;;  %v4508_v59 = vmax.f32 %v8007_v21, 0.0  ;;  %v2429_v0 = vcvt.s32.f32 %v1405_v28  ;;  %v821_v47 = vld [vmem:[#allocation7 + $0x330] sm:$0xff]  ;;  %v3980_v25 = vpop.f32.mrf.mxu3 }
 0x2a6   :  { %4213 = vmatpush.bf16.msra.mxu0 %v3037_v30  ;;  %v3173_v60 = vpack.c.bf16 %v2301_v41, %v2293_v18  ;;  %v1109_v31 = vunpack.c.0.s8 %v757_v10  ;;  %v2005_v34 = vcvt.s32.f32 %v981_v3  ;;  %v1117_v20 = vunpack.c.1.s8 %v757_v10  ;;  %v941_v3 = vld [vmem:[#allocation7 + $0x6f0] sm:$0xff] }
 0x2a7   :  { %4227 = vmatpush.bf16.msra.mxu1 %v3101_v33  ;;  %v2013_v57 = vcvt.s32.f32 %v989_v7  ;;  %v1605_v11 = vunpack.c.2.s8 %v8009_v43  ;;  %v3237_v51 = vpack.c.bf16 %v2429_v0, %v2421_v42  ;;  %v1613_v6 = vunpack.c.3.s8 %v8009_v43 }
 0x2a8   :  { %4240 = vmatpush.bf16.msra.mxu2 %v3173_v60  ;;  %v2133_v62 = vcvt.s32.f32 %v1109_v31  ;;  %v1733_v58 = vunpack.c.2.s8 %v909_v55  ;;  %v2141_v37 = vcvt.s32.f32 %v1117_v20  ;;  %v1741_v54 = vunpack.c.3.s8 %v909_v55 }
 0x2a9   :  { %v3029_v16 = vpack.c.bf16 %v2013_v57, %v2005_v34  ;;  %v2629_v61 = vcvt.s32.f32 %v1605_v11  ;;  %4254 = vmatpush.bf16.msra.mxu3 %v3237_v51  ;;  %v2637_v12 = vcvt.s32.f32 %v1613_v6  ;;  %v1253_v4 = vunpack.c.2.s8 %v789_v1  ;;  %v973_v11 = vld [vmem:[#allocation7 + $0x7f0] sm:$0xff] }
 0x2aa   :  { %v2757_v36 = vcvt.s32.f32 %v1733_v58  ;;  %v1261_v10 = vunpack.c.3.s8 %v789_v1  ;;  %v3093_v32 = vpack.c.bf16 %v2141_v37, %v2133_v62  ;;  %v2765_v63 = vcvt.s32.f32 %v1741_v54  ;;  %v869_v58 = vld [vmem:[#allocation7 + $0x4b0] sm:$0xff] }
 0x2ab   :  { %4214 = vmatpush.bf16.msra.mxu0 %v3029_v16  ;;  %v1381_v49 = vunpack.c.2.s8 %v821_v47  ;;  %v1389_v46 = vunpack.c.3.s8 %v821_v47  ;;  %v3341_v53 = vpack.c.bf16 %v2637_v12, %v2629_v61  ;;  %v2277_v40 = vcvt.s32.f32 %v1253_v4  ;;  %v901_v54 = vld [vmem:[#allocation7 + $0x5b0] sm:$0xff] }
 0x2ac   :  { %v2285_v52 = vcvt.s32.f32 %v1261_v10  ;;  %v3967_v8 = vadd.f32 %v3966_v19, %v7998_v27  ;;  %4228 = vmatpush.bf16.msra.mxu1 %v3093_v32  ;;  %v3405_v14 = vpack.c.bf16 %v2765_v63, %v2757_v36  ;;  %v1589_v39 = vunpack.c.0.s8 %v8009_v43 }
 0x2ad   :  { %v2405_v26 = vcvt.s32.f32 %v1381_v49  ;;  %v2413_v17 = vcvt.s32.f32 %v1389_v46  ;;  %v1597_v30 = vunpack.c.1.s8 %v8009_v43  ;;  %v1717_v41 = vunpack.c.0.s8 %v909_v55 }
 0x2ae   :  { %v3165_v18 = vpack.c.bf16 %v2285_v52, %v2277_v40  ;;  %v3981_v56 = vadd.f32 %v3980_v25, %v3967_v8  ;;  %4215 = vmatmul.bf16.vlgmr.msra.gmra.mxu0 %v7602_v50  ;;  %v2613_v33 = vcvt.s32.f32 %v1589_v39  ;;  %v1725_v42 = vunpack.c.1.s8 %v909_v55 }
 0x2af   :  { %4263 = vmatpush.bf16.msrb.mxu0 %v3341_v53  ;;  %v3229_v28 = vpack.c.bf16 %v2413_v17, %v2405_v26  ;;  %v1237_v27 = vunpack.c.0.s8 %v789_v1  ;;  %4229 = vmatmul.bf16.vlgmr.msra.gmra.mxu1 %v7598_v44  ;;  %v2621_v60 = vcvt.s32.f32 %v1597_v30  ;;  %v2741_v0 = vcvt.s32.f32 %v1717_v41  ;;  %v4006_v26 = vpop.f32.mrf.mxu1 }
 0x2b0   :  { %4277 = vmatpush.bf16.msrb.mxu1 %v3405_v14  ;;  %4241 = vmatpush.bf16.msra.mxu2 %v3165_v18  ;;  %v4467_v7 = vmul.f32 %v4443_v9, %v3981_v56  ;;  %v1245_v31 = vunpack.c.1.s8 %v789_v1  ;;  %v2749_v43 = vcvt.s32.f32 %v1725_v42  ;;  %v1365_v57 = vunpack.c.0.s8 %v821_v47  ;;  %v3992_v14 = vpop.f32.mrf.mxu0 }
 0x2b1   :  { %4255 = vmatpush.bf16.msra.mxu3 %v3229_v28  ;;  %v2261_v34 = vcvt.s32.f32 %v1237_v27  ;;  %v1373_v20 = vunpack.c.1.s8 %v821_v47  ;;  %v3333_v51 = vpack.c.bf16 %v2621_v60, %v2613_v33  ;;  %v1861_v6 = vunpack.c.2.s8 %v941_v3  ;;  %v933_v27 = vld [vmem:[#allocation7 + $0x6b0] sm:$0xff] }
 0x2b2   :  { %v4500_v55 = vadd.f32 %v4476_v5, %v4467_v7  ;;  %v2269_v62 = vcvt.s32.f32 %v1245_v31  ;;  %v3397_v16 = vpack.c.bf16 %v2749_v43, %v2741_v0  ;;  %v2389_v9 = vcvt.s32.f32 %v1365_v57  ;;  %v965_v31 = vld [vmem:[#allocation7 + $0x7b0] sm:$0xff] }
 0x2b3   :  { %v2397_v37 = vcvt.s32.f32 %v1373_v20  ;;  %v1869_v61 = vunpack.c.3.s8 %v941_v3  ;;  %4264 = vmatpush.bf16.msrb.mxu0 %v3333_v51  ;;  %v2885_v12 = vcvt.s32.f32 %v1861_v6  ;;  %v1989_v36 = vunpack.c.2.s8 %v973_v11 }
 0x2b4   :  { %v4516_v19 = vmax.f32 %v4500_v55, 0.0  ;;  %v3157_v1 = vpack.c.bf16 %v2269_v62, %v2261_v34  ;;  %4278 = vmatpush.bf16.msrb.mxu1 %v3397_v16  ;;  %v1997_v10 = vunpack.c.3.s8 %v973_v11  ;;  %v1573_v32 = vunpack.c.2.s8 %v869_v58 }
 0x2b5   :  { %v3221_v47 = vpack.c.bf16 %v2397_v37, %v2389_v9  ;;  %v2893_v4 = vcvt.s32.f32 %v1869_v61  ;;  %v3013_v63 = vcvt.s32.f32 %v1989_v36  ;;  %v1581_v49 = vunpack.c.3.s8 %v869_v58 }
 0x2b6   :  { %v8025_v5 = vpack.c.bf16 %v4516_v19, %v4508_v59  ;;  %4242 = vmatpush.bf16.msra.mxu2 %v3157_v1  ;;  %v1701_v46 = vunpack.c.2.s8 %v901_v54  ;;  %v3021_v40 = vcvt.s32.f32 %v1997_v10  ;;  %v2597_v52 = vcvt.s32.f32 %v1573_v32  ;;  %v893_v19 = vld [vmem:[#allocation7 + $0x570] sm:$0xff] }
 0x2b7   :  { %4256 = vmatpush.bf16.msra.mxu3 %v3221_v47  ;;  %v3469_v53 = vpack.c.bf16 %v2893_v4, %v2885_v12  ;;  %v1709_v8 = vunpack.c.3.s8 %v901_v54  ;;  %v2605_v17 = vcvt.s32.f32 %v1581_v49  ;;  %v1845_v39 = vunpack.c.0.s8 %v941_v3 }
 0x2b8   :  { %v2725_v25 = vcvt.s32.f32 %v1701_v46  ;;  %v1853_v18 = vunpack.c.1.s8 %v941_v3  ;;  %v3533_v56 = vpack.c.bf16 %v3021_v40, %v3013_v63  ;;  %v1973_v59 = vunpack.c.0.s8 %v973_v11 }
 0x2b9   :  { %v2733_v21 = vcvt.s32.f32 %v1709_v8  ;;  %v1981_v30 = vunpack.c.1.s8 %v973_v11  ;;  %4243 = vmatmul.bf16.vlgmr.msra.gmra.mxu2 %v7645_v2  ;;  %v3325_v41 = vpack.c.bf16 %v2605_v17, %v2597_v52  ;;  %v2869_v28 = vcvt.s32.f32 %v1845_v39  ;;  %v861_v11 = vld [vmem:[#allocation7 + $0x470] sm:$0xff] }
 0x2ba   :  { %4291 = vmatpush.bf16.msrb.mxu2 %v3469_v53  ;;  %4257 = vmatmul.bf16.vlgmr.msra.gmra.mxu3 %v7638_v23  ;;  %v2877_v33 = vcvt.s32.f32 %v1853_v18  ;;  %v8029_v42 = vadd.f32 %v4006_v26, %v3992_v14  ;;  %v2997_v60 = vcvt.s32.f32 %v1973_v59  ;;  %v1557_v3 = vunpack.c.0.s8 %v869_v58  ;;  %v3994_v14 = vpop.f32.mrf.mxu0  ;;  %v4008_v26 = vpop.f32.mrf.mxu1 }
 0x2bb   :  { %4305 = vmatpush.bf16.msrb.mxu3 %v3533_v56  ;;  %v3389_v7 = vpack.c.bf16 %v2733_v21, %v2725_v25  ;;  %v3005_v0 = vcvt.s32.f32 %v1981_v30  ;;  %4265 = vmatpush.bf16.msrb.mxu0 %v3325_v41  ;;  %v1565_v34 = vunpack.c.1.s8 %v869_v58  ;;  %v1685_v57 = vunpack.c.0.s8 %v901_v54  ;;  %v925_v41 = vld [vmem:[#allocation7 + $0x670] sm:$0xff] }
 0x2bc   :  { %v3461_v43 = vpack.c.bf16 %v2877_v33, %v2869_v28  ;;  %v1693_v20 = vunpack.c.1.s8 %v901_v54  ;;  %v2581_v51 = vcvt.s32.f32 %v1557_v3  ;;  %v1829_v62 = vunpack.c.2.s8 %v933_v27 }
 0x2bd   :  { %4279 = vmatpush.bf16.msrb.mxu1 %v3389_v7  ;;  %v3525_v55 = vpack.c.bf16 %v3005_v0, %v2997_v60  ;;  %v1837_v6 = vunpack.c.3.s8 %v933_v27  ;;  %v2589_v16 = vcvt.s32.f32 %v1565_v34  ;;  %v2709_v9 = vcvt.s32.f32 %v1685_v57  ;;  %v957_v0 = vld [vmem:[#allocation7 + $0x770] sm:$0xff]  ;;  %v4020_v57 = vpop.f32.mrf.mxu2 }
 0x2be   :  { %4292 = vmatpush.bf16.msrb.mxu2 %v3461_v43  ;;  %v2717_v37 = vcvt.s32.f32 %v1693_v20  ;;  %v1957_v61 = vunpack.c.2.s8 %v965_v31  ;;  %v2853_v1 = vcvt.s32.f32 %v1829_v62  ;;  %v1965_v36 = vunpack.c.3.s8 %v965_v31  ;;  %v853_v62 = vld [vmem:[#allocation7 + $0x430] sm:$0xff] }
 0x2bf   :  { %4306 = vmatpush.bf16.msrb.mxu3 %v3525_v55  ;;  %v2861_v12 = vcvt.s32.f32 %v1837_v6  ;;  %v1541_v47 = vunpack.c.2.s8 %v861_v11  ;;  %v3317_v58 = vpack.c.bf16 %v2589_v16, %v2581_v51  ;;  %v1549_v10 = vunpack.c.3.s8 %v861_v11 }
 0x2c0   :  { %v3381_v4 = vpack.c.bf16 %v2717_v37, %v2709_v9  ;;  %v2981_v54 = vcvt.s32.f32 %v1957_v61  ;;  %v2989_v63 = vcvt.s32.f32 %v1965_v36  ;;  %v1669_v46 = vunpack.c.2.s8 %v893_v19 }
 0x2c1   :  { %v3453_v32 = vpack.c.bf16 %v2861_v12, %v2853_v1  ;;  %v2565_v49 = vcvt.s32.f32 %v1541_v47  ;;  %4266 = vmatpush.bf16.msrb.mxu0 %v3317_v58  ;;  %v2573_v53 = vcvt.s32.f32 %v1549_v10  ;;  %v1677_v40 = vunpack.c.3.s8 %v893_v19 }
 0x2c2   :  { %4280 = vmatpush.bf16.msrb.mxu1 %v3381_v4  ;;  %v1813_v52 = vunpack.c.0.s8 %v933_v27  ;;  %v1821_v8 = vunpack.c.1.s8 %v933_v27  ;;  %v3517_v17 = vpack.c.bf16 %v2989_v63, %v2981_v54  ;;  %v2693_v25 = vcvt.s32.f32 %v1669_v46  ;;  %v4034_v54 = vpop.f32.mrf.mxu3 }
 0x2c3   :  { %4293 = vmatpush.bf16.msrb.mxu2 %v3453_v32  ;;  %v1941_v39 = vunpack.c.0.s8 %v965_v31  ;;  %v1949_v18 = vunpack.c.1.s8 %v965_v31  ;;  %v3309_v56 = vpack.c.bf16 %v2573_v53, %v2565_v49  ;;  %v2701_v21 = vcvt.s32.f32 %v1677_v40 }
 0x2c4   :  { %v2837_v59 = vcvt.s32.f32 %v1813_v52  ;;  %v2845_v30 = vcvt.s32.f32 %v1821_v8  ;;  %4307 = vmatpush.bf16.msrb.mxu3 %v3517_v17  ;;  %v8031_v7 = vadd.f32 %v4008_v26, %v3994_v14  ;;  %v1525_v60 = vunpack.c.0.s8 %v861_v11 }
 0x2c5   :  { %v2965_v28 = vcvt.s32.f32 %v1941_v39  ;;  %v2973_v33 = vcvt.s32.f32 %v1949_v18  ;;  %4267 = vmatpush.bf16.msrb.mxu0 %v3309_v56  ;;  %v3373_v27 = vpack.c.bf16 %v2701_v21, %v2693_v25  ;;  %v1533_v43 = vunpack.c.1.s8 %v861_v11  ;;  %v885_v11 = vld [vmem:[#allocation7 + $0x530] sm:$0xff] }
 0x2c6   :  { %v3445_v3 = vpack.c.bf16 %v2845_v30, %v2837_v59  ;;  %v1653_v34 = vunpack.c.0.s8 %v893_v19  ;;  %v2549_v31 = vcvt.s32.f32 %v1525_v60  ;;  %v1661_v55 = vunpack.c.1.s8 %v893_v19 }
 0x2c7   :  { %v3509_v20 = vpack.c.bf16 %v2973_v33, %v2965_v28  ;;  %v1797_v51 = vunpack.c.2.s8 %v925_v41  ;;  %4281 = vmatpush.bf16.msrb.mxu1 %v3373_v27  ;;  %v2557_v6 = vcvt.s32.f32 %v1533_v43  ;;  %v1805_v9 = vunpack.c.3.s8 %v925_v41  ;;  %v750_v28 = vld [vmem:[#allocation7 + $0xf8] sm:$0xff] }
 0x2c8   :  { %4294 = vmatpush.bf16.msrb.mxu2 %v3445_v3  ;;  %v2677_v16 = vcvt.s32.f32 %v1653_v34  ;;  %v1925_v37 = vunpack.c.2.s8 %v957_v0  ;;  %v2685_v61 = vcvt.s32.f32 %v1661_v55  ;;  %v1933_v12 = vunpack.c.3.s8 %v957_v0  ;;  %v782_v43 = vld [vmem:[#allocation7 + $0x1f8] sm:$0xff] }
 0x2c9   :  { %4308 = vmatpush.bf16.msrb.mxu3 %v3509_v20  ;;  %v2821_v1 = vcvt.s32.f32 %v1797_v51  ;;  %v4021_v36 = vadd.f32 %v4020_v57, %v8029_v42  ;;  %v3301_v47 = vpack.c.bf16 %v2557_v6, %v2549_v31  ;;  %v2829_v58 = vcvt.s32.f32 %v1805_v9  ;;  %v8036_v31 = vld [vmem:[#allocation7 + $0x630] sm:$0xff] }
 0x2ca   :  { %v2949_v4 = vcvt.s32.f32 %v1925_v37  ;;  %v1509_v19 = vunpack.c.2.s8 %v853_v62  ;;  %v3365_v10 = vpack.c.bf16 %v2685_v61, %v2677_v16  ;;  %v2957_v32 = vcvt.s32.f32 %v1933_v12 }
 0x2cb   :  { %v8034_v63 = vadd.f32 %v4034_v54, %v4021_v36  ;;  %v1517_v49 = vunpack.c.3.s8 %v853_v62  ;;  %4268 = vmatpush.bf16.msrb.mxu0 %v3301_v47  ;;  %v3437_v46 = vpack.c.bf16 %v2829_v58, %v2821_v1  ;;  %v1637_v40 = vunpack.c.2.s8 %v885_v11  ;;  %v949_v1 = vld [vmem:[#allocation7 + $0x730] sm:$0xff] }
 0x2cc   :  { %v2533_v53 = vcvt.s32.f32 %v1509_v19  ;;  %v1645_v52 = vunpack.c.3.s8 %v885_v11  ;;  %4282 = vmatpush.bf16.msrb.mxu1 %v3365_v10  ;;  %v3501_v8 = vpack.c.bf16 %v2957_v32, %v2949_v4  ;;  %v1781_v42 = vunpack.c.0.s8 %v925_v41 }
 0x2cd   :  { %v2541_v14 = vcvt.s32.f32 %v1517_v49  ;;  %v1789_v26 = vunpack.c.1.s8 %v925_v41  ;;  %4295 = vmatpush.bf16.msrb.mxu2 %v3437_v46  ;;  %v2661_v17 = vcvt.s32.f32 %v1637_v40  ;;  %v1909_v39 = vunpack.c.0.s8 %v957_v0 }
 0x2ce   :  { %v2669_v25 = vcvt.s32.f32 %v1645_v52  ;;  %v1917_v18 = vunpack.c.1.s8 %v957_v0  ;;  %4309 = vmatpush.bf16.msrb.mxu3 %v3501_v8  ;;  %v2805_v21 = vcvt.s32.f32 %v1781_v42  ;;  %v1493_v30 = vunpack.c.0.s8 %v853_v62 }
 0x2cf   :  { %v3293_v56 = vpack.c.bf16 %v2541_v14, %v2533_v53  ;;  %v2813_v59 = vcvt.s32.f32 %v1789_v26  ;;  %v2933_v60 = vcvt.s32.f32 %v1909_v39  ;;  %v1501_v3 = vunpack.c.1.s8 %v853_v62  ;;  %v4036_v26 = vpop.f32.mrf.mxu3 }
 0x2d0   :  { %v3357_v33 = vpack.c.bf16 %v2669_v25, %v2661_v17  ;;  %v2941_v27 = vcvt.s32.f32 %v1917_v18  ;;  %v2517_v57 = vcvt.s32.f32 %v1493_v30  ;;  %v1621_v41 = vunpack.c.0.s8 %v885_v11 }
 0x2d1   :  { %4269 = vmatpush.bf16.msrb.mxu0 %v3293_v56  ;;  %v3429_v34 = vpack.c.bf16 %v2813_v59, %v2805_v21  ;;  %v1629_v20 = vunpack.c.1.s8 %v885_v11  ;;  %v2525_v55 = vcvt.s32.f32 %v1501_v3  ;;  %v1094_v51 = vunpack.c.2.s8 %v750_v28  ;;  %v4022_v11 = vpop.f32.mrf.mxu2  ;;  %v814_v59 = vld [vmem:[#allocation7 + $0x2f8] sm:$0xff] }
 0x2d2   :  { %4283 = vmatpush.bf16.msrb.mxu1 %v3357_v33  ;;  %v3493_v0 = vpack.c.bf16 %v2941_v27, %v2933_v60  ;;  %v1102_v6 = vunpack.c.3.s8 %v750_v28  ;;  %v2645_v16 = vcvt.s32.f32 %v1621_v41  ;;  %v1222_v37 = vunpack.c.2.s8 %v782_v43 }
 0x2d3   :  { %4296 = vmatpush.bf16.msrb.mxu2 %v3429_v34  ;;  %v2653_v9 = vcvt.s32.f32 %v1629_v20  ;;  %v1230_v61 = vunpack.c.3.s8 %v782_v43  ;;  %v3285_v62 = vpack.c.bf16 %v2525_v55, %v2517_v57  ;;  %v2118_v12 = vcvt.s32.f32 %v1094_v51  ;;  %v846_v57 = vld [vmem:[#allocation7 + $0x3f8] sm:$0xff] }
 0x2d4   :  { %4310 = vmatpush.bf16.msrb.mxu3 %v3493_v0  ;;  %v2126_v36 = vcvt.s32.f32 %v1102_v6  ;;  %v1765_v47 = vunpack.c.2.s8 %v8036_v31  ;;  %v2246_v4 = vcvt.s32.f32 %v1222_v37  ;;  %v1773_v19 = vunpack.c.3.s8 %v8036_v31  ;;  %v742_v55 = vld [vmem:[#allocation7 + $0xb8] sm:$0xff] }
 0x2d5   :  { %v3349_v58 = vpack.c.bf16 %v2653_v9, %v2645_v16  ;;  %v2254_v54 = vcvt.s32.f32 %v1230_v61  ;;  %4270 = vmatpush.bf16.msrb.mxu0 %v3285_v62  ;;  %v1893_v49 = vunpack.c.2.s8 %v949_v1  ;;  %v1901_v46 = vunpack.c.3.s8 %v949_v1  ;;  %v774_v37 = vld [vmem:[#allocation7 + $0x1b8] sm:$0xff] }
 0x2d6   :  { %v3086_v10 = vpack.c.bf16 %v2126_v36, %v2118_v12  ;;  %v2789_v32 = vcvt.s32.f32 %v1765_v47  ;;  %v2797_v40 = vcvt.s32.f32 %v1773_v19  ;;  %v4023_v52 = vadd.f32 %v4022_v11, %v8031_v7 }
 0x2d7   :  { %4284 = vmatpush.bf16.msrb.mxu1 %v3349_v58  ;;  %v3150_v53 = vpack.c.bf16 %v2254_v54, %v2246_v4  ;;  %v1078_v8 = vunpack.c.0.s8 %v750_v28  ;;  %v2917_v14 = vcvt.s32.f32 %v1893_v49  ;;  %v2925_v42 = vcvt.s32.f32 %v1901_v46 }
 0x2d8   :  { %v1086_v17 = vunpack.c.1.s8 %v750_v28  ;;  %v1206_v25 = vunpack.c.0.s8 %v782_v43  ;;  %v3421_v39 = vpack.c.bf16 %v2797_v40, %v2789_v32  ;;  %v8041_v18 = vadd.f32 %v4036_v26, %v4023_v52  ;;  %4271 = vmatmul.bf16.vlgmr.msrb.gmra.mxu0 %v7732_v24 }
 0x2d9   :  { %4319 = vmatpush.bf16.msra.mxu0 %v3086_v10  ;;  %v2102_v56 = vcvt.s32.f32 %v1078_v8  ;;  %v1214_v21 = vunpack.c.1.s8 %v782_v43  ;;  %v3485_v30 = vpack.c.bf16 %v2925_v42, %v2917_v14  ;;  %v1749_v60 = vunpack.c.0.s8 %v8036_v31 }
 0x2da   :  { %4285 = vmatmul.bf16.vlgmr.msrb.gmra.mxu1 %v7735_v48  ;;  %v2110_v7 = vcvt.s32.f32 %v1086_v17  ;;  %v2230_v33 = vcvt.s32.f32 %v1206_v25  ;;  %4297 = vmatpush.bf16.msrb.mxu2 %v3421_v39  ;;  %v1757_v28 = vunpack.c.1.s8 %v8036_v31  ;;  %v1877_v3 = vunpack.c.0.s8 %v949_v1 }
 0x2db   :  { %4333 = vmatpush.bf16.msra.mxu1 %v3150_v53  ;;  %v2238_v27 = vcvt.s32.f32 %v1214_v21  ;;  %v1885_v34 = vunpack.c.1.s8 %v949_v1  ;;  %4311 = vmatpush.bf16.msrb.mxu3 %v3485_v30  ;;  %v2773_v20 = vcvt.s32.f32 %v1749_v60  ;;  %v1350_v0 = vunpack.c.2.s8 %v814_v59  ;;  %v4048_v53 = vpop.f32.mrf.mxu0 }
 0x2dc   :  { %v3078_v41 = vpack.c.bf16 %v2110_v7, %v2102_v56  ;;  %v1358_v43 = vunpack.c.3.s8 %v814_v59  ;;  %v2781_v6 = vcvt.s32.f32 %v1757_v28  ;;  %v2901_v16 = vcvt.s32.f32 %v1877_v3  ;;  %v806_v7 = vld [vmem:[#allocation7 + $0x2b8] sm:$0xff] }
 0x2dd   :  { %v3142_v51 = vpack.c.bf16 %v2238_v27, %v2230_v33  ;;  %v2909_v9 = vcvt.s32.f32 %v1885_v34  ;;  %v2374_v61 = vcvt.s32.f32 %v1350_v0  ;;  %v1478_v12 = vunpack.c.2.s8 %v846_v57  ;;  %v838_v3 = vld [vmem:[#allocation7 + $0x3b8] sm:$0xff] }
 0x2de   :  { %4320 = vmatpush.bf16.msra.mxu0 %v3078_v41  ;;  %v2382_v62 = vcvt.s32.f32 %v1358_v43  ;;  %v1486_v36 = vunpack.c.3.s8 %v846_v57  ;;  %v3413_v31 = vpack.c.bf16 %v2781_v6, %v2773_v20  ;;  %v1062_v47 = vunpack.c.2.s8 %v742_v55  ;;  %v734_v0 = vld [vmem:[#allocation7 + $0x78] sm:$0xff] }
 0x2df   :  { %4334 = vmatpush.bf16.msra.mxu1 %v3142_v51  ;;  %v3477_v1 = vpack.c.bf16 %v2909_v9, %v2901_v16  ;;  %v1070_v11 = vunpack.c.3.s8 %v742_v55  ;;  %v2502_v4 = vcvt.s32.f32 %v1478_v12  ;;  %v1190_v19 = vunpack.c.2.s8 %v774_v37  ;;  %v766_v12 = vld [vmem:[#allocation7 + $0x178] sm:$0xff] }
 0x2e0   :  { %v3214_v58 = vpack.c.bf16 %v2382_v62, %v2374_v61  ;;  %v2510_v54 = vcvt.s32.f32 %v1486_v36  ;;  %4298 = vmatpush.bf16.msrb.mxu2 %v3413_v31  ;;  %v2086_v10 = vcvt.s32.f32 %v1062_v47  ;;  %v1198_v49 = vunpack.c.3.s8 %v774_v37 }
 0x2e1   :  { %4312 = vmatpush.bf16.msrb.mxu3 %v3477_v1  ;;  %v2094_v32 = vcvt.s32.f32 %v1070_v11  ;;  %v1334_v46 = vunpack.c.0.s8 %v814_v59  ;;  %v2214_v52 = vcvt.s32.f32 %v1190_v19  ;;  %v1342_v8 = vunpack.c.1.s8 %v814_v59  ;;  %v4062_v59 = vpop.f32.mrf.mxu1 }
 0x2e2   :  { %v3278_v40 = vpack.c.bf16 %v2510_v54, %v2502_v4  ;;  %v1462_v14 = vunpack.c.0.s8 %v846_v57  ;;  %v2222_v26 = vcvt.s32.f32 %v1198_v49  ;;  %v1470_v25 = vunpack.c.1.s8 %v846_v57 }
 0x2e3   :  { %v3070_v42 = vpack.c.bf16 %v2094_v32, %v2086_v10  ;;  %v2358_v17 = vcvt.s32.f32 %v1334_v46  ;;  %4299 = vmatmul.bf16.vlgmr.msrb.gmra.mxu2 %v7751_v45  ;;  %v2366_v39 = vcvt.s32.f32 %v1342_v8  ;;  %v4049_v21 = vadd.f32 %v4048_v53, %v8034_v63  ;;  %v4050_v32 = vpop.f32.mrf.mxu0 }
 0x2e4   :  { %4347 = vmatpush.bf16.msra.mxu2 %v3214_v58  ;;  %v2486_v56 = vcvt.s32.f32 %v1462_v14  ;;  %v1046_v30 = vunpack.c.0.s8 %v742_v55  ;;  %4313 = vmatmul.bf16.vlgmr.msrb.gmra.mxu3 %v7753_v38  ;;  %v3134_v33 = vpack.c.bf16 %v2222_v26, %v2214_v52  ;;  %v2494_v60 = vcvt.s32.f32 %v1470_v25 }
 0x2e5   :  { %4361 = vmatpush.bf16.msra.mxu3 %v3278_v40  ;;  %4321 = vmatpush.bf16.msra.mxu0 %v3070_v42  ;;  %v1054_v27 = vunpack.c.1.s8 %v742_v55  ;;  %v1174_v28 = vunpack.c.0.s8 %v774_v37  ;;  %v3206_v34 = vpack.c.bf16 %v2366_v39, %v2358_v17  ;;  %v8050_v57 = vadd.f32 %v4062_v59, %v4049_v21 }
 0x2e6   :  { %v2070_v41 = vcvt.s32.f32 %v1046_v30  ;;  %v1182_v20 = vunpack.c.1.s8 %v774_v37  ;;  %4335 = vmatpush.bf16.msra.mxu1 %v3134_v33  ;;  %v3270_v43 = vpack.c.bf16 %v2494_v60, %v2486_v56  ;;  %v1318_v6 = vunpack.c.2.s8 %v806_v7  ;;  %v798_v56 = vld [vmem:[#allocation7 + $0x278] sm:$0xff] }
 0x2e7   :  { %v2078_v63 = vcvt.s32.f32 %v1054_v27  ;;  %v2198_v51 = vcvt.s32.f32 %v1174_v28  ;;  %v1326_v9 = vunpack.c.3.s8 %v806_v7  ;;  %v1446_v61 = vunpack.c.2.s8 %v838_v3  ;;  %v830_v27 = vld [vmem:[#allocation7 + $0x378] sm:$0xff] }
 0x2e8   :  { %4348 = vmatpush.bf16.msra.mxu2 %v3206_v34  ;;  %v2206_v16 = vcvt.s32.f32 %v1182_v20  ;;  %v1454_v62 = vunpack.c.3.s8 %v838_v3  ;;  %v2342_v36 = vcvt.s32.f32 %v1318_v6  ;;  %v1030_v31 = vunpack.c.2.s8 %v734_v0 }
 0x2e9   :  { %4362 = vmatpush.bf16.msra.mxu3 %v3270_v43  ;;  %v3062_v55 = vpack.c.bf16 %v2078_v63, %v2070_v41  ;;  %v1038_v1 = vunpack.c.3.s8 %v734_v0  ;;  %v2350_v11 = vcvt.s32.f32 %v1326_v9  ;;  %v2470_v37 = vcvt.s32.f32 %v1446_v61  ;;  %v4064_v33 = vpop.f32.mrf.mxu1  ;;  %v726_v61 = vld [vmem:[#allocation7 + $0x38] sm:$0xff] }
 0x2ea   :  { %v3126_v47 = vpack.c.bf16 %v2206_v16, %v2198_v51  ;;  %v2478_v58 = vcvt.s32.f32 %v1454_v62  ;;  %v2054_v4 = vcvt.s32.f32 %v1030_v31  ;;  %v1158_v19 = vunpack.c.2.s8 %v766_v12  ;;  %v4076_v51 = vpop.f32.mrf.mxu2  ;;  %v758_v31 = vld [vmem:[#allocation7 + $0x138] sm:$0xff] }
 0x2eb   :  { %4322 = vmatpush.bf16.msra.mxu0 %v3062_v55  ;;  %v2062_v54 = vcvt.s32.f32 %v1038_v1  ;;  %v1166_v10 = vunpack.c.3.s8 %v766_v12  ;;  %v3198_v49 = vpack.c.bf16 %v2350_v11, %v2342_v36  ;;  %v1302_v53 = vunpack.c.0.s8 %v806_v7 }
 0x2ec   :  { %4336 = vmatpush.bf16.msra.mxu1 %v3126_v47  ;;  %v3262_v46 = vpack.c.bf16 %v2478_v58, %v2470_v37  ;;  %v1310_v40 = vunpack.c.1.s8 %v806_v7  ;;  %v2182_v8 = vcvt.s32.f32 %v1158_v19  ;;  %v1430_v42 = vunpack.c.0.s8 %v838_v3 }
 0x2ed   :  { %v3054_v52 = vpack.c.bf16 %v2062_v54, %v2054_v4  ;;  %v2190_v14 = vcvt.s32.f32 %v1166_v10  ;;  %4349 = vmatpush.bf16.msra.mxu2 %v3198_v49  ;;  %v2326_v26 = vcvt.s32.f32 %v1302_v53  ;;  %v1438_v25 = vunpack.c.1.s8 %v838_v3  ;;  %v4090_v4 = vpop.f32.mrf.mxu3 }
 0x2ee   :  { %4363 = vmatpush.bf16.msra.mxu3 %v3262_v46  ;;  %v2334_v17 = vcvt.s32.f32 %v1310_v40  ;;  %v4051_v39 = vadd.f32 %v4050_v32, %v8041_v18  ;;  %v2454_v30 = vcvt.s32.f32 %v1430_v42  ;;  %v1014_v60 = vunpack.c.0.s8 %v734_v0 }
 0x2ef   :  { %4323 = vmatpush.bf16.msra.mxu0 %v3054_v52  ;;  %v3118_v21 = vpack.c.bf16 %v2190_v14, %v2182_v8  ;;  %v1022_v59 = vunpack.c.1.s8 %v734_v0  ;;  %v2462_v28 = vcvt.s32.f32 %v1438_v25  ;;  %v1142_v41 = vunpack.c.0.s8 %v766_v12 }
 0x2f0   :  { %v3190_v7 = vpack.c.bf16 %v2334_v17, %v2326_v26  ;;  %v8053_v34 = vadd.f32 %v4064_v33, %v4051_v39  ;;  %v2038_v20 = vcvt.s32.f32 %v1014_v60  ;;  %v1150_v63 = vunpack.c.1.s8 %v766_v12 }
 0x2f1   :  { %4337 = vmatpush.bf16.msra.mxu1 %v3118_v21  ;;  %v2046_v43 = vcvt.s32.f32 %v1022_v59  ;;  %v1286_v3 = vunpack.c.2.s8 %v798_v56  ;;  %v3254_v18 = vpack.c.bf16 %v2462_v28, %v2454_v30  ;;  %v2166_v6 = vcvt.s32.f32 %v1142_v41 }
 0x2f2   :  { %4350 = vmatpush.bf16.msra.mxu2 %v3190_v7  ;;  %v1294_v16 = vunpack.c.3.s8 %v798_v56  ;;  %v1414_v9 = vunpack.c.2.s8 %v830_v27  ;;  %v2174_v0 = vcvt.s32.f32 %v1150_v63  ;;  %v1422_v36 = vunpack.c.3.s8 %v830_v27  ;;  %v878_v7 = vld [vmem:[#allocation7 + $0x4f8] sm:$0xff] }
 0x2f3   :  { %v3046_v62 = vpack.c.bf16 %v2046_v43, %v2038_v20  ;;  %v2310_v55 = vcvt.s32.f32 %v1286_v3  ;;  %4364 = vmatpush.bf16.msra.mxu3 %v3254_v18  ;;  %v4077_v11 = vadd.f32 %v4076_v51, %v8050_v57  ;;  %v4444_v12 = vperm.slane %v7814_v22, 4  ;;  %v910_v63 = vld [vmem:[#allocation7 + $0x5f8] sm:$0xff] }
 0x2f4   :  { %v2318_v1 = vcvt.s32.f32 %v1294_v16  ;;  %v2438_v47 = vcvt.s32.f32 %v1414_v9  ;;  %v3110_v37 = vpack.c.bf16 %v2174_v0, %v2166_v6  ;;  %v2446_v58 = vcvt.s32.f32 %v1422_v36 }
 0x2f5   :  { %4324 = vmatpush.bf16.msra.mxu0 %v3046_v62  ;;  %v4477_v54 = vperm.slane %v7816_v29, 4  ;;  %v998_v19 = vunpack.c.2.s8 %v726_v61  ;;  %v4091_v32 = vadd.f32 %v4090_v4, %v4077_v11  ;;  %v1006_v49 = vunpack.c.3.s8 %v726_v61  ;;  %v4078_v4 = vpop.f32.mrf.mxu2 }
 0x2f6   :  { %v3182_v10 = vpack.c.bf16 %v2318_v1, %v2310_v55  ;;  %v1126_v46 = vunpack.c.2.s8 %v758_v31  ;;  %4338 = vmatpush.bf16.msra.mxu1 %v3110_v37  ;;  %v3246_v53 = vpack.c.bf16 %v2446_v58, %v2438_v47  ;;  %v1134_v52 = vunpack.c.3.s8 %v758_v31 }
 0x2f7   :  { %v2022_v40 = vcvt.s32.f32 %v998_v19  ;;  %v1270_v8 = vunpack.c.0.s8 %v798_v56  ;;  %v4460_v57 = vmul.f32 %v4444_v12, %v4091_v32  ;;  %v2030_v14 = vcvt.s32.f32 %v1006_v49 }
 0x2f8   :  { %4351 = vmatpush.bf16.msra.mxu2 %v3182_v10  ;;  %v2150_v42 = vcvt.s32.f32 %v1126_v46  ;;  %v1278_v26 = vunpack.c.1.s8 %v798_v56  ;;  %4365 = vmatpush.bf16.msra.mxu3 %v3246_v53  ;;  %v2158_v17 = vcvt.s32.f32 %v1134_v52  ;;  %v1398_v39 = vunpack.c.0.s8 %v830_v27 }
 0x2f9   :  { %v2294_v25 = vcvt.s32.f32 %v1270_v8  ;;  %v1406_v21 = vunpack.c.1.s8 %v830_v27  ;;  %v8062_v30 = vadd.f32 %v4477_v54, %v4460_v57  ;;  %v3038_v33 = vpack.c.bf16 %v2030_v14, %v2022_v40  ;;  %v8065_v27 = vld [vmem:[#allocation7 + $0x238] sm:$0xff] }
 0x2fa   :  { %v2302_v60 = vcvt.s32.f32 %v1278_v26  ;;  %v982_v59 = vunpack.c.0.s8 %v726_v61  ;;  %v3102_v28 = vpack.c.bf16 %v2158_v17, %v2150_v42  ;;  %v2422_v41 = vcvt.s32.f32 %v1398_v39  ;;  %v4092_v17 = vpop.f32.mrf.mxu3 }
 0x2fb   :  { %v2430_v20 = vcvt.s32.f32 %v1406_v21  ;;  %v990_v43 = vunpack.c.1.s8 %v726_v61  ;;  %v4509_v56 = vmax.f32 %v8062_v30, 0.0  ;;  %4325 = vmatpush.bf16.msra.mxu0 %v3038_v33  ;;  %v1110_v18 = vunpack.c.0.s8 %v758_v31  ;;  %v822_v61 = vld [vmem:[#allocation7 + $0x338] sm:$0xff] }
 0x2fc   :  { %v3174_v3 = vpack.c.bf16 %v2302_v60, %v2294_v25  ;;  %v2006_v51 = vcvt.s32.f32 %v982_v59  ;;  %4339 = vmatpush.bf16.msra.mxu1 %v3102_v28  ;;  %v1118_v9 = vunpack.c.1.s8 %v758_v31  ;;  %v1606_v62 = vunpack.c.2.s8 %v878_v7 }
 0x2fd   :  { %v3238_v6 = vpack.c.bf16 %v2430_v20, %v2422_v41  ;;  %v2014_v16 = vcvt.s32.f32 %v990_v43  ;;  %v2134_v0 = vcvt.s32.f32 %v1110_v18  ;;  %v1614_v55 = vunpack.c.3.s8 %v878_v7 }
 0x2fe   :  { %4352 = vmatpush.bf16.msra.mxu2 %v3174_v3  ;;  %v1734_v36 = vunpack.c.2.s8 %v910_v63  ;;  %v1742_v1 = vunpack.c.3.s8 %v910_v63  ;;  %v2142_v11 = vcvt.s32.f32 %v1118_v9  ;;  %v2630_v37 = vcvt.s32.f32 %v1606_v62 }
 0x2ff   :  { %4366 = vmatpush.bf16.msra.mxu3 %v3238_v6  ;;  %v3030_v47 = vpack.c.bf16 %v2014_v16, %v2006_v51  ;;  %v1254_v58 = vunpack.c.2.s8 %v8065_v27  ;;  %v2638_v19 = vcvt.s32.f32 %v1614_v55  ;;  %v1262_v49 = vunpack.c.3.s8 %v8065_v27  ;;  %v974_v6 = vld [vmem:[#allocation7 + $0x7f8] sm:$0xff] }
 0x300   :  { %v2758_v10 = vcvt.s32.f32 %v1734_v36  ;;  %v2766_v32 = vcvt.s32.f32 %v1742_v1  ;;  %v3094_v31 = vpack.c.bf16 %v2142_v11, %v2134_v0  ;;  %v1382_v53 = vunpack.c.2.s8 %v822_v61  ;;  %v870_v1 = vld [vmem:[#allocation7 + $0x4b8] sm:$0xff] }
 0x301   :  { %4326 = vmatpush.bf16.msra.mxu0 %v3030_v47  ;;  %v2278_v46 = vcvt.s32.f32 %v1254_v58  ;;  %v1390_v40 = vunpack.c.3.s8 %v822_v61  ;;  %v3342_v52 = vpack.c.bf16 %v2638_v19, %v2630_v37  ;;  %v2286_v57 = vcvt.s32.f32 %v1262_v49  ;;  %v902_v37 = vld [vmem:[#allocation7 + $0x5b8] sm:$0xff] }
 0x302   :  { %v3406_v8 = vpack.c.bf16 %v2766_v32, %v2758_v10  ;;  %v4079_v14 = vadd.f32 %v4078_v4, %v8053_v34  ;;  %4340 = vmatpush.bf16.msra.mxu1 %v3094_v31  ;;  %v2406_v42 = vcvt.s32.f32 %v1382_v53  ;;  %v1590_v25 = vunpack.c.0.s8 %v878_v7  ;;  %v942_v34 = vld [vmem:[#allocation7 + $0x6f8] sm:$0xff] }
 0x303   :  { %v2414_v26 = vcvt.s32.f32 %v1390_v40  ;;  %v1598_v39 = vunpack.c.1.s8 %v878_v7  ;;  %v3166_v21 = vpack.c.bf16 %v2286_v57, %v2278_v46  ;;  %v1718_v60 = vunpack.c.0.s8 %v910_v63 }
 0x304   :  { %v4093_v33 = vadd.f32 %v4092_v17, %v4079_v14  ;;  %v1726_v59 = vunpack.c.1.s8 %v910_v63  ;;  %4327 = vmatmul.bf16.vlgmr.msra.gmra.mxu0 %v7602_v50  ;;  %v2614_v41 = vcvt.s32.f32 %v1590_v25  ;;  %v1238_v43 = vunpack.c.0.s8 %v8065_v27  ;;  %v4104_v14 = vpop.f32.mrf.mxu0 }
 0x305   :  { %4375 = vmatpush.bf16.msrb.mxu0 %v3342_v52  ;;  %v3230_v28 = vpack.c.bf16 %v2414_v26, %v2406_v42  ;;  %v2622_v20 = vcvt.s32.f32 %v1598_v39  ;;  %4353 = vmatpush.bf16.msra.mxu2 %v3166_v21  ;;  %v2742_v7 = vcvt.s32.f32 %v1718_v60  ;;  %v1246_v18 = vunpack.c.1.s8 %v8065_v27  ;;  %v4118_v42 = vpop.f32.mrf.mxu1 }
 0x306   :  { %4389 = vmatpush.bf16.msrb.mxu1 %v3406_v8  ;;  %v4468_v3 = vmul.f32 %v4444_v12, %v4093_v33  ;;  %v2750_v51 = vcvt.s32.f32 %v1726_v59  ;;  %v2262_v16 = vcvt.s32.f32 %v1238_v43  ;;  %v1366_v50 = vunpack.c.0.s8 %v822_v61 }
 0x307   :  { %4341 = vmatmul.bf16.vlgmr.msra.gmra.mxu1 %v7598_v44  ;;  %4367 = vmatpush.bf16.msra.mxu3 %v3230_v28  ;;  %v3334_v63 = vpack.c.bf16 %v2622_v20, %v2614_v41  ;;  %v1374_v9 = vunpack.c.1.s8 %v822_v61  ;;  %v2270_v55 = vcvt.s32.f32 %v1246_v18  ;;  %v1862_v36 = vunpack.c.2.s8 %v942_v34  ;;  %v934_v20 = vld [vmem:[#allocation7 + $0x6b8] sm:$0xff] }
 0x308   :  { %v4501_v62 = vadd.f32 %v4477_v54, %v4468_v3  ;;  %v3398_v0 = vpack.c.bf16 %v2750_v51, %v2742_v7  ;;  %v2390_v12 = vcvt.s32.f32 %v1366_v50  ;;  %v1870_v47 = vunpack.c.3.s8 %v942_v34  ;;  %v966_v51 = vld [vmem:[#allocation7 + $0x7b8] sm:$0xff] }
 0x309   :  { %4376 = vmatpush.bf16.msrb.mxu0 %v3334_v63  ;;  %v2398_v44 = vcvt.s32.f32 %v1374_v9  ;;  %v1990_v11 = vunpack.c.2.s8 %v974_v6  ;;  %v3158_v58 = vpack.c.bf16 %v2270_v55, %v2262_v16  ;;  %v2886_v4 = vcvt.s32.f32 %v1862_v36  ;;  %v862_v50 = vld [vmem:[#allocation7 + $0x478] sm:$0xff] }
 0x30a   :  { %v4517_v27 = vmax.f32 %v4501_v62, 0.0  ;;  %4390 = vmatpush.bf16.msrb.mxu1 %v3398_v0  ;;  %v1998_v19 = vunpack.c.3.s8 %v974_v6  ;;  %v2894_v61 = vcvt.s32.f32 %v1870_v47  ;;  %v1574_v49 = vunpack.c.2.s8 %v870_v1 }
 0x30b   :  { %v3222_v10 = vpack.c.bf16 %v2398_v44, %v2390_v12  ;;  %v3014_v32 = vcvt.s32.f32 %v1990_v11  ;;  %4354 = vmatpush.bf16.msra.mxu2 %v3158_v58  ;;  %v1582_v46 = vunpack.c.3.s8 %v870_v1  ;;  %v1702_v53 = vunpack.c.2.s8 %v902_v37  ;;  %v894_v44 = vld [vmem:[#allocation7 + $0x578] sm:$0xff] }
 0x30c   :  { %v8080_v54 = vpack.c.bf16 %v4517_v27, %v4509_v56  ;;  %v3022_v31 = vcvt.s32.f32 %v1998_v19  ;;  %v3470_v40 = vpack.c.bf16 %v2894_v61, %v2886_v4  ;;  %v2598_v52 = vcvt.s32.f32 %v1574_v49 }
 0x30d   :  { %4368 = vmatpush.bf16.msra.mxu3 %v3222_v10  ;;  %v1710_v8 = vunpack.c.3.s8 %v902_v37  ;;  %v1846_v57 = vunpack.c.0.s8 %v942_v34  ;;  %v2606_v17 = vcvt.s32.f32 %v1582_v46  ;;  %v2726_v25 = vcvt.s32.f32 %v1702_v53  ;;  %v4120_v46 = vpop.f32.mrf.mxu1 }
 0x30e   :  { %v3534_v26 = vpack.c.bf16 %v3022_v31, %v3014_v32  ;;  %v1854_v39 = vunpack.c.1.s8 %v942_v34  ;;  %v1974_v56 = vunpack.c.0.s8 %v974_v6  ;;  %v1982_v33 = vunpack.c.1.s8 %v974_v6  ;;  %4355 = vmatmul.bf16.vlgmr.msra.gmra.mxu2 %v7645_v2  ;;  %v4106_v31 = vpop.f32.mrf.mxu0 }
 0x30f   :  { %4403 = vmatpush.bf16.msrb.mxu2 %v3470_v40  ;;  %v2734_v21 = vcvt.s32.f32 %v1710_v8  ;;  %v2870_v30 = vcvt.s32.f32 %v1846_v57  ;;  %v3326_v60 = vpack.c.bf16 %v2606_v17, %v2598_v52  ;;  %v8083_v28 = vadd.f32 %v4118_v42, %v4104_v14 }
 0x310   :  { %v2878_v59 = vcvt.s32.f32 %v1854_v39  ;;  %v1558_v41 = vunpack.c.0.s8 %v870_v1  ;;  %4369 = vmatmul.bf16.vlgmr.msra.gmra.mxu3 %v7638_v23  ;;  %v2998_v3 = vcvt.s32.f32 %v1974_v56  ;;  %v3006_v7 = vcvt.s32.f32 %v1982_v33 }
 0x311   :  { %4417 = vmatpush.bf16.msrb.mxu3 %v3534_v26  ;;  %v3390_v43 = vpack.c.bf16 %v2734_v21, %v2726_v25  ;;  %v1566_v34 = vunpack.c.1.s8 %v870_v1  ;;  %4377 = vmatpush.bf16.msrb.mxu0 %v3326_v60  ;;  %v1686_v6 = vunpack.c.0.s8 %v902_v37  ;;  %v1694_v16 = vunpack.c.1.s8 %v902_v37 }
 0x312   :  { %v3462_v18 = vpack.c.bf16 %v2878_v59, %v2870_v30  ;;  %v2582_v63 = vcvt.s32.f32 %v1558_v41  ;;  %v3526_v2 = vpack.c.bf16 %v3006_v7, %v2998_v3  ;;  %v1830_v62 = vunpack.c.2.s8 %v934_v20  ;;  %v926_v30 = vld [vmem:[#allocation7 + $0x678] sm:$0xff] }
 0x313   :  { %4391 = vmatpush.bf16.msrb.mxu1 %v3390_v43  ;;  %v2590_v9 = vcvt.s32.f32 %v1566_v34  ;;  %v1838_v0 = vunpack.c.3.s8 %v934_v20  ;;  %v2710_v55 = vcvt.s32.f32 %v1686_v6  ;;  %v2718_v36 = vcvt.s32.f32 %v1694_v16  ;;  %v958_v41 = vld [vmem:[#allocation7 + $0x778] sm:$0xff]  ;;  %v4132_v34 = vpop.f32.mrf.mxu2 }
 0x314   :  { %4404 = vmatpush.bf16.msrb.mxu2 %v3462_v18  ;;  %v1958_v23 = vunpack.c.2.s8 %v966_v51  ;;  %v1966_v12 = vunpack.c.3.s8 %v966_v51  ;;  %v2854_v47 = vcvt.s32.f32 %v1830_v62  ;;  %v1542_v27 = vunpack.c.2.s8 %v862_v50  ;;  %v854_v16 = vld [vmem:[#allocation7 + $0x438] sm:$0xff] }
 0x315   :  { %4418 = vmatpush.bf16.msrb.mxu3 %v3526_v2  ;;  %v3318_v1 = vpack.c.bf16 %v2590_v9, %v2582_v63  ;;  %v2862_v11 = vcvt.s32.f32 %v1838_v0  ;;  %v3382_v58 = vpack.c.bf16 %v2718_v36, %v2710_v55  ;;  %v1550_v19 = vunpack.c.3.s8 %v862_v50 }
 0x316   :  { %v2982_v4 = vcvt.s32.f32 %v1958_v23  ;;  %v2990_v37 = vcvt.s32.f32 %v1966_v12  ;;  %v2566_v61 = vcvt.s32.f32 %v1542_v27  ;;  %v1670_v32 = vunpack.c.2.s8 %v894_v44  ;;  %v886_v12 = vld [vmem:[#allocation7 + $0x538] sm:$0xff] }
 0x317   :  { %4378 = vmatpush.bf16.msrb.mxu0 %v3318_v1  ;;  %v3454_v10 = vpack.c.bf16 %v2862_v11, %v2854_v47  ;;  %v1678_v49 = vunpack.c.3.s8 %v894_v44  ;;  %4392 = vmatpush.bf16.msrb.mxu1 %v3382_v58  ;;  %v2574_v40 = vcvt.s32.f32 %v1550_v19  ;;  %v1814_v52 = vunpack.c.0.s8 %v934_v20  ;;  %v4146_v11 = vpop.f32.mrf.mxu3 }
 0x318   :  { %v3518_v53 = vpack.c.bf16 %v2990_v37, %v2982_v4  ;;  %v1822_v8 = vunpack.c.1.s8 %v934_v20  ;;  %v2694_v57 = vcvt.s32.f32 %v1670_v32  ;;  %v1942_v42 = vunpack.c.0.s8 %v966_v51 }
 0x319   :  { %4405 = vmatpush.bf16.msrb.mxu2 %v3454_v10  ;;  %v2702_v14 = vcvt.s32.f32 %v1678_v49  ;;  %v1950_v26 = vunpack.c.1.s8 %v966_v51  ;;  %v3310_v17 = vpack.c.bf16 %v2574_v40, %v2566_v61  ;;  %v2838_v25 = vcvt.s32.f32 %v1814_v52 }
 0x31a   :  { %4419 = vmatpush.bf16.msrb.mxu3 %v3518_v53  ;;  %v2846_v39 = vcvt.s32.f32 %v1822_v8  ;;  %v8086_v21 = vadd.f32 %v4120_v46, %v4106_v31  ;;  %v2966_v33 = vcvt.s32.f32 %v1942_v42  ;;  %v1526_v59 = vunpack.c.0.s8 %v862_v50 }
 0x31b   :  { %v3374_v56 = vpack.c.bf16 %v2702_v14, %v2694_v57  ;;  %v2974_v60 = vcvt.s32.f32 %v1950_v26  ;;  %4379 = vmatpush.bf16.msrb.mxu0 %v3310_v17  ;;  %v1534_v20 = vunpack.c.1.s8 %v862_v50  ;;  %v1654_v3 = vunpack.c.0.s8 %v894_v44  ;;  %v8091_v14 = vld [vmem:[#allocation8 + $0x60] sm:$0xff] }
 0x31c   :  { %v3446_v43 = vpack.c.bf16 %v2846_v39, %v2838_v25  ;;  %v1662_v7 = vunpack.c.1.s8 %v894_v44  ;;  %v2550_v18 = vcvt.s32.f32 %v1526_v59  ;;  %v1798_v63 = vunpack.c.2.s8 %v926_v30  ;;  %v4557_v59 = vld [vmem:[#allocation8 + $0xe0] sm:$0xff] }
 0x31d   :  { %4393 = vmatpush.bf16.msrb.mxu1 %v3374_v56  ;;  %v3510_v51 = vpack.c.bf16 %v2974_v60, %v2966_v33  ;;  %v1806_v6 = vunpack.c.3.s8 %v926_v30  ;;  %v2558_v2 = vcvt.s32.f32 %v1534_v20  ;;  %v2678_v9 = vcvt.s32.f32 %v1654_v3 }
 0x31e   :  { %4406 = vmatpush.bf16.msrb.mxu2 %v3446_v43  ;;  %v2686_v62 = vcvt.s32.f32 %v1662_v7  ;;  %v1926_v0 = vunpack.c.2.s8 %v958_v41  ;;  %v2822_v55 = vcvt.s32.f32 %v1798_v63  ;;  %v1934_v23 = vunpack.c.3.s8 %v958_v41  ;;  %v918_v7 = vld [vmem:[#allocation7 + $0x638] sm:$0xff] }
 0x31f   :  { %4420 = vmatpush.bf16.msrb.mxu3 %v3510_v51  ;;  %v2830_v36 = vcvt.s32.f32 %v1806_v6  ;;  %v4133_v50 = vadd.f32 %v4132_v34, %v8083_v28  ;;  %v3302_v44 = vpack.c.bf16 %v2558_v2, %v2550_v18  ;;  %v1510_v27 = vunpack.c.2.s8 %v854_v16  ;;  %v950_v63 = vld [vmem:[#allocation7 + $0x738] sm:$0xff] }
 0x320   :  { %v3366_v1 = vpack.c.bf16 %v2686_v62, %v2678_v9  ;;  %v2950_v47 = vcvt.s32.f32 %v1926_v0  ;;  %v2958_v4 = vcvt.s32.f32 %v1934_v23  ;;  %v1518_v19 = vunpack.c.3.s8 %v854_v16  ;;  %v4134_v23 = vpop.f32.mrf.mxu2 }
 0x321   :  { %v3438_v58 = vpack.c.bf16 %v2830_v36, %v2822_v55  ;;  %v8089_v37 = vadd.f32 %v4146_v11, %v4133_v50  ;;  %4380 = vmatpush.bf16.msrb.mxu0 %v3302_v44  ;;  %v2534_v10 = vcvt.s32.f32 %v1510_v27  ;;  %v1638_v61 = vunpack.c.2.s8 %v886_v12 }
 0x322   :  { %4394 = vmatpush.bf16.msrb.mxu1 %v3366_v1  ;;  %v1646_v32 = vunpack.c.3.s8 %v886_v12  ;;  %v1782_v49 = vunpack.c.0.s8 %v926_v30  ;;  %v3502_v31 = vpack.c.bf16 %v2958_v4, %v2950_v47  ;;  %v2542_v28 = vcvt.s32.f32 %v1518_v19 }
 0x323   :  { %4407 = vmatpush.bf16.msrb.mxu2 %v3438_v58  ;;  %v1790_v46 = vunpack.c.1.s8 %v926_v30  ;;  %v1910_v53 = vunpack.c.0.s8 %v958_v41  ;;  %v2662_v40 = vcvt.s32.f32 %v1638_v61  ;;  %v1918_v57 = vunpack.c.1.s8 %v958_v41 }
 0x324   :  { %v2670_v52 = vcvt.s32.f32 %v1646_v32  ;;  %v2806_v8 = vcvt.s32.f32 %v1782_v49  ;;  %4421 = vmatpush.bf16.msrb.mxu3 %v3502_v31  ;;  %v3294_v42 = vpack.c.bf16 %v2542_v28, %v2534_v10  ;;  %v1494_v25 = vunpack.c.0.s8 %v854_v16  ;;  %v4148_v31 = vpop.f32.mrf.mxu3 }
 0x325   :  { %v2814_v26 = vcvt.s32.f32 %v1790_v46  ;;  %v2934_v17 = vcvt.s32.f32 %v1910_v53  ;;  %v2942_v56 = vcvt.s32.f32 %v1918_v57  ;;  %v1502_v33 = vunpack.c.1.s8 %v854_v16  ;;  %v4573_v57 = vld [vmem:[#allocation8 + $0x160] sm:$0xff] }
 0x326   :  { %v3358_v39 = vpack.c.bf16 %v2670_v52, %v2662_v40  ;;  %v1622_v60 = vunpack.c.0.s8 %v886_v12  ;;  %4381 = vmatpush.bf16.msrb.mxu0 %v3294_v42  ;;  %v2518_v30 = vcvt.s32.f32 %v1494_v25  ;;  %v1630_v20 = vunpack.c.1.s8 %v886_v12  ;;  %v4589_v25 = vld [vmem:[#allocation8 + $0x1e0] sm:$0xff] }
 0x327   :  { %v3430_v43 = vpack.c.bf16 %v2814_v26, %v2806_v8  ;;  %v4713_v3 = vunpack.c.2.s8 %v8091_v14  ;;  %v3494_v41 = vpack.c.bf16 %v2942_v56, %v2934_v17  ;;  %v2526_v34 = vcvt.s32.f32 %v1502_v33 }
 0x328   :  { %4395 = vmatpush.bf16.msrb.mxu1 %v3358_v39  ;;  %v2646_v51 = vcvt.s32.f32 %v1622_v60  ;;  %v4717_v18 = vunpack.c.3.s8 %v8091_v14  ;;  %v2654_v6 = vcvt.s32.f32 %v1630_v20  ;;  %v4777_v16 = vunpack.c.2.s8 %v4557_v59 }
 0x329   :  { %4408 = vmatpush.bf16.msrb.mxu2 %v3430_v43  ;;  %v5225_v2 = vcvt.s32.f32 %v4713_v3  ;;  %v4781_v9 = vunpack.c.3.s8 %v4557_v59  ;;  %4422 = vmatpush.bf16.msrb.mxu3 %v3494_v41  ;;  %v3286_v62 = vpack.c.bf16 %v2526_v34, %v2518_v30  ;;  %v1766_v55 = vunpack.c.2.s8 %v918_v7 }
 0x32a   :  { %v5229_v0 = vcvt.s32.f32 %v4717_v18  ;;  %v1774_v36 = vunpack.c.3.s8 %v918_v7  ;;  %v3350_v50 = vpack.c.bf16 %v2654_v6, %v2646_v51  ;;  %v5289_v12 = vcvt.s32.f32 %v4777_v16  ;;  %v4553_v51 = vld [vmem:[#allocation8 + $0xc0] sm:$0xff] }
 0x32b   :  { %v5293_v44 = vcvt.s32.f32 %v4781_v9  ;;  %v1894_v1 = vunpack.c.2.s8 %v950_v63  ;;  %4382 = vmatpush.bf16.msrb.mxu0 %v3286_v62  ;;  %v2790_v11 = vcvt.s32.f32 %v1766_v55  ;;  %v1902_v58 = vunpack.c.3.s8 %v950_v63 }
 0x32c   :  { %v5709_v47 = vpack.c.bf16 %v5229_v0, %v5225_v2  ;;  %v2798_v27 = vcvt.s32.f32 %v1774_v36  ;;  %4396 = vmatpush.bf16.msrb.mxu1 %v3350_v50  ;;  %v4135_v10 = vadd.f32 %v4134_v23, %v8086_v21  ;;  %v4705_v61 = vunpack.c.0.s8 %v8091_v14 }
 0x32d   :  { %v5741_v4 = vpack.c.bf16 %v5293_v44, %v5289_v12  ;;  %v2918_v19 = vcvt.s32.f32 %v1894_v1  ;;  %v2926_v49 = vcvt.s32.f32 %v1902_v58  ;;  %v4709_v28 = vunpack.c.1.s8 %v8091_v14  ;;  %v4160_v1 = vpop.f32.mrf.mxu0 }
 0x32e   :  { %v3422_v32 = vpack.c.bf16 %v2798_v27, %v2790_v11  ;;  %v4769_v46 = vunpack.c.0.s8 %v4557_v59  ;;  %v8098_v53 = vadd.f32 %v4148_v31, %v4135_v10  ;;  %4383 = vmatmul.bf16.vlgmr.msrb.gmra.mxu0 %v7732_v24  ;;  %v5217_v40 = vcvt.s32.f32 %v4705_v61 }
 0x32f   :  { %5937 = vmatpush.bf16.msra.mxu0 %v5709_v47  ;;  %v4773_v52 = vunpack.c.1.s8 %v4557_v59  ;;  %v1750_v8 = vunpack.c.0.s8 %v918_v7  ;;  %v3486_v21 = vpack.c.bf16 %v2926_v49, %v2918_v19  ;;  %4397 = vmatmul.bf16.vlgmr.msrb.gmra.mxu1 %v7735_v48  ;;  %v5221_v42 = vcvt.s32.f32 %v4709_v28  ;;  %v4537_v59 = vld [vmem:[#allocation8 + $0x40] sm:$0xff] }
 0x330   :  { %5951 = vmatpush.bf16.msra.mxu1 %v5741_v4  ;;  %4409 = vmatpush.bf16.msrb.mxu2 %v3422_v32  ;;  %v5281_v26 = vcvt.s32.f32 %v4769_v46  ;;  %v1758_v17 = vunpack.c.1.s8 %v918_v7  ;;  %v1878_v56 = vunpack.c.0.s8 %v950_v63  ;;  %v1886_v33 = vunpack.c.1.s8 %v950_v63  ;;  %v4569_v32 = vld [vmem:[#allocation8 + $0x140] sm:$0xff] }
 0x331   :  { %v5285_v39 = vcvt.s32.f32 %v4773_v52  ;;  %v2774_v14 = vcvt.s32.f32 %v1750_v8  ;;  %4423 = vmatpush.bf16.msrb.mxu3 %v3486_v21  ;;  %v5705_v60 = vpack.c.bf16 %v5221_v42, %v5217_v40  ;;  %v4841_v24 = vunpack.c.2.s8 %v4573_v57  ;;  %v4174_v8 = vpop.f32.mrf.mxu1 }
 0x332   :  { %v2782_v43 = vcvt.s32.f32 %v1758_v17  ;;  %v4845_v30 = vunpack.c.3.s8 %v4573_v57  ;;  %v2902_v3 = vcvt.s32.f32 %v1878_v56  ;;  %v2910_v41 = vcvt.s32.f32 %v1886_v33 }
 0x333   :  { %v5737_v20 = vpack.c.bf16 %v5285_v39, %v5281_v26  ;;  %v4905_v34 = vunpack.c.2.s8 %v4589_v25  ;;  %5938 = vmatpush.bf16.msra.mxu0 %v5705_v60  ;;  %v5353_v18 = vcvt.s32.f32 %v4841_v24  ;;  %v4909_v6 = vunpack.c.3.s8 %v4589_v25  ;;  %v4533_v39 = vld [vmem:[#allocation8 + $0x20] sm:$0xff] }
 0x334   :  { %v3414_v48 = vpack.c.bf16 %v2782_v43, %v2774_v14  ;;  %v5357_v7 = vcvt.s32.f32 %v4845_v30  ;;  %v3478_v2 = vpack.c.bf16 %v2910_v41, %v2902_v3  ;;  %v4697_v63 = vunpack.c.2.s8 %v4537_v59 }
 0x335   :  { %5952 = vmatpush.bf16.msra.mxu1 %v5737_v20  ;;  %v5417_v16 = vcvt.s32.f32 %v4905_v34  ;;  %v4701_v9 = vunpack.c.3.s8 %v4537_v59  ;;  %v5421_v0 = vcvt.s32.f32 %v4909_v6  ;;  %v4761_v55 = vunpack.c.2.s8 %v4553_v51 }
 0x336   :  { %4410 = vmatpush.bf16.msrb.mxu2 %v3414_v48  ;;  %v5773_v62 = vpack.c.bf16 %v5357_v7, %v5353_v18  ;;  %v4765_v36 = vunpack.c.3.s8 %v4553_v51  ;;  %4424 = vmatpush.bf16.msrb.mxu3 %v3478_v2  ;;  %v5209_v23 = vcvt.s32.f32 %v4697_v63  ;;  %v4833_v12 = vunpack.c.0.s8 %v4573_v57  ;;  %v4162_v63 = vpop.f32.mrf.mxu0 }
 0x337   :  { %v5213_v50 = vcvt.s32.f32 %v4701_v9  ;;  %v4837_v44 = vunpack.c.1.s8 %v4573_v57  ;;  %v5805_v47 = vpack.c.bf16 %v5421_v0, %v5417_v16  ;;  %v5273_v11 = vcvt.s32.f32 %v4761_v55 }
 0x338   :  { %v5277_v27 = vcvt.s32.f32 %v4765_v36  ;;  %v4897_v58 = vunpack.c.0.s8 %v4589_v25  ;;  %v5345_v19 = vcvt.s32.f32 %v4833_v12  ;;  %v4901_v61 = vunpack.c.1.s8 %v4589_v25 }
 0x339   :  { %4411 = vmatmul.bf16.vlgmr.msrb.gmra.mxu2 %v7751_v45  ;;  %v5701_v4 = vpack.c.bf16 %v5213_v50, %v5209_v23  ;;  %v5349_v10 = vcvt.s32.f32 %v4837_v44  ;;  %v4161_v28 = vadd.f32 %v4160_v1, %v8089_v37  ;;  %v4689_v46 = vunpack.c.0.s8 %v4537_v59  ;;  %4425 = vmatmul.bf16.vlgmr.msrb.gmra.mxu3 %v7753_v38  ;;  %v4585_v45 = vld [vmem:[#allocation8 + $0x1c0] sm:$0xff] }
 0x33a   :  { %5965 = vmatpush.bf16.msra.mxu2 %v5773_v62  ;;  %5979 = vmatpush.bf16.msra.mxu3 %v5805_v47  ;;  %v5733_v49 = vpack.c.bf16 %v5277_v27, %v5273_v11  ;;  %v5409_v31 = vcvt.s32.f32 %v4897_v58  ;;  %v5413_v52 = vcvt.s32.f32 %v4901_v61  ;;  %v4693_v57 = vunpack.c.1.s8 %v4537_v59  ;;  %v4549_v38 = vld [vmem:[#allocation8 + $0xa0] sm:$0xff] }
 0x33b   :  { %5939 = vmatpush.bf16.msra.mxu0 %v5701_v4  ;;  %v5769_v40 = vpack.c.bf16 %v5349_v10, %v5345_v19  ;;  %v4753_v21 = vunpack.c.0.s8 %v4553_v51  ;;  %v8105_v42 = vadd.f32 %v4174_v8, %v4161_v28  ;;  %v5201_v26 = vcvt.s32.f32 %v4689_v46  ;;  %v4565_v27 = vld [vmem:[#allocation8 + $0x120] sm:$0xff]  ;;  %v4176_v10 = vpop.f32.mrf.mxu1 }
 0x33c   :  { %5953 = vmatpush.bf16.msra.mxu1 %v5733_v49  ;;  %v4757_v17 = vunpack.c.1.s8 %v4553_v51  ;;  %v4825_v25 = vunpack.c.2.s8 %v4569_v32  ;;  %v5801_v14 = vpack.c.bf16 %v5413_v52, %v5409_v31  ;;  %v5205_v37 = vcvt.s32.f32 %v4693_v57  ;;  %v4581_v49 = vld [vmem:[#allocation8 + $0x1a0] sm:$0xff] }
 0x33d   :  { %v5265_v56 = vcvt.s32.f32 %v4753_v21  ;;  %v4829_v33 = vunpack.c.3.s8 %v4569_v32  ;;  %v4889_v24 = vunpack.c.2.s8 %v4585_v45  ;;  %v4893_v30 = vunpack.c.3.s8 %v4585_v45 }
 0x33e   :  { %5966 = vmatpush.bf16.msra.mxu2 %v5769_v40  ;;  %v5269_v60 = vcvt.s32.f32 %v4757_v17  ;;  %v5337_v43 = vcvt.s32.f32 %v4825_v25  ;;  %5980 = vmatpush.bf16.msra.mxu3 %v5801_v14  ;;  %v5697_v59 = vpack.c.bf16 %v5205_v37, %v5201_v26  ;;  %v4681_v3 = vunpack.c.2.s8 %v4533_v39  ;;  %v4188_v40 = vpop.f32.mrf.mxu2  ;;  %v4529_v25 = vld [vmem:[#allocation8] sm:$0xff] }
 0x33f   :  { %v5341_v20 = vcvt.s32.f32 %v4829_v33  ;;  %v4685_v41 = vunpack.c.3.s8 %v4533_v39  ;;  %v5401_v48 = vcvt.s32.f32 %v4889_v24  ;;  %v5405_v51 = vcvt.s32.f32 %v4893_v30  ;;  %v4545_v33 = vld [vmem:[#allocation8 + $0x80] sm:$0xff]  ;;  %v4202_v30 = vpop.f32.mrf.mxu3 }
 0x340   :  { %v5729_v34 = vpack.c.bf16 %v5269_v60, %v5265_v56  ;;  %v4745_v18 = vunpack.c.2.s8 %v4549_v38  ;;  %5940 = vmatpush.bf16.msra.mxu0 %v5697_v59  ;;  %v5193_v6 = vcvt.s32.f32 %v4681_v3  ;;  %v4749_v16 = vunpack.c.3.s8 %v4549_v38 }
 0x341   :  { %v5765_v7 = vpack.c.bf16 %v5341_v20, %v5337_v43  ;;  %v5197_v2 = vcvt.s32.f32 %v4685_v41  ;;  %v5797_v9 = vpack.c.bf16 %v5405_v51, %v5401_v48  ;;  %v4817_v0 = vunpack.c.0.s8 %v4569_v32 }
 0x342   :  { %5954 = vmatpush.bf16.msra.mxu1 %v5729_v34  ;;  %v5257_v62 = vcvt.s32.f32 %v4745_v18  ;;  %v4821_v55 = vunpack.c.1.s8 %v4569_v32  ;;  %v5261_v23 = vcvt.s32.f32 %v4749_v16  ;;  %v4881_v50 = vunpack.c.0.s8 %v4585_v45 }
 0x343   :  { %5967 = vmatpush.bf16.msra.mxu2 %v5765_v7  ;;  %v5693_v36 = vpack.c.bf16 %v5197_v2, %v5193_v6  ;;  %v4885_v12 = vunpack.c.1.s8 %v4585_v45  ;;  %5981 = vmatpush.bf16.msra.mxu3 %v5797_v9  ;;  %v5329_v44 = vcvt.s32.f32 %v4817_v0  ;;  %v4163_v47 = vadd.f32 %v4162_v63, %v8098_v53 }
 0x344   :  { %v5333_v1 = vcvt.s32.f32 %v4821_v55  ;;  %v4673_v11 = vunpack.c.0.s8 %v4533_v39  ;;  %v5725_v58 = vpack.c.bf16 %v5261_v23, %v5257_v62  ;;  %v5393_v4 = vcvt.s32.f32 %v4881_v50 }
 0x345   :  { %5941 = vmatpush.bf16.msra.mxu0 %v5693_v36  ;;  %v5397_v19 = vcvt.s32.f32 %v4885_v12  ;;  %v4677_v61 = vunpack.c.1.s8 %v4533_v39  ;;  %v8108_v31 = vadd.f32 %v4176_v10, %v4163_v47  ;;  %v4737_v46 = vunpack.c.0.s8 %v4549_v38  ;;  %v4605_v47 = vld [vmem:[#allocation8 + $0x260] sm:$0xff] }
 0x346   :  { %v5761_v32 = vpack.c.bf16 %v5333_v1, %v5329_v44  ;;  %v5185_v28 = vcvt.s32.f32 %v4673_v11  ;;  %5955 = vmatpush.bf16.msra.mxu1 %v5725_v58  ;;  %v4741_v57 = vunpack.c.1.s8 %v4549_v38  ;;  %v4809_v53 = vunpack.c.2.s8 %v4565_v27  ;;  %v4621_v10 = vld [vmem:[#allocation8 + $0x2e0] sm:$0xff] }
 0x347   :  { %v5793_v52 = vpack.c.bf16 %v5397_v19, %v5393_v4  ;;  %v5189_v8 = vcvt.s32.f32 %v4677_v61  ;;  %v5249_v21 = vcvt.s32.f32 %v4737_v46  ;;  %v4813_v45 = vunpack.c.3.s8 %v4565_v27  ;;  %v8120_v46 = vld [vmem:[#allocation8 + $0x100] sm:$0xff] }
 0x348   :  { %5968 = vmatpush.bf16.msra.mxu2 %v5761_v32  ;;  %v4873_v26 = vunpack.c.2.s8 %v4581_v49  ;;  %v4877_v17 = vunpack.c.3.s8 %v4581_v49  ;;  %v5253_v14 = vcvt.s32.f32 %v4741_v57  ;;  %v5321_v37 = vcvt.s32.f32 %v4809_v53 }
 0x349   :  { %5982 = vmatpush.bf16.msra.mxu3 %v5793_v52  ;;  %v5689_v39 = vpack.c.bf16 %v5189_v8, %v5185_v28  ;;  %v4189_v56 = vadd.f32 %v4188_v40, %v8105_v42  ;;  %v5325_v60 = vcvt.s32.f32 %v4813_v45  ;;  %v4445_v38 = vperm.slane %v7814_v22, 5 }
 0x34a   :  { %v5385_v43 = vcvt.s32.f32 %v4873_v26  ;;  %v5389_v24 = vcvt.s32.f32 %v4877_v17  ;;  %v5721_v59 = vpack.c.bf16 %v5253_v14, %v5249_v21  ;;  %v4478_v3 = vperm.slane %v7816_v29, 5  ;;  %v4577_v26 = vld [vmem:[#allocation8 + $0x180] sm:$0xff] }
 0x34b   :  { %5942 = vmatpush.bf16.msra.mxu0 %v5689_v39  ;;  %v4203_v20 = vadd.f32 %v4202_v30, %v4189_v56  ;;  %v4665_v41 = vunpack.c.2.s8 %v4529_v25  ;;  %v5757_v34 = vpack.c.bf16 %v5325_v60, %v5321_v37  ;;  %v4669_v51 = vunpack.c.3.s8 %v4529_v25  ;;  %v4190_v37 = vpop.f32.mrf.mxu2 }
 0x34c   :  { %v5789_v48 = vpack.c.bf16 %v5389_v24, %v5385_v43  ;;  %v4729_v18 = vunpack.c.2.s8 %v4545_v33  ;;  %5956 = vmatpush.bf16.msra.mxu1 %v5721_v59  ;;  %v4733_v6 = vunpack.c.3.s8 %v4545_v33  ;;  %v4801_v2 = vunpack.c.0.s8 %v4565_v27 }
 0x34d   :  { %v4461_v42 = vmul.f32 %v4445_v38, %v4203_v20  ;;  %v5177_v7 = vcvt.s32.f32 %v4665_v41  ;;  %5969 = vmatpush.bf16.msra.mxu2 %v5757_v34  ;;  %v5181_v16 = vcvt.s32.f32 %v4669_v51  ;;  %v4805_v9 = vunpack.c.1.s8 %v4565_v27 }
 0x34e   :  { %5983 = vmatpush.bf16.msra.mxu3 %v5789_v48  ;;  %v5241_v63 = vcvt.s32.f32 %v4729_v18  ;;  %v4865_v62 = vunpack.c.0.s8 %v4581_v49  ;;  %v5245_v55 = vcvt.s32.f32 %v4733_v6  ;;  %v5313_v36 = vcvt.s32.f32 %v4801_v2 }
 0x34f   :  { %v8117_v0 = vadd.f32 %v4478_v3, %v4461_v42  ;;  %v4869_v23 = vunpack.c.1.s8 %v4581_v49  ;;  %v5685_v50 = vpack.c.bf16 %v5181_v16, %v5177_v7  ;;  %v5317_v12 = vcvt.s32.f32 %v4805_v9  ;;  %v4204_v7 = vpop.f32.mrf.mxu3 }
 0x350   :  { %v5377_v44 = vcvt.s32.f32 %v4865_v62  ;;  %v4657_v1 = vunpack.c.0.s8 %v4529_v25  ;;  %v5717_v58 = vpack.c.bf16 %v5245_v55, %v5241_v63  ;;  %v4661_v19 = vunpack.c.1.s8 %v4529_v25  ;;  %v4601_v55 = vld [vmem:[#allocation8 + $0x240] sm:$0xff] }
 0x351   :  { %v4510_v11 = vmax.f32 %v8117_v0, 0.0  ;;  %v5381_v4 = vcvt.s32.f32 %v4869_v23  ;;  %5943 = vmatpush.bf16.msra.mxu0 %v5685_v50  ;;  %v5753_v27 = vpack.c.bf16 %v5317_v12, %v5313_v36  ;;  %v4721_v32 = vunpack.c.0.s8 %v4545_v33  ;;  %v4216_v36 = vpop.f32.mrf.mxu0  ;;  %v4230_v23 = vpop.f32.mrf.mxu1 }
 0x352   :  { %v5169_v61 = vcvt.s32.f32 %v4657_v1  ;;  %v4725_v28 = vunpack.c.1.s8 %v4545_v33  ;;  %5957 = vmatpush.bf16.msra.mxu1 %v5717_v58  ;;  %v5173_v40 = vcvt.s32.f32 %v4661_v19  ;;  %v4969_v52 = vunpack.c.2.s8 %v4605_v47  ;;  %v4617_v19 = vld [vmem:[#allocation8 + $0x2c0] sm:$0xff] }
 0x353   :  { %v5785_v49 = vpack.c.bf16 %v5381_v4, %v5377_v44  ;;  %v4973_v8 = vunpack.c.3.s8 %v4605_v47  ;;  %5970 = vmatpush.bf16.msra.mxu2 %v5753_v27  ;;  %v5233_v57 = vcvt.s32.f32 %v4721_v32  ;;  %v5033_v21 = vunpack.c.2.s8 %v4621_v10 }
 0x354   :  { %v5237_v53 = vcvt.s32.f32 %v4725_v28  ;;  %v5037_v45 = vunpack.c.3.s8 %v4621_v10  ;;  %v5681_v17 = vpack.c.bf16 %v5173_v40, %v5169_v61  ;;  %v5481_v25 = vcvt.s32.f32 %v4969_v52 }
 0x355   :  { %5984 = vmatpush.bf16.msra.mxu3 %v5785_v49  ;;  %v5485_v39 = vcvt.s32.f32 %v4973_v8  ;;  %v4793_v14 = vunpack.c.2.s8 %v8120_v46  ;;  %v5545_v33 = vcvt.s32.f32 %v5033_v21  ;;  %v4797_v43 = vunpack.c.3.s8 %v8120_v46 }
 0x356   :  { %v5713_v56 = vpack.c.bf16 %v5237_v53, %v5233_v57  ;;  %v5549_v60 = vcvt.s32.f32 %v5037_v45  ;;  %5944 = vmatpush.bf16.msra.mxu0 %v5681_v17  ;;  %v4857_v59 = vunpack.c.2.s8 %v4577_v26  ;;  %v4861_v20 = vunpack.c.3.s8 %v4577_v26 }
 0x357   :  { %v5837_v24 = vpack.c.bf16 %v5485_v39, %v5481_v25  ;;  %v5305_v30 = vcvt.s32.f32 %v4793_v14  ;;  %v5309_v34 = vcvt.s32.f32 %v4797_v43  ;;  %v4191_v48 = vadd.f32 %v4190_v37, %v8108_v31  ;;  %v4637_v25 = vld [vmem:[#allocation8 + $0x360] sm:$0xff] }
 0x358   :  { %5958 = vmatpush.bf16.msra.mxu1 %v5713_v56  ;;  %v5869_v41 = vpack.c.bf16 %v5549_v60, %v5545_v33  ;;  %v4961_v51 = vunpack.c.0.s8 %v4605_v47  ;;  %v5369_v18 = vcvt.s32.f32 %v4857_v59  ;;  %v5373_v42 = vcvt.s32.f32 %v4861_v20  ;;  %v4597_v43 = vld [vmem:[#allocation8 + $0x220] sm:$0xff] }
 0x359   :  { %v4965_v6 = vunpack.c.1.s8 %v4605_v47  ;;  %v5025_v2 = vunpack.c.0.s8 %v4621_v10  ;;  %v5749_v16 = vpack.c.bf16 %v5309_v34, %v5305_v30  ;;  %v4205_v63 = vadd.f32 %v4204_v7, %v4191_v48  ;;  %5945 = vmatmul.bf16.vlgmr.msra.gmra.mxu0 %v7850_v13  ;;  %v4232_v7 = vpop.f32.mrf.mxu1 }
 0x35a   :  { %5993 = vmatpush.bf16.msrb.mxu0 %v5837_v24  ;;  %v5473_v9 = vcvt.s32.f32 %v4961_v51  ;;  %v5029_v62 = vunpack.c.1.s8 %v4621_v10  ;;  %v5781_v50 = vpack.c.bf16 %v5373_v42, %v5369_v18  ;;  %v4785_v44 = vunpack.c.0.s8 %v8120_v46  ;;  %v4218_v42 = vpop.f32.mrf.mxu0 }
 0x35b   :  { %5959 = vmatmul.bf16.vlgmr.msra.gmra.mxu1 %v7894_v35  ;;  %v5477_v31 = vcvt.s32.f32 %v4965_v6  ;;  %v5537_v12 = vcvt.s32.f32 %v5025_v2  ;;  %5971 = vmatpush.bf16.msra.mxu2 %v5749_v16  ;;  %v4469_v1 = vmul.f32 %v4445_v38, %v4205_v63  ;;  %v4789_v58 = vunpack.c.1.s8 %v8120_v46 }
 0x35c   :  { %6007 = vmatpush.bf16.msrb.mxu1 %v5869_v41  ;;  %v5541_v47 = vcvt.s32.f32 %v5029_v62  ;;  %v4849_v4 = vunpack.c.0.s8 %v4577_v26  ;;  %5985 = vmatpush.bf16.msra.mxu3 %v5781_v50  ;;  %v5297_v27 = vcvt.s32.f32 %v4785_v44  ;;  %v4853_v61 = vunpack.c.1.s8 %v4577_v26  ;;  %v4613_v41 = vld [vmem:[#allocation8 + $0x2a0] sm:$0xff] }
 0x35d   :  { %v5833_v10 = vpack.c.bf16 %v5477_v31, %v5473_v9  ;;  %v4953_v32 = vunpack.c.2.s8 %v4601_v55  ;;  %v4502_v28 = vadd.f32 %v4478_v3, %v4469_v1  ;;  %v5301_v40 = vcvt.s32.f32 %v4789_v58 }
 0x35e   :  { %v5865_v49 = vpack.c.bf16 %v5541_v47, %v5537_v12  ;;  %v5361_v52 = vcvt.s32.f32 %v4849_v4  ;;  %v5365_v8 = vcvt.s32.f32 %v4853_v61  ;;  %v4957_v57 = vunpack.c.3.s8 %v4601_v55  ;;  %v4244_v47 = vpop.f32.mrf.mxu2 }
 0x35f   :  { %5994 = vmatpush.bf16.msrb.mxu0 %v5833_v10  ;;  %v5465_v38 = vcvt.s32.f32 %v4953_v32  ;;  %v5017_v53 = vunpack.c.2.s8 %v4617_v19  ;;  %v4518_v21 = vmax.f32 %v4502_v28, 0.0  ;;  %v5745_v46 = vpack.c.bf16 %v5301_v40, %v5297_v27  ;;  %v4633_v27 = vld [vmem:[#allocation8 + $0x340] sm:$0xff] }
 0x360   :  { %6008 = vmatpush.bf16.msrb.mxu1 %v5865_v49  ;;  %v5021_v45 = vunpack.c.3.s8 %v4617_v19  ;;  %v4231_v17 = vadd.f32 %v4230_v23, %v4216_v36  ;;  %v5777_v39 = vpack.c.bf16 %v5365_v8, %v5361_v52  ;;  %v5469_v26 = vcvt.s32.f32 %v4957_v57  ;;  %v4593_v40 = vld [vmem:[#allocation8 + $0x200] sm:$0xff] }
 0x361   :  { %v5529_v14 = vcvt.s32.f32 %v5017_v53  ;;  %v4945_v37 = vunpack.c.0.s8 %v4601_v55  ;;  %v8135_v3 = vpack.c.bf16 %v4518_v21, %v4510_v11  ;;  %5972 = vmatpush.bf16.msra.mxu2 %v5745_v46  ;;  %v4949_v33 = vunpack.c.1.s8 %v4601_v55  ;;  %v4258_v46 = vpop.f32.mrf.mxu3 }
 0x362   :  { %v5533_v56 = vcvt.s32.f32 %v5021_v45  ;;  %v5009_v60 = vunpack.c.0.s8 %v4617_v19  ;;  %5986 = vmatpush.bf16.msra.mxu3 %v5777_v39  ;;  %v5829_v24 = vpack.c.bf16 %v5469_v26, %v5465_v38  ;;  %v5013_v59 = vunpack.c.1.s8 %v4617_v19 }
 0x363   :  { %v5457_v30 = vcvt.s32.f32 %v4945_v37  ;;  %v5097_v20 = vunpack.c.2.s8 %v4637_v25  ;;  %v5461_v48 = vcvt.s32.f32 %v4949_v33  ;;  %v5101_v18 = vunpack.c.3.s8 %v4637_v25 }
 0x364   :  { %v5861_v34 = vpack.c.bf16 %v5533_v56, %v5529_v14  ;;  %v5521_v51 = vcvt.s32.f32 %v5009_v60  ;;  %5973 = vmatmul.bf16.vlgmr.msra.gmra.mxu2 %v7964_v15  ;;  %5995 = vmatpush.bf16.msrb.mxu0 %v5829_v24  ;;  %v5525_v0 = vcvt.s32.f32 %v5013_v59  ;;  %v4937_v6 = vunpack.c.2.s8 %v4597_v43 }
 0x365   :  { %v5609_v11 = vcvt.s32.f32 %v5097_v20  ;;  %v4941_v2 = vunpack.c.3.s8 %v4597_v43  ;;  %5987 = vmatmul.bf16.vlgmr.msra.gmra.mxu3 %v8025_v5  ;;  %v5825_v16 = vpack.c.bf16 %v5461_v48, %v5457_v30  ;;  %v5613_v63 = vcvt.s32.f32 %v5101_v18  ;;  %v4542_v18 = vld [vmem:[#allocation8 + $0x68] sm:$0xff] }
 0x366   :  { %6009 = vmatpush.bf16.msrb.mxu1 %v5861_v34  ;;  %v5001_v9 = vunpack.c.2.s8 %v4613_v41  ;;  %v5005_v62 = vunpack.c.3.s8 %v4613_v41  ;;  %v5857_v55 = vpack.c.bf16 %v5525_v0, %v5521_v51  ;;  %v5449_v36 = vcvt.s32.f32 %v4937_v6  ;;  %v4558_v6 = vld [vmem:[#allocation8 + $0xe8] sm:$0xff] }
 0x367   :  { %v5453_v23 = vcvt.s32.f32 %v4941_v2  ;;  %v8139_v50 = vadd.f32 %v4232_v7, %v4218_v42  ;;  %v5901_v31 = vpack.c.bf16 %v5613_v63, %v5609_v11  ;;  %v5089_v1 = vunpack.c.0.s8 %v4637_v25 }
 0x368   :  { %v5513_v12 = vcvt.s32.f32 %v5001_v9  ;;  %v5517_v44 = vcvt.s32.f32 %v5005_v62  ;;  %5996 = vmatpush.bf16.msrb.mxu0 %v5825_v16  ;;  %v5093_v4 = vunpack.c.1.s8 %v4637_v25  ;;  %v4929_v19 = vunpack.c.0.s8 %v4597_v43  ;;  %v4609_v25 = vld [vmem:[#allocation8 + $0x280] sm:$0xff] }
 0x369   :  { %v5821_v58 = vpack.c.bf16 %v5453_v23, %v5449_v36  ;;  %v4933_v10 = vunpack.c.1.s8 %v4597_v43  ;;  %6021 = vmatpush.bf16.msrb.mxu2 %v5901_v31  ;;  %v5601_v32 = vcvt.s32.f32 %v5089_v1  ;;  %v4993_v28 = vunpack.c.0.s8 %v4613_v41  ;;  %v4246_v31 = vpop.f32.mrf.mxu2 }
 0x36a   :  { %6010 = vmatpush.bf16.msrb.mxu1 %v5857_v55  ;;  %v5853_v61 = vpack.c.bf16 %v5517_v44, %v5513_v12  ;;  %v4997_v49 = vunpack.c.1.s8 %v4613_v41  ;;  %v5605_v52 = vcvt.s32.f32 %v5093_v4  ;;  %v5441_v8 = vcvt.s32.f32 %v4929_v19  ;;  %v4629_v12 = vld [vmem:[#allocation8 + $0x320] sm:$0xff] }
 0x36b   :  { %v5445_v57 = vcvt.s32.f32 %v4933_v10  ;;  %v4245_v38 = vadd.f32 %v4244_v47, %v4231_v17  ;;  %v5505_v53 = vcvt.s32.f32 %v4993_v28  ;;  %v5081_v45 = vunpack.c.2.s8 %v4633_v27 }
 0x36c   :  { %v5509_v21 = vcvt.s32.f32 %v4997_v49  ;;  %v5085_v39 = vunpack.c.3.s8 %v4633_v27  ;;  %5997 = vmatpush.bf16.msrb.mxu0 %v5821_v58  ;;  %v5897_v26 = vpack.c.bf16 %v5605_v52, %v5601_v32  ;;  %v4921_v56 = vunpack.c.2.s8 %v4593_v40 }
 0x36d   :  { %v5817_v14 = vpack.c.bf16 %v5445_v57, %v5441_v8  ;;  %v8141_v37 = vadd.f32 %v4258_v46, %v4245_v38  ;;  %v5593_v60 = vcvt.s32.f32 %v5081_v45  ;;  %v4925_v24 = vunpack.c.3.s8 %v4593_v40  ;;  %v4260_v8 = vpop.f32.mrf.mxu3 }
 0x36e   :  { %6011 = vmatpush.bf16.msrb.mxu1 %v5853_v61  ;;  %v5849_v33 = vpack.c.bf16 %v5509_v21, %v5505_v53  ;;  %v5597_v43 = vcvt.s32.f32 %v5085_v39  ;;  %6022 = vmatpush.bf16.msrb.mxu2 %v5897_v26  ;;  %v5433_v30 = vcvt.s32.f32 %v4921_v56  ;;  %v4985_v17 = vunpack.c.2.s8 %v4609_v25  ;;  %v4538_v39 = vld [vmem:[#allocation8 + $0x48] sm:$0xff] }
 0x36f   :  { %v4989_v59 = vunpack.c.3.s8 %v4609_v25  ;;  %v5073_v20 = vunpack.c.0.s8 %v4633_v27  ;;  %v5437_v34 = vcvt.s32.f32 %v4925_v24  ;;  %v5077_v48 = vunpack.c.1.s8 %v4633_v27  ;;  %v4554_v24 = vld [vmem:[#allocation8 + $0xc8] sm:$0xff] }
 0x370   :  { %v5893_v41 = vpack.c.bf16 %v5597_v43, %v5593_v60  ;;  %v4913_v51 = vunpack.c.0.s8 %v4593_v40  ;;  %5998 = vmatpush.bf16.msrb.mxu0 %v5817_v14  ;;  %v5497_v42 = vcvt.s32.f32 %v4985_v17  ;;  %v4917_v11 = vunpack.c.1.s8 %v4593_v40 }
 0x371   :  { %v5501_v7 = vcvt.s32.f32 %v4989_v59  ;;  %v5585_v0 = vcvt.s32.f32 %v5073_v20  ;;  %v5813_v2 = vpack.c.bf16 %v5437_v34, %v5433_v30  ;;  %v5589_v16 = vcvt.s32.f32 %v5077_v48  ;;  %v4272_v30 = vpop.f32.mrf.mxu0  ;;  %v4625_v34 = vld [vmem:[#allocation8 + $0x300] sm:$0xff] }
 0x372   :  { %6012 = vmatpush.bf16.msrb.mxu1 %v5849_v33  ;;  %v5425_v63 = vcvt.s32.f32 %v4913_v51  ;;  %v4977_v9 = vunpack.c.0.s8 %v4609_v25  ;;  %6023 = vmatpush.bf16.msrb.mxu2 %v5893_v41  ;;  %v5429_v55 = vcvt.s32.f32 %v4917_v11  ;;  %v4981_v36 = vunpack.c.1.s8 %v4609_v25 }
 0x373   :  { %v5845_v62 = vpack.c.bf16 %v5501_v7, %v5497_v42  ;;  %v4714_v23 = vunpack.c.2.s8 %v4542_v18  ;;  %v5889_v44 = vpack.c.bf16 %v5589_v16, %v5585_v0  ;;  %v4718_v47 = vunpack.c.3.s8 %v4542_v18 }
 0x374   :  { %v5489_v1 = vcvt.s32.f32 %v4977_v9  ;;  %v4778_v58 = vunpack.c.2.s8 %v4558_v6  ;;  %5999 = vmatpush.bf16.msrb.mxu0 %v5813_v2  ;;  %v5809_v4 = vpack.c.bf16 %v5429_v55, %v5425_v63  ;;  %v5493_v19 = vcvt.s32.f32 %v4981_v36 }
 0x375   :  { %v5226_v10 = vcvt.s32.f32 %v4714_v23  ;;  %v4782_v27 = vunpack.c.3.s8 %v4558_v6  ;;  %v5230_v61 = vcvt.s32.f32 %v4718_v47  ;;  %v4247_v28 = vadd.f32 %v4246_v31, %v8139_v50 }
 0x376   :  { %6013 = vmatpush.bf16.msrb.mxu1 %v5845_v62  ;;  %v5290_v32 = vcvt.s32.f32 %v4778_v58  ;;  %v5065_v49 = vunpack.c.2.s8 %v4629_v12  ;;  %6024 = vmatpush.bf16.msrb.mxu2 %v5889_v44  ;;  %v5841_v40 = vpack.c.bf16 %v5493_v19, %v5489_v1  ;;  %v5069_v57 = vunpack.c.3.s8 %v4629_v12  ;;  %v4286_v62 = vpop.f32.mrf.mxu1  ;;  %v4574_v58 = vld [vmem:[#allocation8 + $0x168] sm:$0xff] }
 0x377   :  { %v5294_v52 = vcvt.s32.f32 %v4782_v27  ;;  %v4706_v38 = vunpack.c.0.s8 %v4542_v18  ;;  %v5710_v53 = vpack.c.bf16 %v5230_v61, %v5226_v10  ;;  %v8144_v21 = vadd.f32 %v4260_v8, %v4247_v28  ;;  %v4534_v61 = vld [vmem:[#allocation8 + $0x28] sm:$0xff] }
 0x378   :  { %v5577_v46 = vcvt.s32.f32 %v5065_v49  ;;  %v4710_v45 = vunpack.c.1.s8 %v4542_v18  ;;  %6000 = vmatpush.bf16.msrb.mxu0 %v5809_v4  ;;  %v5581_v26 = vcvt.s32.f32 %v5069_v57  ;;  %v4770_v56 = vunpack.c.0.s8 %v4558_v6 }
 0x379   :  { %v5742_v25 = vpack.c.bf16 %v5294_v52, %v5290_v32  ;;  %v5218_v14 = vcvt.s32.f32 %v4706_v38  ;;  %v4774_v33 = vunpack.c.1.s8 %v4558_v6  ;;  %v5057_v60 = vunpack.c.0.s8 %v4629_v12  ;;  %v4550_v38 = vld [vmem:[#allocation8 + $0xa8] sm:$0xff] }
 0x37a   :  { %6014 = vmatpush.bf16.msrb.mxu1 %v5841_v40  ;;  %v5222_v50 = vcvt.s32.f32 %v4710_v45  ;;  %v5061_v43 = vunpack.c.1.s8 %v4629_v12  ;;  %v5885_v17 = vpack.c.bf16 %v5581_v26, %v5577_v46  ;;  %v5282_v59 = vcvt.s32.f32 %v4770_v56 }
 0x37b   :  { %v4698_v20 = vunpack.c.2.s8 %v4538_v39  ;;  %v4702_v41 = vunpack.c.3.s8 %v4538_v39  ;;  %6001 = vmatmul.bf16.vlgmr.msrb.gmra.mxu0 %v8080_v54  ;;  %v5286_v51 = vcvt.s32.f32 %v4774_v33  ;;  %v5569_v18 = vcvt.s32.f32 %v5057_v60 }
 0x37c   :  { %6049 = vmatpush.bf16.msra.mxu0 %v5710_v53  ;;  %v5706_v48 = vpack.c.bf16 %v5222_v50, %v5218_v14  ;;  %v5573_v42 = vcvt.s32.f32 %v5061_v43  ;;  %6025 = vmatpush.bf16.msrb.mxu2 %v5885_v17  ;;  %v4762_v11 = vunpack.c.2.s8 %v4554_v24  ;;  %v4766_v6 = vunpack.c.3.s8 %v4554_v24 }
 0x37d   :  { %6015 = vmatmul.bf16.vlgmr.msrb.gmra.mxu1 %v8135_v3  ;;  %v5210_v7 = vcvt.s32.f32 %v4698_v20  ;;  %v5214_v0 = vcvt.s32.f32 %v4702_v41  ;;  %v5738_v2 = vpack.c.bf16 %v5286_v51, %v5282_v59  ;;  %v5049_v63 = vunpack.c.2.s8 %v4625_v34 }
 0x37e   :  { %6063 = vmatpush.bf16.msra.mxu1 %v5742_v25  ;;  %v5881_v16 = vpack.c.bf16 %v5573_v42, %v5569_v18  ;;  %v5053_v9 = vunpack.c.3.s8 %v4625_v34  ;;  %v5274_v36 = vcvt.s32.f32 %v4762_v11  ;;  %v5278_v23 = vcvt.s32.f32 %v4766_v6  ;;  %v4274_v25 = vpop.f32.mrf.mxu0  ;;  %v4288_v51 = vpop.f32.mrf.mxu1 }
 0x37f   :  { %v5702_v55 = vpack.c.bf16 %v5214_v0, %v5210_v7  ;;  %v4273_v31 = vadd.f32 %v4272_v30, %v8141_v37  ;;  %v5561_v12 = vcvt.s32.f32 %v5049_v63  ;;  %v4690_v1 = vunpack.c.0.s8 %v4538_v39  ;;  %v4300_v42 = vpop.f32.mrf.mxu2 }
 0x380   :  { %6050 = vmatpush.bf16.msra.mxu0 %v5706_v48  ;;  %v5565_v44 = vcvt.s32.f32 %v5053_v9  ;;  %v4694_v47 = vunpack.c.1.s8 %v4538_v39  ;;  %6026 = vmatpush.bf16.msrb.mxu2 %v5881_v16  ;;  %v5734_v4 = vpack.c.bf16 %v5278_v23, %v5274_v36  ;;  %v4754_v10 = vunpack.c.0.s8 %v4554_v24 }
 0x381   :  { %v4287_v19 = vadd.f32 %v4286_v62, %v4273_v31  ;;  %v4758_v27 = vunpack.c.1.s8 %v4554_v24  ;;  %v5202_v28 = vcvt.s32.f32 %v4690_v1  ;;  %v5041_v40 = vunpack.c.0.s8 %v4625_v34  ;;  %v4530_v31 = vld [vmem:[#allocation8 + $0x8] sm:$0xff] }
 0x382   :  { %6064 = vmatpush.bf16.msra.mxu1 %v5738_v2  ;;  %v5877_v32 = vpack.c.bf16 %v5565_v44, %v5561_v12  ;;  %v5206_v49 = vcvt.s32.f32 %v4694_v47  ;;  %v5266_v52 = vcvt.s32.f32 %v4754_v10  ;;  %v5045_v37 = vunpack.c.1.s8 %v4625_v34  ;;  %v4546_v12 = vld [vmem:[#allocation8 + $0x88] sm:$0xff] }
 0x383   :  { %v5270_v8 = vcvt.s32.f32 %v4758_v27  ;;  %v4842_v57 = vunpack.c.2.s8 %v4574_v58  ;;  %v5553_v46 = vcvt.s32.f32 %v5041_v40  ;;  %v4846_v45 = vunpack.c.3.s8 %v4574_v58 }
 0x384   :  { %6051 = vmatpush.bf16.msra.mxu0 %v5702_v55  ;;  %v5698_v53 = vpack.c.bf16 %v5206_v49, %v5202_v28  ;;  %v4682_v39 = vunpack.c.2.s8 %v4534_v61  ;;  %6027 = vmatpush.bf16.msrb.mxu2 %v5877_v32  ;;  %v5557_v14 = vcvt.s32.f32 %v5045_v37  ;;  %v4686_v50 = vunpack.c.3.s8 %v4534_v61 }
 0x385   :  { %v5730_v26 = vpack.c.bf16 %v5270_v8, %v5266_v52  ;;  %v5354_v56 = vcvt.s32.f32 %v4842_v57  ;;  %v5358_v33 = vcvt.s32.f32 %v4846_v45  ;;  %v4746_v43 = vunpack.c.2.s8 %v4550_v38 }
 0x386   :  { %6065 = vmatpush.bf16.msra.mxu1 %v5734_v4  ;;  %v5194_v60 = vcvt.s32.f32 %v4682_v39  ;;  %v4750_v24 = vunpack.c.3.s8 %v4550_v38  ;;  %v5873_v30 = vpack.c.bf16 %v5557_v14, %v5553_v46  ;;  %v5198_v17 = vcvt.s32.f32 %v4686_v50 }
 0x387   :  { %v4275_v59 = vadd.f32 %v4274_v25, %v8144_v21  ;;  %v4834_v20 = vunpack.c.0.s8 %v4574_v58  ;;  %v5774_v41 = vpack.c.bf16 %v5358_v33, %v5354_v56  ;;  %v5258_v34 = vcvt.s32.f32 %v4746_v43  ;;  %v4570_v21 = vld [vmem:[#allocation8 + $0x148] sm:$0xff] }
 0x388   :  { %6052 = vmatpush.bf16.msra.mxu0 %v5698_v53  ;;  %v5262_v48 = vcvt.s32.f32 %v4750_v24  ;;  %v4838_v18 = vunpack.c.1.s8 %v4574_v58  ;;  %6028 = vmatpush.bf16.msrb.mxu2 %v5873_v30  ;;  %v5694_v7 = vpack.c.bf16 %v5198_v17, %v5194_v60  ;;  %v4674_v6 = vunpack.c.0.s8 %v4534_v61  ;;  %v4314_v58 = vpop.f32.mrf.mxu3  ;;  %v4606_v43 = vld [vmem:[#allocation8 + $0x268] sm:$0xff] }
 0x389   :  { %v8150_v0 = vadd.f32 %v4288_v51, %v4275_v59  ;;  %v5346_v11 = vcvt.s32.f32 %v4834_v20  ;;  %v4678_v63 = vunpack.c.1.s8 %v4534_v61  ;;  %v4738_v9 = vunpack.c.0.s8 %v4550_v38  ;;  %v4622_v20 = vld [vmem:[#allocation8 + $0x2e8] sm:$0xff] }
 0x38a   :  { %6066 = vmatpush.bf16.msra.mxu1 %v5730_v26  ;;  %v5726_v2 = vpack.c.bf16 %v5262_v48, %v5258_v34  ;;  %v5350_v16 = vcvt.s32.f32 %v4838_v18  ;;  %v5186_v62 = vcvt.s32.f32 %v4674_v6  ;;  %v4742_v55 = vunpack.c.1.s8 %v4550_v38  ;;  %v4302_v18 = vpop.f32.mrf.mxu2 }
 0x38b   :  { %v4301_v36 = vadd.f32 %v4300_v42, %v4287_v19  ;;  %v4446_v23 = vperm.slane %v7814_v22, 6  ;;  %v5190_v1 = vcvt.s32.f32 %v4678_v63  ;;  %v5250_v47 = vcvt.s32.f32 %v4738_v9  ;;  %v4566_v42 = vld [vmem:[#allocation8 + $0x128] sm:$0xff] }
 0x38c   :  { %6077 = vmatpush.bf16.msra.mxu2 %v5774_v41  ;;  %6053 = vmatpush.bf16.msra.mxu0 %v5694_v7  ;;  %v5770_v44 = vpack.c.bf16 %v5350_v16, %v5346_v11  ;;  %v4479_v4 = vperm.slane %v7816_v29, 6  ;;  %v5254_v10 = vcvt.s32.f32 %v4742_v55  ;;  %v4826_v61 = vunpack.c.2.s8 %v4570_v21 }
 0x38d   :  { %v4315_v27 = vadd.f32 %v4314_v58, %v4301_v36  ;;  %v4830_v32 = vunpack.c.3.s8 %v4570_v21  ;;  %v5690_v28 = vpack.c.bf16 %v5190_v1, %v5186_v62  ;;  %v4666_v49 = vunpack.c.2.s8 %v4530_v31 }
 0x38e   :  { %6067 = vmatpush.bf16.msra.mxu1 %v5726_v2  ;;  %v4670_v40 = vunpack.c.3.s8 %v4530_v31  ;;  %v4730_v19 = vunpack.c.2.s8 %v4546_v12  ;;  %v5722_v52 = vpack.c.bf16 %v5254_v10, %v5250_v47  ;;  %v5338_v37 = vcvt.s32.f32 %v4826_v61 }
 0x38f   :  { %v4462_v8 = vmul.f32 %v4446_v23, %v4315_v27  ;;  %v5342_v57 = vcvt.s32.f32 %v4830_v32  ;;  %v5178_v38 = vcvt.s32.f32 %v4666_v49  ;;  %v4734_v46 = vunpack.c.3.s8 %v4546_v12 }
 0x390   :  { %6078 = vmatpush.bf16.msra.mxu2 %v5770_v44  ;;  %6054 = vmatpush.bf16.msra.mxu0 %v5690_v28  ;;  %v5182_v53 = vcvt.s32.f32 %v4670_v40  ;;  %v5242_v45 = vcvt.s32.f32 %v4730_v19  ;;  %v4818_v26 = vunpack.c.0.s8 %v4570_v21  ;;  %v4822_v14 = vunpack.c.1.s8 %v4570_v21  ;;  %v4316_v47 = vpop.f32.mrf.mxu3 }
 0x391   :  { %v8158_v39 = vadd.f32 %v4479_v4, %v4462_v8  ;;  %v5766_v25 = vpack.c.bf16 %v5342_v57, %v5338_v37  ;;  %v5246_v50 = vcvt.s32.f32 %v4734_v46  ;;  %v4658_v33 = vunpack.c.0.s8 %v4530_v31 }
 0x392   :  { %6068 = vmatpush.bf16.msra.mxu1 %v5722_v52  ;;  %v5686_v56 = vpack.c.bf16 %v5182_v53, %v5178_v38  ;;  %v4662_v60 = vunpack.c.1.s8 %v4530_v31  ;;  %v5330_v30 = vcvt.s32.f32 %v4818_v26  ;;  %v5334_v17 = vcvt.s32.f32 %v4822_v14  ;;  %v4602_v52 = vld [vmem:[#allocation8 + $0x248] sm:$0xff] }
 0x393   :  { %v4511_v24 = vmax.f32 %v8158_v39, 0.0  ;;  %v4722_v59 = vunpack.c.0.s8 %v4546_v12  ;;  %v5718_v41 = vpack.c.bf16 %v5246_v50, %v5242_v45  ;;  %v5170_v34 = vcvt.s32.f32 %v4658_v33  ;;  %v4618_v38 = vld [vmem:[#allocation8 + $0x2c8] sm:$0xff]  ;;  %v4328_v33 = vpop.f32.mrf.mxu0 }
 0x394   :  { %6079 = vmatpush.bf16.msra.mxu2 %v5766_v25  ;;  %6055 = vmatpush.bf16.msra.mxu0 %v5686_v56  ;;  %v5174_v48 = vcvt.s32.f32 %v4662_v60  ;;  %v4726_v51 = vunpack.c.1.s8 %v4546_v12  ;;  %v5762_v7 = vpack.c.bf16 %v5334_v17, %v5330_v30  ;;  %v4970_v6 = vunpack.c.2.s8 %v4606_v43  ;;  %v4342_v60 = vpop.f32.mrf.mxu1 }
 0x395   :  { %v5234_v11 = vcvt.s32.f32 %v4722_v59  ;;  %v4974_v2 = vunpack.c.3.s8 %v4606_v43  ;;  %v5034_v9 = vunpack.c.2.s8 %v4622_v20  ;;  %v5038_v21 = vunpack.c.3.s8 %v4622_v20 }
 0x396   :  { %6069 = vmatpush.bf16.msra.mxu1 %v5718_v41  ;;  %v5682_v16 = vpack.c.bf16 %v5174_v48, %v5170_v34  ;;  %v5238_v63 = vcvt.s32.f32 %v4726_v51  ;;  %v5482_v62 = vcvt.s32.f32 %v4970_v6  ;;  %v4303_v36 = vadd.f32 %v4302_v18, %v8150_v0 }
 0x397   :  { %v5486_v55 = vcvt.s32.f32 %v4974_v2  ;;  %v4810_v31 = vunpack.c.2.s8 %v4566_v42  ;;  %v5546_v12 = vcvt.s32.f32 %v5034_v9  ;;  %v5550_v1 = vcvt.s32.f32 %v5038_v21 }
 0x398   :  { %6080 = vmatpush.bf16.msra.mxu2 %v5762_v7  ;;  %6056 = vmatpush.bf16.msra.mxu0 %v5682_v16  ;;  %v5714_v44 = vpack.c.bf16 %v5238_v63, %v5234_v11  ;;  %v4814_v58 = vunpack.c.3.s8 %v4566_v42  ;;  %v4317_v27 = vadd.f32 %v4316_v47, %v4303_v36  ;;  %v4962_v32 = vunpack.c.0.s8 %v4606_v43  ;;  %v4638_v47 = vld [vmem:[#allocation8 + $0x368] sm:$0xff] }
 0x399   :  { %v5838_v10 = vpack.c.bf16 %v5486_v55, %v5482_v62  ;;  %v5322_v61 = vcvt.s32.f32 %v4810_v31  ;;  %v5870_v28 = vpack.c.bf16 %v5550_v1, %v5546_v12  ;;  %v4966_v40 = vunpack.c.1.s8 %v4606_v43  ;;  %v4653_v62 = vld [vmem:[#allocation8 + $0x3e0] sm:$0xff] }
 0x39a   :  { %6070 = vmatpush.bf16.msra.mxu1 %v5714_v44  ;;  %v5326_v49 = vcvt.s32.f32 %v4814_v58  ;;  %v5026_v19 = vunpack.c.0.s8 %v4622_v20  ;;  %v4470_v0 = vmul.f32 %v4446_v23, %v4317_v27  ;;  %v5474_v8 = vcvt.s32.f32 %v4962_v32  ;;  %v4562_v23 = vld [vmem:[#allocation8 + $0x108] sm:$0xff] }
 0x39b   :  { %v5030_v37 = vunpack.c.1.s8 %v4622_v20  ;;  %v4802_v57 = vunpack.c.0.s8 %v4566_v42  ;;  %6057 = vmatmul.bf16.vlgmr.msra.gmra.mxu0 %v7850_v13  ;;  %v5478_v46 = vcvt.s32.f32 %v4966_v40  ;;  %v4806_v25 = vunpack.c.1.s8 %v4566_v42  ;;  %v4598_v32 = vld [vmem:[#allocation8 + $0x228] sm:$0xff] }
 0x39c   :  { %6105 = vmatpush.bf16.msrb.mxu0 %v5838_v10  ;;  %v5758_v53 = vpack.c.bf16 %v5326_v49, %v5322_v61  ;;  %v5538_v45 = vcvt.s32.f32 %v5026_v19  ;;  %v4503_v26 = vadd.f32 %v4479_v4, %v4470_v0  ;;  %v4954_v50 = vunpack.c.2.s8 %v4602_v52 }
 0x39d   :  { %6071 = vmatmul.bf16.vlgmr.msra.gmra.mxu1 %v7894_v35  ;;  %v5542_v14 = vcvt.s32.f32 %v5030_v37  ;;  %v5314_v56 = vcvt.s32.f32 %v4802_v57  ;;  %v5834_v43 = vpack.c.bf16 %v5478_v46, %v5474_v8  ;;  %v5318_v30 = vcvt.s32.f32 %v4806_v25 }
 0x39e   :  { %6119 = vmatpush.bf16.msrb.mxu1 %v5870_v28  ;;  %6081 = vmatpush.bf16.msra.mxu2 %v5758_v53  ;;  %v4958_v17 = vunpack.c.3.s8 %v4602_v52  ;;  %v5018_v59 = vunpack.c.2.s8 %v4618_v38  ;;  %v4519_v20 = vmax.f32 %v4503_v26, 0.0  ;;  %v5466_v34 = vcvt.s32.f32 %v4954_v50  ;;  %v4344_v53 = vpop.f32.mrf.mxu1 }
 0x39f   :  { %v5866_v41 = vpack.c.bf16 %v5542_v14, %v5538_v45  ;;  %v5022_v48 = vunpack.c.3.s8 %v4618_v38  ;;  %v5754_v51 = vpack.c.bf16 %v5318_v30, %v5314_v56  ;;  %v4794_v42 = vunpack.c.2.s8 %v4562_v23 }
 0x3a0   :  { %6106 = vmatpush.bf16.msrb.mxu0 %v5834_v43  ;;  %v5470_v4 = vcvt.s32.f32 %v4958_v17  ;;  %v5530_v18 = vcvt.s32.f32 %v5018_v59  ;;  %v8170_v7 = vpack.c.bf16 %v4519_v20, %v4511_v24  ;;  %v4798_v6 = vunpack.c.3.s8 %v4562_v23 }
 0x3a1   :  { %v5534_v11 = vcvt.s32.f32 %v5022_v48  ;;  %v8172_v2 = vadd.f32 %v4342_v60, %v4328_v33  ;;  %v5306_v63 = vcvt.s32.f32 %v4794_v42  ;;  %v4946_v9 = vunpack.c.0.s8 %v4602_v52 }
 0x3a2   :  { %6120 = vmatpush.bf16.msrb.mxu1 %v5866_v41  ;;  %6082 = vmatpush.bf16.msra.mxu2 %v5754_v51  ;;  %v5830_v16 = vpack.c.bf16 %v5470_v4, %v5466_v34  ;;  %v4950_v21 = vunpack.c.1.s8 %v4602_v52  ;;  %v5310_v36 = vcvt.s32.f32 %v4798_v6  ;;  %v5010_v31 = vunpack.c.0.s8 %v4618_v38  ;;  %v4614_v52 = vld [vmem:[#allocation8 + $0x2a8] sm:$0xff] }
 0x3a3   :  { %v5862_v55 = vpack.c.bf16 %v5534_v11, %v5530_v18  ;;  %v5014_v44 = vunpack.c.1.s8 %v4618_v38  ;;  %6029 = vmatmul.bf16.vlgmr.msrb.gmra.mxu2 %v8170_v7  ;;  %v5458_v39 = vcvt.s32.f32 %v4946_v9  ;;  %v4786_v12 = vunpack.c.0.s8 %v4562_v23  ;;  %v4330_v38 = vpop.f32.mrf.mxu0  ;;  %v4356_v18 = vpop.f32.mrf.mxu2 }
 0x3a4   :  { %6107 = vmatpush.bf16.msrb.mxu0 %v5830_v16  ;;  %v5462_v24 = vcvt.s32.f32 %v4950_v21  ;;  %v4790_v1 = vunpack.c.1.s8 %v4562_v23  ;;  %v5750_v58 = vpack.c.bf16 %v5310_v36, %v5306_v63  ;;  %v5522_v10 = vcvt.s32.f32 %v5010_v31  ;;  %v4649_v63 = vld [vmem:[#allocation8 + $0x3c0] sm:$0xff] }
 0x3a5   :  { %v5526_v27 = vcvt.s32.f32 %v5014_v44  ;;  %v5161_v61 = vunpack.c.2.s8 %v4653_v62  ;;  %v5298_v49 = vcvt.s32.f32 %v4786_v12  ;;  %v5165_v19 = vunpack.c.3.s8 %v4653_v62  ;;  %v4594_v12 = vld [vmem:[#allocation8 + $0x208] sm:$0xff] }
 0x3a6   :  { %6121 = vmatpush.bf16.msrb.mxu1 %v5862_v55  ;;  %v5826_v28 = vpack.c.bf16 %v5462_v24, %v5458_v39  ;;  %v5302_v40 = vcvt.s32.f32 %v4790_v1  ;;  %6083 = vmatpush.bf16.msra.mxu2 %v5750_v58  ;;  %v5098_v37 = vunpack.c.2.s8 %v4638_v47  ;;  %v5102_v57 = vunpack.c.3.s8 %v4638_v47  ;;  %v4634_v24 = vld [vmem:[#allocation8 + $0x348] sm:$0xff] }
 0x3a7   :  { %v5858_v0 = vpack.c.bf16 %v5526_v27, %v5522_v10  ;;  %v5673_v8 = vcvt.s32.f32 %v5161_v61  ;;  %v5677_v45 = vcvt.s32.f32 %v5165_v19  ;;  %v4938_v25 = vunpack.c.2.s8 %v4598_v32  ;;  %v4370_v10 = vpop.f32.mrf.mxu3  ;;  %v4610_v61 = vld [vmem:[#allocation8 + $0x288] sm:$0xff] }
 0x3a8   :  { %6108 = vmatpush.bf16.msrb.mxu0 %v5826_v28  ;;  %v5746_v46 = vpack.c.bf16 %v5302_v40, %v5298_v49  ;;  %v4942_v26 = vunpack.c.3.s8 %v4598_v32  ;;  %v5610_v14 = vcvt.s32.f32 %v5098_v37  ;;  %v5614_v56 = vcvt.s32.f32 %v5102_v57 }
 0x3a9   :  { %v5002_v50 = vunpack.c.2.s8 %v4614_v52  ;;  %v5006_v23 = vunpack.c.3.s8 %v4614_v52  ;;  %v5933_v33 = vpack.c.bf16 %v5677_v45, %v5673_v8  ;;  %v5450_v60 = vcvt.s32.f32 %v4938_v25 }
 0x3aa   :  { %6122 = vmatpush.bf16.msrb.mxu1 %v5858_v0  ;;  %v5454_v43 = vcvt.s32.f32 %v4942_v26  ;;  %v8175_v30 = vadd.f32 %v4344_v53, %v4330_v38  ;;  %6084 = vmatpush.bf16.msra.mxu2 %v5746_v46  ;;  %v5902_v17 = vpack.c.bf16 %v5614_v56, %v5610_v14  ;;  %v5153_v41 = vunpack.c.0.s8 %v4653_v62 }
 0x3ab   :  { %v5514_v59 = vcvt.s32.f32 %v5002_v50  ;;  %v5518_v20 = vcvt.s32.f32 %v5006_v23  ;;  %6035 = vmatpush.bf16.msrb.mxu3 %v5933_v33  ;;  %v5157_v48 = vunpack.c.1.s8 %v4653_v62  ;;  %v5090_v51 = vunpack.c.0.s8 %v4638_v47 }
 0x3ac   :  { %v5822_v34 = vpack.c.bf16 %v5454_v43, %v5450_v60  ;;  %v5094_v4 = vunpack.c.1.s8 %v4638_v47  ;;  %v5665_v11 = vcvt.s32.f32 %v5153_v41  ;;  %v4930_v6 = vunpack.c.0.s8 %v4598_v32 }
 0x3ad   :  { %v5854_v42 = vpack.c.bf16 %v5518_v20, %v5514_v59  ;;  %v4934_v16 = vunpack.c.1.s8 %v4598_v32  ;;  %v5669_v9 = vcvt.s32.f32 %v5157_v48  ;;  %v5602_v21 = vcvt.s32.f32 %v5090_v51 }
 0x3ae   :  { %6133 = vmatpush.bf16.msrb.mxu2 %v5902_v17  ;;  %6109 = vmatpush.bf16.msrb.mxu0 %v5822_v34  ;;  %v5606_v55 = vcvt.s32.f32 %v5094_v4  ;;  %v4994_v36 = vunpack.c.0.s8 %v4614_v52  ;;  %v5442_v31 = vcvt.s32.f32 %v4930_v6  ;;  %v4998_v39 = vunpack.c.1.s8 %v4614_v52  ;;  %v4543_v34 = vld [vmem:[#allocation8 + $0x70] sm:$0xff] }
 0x3af   :  { %6123 = vmatpush.bf16.msrb.mxu1 %v5854_v42  ;;  %v5446_v44 = vcvt.s32.f32 %v4934_v16  ;;  %v4357_v62 = vadd.f32 %v4356_v18, %v8172_v2  ;;  %v5929_v1 = vpack.c.bf16 %v5669_v9, %v5665_v11  ;;  %v5145_v27 = vunpack.c.2.s8 %v4649_v63  ;;  %v4559_v42 = vld [vmem:[#allocation8 + $0xf0] sm:$0xff] }
 0x3b0   :  { %v5898_v47 = vpack.c.bf16 %v5606_v55, %v5602_v21  ;;  %v5506_v58 = vcvt.s32.f32 %v4994_v36  ;;  %v5510_v28 = vcvt.s32.f32 %v4998_v39  ;;  %v5149_v40 = vunpack.c.3.s8 %v4649_v63 }
 0x3b1   :  { %v5818_v32 = vpack.c.bf16 %v5446_v44, %v5442_v31  ;;  %v8178_v49 = vadd.f32 %v4370_v10, %v4357_v62  ;;  %6036 = vmatpush.bf16.msrb.mxu3 %v5929_v1  ;;  %v5657_v19 = vcvt.s32.f32 %v5145_v27  ;;  %v5082_v0 = vunpack.c.2.s8 %v4634_v24  ;;  %v4358_v31 = vpop.f32.mrf.mxu2  ;;  %v4645_v44 = vld [vmem:[#allocation8 + $0x3a0] sm:$0xff] }
 0x3b2   :  { %6134 = vmatpush.bf16.msrb.mxu2 %v5898_v47  ;;  %v5086_v52 = vunpack.c.3.s8 %v4634_v24  ;;  %v4922_v8 = vunpack.c.2.s8 %v4594_v12  ;;  %v5850_v2 = vpack.c.bf16 %v5510_v28, %v5506_v58  ;;  %v5661_v37 = vcvt.s32.f32 %v5149_v40  ;;  %v4630_v47 = vld [vmem:[#allocation8 + $0x328] sm:$0xff] }
 0x3b3   :  { %6110 = vmatpush.bf16.msrb.mxu0 %v5818_v32  ;;  %v4926_v57 = vunpack.c.3.s8 %v4594_v12  ;;  %v4986_v38 = vunpack.c.2.s8 %v4610_v61  ;;  %6085 = vmatmul.bf16.vlgmr.msra.gmra.mxu2 %v7964_v15  ;;  %v5594_v53 = vcvt.s32.f32 %v5082_v0  ;;  %v4990_v25 = vunpack.c.3.s8 %v4610_v61 }
 0x3b4   :  { %v5598_v46 = vcvt.s32.f32 %v5086_v52  ;;  %v5434_v45 = vcvt.s32.f32 %v4922_v8  ;;  %6124 = vmatpush.bf16.msrb.mxu1 %v5850_v2  ;;  %v5925_v26 = vpack.c.bf16 %v5661_v37, %v5657_v19  ;;  %v5137_v50 = vunpack.c.0.s8 %v4649_v63  ;;  %v4372_v52 = vpop.f32.mrf.mxu3 }
 0x3b5   :  { %v5438_v14 = vcvt.s32.f32 %v4926_v57  ;;  %v5498_v56 = vcvt.s32.f32 %v4986_v38  ;;  %v5502_v33 = vcvt.s32.f32 %v4990_v25  ;;  %v5141_v60 = vunpack.c.1.s8 %v4649_v63 }
 0x3b6   :  { %v5894_v23 = vpack.c.bf16 %v5598_v46, %v5594_v53  ;;  %v5074_v43 = vunpack.c.0.s8 %v4634_v24  ;;  %6037 = vmatpush.bf16.msrb.mxu3 %v5925_v26  ;;  %v5649_v59 = vcvt.s32.f32 %v5137_v50  ;;  %v5078_v20 = vunpack.c.1.s8 %v4634_v24 }
 0x3b7   :  { %v5814_v17 = vpack.c.bf16 %v5438_v14, %v5434_v45  ;;  %v4914_v41 = vunpack.c.0.s8 %v4594_v12  ;;  %v5846_v48 = vpack.c.bf16 %v5502_v33, %v5498_v56  ;;  %v5653_v51 = vcvt.s32.f32 %v5141_v60 }
 0x3b8   :  { %6135 = vmatpush.bf16.msrb.mxu2 %v5894_v23  ;;  %v5586_v4 = vcvt.s32.f32 %v5074_v43  ;;  %v4918_v18 = vunpack.c.1.s8 %v4594_v12  ;;  %v5590_v11 = vcvt.s32.f32 %v5078_v20  ;;  %v4978_v16 = vunpack.c.0.s8 %v4610_v61 }
 0x3b9   :  { %6111 = vmatpush.bf16.msrb.mxu0 %v5814_v17  ;;  %v5426_v6 = vcvt.s32.f32 %v4914_v41  ;;  %v4982_v9 = vunpack.c.1.s8 %v4610_v61  ;;  %6125 = vmatpush.bf16.msrb.mxu1 %v5846_v48  ;;  %v5921_v63 = vpack.c.bf16 %v5653_v51, %v5649_v59  ;;  %v4715_v55 = vunpack.c.2.s8 %v4543_v34  ;;  %v4539_v17 = vld [vmem:[#allocation8 + $0x50] sm:$0xff] }
 0x3ba   :  { %v5430_v21 = vcvt.s32.f32 %v4918_v18  ;;  %v4719_v36 = vunpack.c.3.s8 %v4543_v34  ;;  %v5890_v39 = vpack.c.bf16 %v5590_v11, %v5586_v4  ;;  %v5490_v62 = vcvt.s32.f32 %v4978_v16  ;;  %v4555_v51 = vld [vmem:[#allocation8 + $0xd0] sm:$0xff] }
 0x3bb   :  { %v5494_v24 = vcvt.s32.f32 %v4982_v9  ;;  %v4779_v1 = vunpack.c.2.s8 %v4559_v42  ;;  %6038 = vmatpush.bf16.msrb.mxu3 %v5921_v63  ;;  %v5227_v58 = vcvt.s32.f32 %v4715_v55  ;;  %v4783_v27 = vunpack.c.3.s8 %v4559_v42 }
 0x3bc   :  { %v5810_v12 = vpack.c.bf16 %v5430_v21, %v5426_v6  ;;  %v5231_v10 = vcvt.s32.f32 %v4719_v36  ;;  %6136 = vmatpush.bf16.msrb.mxu2 %v5890_v39  ;;  %v4359_v28 = vadd.f32 %v4358_v31, %v8175_v30  ;;  %v5129_v40 = vunpack.c.2.s8 %v4645_v44  ;;  %v4641_v6 = vld [vmem:[#allocation8 + $0x380] sm:$0xff]  ;;  %v4626_v21 = vld [vmem:[#allocation8 + $0x308] sm:$0xff] }
 0x3bd   :  { %v5842_v32 = vpack.c.bf16 %v5494_v24, %v5490_v62  ;;  %v5291_v61 = vcvt.s32.f32 %v4779_v1  ;;  %v5295_v0 = vcvt.s32.f32 %v4783_v27  ;;  %v5133_v8 = vunpack.c.3.s8 %v4645_v44 }
 0x3be   :  { %6112 = vmatpush.bf16.msrb.mxu0 %v5810_v12  ;;  %v5711_v19 = vpack.c.bf16 %v5231_v10, %v5227_v58  ;;  %v5066_v2 = vunpack.c.2.s8 %v4630_v47  ;;  %v8182_v37 = vadd.f32 %v4372_v52, %v4359_v28  ;;  %v5641_v57 = vcvt.s32.f32 %v5129_v40  ;;  %v4384_v12 = vpop.f32.mrf.mxu0 }
 0x3bf   :  { %6126 = vmatpush.bf16.msrb.mxu1 %v5842_v32  ;;  %v5070_v38 = vunpack.c.3.s8 %v4630_v47  ;;  %v4707_v53 = vunpack.c.0.s8 %v4543_v34  ;;  %v5743_v46 = vpack.c.bf16 %v5295_v0, %v5291_v61  ;;  %v5645_v45 = vcvt.s32.f32 %v5133_v8 }
 0x3c0   :  { %v5578_v25 = vcvt.s32.f32 %v5066_v2  ;;  %v4711_v26 = vunpack.c.1.s8 %v4543_v34  ;;  %v4771_v56 = vunpack.c.0.s8 %v4559_v42  ;;  %v4775_v50 = vunpack.c.1.s8 %v4559_v42 }
 0x3c1   :  { %6113 = vmatmul.bf16.vlgmr.msrb.gmra.mxu0 %v8080_v54  ;;  %v5582_v30 = vcvt.s32.f32 %v5070_v38  ;;  %v5219_v14 = vcvt.s32.f32 %v4707_v53  ;;  %v5917_v23 = vpack.c.bf16 %v5645_v45, %v5641_v57  ;;  %v5121_v60 = vunpack.c.0.s8 %v4645_v44  ;;  %v4398_v38 = vpop.f32.mrf.mxu1 }
 0x3c2   :  { %6161 = vmatpush.bf16.msra.mxu0 %v5711_v19  ;;  %v5223_v33 = vcvt.s32.f32 %v4711_v26  ;;  %v5125_v43 = vunpack.c.1.s8 %v4645_v44  ;;  %6127 = vmatmul.bf16.vlgmr.msrb.gmra.mxu1 %v8135_v3  ;;  %v5283_v20 = vcvt.s32.f32 %v4771_v56  ;;  %v5287_v41 = vcvt.s32.f32 %v4775_v50 }
 0x3c3   :  { %6175 = vmatpush.bf16.msra.mxu1 %v5743_v46  ;;  %v5886_v59 = vpack.c.bf16 %v5582_v30, %v5578_v25  ;;  %v5058_v48 = vunpack.c.0.s8 %v4630_v47  ;;  %6039 = vmatpush.bf16.msrb.mxu3 %v5917_v23  ;;  %v5633_v4 = vcvt.s32.f32 %v5121_v60  ;;  %v5062_v11 = vunpack.c.1.s8 %v4630_v47 }
 0x3c4   :  { %v5707_v34 = vpack.c.bf16 %v5223_v33, %v5219_v14  ;;  %v5637_v18 = vcvt.s32.f32 %v5125_v43  ;;  %v5739_v42 = vpack.c.bf16 %v5287_v41, %v5283_v20  ;;  %v4699_v9 = vunpack.c.2.s8 %v4539_v17  ;;  %v4590_v14 = vld [vmem:[#allocation8 + $0x1e8] sm:$0xff] }
 0x3c5   :  { %6137 = vmatpush.bf16.msrb.mxu2 %v5886_v59  ;;  %v5570_v16 = vcvt.s32.f32 %v5058_v48  ;;  %v4703_v63 = vunpack.c.3.s8 %v4539_v17  ;;  %v5574_v36 = vcvt.s32.f32 %v5062_v11  ;;  %v4763_v31 = vunpack.c.2.s8 %v4555_v51 }
 0x3c6   :  { %6162 = vmatpush.bf16.msra.mxu0 %v5707_v34  ;;  %v5913_v55 = vpack.c.bf16 %v5637_v18, %v5633_v4  ;;  %v4767_v44 = vunpack.c.3.s8 %v4555_v51  ;;  %v5211_v39 = vcvt.s32.f32 %v4699_v9  ;;  %v5113_v24 = vunpack.c.2.s8 %v4641_v6  ;;  %v4535_v4 = vld [vmem:[#allocation8 + $0x30] sm:$0xff] }
 0x3c7   :  { %6176 = vmatpush.bf16.msra.mxu1 %v5739_v42  ;;  %v5215_v62 = vcvt.s32.f32 %v4703_v63  ;;  %v5117_v1 = vunpack.c.3.s8 %v4641_v6  ;;  %v5882_v47 = vpack.c.bf16 %v5574_v36, %v5570_v16  ;;  %v5275_v58 = vcvt.s32.f32 %v4763_v31  ;;  %v4551_v16 = vld [vmem:[#allocation8 + $0xb0] sm:$0xff]  ;;  %v4386_v36 = vpop.f32.mrf.mxu0 }
 0x3c8   :  { %6040 = vmatpush.bf16.msrb.mxu3 %v5913_v55  ;;  %v5279_v10 = vcvt.s32.f32 %v4767_v44  ;;  %v5050_v27 = vunpack.c.2.s8 %v4626_v21  ;;  %v5625_v61 = vcvt.s32.f32 %v5113_v24  ;;  %v5054_v40 = vunpack.c.3.s8 %v4626_v21 }
 0x3c9   :  { %v5703_v32 = vpack.c.bf16 %v5215_v62, %v5211_v39  ;;  %v5629_v28 = vcvt.s32.f32 %v5117_v1  ;;  %6138 = vmatpush.bf16.msrb.mxu2 %v5882_v47  ;;  %v4385_v52 = vadd.f32 %v4384_v12, %v8178_v49  ;;  %v4691_v8 = vunpack.c.0.s8 %v4539_v17  ;;  %v4575_v49 = vld [vmem:[#allocation8 + $0x170] sm:$0xff] }
 0x3ca   :  { %v5735_v19 = vpack.c.bf16 %v5279_v10, %v5275_v58  ;;  %v5562_v0 = vcvt.s32.f32 %v5050_v27  ;;  %v5566_v57 = vcvt.s32.f32 %v5054_v40  ;;  %v4695_v53 = vunpack.c.1.s8 %v4539_v17  ;;  %v4400_v40 = vpop.f32.mrf.mxu1 }
 0x3cb   :  { %6163 = vmatpush.bf16.msra.mxu0 %v5703_v32  ;;  %v5909_v2 = vpack.c.bf16 %v5629_v28, %v5625_v61  ;;  %v4755_v46 = vunpack.c.0.s8 %v4555_v51  ;;  %v8187_v45 = vadd.f32 %v4398_v38, %v4385_v52  ;;  %v5203_v25 = vcvt.s32.f32 %v4691_v8 }
 0x3cc   :  { %6177 = vmatpush.bf16.msra.mxu1 %v5735_v19  ;;  %v4759_v26 = vunpack.c.1.s8 %v4555_v51  ;;  %v5105_v30 = vunpack.c.0.s8 %v4641_v6  ;;  %v5878_v56 = vpack.c.bf16 %v5566_v57, %v5562_v0  ;;  %v5207_v50 = vcvt.s32.f32 %v4695_v53  ;;  %v4412_v57 = vpop.f32.mrf.mxu2 }
 0x3cd   :  { %6041 = vmatpush.bf16.msrb.mxu3 %v5909_v2  ;;  %v5267_v23 = vcvt.s32.f32 %v4755_v46  ;;  %v5109_v33 = vunpack.c.1.s8 %v4641_v6  ;;  %v5042_v59 = vunpack.c.0.s8 %v4626_v21  ;;  %v5046_v20 = vunpack.c.1.s8 %v4626_v21 }
 0x3ce   :  { %v5271_v60 = vcvt.s32.f32 %v4759_v26  ;;  %v5617_v43 = vcvt.s32.f32 %v5105_v30  ;;  %6139 = vmatpush.bf16.msrb.mxu2 %v5878_v56  ;;  %v5699_v17 = vpack.c.bf16 %v5207_v50, %v5203_v25  ;;  %v4906_v48 = vunpack.c.2.s8 %v4590_v14  ;;  %v4586_v50 = vld [vmem:[#allocation8 + $0x1c8] sm:$0xff] }
 0x3cf   :  { %v5621_v41 = vcvt.s32.f32 %v5109_v33  ;;  %v4910_v34 = vunpack.c.3.s8 %v4590_v14  ;;  %v5554_v51 = vcvt.s32.f32 %v5042_v59  ;;  %v5558_v11 = vcvt.s32.f32 %v5046_v20 }
 0x3d0   :  { %v5731_v18 = vpack.c.bf16 %v5271_v60, %v5267_v23  ;;  %v4843_v42 = vunpack.c.2.s8 %v4575_v49  ;;  %6164 = vmatpush.bf16.msra.mxu0 %v5699_v17  ;;  %v5418_v63 = vcvt.s32.f32 %v4906_v48  ;;  %v4847_v55 = vunpack.c.3.s8 %v4575_v49  ;;  %v4531_v48 = vld [vmem:[#allocation8 + $0x10] sm:$0xff] }
 0x3d1   :  { %v5905_v9 = vpack.c.bf16 %v5621_v41, %v5617_v43  ;;  %v5422_v6 = vcvt.s32.f32 %v4910_v34  ;;  %v5874_v31 = vpack.c.bf16 %v5558_v11, %v5554_v51  ;;  %v4683_v44 = vunpack.c.2.s8 %v4535_v4  ;;  %v4571_v43 = vld [vmem:[#allocation8 + $0x150] sm:$0xff] }
 0x3d2   :  { %6178 = vmatpush.bf16.msra.mxu1 %v5731_v18  ;;  %v5355_v21 = vcvt.s32.f32 %v4843_v42  ;;  %v4687_v39 = vunpack.c.3.s8 %v4535_v4  ;;  %v5359_v24 = vcvt.s32.f32 %v4847_v55  ;;  %v4747_v1 = vunpack.c.2.s8 %v4551_v16  ;;  %v4547_v11 = vld [vmem:[#allocation8 + $0x90] sm:$0xff] }
 0x3d3   :  { %6042 = vmatpush.bf16.msrb.mxu3 %v5905_v9  ;;  %v5806_v62 = vpack.c.bf16 %v5422_v6, %v5418_v63  ;;  %v4751_v12 = vunpack.c.3.s8 %v4551_v16  ;;  %6140 = vmatpush.bf16.msrb.mxu2 %v5874_v31  ;;  %v5195_v47 = vcvt.s32.f32 %v4683_v44  ;;  %v4387_v10 = vadd.f32 %v4386_v36, %v8182_v37 }
 0x3d4   :  { %v5199_v58 = vcvt.s32.f32 %v4687_v39  ;;  %v4898_v27 = vunpack.c.0.s8 %v4590_v14  ;;  %v5775_v32 = vpack.c.bf16 %v5359_v24, %v5355_v21  ;;  %v5259_v61 = vcvt.s32.f32 %v4747_v1 }
 0x3d5   :  { %v5263_v28 = vcvt.s32.f32 %v4751_v12  ;;  %v4902_v19 = vunpack.c.1.s8 %v4590_v14  ;;  %v8190_v52 = vadd.f32 %v4400_v40, %v4387_v10  ;;  %v4835_v2 = vunpack.c.0.s8 %v4575_v49 }
 0x3d6   :  { %v5695_v0 = vpack.c.bf16 %v5199_v58, %v5195_v47  ;;  %v5410_v8 = vcvt.s32.f32 %v4898_v27  ;;  %v4839_v46 = vunpack.c.1.s8 %v4575_v49  ;;  %v4675_v25 = vunpack.c.0.s8 %v4535_v4  ;;  %6141 = vmatmul.bf16.vlgmr.msrb.gmra.mxu2 %v8170_v7  ;;  %v4426_v49 = vpop.f32.mrf.mxu3 }
 0x3d7   :  { %6091 = vmatpush.bf16.msra.mxu3 %v5806_v62  ;;  %6189 = vmatpush.bf16.msra.mxu2 %v5775_v32  ;;  %v5727_v38 = vpack.c.bf16 %v5263_v28, %v5259_v61  ;;  %v5414_v53 = vcvt.s32.f32 %v4902_v19  ;;  %v5347_v37 = vcvt.s32.f32 %v4835_v2  ;;  %v4679_v26 = vunpack.c.1.s8 %v4535_v4 }
 0x3d8   :  { %6165 = vmatpush.bf16.msra.mxu0 %v5695_v0  ;;  %v4739_v30 = vunpack.c.0.s8 %v4551_v16  ;;  %v4743_v56 = vunpack.c.1.s8 %v4551_v16  ;;  %v5351_v23 = vcvt.s32.f32 %v4839_v46  ;;  %v5187_v33 = vcvt.s32.f32 %v4675_v25 }
 0x3d9   :  { %6179 = vmatpush.bf16.msra.mxu1 %v5727_v38  ;;  %v5802_v14 = vpack.c.bf16 %v5414_v53, %v5410_v8  ;;  %v4413_v60 = vadd.f32 %v4412_v57, %v8187_v45  ;;  %v5191_v59 = vcvt.s32.f32 %v4679_v26  ;;  %v4447_v41 = vperm.slane %v7814_v22, 7  ;;  %v8203_v57 = vld [vmem:[#allocation8 + $0x270] sm:$0xff] }
 0x3da   :  { %v5251_v20 = vcvt.s32.f32 %v4739_v30  ;;  %v5255_v17 = vcvt.s32.f32 %v4743_v56  ;;  %v5771_v34 = vpack.c.bf16 %v5351_v23, %v5347_v37  ;;  %v4480_v18 = vperm.slane %v7816_v29, 7 }
 0x3db   :  { %6092 = vmatpush.bf16.msra.mxu3 %v5802_v14  ;;  %v4427_v4 = vadd.f32 %v4426_v49, %v4413_v60  ;;  %v4890_v51 = vunpack.c.2.s8 %v4586_v50  ;;  %v5691_v42 = vpack.c.bf16 %v5191_v59, %v5187_v33  ;;  %v4894_v9 = vunpack.c.3.s8 %v4586_v50  ;;  %v4623_v14 = vld [vmem:[#allocation8 + $0x2f0] sm:$0xff]  ;;  %v4582_v59 = vld [vmem:[#allocation8 + $0x1a8] sm:$0xff] }
 0x3dc   :  { %v5723_v16 = vpack.c.bf16 %v5255_v17, %v5251_v20  ;;  %v4827_v63 = vunpack.c.2.s8 %v4571_v43  ;;  %6190 = vmatpush.bf16.msra.mxu2 %v5771_v34  ;;  %v4831_v55 = vunpack.c.3.s8 %v4571_v43  ;;  %v4667_v36 = vunpack.c.2.s8 %v4531_v48 }
 0x3dd   :  { %v4463_v45 = vmul.f32 %v4447_v41, %v4427_v4  ;;  %v5402_v6 = vcvt.s32.f32 %v4890_v51  ;;  %6166 = vmatpush.bf16.msra.mxu0 %v5691_v42  ;;  %v5406_v31 = vcvt.s32.f32 %v4894_v9  ;;  %v4671_v44 = vunpack.c.3.s8 %v4531_v48 }
 0x3de   :  { %6180 = vmatpush.bf16.msra.mxu1 %v5723_v16  ;;  %v5339_v21 = vcvt.s32.f32 %v4827_v63  ;;  %v4731_v39 = vunpack.c.2.s8 %v4547_v11  ;;  %v5343_v24 = vcvt.s32.f32 %v4831_v55  ;;  %v5179_v1 = vcvt.s32.f32 %v4667_v36  ;;  %v4428_v36 = vpop.f32.mrf.mxu3 }
 0x3df   :  { %v8200_v62 = vadd.f32 %v4480_v18, %v4463_v45  ;;  %v4735_v12 = vunpack.c.3.s8 %v4547_v11  ;;  %v5798_v47 = vpack.c.bf16 %v5406_v31, %v5402_v6  ;;  %v5183_v58 = vcvt.s32.f32 %v4671_v44 }
 0x3e0   :  { %v5243_v10 = vcvt.s32.f32 %v4731_v39  ;;  %v4882_v27 = vunpack.c.0.s8 %v4586_v50  ;;  %v5767_v61 = vpack.c.bf16 %v5343_v24, %v5339_v21  ;;  %v4886_v40 = vunpack.c.1.s8 %v4586_v50 }
 0x3e1   :  { %v4512_v32 = vmax.f32 %v8200_v62, 0.0  ;;  %v5247_v28 = vcvt.s32.f32 %v4735_v12  ;;  %6093 = vmatpush.bf16.msra.mxu3 %v5798_v47  ;;  %v5687_v19 = vpack.c.bf16 %v5183_v58, %v5179_v1  ;;  %v4819_v8 = vunpack.c.0.s8 %v4571_v43 }
 0x3e2   :  { %v5394_v0 = vcvt.s32.f32 %v4882_v27  ;;  %v4823_v2 = vunpack.c.1.s8 %v4571_v43  ;;  %6191 = vmatpush.bf16.msra.mxu2 %v5767_v61  ;;  %v5398_v53 = vcvt.s32.f32 %v4886_v40  ;;  %v4659_v46 = vunpack.c.0.s8 %v4531_v48  ;;  %v4414_v43 = vpop.f32.mrf.mxu2 }
 0x3e3   :  { %v5719_v38 = vpack.c.bf16 %v5247_v28, %v5243_v10  ;;  %v4663_v25 = vunpack.c.1.s8 %v4531_v48  ;;  %6167 = vmatpush.bf16.msra.mxu0 %v5687_v19  ;;  %v5331_v37 = vcvt.s32.f32 %v4819_v8  ;;  %v4723_v30 = vunpack.c.0.s8 %v4547_v11  ;;  %v4567_v48 = vld [vmem:[#allocation8 + $0x130] sm:$0xff] }
 0x3e4   :  { %v5335_v26 = vcvt.s32.f32 %v4823_v2  ;;  %v4727_v56 = vunpack.c.1.s8 %v4547_v11  ;;  %v5794_v50 = vpack.c.bf16 %v5398_v53, %v5394_v0  ;;  %v5171_v23 = vcvt.s32.f32 %v4659_v46  ;;  %v4603_v2 = vld [vmem:[#allocation8 + $0x250] sm:$0xff] }
 0x3e5   :  { %6181 = vmatpush.bf16.msra.mxu1 %v5719_v38  ;;  %v5175_v33 = vcvt.s32.f32 %v4663_v25  ;;  %v4971_v60 = vunpack.c.2.s8 %v8203_v57  ;;  %v5235_v17 = vcvt.s32.f32 %v4723_v30  ;;  %v4975_v34 = vunpack.c.3.s8 %v8203_v57 }
 0x3e6   :  { %v5763_v20 = vpack.c.bf16 %v5335_v26, %v5331_v37  ;;  %v5239_v49 = vcvt.s32.f32 %v4727_v56  ;;  %6094 = vmatpush.bf16.msra.mxu3 %v5794_v50  ;;  %v5035_v42 = vunpack.c.2.s8 %v4623_v14  ;;  %v5039_v11 = vunpack.c.3.s8 %v4623_v14  ;;  %v4619_v26 = vld [vmem:[#allocation8 + $0x2d0] sm:$0xff] }
 0x3e7   :  { %v5683_v4 = vpack.c.bf16 %v5175_v33, %v5171_v23  ;;  %v5483_v51 = vcvt.s32.f32 %v4971_v60  ;;  %v5487_v9 = vcvt.s32.f32 %v4975_v34  ;;  %v4415_v63 = vadd.f32 %v4414_v43, %v8190_v52  ;;  %v4578_v23 = vld [vmem:[#allocation8 + $0x188] sm:$0xff]  ;;  %v4563_v43 = vld [vmem:[#allocation8 + $0x110] sm:$0xff] }
 0x3e8   :  { %6192 = vmatpush.bf16.msra.mxu2 %v5763_v20  ;;  %v5715_v16 = vpack.c.bf16 %v5239_v49, %v5235_v17  ;;  %v4874_v45 = vunpack.c.2.s8 %v4582_v59  ;;  %v5547_v6 = vcvt.s32.f32 %v5035_v42  ;;  %v5551_v55 = vcvt.s32.f32 %v5039_v11 }
 0x3e9   :  { %6168 = vmatpush.bf16.msra.mxu0 %v5683_v4  ;;  %v4878_v31 = vunpack.c.3.s8 %v4582_v59  ;;  %v4811_v21 = vunpack.c.2.s8 %v4567_v48  ;;  %v5839_v44 = vpack.c.bf16 %v5487_v9, %v5483_v51  ;;  %v4429_v39 = vadd.f32 %v4428_v36, %v4415_v63 }
 0x3ea   :  { %6182 = vmatpush.bf16.msra.mxu1 %v5715_v16  ;;  %v5386_v24 = vcvt.s32.f32 %v4874_v45  ;;  %v4815_v1 = vunpack.c.3.s8 %v4567_v48  ;;  %v5871_v12 = vpack.c.bf16 %v5551_v55, %v5547_v6  ;;  %v4963_v10 = vunpack.c.0.s8 %v8203_v57 }
 0x3eb   :  { %v5390_v47 = vcvt.s32.f32 %v4878_v31  ;;  %v5323_v58 = vcvt.s32.f32 %v4811_v21  ;;  %v4471_v52 = vmul.f32 %v4447_v41, %v4429_v39  ;;  %v4967_v61 = vunpack.c.1.s8 %v8203_v57 }
 0x3ec   :  { %v5327_v27 = vcvt.s32.f32 %v4815_v1  ;;  %v5027_v28 = vunpack.c.0.s8 %v4623_v14  ;;  %6169 = vmatmul.bf16.vlgmr.msra.gmra.mxu0 %v7850_v13  ;;  %v5475_v19 = vcvt.s32.f32 %v4963_v10  ;;  %v5031_v0 = vunpack.c.1.s8 %v4623_v14 }
 0x3ed   :  { %6217 = vmatpush.bf16.msrb.mxu0 %v5839_v44  ;;  %v5790_v40 = vpack.c.bf16 %v5390_v47, %v5386_v24  ;;  %v4866_v8 = vunpack.c.0.s8 %v4582_v59  ;;  %v4504_v38 = vadd.f32 %v4480_v18, %v4471_v52  ;;  %6183 = vmatmul.bf16.vlgmr.msra.gmra.mxu1 %v7894_v35  ;;  %v5479_v22 = vcvt.s32.f32 %v4967_v61 }
 0x3ee   :  { %6231 = vmatpush.bf16.msrb.mxu1 %v5871_v12  ;;  %v5759_v53 = vpack.c.bf16 %v5327_v27, %v5323_v58  ;;  %v5539_v41 = vcvt.s32.f32 %v5027_v28  ;;  %v5543_v46 = vcvt.s32.f32 %v5031_v0  ;;  %v4870_v57 = vunpack.c.1.s8 %v4582_v59  ;;  %v4654_v58 = vld [vmem:[#allocation8 + $0x3e8] sm:$0xff]  ;;  %v4639_v28 = vld [vmem:[#allocation8 + $0x370] sm:$0xff] }
 0x3ef   :  { %6095 = vmatpush.bf16.msra.mxu3 %v5790_v40  ;;  %v5378_v25 = vcvt.s32.f32 %v4866_v8  ;;  %v4803_v37 = vunpack.c.0.s8 %v4567_v48  ;;  %v4520_v30 = vmax.f32 %v4504_v38, 0.0  ;;  %v5835_v56 = vpack.c.bf16 %v5479_v22, %v5475_v19 }
 0x3f0   :  { %6193 = vmatpush.bf16.msra.mxu2 %v5759_v53  ;;  %v4807_v14 = vunpack.c.1.s8 %v4567_v48  ;;  %v4955_v50 = vunpack.c.2.s8 %v4603_v2  ;;  %v5867_v33 = vpack.c.bf16 %v5543_v46, %v5539_v41  ;;  %v5382_v29 = vcvt.s32.f32 %v4870_v57  ;;  %v4599_v41 = vld [vmem:[#allocation8 + $0x230] sm:$0xff] }
 0x3f1   :  { %v5315_v18 = vcvt.s32.f32 %v4803_v37  ;;  %v4959_v60 = vunpack.c.3.s8 %v4603_v2  ;;  %v8218_v20 = vpack.c.bf16 %v4520_v30, %v4512_v32  ;;  %6218 = vmatpush.bf16.msrb.mxu0 %v5835_v56  ;;  %v5019_v49 = vunpack.c.2.s8 %v4619_v26 }
 0x3f2   :  { %v5319_v59 = vcvt.s32.f32 %v4807_v14  ;;  %v5467_v17 = vcvt.s32.f32 %v4955_v50  ;;  %6232 = vmatpush.bf16.msrb.mxu1 %v5867_v33  ;;  %v5786_v34 = vpack.c.bf16 %v5382_v29, %v5378_v25  ;;  %v5023_v51 = vunpack.c.3.s8 %v4619_v26 }
 0x3f3   :  { %v5471_v4 = vcvt.s32.f32 %v4959_v60  ;;  %v4858_v48 = vunpack.c.2.s8 %v4578_v23  ;;  %v5531_v11 = vcvt.s32.f32 %v5019_v49  ;;  %v4862_v16 = vunpack.c.3.s8 %v4578_v23  ;;  %6043 = vmatmul.bf16.vlgmr.msrb.gmra.mxu3 %v8218_v20 }
 0x3f4   :  { %v5755_v42 = vpack.c.bf16 %v5319_v59, %v5315_v18  ;;  %v4795_v9 = vunpack.c.2.s8 %v4563_v43  ;;  %6096 = vmatpush.bf16.msra.mxu3 %v5786_v34  ;;  %v5535_v62 = vcvt.s32.f32 %v5023_v51  ;;  %v4799_v45 = vunpack.c.3.s8 %v4563_v43 }
 0x3f5   :  { %v5831_v63 = vpack.c.bf16 %v5471_v4, %v5467_v17  ;;  %v5370_v32 = vcvt.s32.f32 %v4858_v48  ;;  %v5374_v6 = vcvt.s32.f32 %v4862_v16  ;;  %v4947_v36 = vunpack.c.0.s8 %v4603_v2 }
 0x3f6   :  { %6194 = vmatpush.bf16.msra.mxu2 %v5755_v42  ;;  %v5307_v55 = vcvt.s32.f32 %v4795_v9  ;;  %v5863_v31 = vpack.c.bf16 %v5535_v62, %v5531_v11  ;;  %v5311_v21 = vcvt.s32.f32 %v4799_v45  ;;  %v4951_v44 = vunpack.c.1.s8 %v4603_v2 }
 0x3f7   :  { %6219 = vmatpush.bf16.msrb.mxu0 %v5831_v63  ;;  %v5011_v39 = vunpack.c.0.s8 %v4619_v26  ;;  %v5782_v24 = vpack.c.bf16 %v5374_v6, %v5370_v32  ;;  %v5459_v1 = vcvt.s32.f32 %v4947_v36  ;;  %v5015_v12 = vunpack.c.1.s8 %v4619_v26  ;;  %v4615_v26 = vld [vmem:[#allocation8 + $0x2b0] sm:$0xff]  ;;  %v4650_v36 = vld [vmem:[#allocation8 + $0x3c8] sm:$0xff] }
 0x3f8   :  { %v4850_v47 = vunpack.c.0.s8 %v4578_v23  ;;  %6233 = vmatpush.bf16.msrb.mxu1 %v5863_v31  ;;  %v5751_v10 = vpack.c.bf16 %v5311_v21, %v5307_v55  ;;  %v5463_v52 = vcvt.s32.f32 %v4951_v44  ;;  %v4854_v61 = vunpack.c.1.s8 %v4578_v23 }
 0x3f9   :  { %v5523_v27 = vcvt.s32.f32 %v5011_v39  ;;  %6097 = vmatpush.bf16.msra.mxu3 %v5782_v24  ;;  %v5527_v40 = vcvt.s32.f32 %v5015_v12  ;;  %v4787_v0 = vunpack.c.0.s8 %v4563_v43  ;;  %v4791_v8 = vunpack.c.1.s8 %v4563_v43  ;;  %v4635_v24 = vld [vmem:[#allocation8 + $0x350] sm:$0xff] }
 0x3fa   :  { %v5362_v19 = vcvt.s32.f32 %v4850_v47  ;;  %6195 = vmatpush.bf16.msra.mxu2 %v5751_v10  ;;  %v5827_v38 = vpack.c.bf16 %v5463_v52, %v5459_v1  ;;  %v5366_v2 = vcvt.s32.f32 %v4854_v61  ;;  %v5162_v53 = vunpack.c.2.s8 %v4654_v58 }
 0x3fb   :  { %v5166_v22 = vunpack.c.3.s8 %v4654_v58  ;;  %v5859_v46 = vpack.c.bf16 %v5527_v40, %v5523_v27  ;;  %v5299_v57 = vcvt.s32.f32 %v4787_v0  ;;  %v5303_v25 = vcvt.s32.f32 %v4791_v8 }
 0x3fc   :  { %v5099_v37 = vunpack.c.2.s8 %v4639_v28  ;;  %6220 = vmatpush.bf16.msrb.mxu0 %v5827_v38  ;;  %v5778_v30 = vpack.c.bf16 %v5366_v2, %v5362_v19  ;;  %v5674_v56 = vcvt.s32.f32 %v5162_v53  ;;  %v5103_v50 = vunpack.c.3.s8 %v4639_v28 }
 0x3fd   :  { %v5678_v14 = vcvt.s32.f32 %v5166_v22  ;;  %6234 = vmatpush.bf16.msrb.mxu1 %v5859_v46  ;;  %v5747_v23 = vpack.c.bf16 %v5303_v25, %v5299_v57  ;;  %v4939_v29 = vunpack.c.2.s8 %v4599_v41  ;;  %v4943_v18 = vunpack.c.3.s8 %v4599_v41 }
 0x3fe   :  { %v5611_v33 = vcvt.s32.f32 %v5099_v37  ;;  %6098 = vmatpush.bf16.msra.mxu3 %v5778_v30  ;;  %v5615_v43 = vcvt.s32.f32 %v5103_v50  ;;  %v5003_v59 = vunpack.c.2.s8 %v4615_v26  ;;  %v5007_v17 = vunpack.c.3.s8 %v4615_v26 }
 0x3ff   :  { %v5934_v60 = vpack.c.bf16 %v5678_v14, %v5674_v56  ;;  %6196 = vmatpush.bf16.msra.mxu2 %v5747_v23  ;;  %v5451_v49 = vcvt.s32.f32 %v4939_v29  ;;  %v5455_v34 = vcvt.s32.f32 %v4943_v18  ;;  %v5154_v4 = vunpack.c.0.s8 %v4654_v58 }
 0x400   :  { %v5903_v51 = vpack.c.bf16 %v5615_v43, %v5611_v33  ;;  %v5515_v48 = vcvt.s32.f32 %v5003_v59  ;;  %v5519_v42 = vcvt.s32.f32 %v5007_v17  ;;  %v5158_v11 = vunpack.c.1.s8 %v4654_v58  ;;  %v4595_v58 = vld [vmem:[#allocation8 + $0x210] sm:$0xff] }
 0x401   :  { %v5823_v16 = vpack.c.bf16 %v5455_v34, %v5451_v49  ;;  %v5666_v9 = vcvt.s32.f32 %v5154_v4  ;;  %v5091_v63 = vunpack.c.0.s8 %v4639_v28  ;;  %v5095_v62 = vunpack.c.1.s8 %v4639_v28  ;;  %v4611_v28 = vld [vmem:[#allocation8 + $0x290] sm:$0xff]  ;;  %v4544_v34 = vld [vmem:[#allocation8 + $0x78] sm:$0xff] }
 0x402   :  { %6147 = vmatpush.bf16.msrb.mxu3 %v5934_v60  ;;  %v5855_v32 = vpack.c.bf16 %v5519_v42, %v5515_v48  ;;  %v5670_v45 = vcvt.s32.f32 %v5158_v11  ;;  %v4931_v6 = vunpack.c.0.s8 %v4599_v41  ;;  %v4935_v55 = vunpack.c.1.s8 %v4599_v41  ;;  %6197 = vmatmul.bf16.vlgmr.msra.gmra.mxu2 %v7964_v15  ;;  %v4560_v11 = vld [vmem:[#allocation8 + $0xf8] sm:$0xff] }
 0x403   :  { %6245 = vmatpush.bf16.msrb.mxu2 %v5903_v51  ;;  %6221 = vmatpush.bf16.msrb.mxu0 %v5823_v16  ;;  %v5603_v31 = vcvt.s32.f32 %v5091_v63  ;;  %v5607_v21 = vcvt.s32.f32 %v5095_v62  ;;  %v4995_v44 = vunpack.c.0.s8 %v4615_v26  ;;  %v4999_v39 = vunpack.c.1.s8 %v4615_v26 }
 0x404   :  { %6235 = vmatpush.bf16.msrb.mxu1 %v5855_v32  ;;  %v5930_v1 = vpack.c.bf16 %v5670_v45, %v5666_v9  ;;  %v5443_v12 = vcvt.s32.f32 %v4931_v6  ;;  %v5447_v47 = vcvt.s32.f32 %v4935_v55  ;;  %6099 = vmatmul.bf16.vlgmr.msra.gmra.mxu3 %v8025_v5  ;;  %v5146_v61 = vunpack.c.2.s8 %v4650_v36 }
 0x405   :  { %v5899_v10 = vpack.c.bf16 %v5607_v21, %v5603_v31  ;;  %v5507_v52 = vcvt.s32.f32 %v4995_v44  ;;  %v5511_v27 = vcvt.s32.f32 %v4999_v39  ;;  %v5150_v19 = vunpack.c.3.s8 %v4650_v36 }
 0x406   :  { %6148 = vmatpush.bf16.msrb.mxu3 %v5930_v1  ;;  %v5819_v40 = vpack.c.bf16 %v5447_v47, %v5443_v12  ;;  %v5083_v0 = vunpack.c.2.s8 %v4635_v24  ;;  %v5658_v38 = vcvt.s32.f32 %v5146_v61  ;;  %v5087_v2 = vunpack.c.3.s8 %v4635_v24 }
 0x407   :  { %6246 = vmatpush.bf16.msrb.mxu2 %v5899_v10  ;;  %v5851_v8 = vpack.c.bf16 %v5511_v27, %v5507_v52  ;;  %v4923_v53 = vunpack.c.2.s8 %v4595_v58  ;;  %v5662_v22 = vcvt.s32.f32 %v5150_v19  ;;  %v4927_v46 = vunpack.c.3.s8 %v4595_v58 }
 0x408   :  { %6222 = vmatpush.bf16.msrb.mxu0 %v5819_v40  ;;  %v5595_v41 = vcvt.s32.f32 %v5083_v0  ;;  %v4987_v57 = vunpack.c.2.s8 %v4611_v28  ;;  %v5599_v25 = vcvt.s32.f32 %v5087_v2  ;;  %v4991_v26 = vunpack.c.3.s8 %v4611_v28 }
 0x409   :  { %6236 = vmatpush.bf16.msrb.mxu1 %v5851_v8  ;;  %v5435_v37 = vcvt.s32.f32 %v4923_v53  ;;  %v5138_v30 = vunpack.c.0.s8 %v4650_v36  ;;  %v5926_v56 = vpack.c.bf16 %v5662_v22, %v5658_v38  ;;  %v5439_v14 = vcvt.s32.f32 %v4927_v46 }
 0x40a   :  { %v5499_v50 = vcvt.s32.f32 %v4987_v57  ;;  %v5142_v23 = vunpack.c.1.s8 %v4650_v36  ;;  %v5895_v33 = vpack.c.bf16 %v5599_v25, %v5595_v41  ;;  %v5503_v29 = vcvt.s32.f32 %v4991_v26  ;;  %v4646_v36 = vld [vmem:[#allocation8 + $0x3a8] sm:$0xff]  ;;  %v4540_v26 = vld [vmem:[#allocation8 + $0x58] sm:$0xff] }
 0x40b   :  { %v5650_v18 = vcvt.s32.f32 %v5138_v30  ;;  %v5075_v60 = vunpack.c.0.s8 %v4635_v24  ;;  %6149 = vmatpush.bf16.msrb.mxu3 %v5926_v56  ;;  %v5815_v43 = vpack.c.bf16 %v5439_v14, %v5435_v37  ;;  %v5079_v17 = vunpack.c.1.s8 %v4635_v24  ;;  %v4631_v24 = vld [vmem:[#allocation8 + $0x330] sm:$0xff] }
 0x40c   :  { %v5654_v59 = vcvt.s32.f32 %v5142_v23  ;;  %v4915_v49 = vunpack.c.0.s8 %v4595_v58  ;;  %6247 = vmatpush.bf16.msrb.mxu2 %v5895_v33  ;;  %v5847_v4 = vpack.c.bf16 %v5503_v29, %v5499_v50  ;;  %v4919_v48 = vunpack.c.1.s8 %v4595_v58  ;;  %v4556_v23 = vld [vmem:[#allocation8 + $0xd8] sm:$0xff] }
 0x40d   :  { %v5587_v51 = vcvt.s32.f32 %v5075_v60  ;;  %v4979_v42 = vunpack.c.0.s8 %v4611_v28  ;;  %6223 = vmatpush.bf16.msrb.mxu0 %v5815_v43  ;;  %v5591_v9 = vcvt.s32.f32 %v5079_v17  ;;  %v4983_v62 = vunpack.c.1.s8 %v4611_v28 }
 0x40e   :  { %v5922_v16 = vpack.c.bf16 %v5654_v59, %v5650_v18  ;;  %v5427_v63 = vcvt.s32.f32 %v4915_v49  ;;  %6237 = vmatpush.bf16.msrb.mxu1 %v5847_v4  ;;  %v5431_v32 = vcvt.s32.f32 %v4919_v48  ;;  %v4716_v6 = vunpack.c.2.s8 %v4544_v34 }
 0x40f   :  { %v5491_v45 = vcvt.s32.f32 %v4979_v42  ;;  %v4720_v55 = vunpack.c.3.s8 %v4544_v34  ;;  %v5891_v31 = vpack.c.bf16 %v5591_v9, %v5587_v51  ;;  %v5495_v21 = vcvt.s32.f32 %v4983_v62 }
 0x410   :  { %6150 = vmatpush.bf16.msrb.mxu3 %v5922_v16  ;;  %v4780_v44 = vunpack.c.2.s8 %v4560_v11  ;;  %v4784_v39 = vunpack.c.3.s8 %v4560_v11  ;;  %v5811_v1 = vpack.c.bf16 %v5431_v32, %v5427_v63  ;;  %v5228_v12 = vcvt.s32.f32 %v4716_v6 }
 0x411   :  { %v5232_v47 = vcvt.s32.f32 %v4720_v55  ;;  %6248 = vmatpush.bf16.msrb.mxu2 %v5891_v31  ;;  %v5843_v58 = vpack.c.bf16 %v5495_v21, %v5491_v45  ;;  %v5130_v27 = vunpack.c.2.s8 %v4646_v36  ;;  %v5134_v28 = vunpack.c.3.s8 %v4646_v36 }
 0x412   :  { %v5292_v10 = vcvt.s32.f32 %v4780_v44  ;;  %v5296_v52 = vcvt.s32.f32 %v4784_v39  ;;  %6224 = vmatpush.bf16.msrb.mxu0 %v5811_v1  ;;  %v5067_v40 = vunpack.c.2.s8 %v4631_v24  ;;  %v5071_v8 = vunpack.c.3.s8 %v4631_v24 }
 0x413   :  { %v5712_v61 = vpack.c.bf16 %v5232_v47, %v5228_v12  ;;  %6238 = vmatpush.bf16.msrb.mxu1 %v5843_v58  ;;  %v5642_v0 = vcvt.s32.f32 %v5130_v27  ;;  %v4708_v38 = vunpack.c.0.s8 %v4544_v34  ;;  %v5646_v2 = vcvt.s32.f32 %v5134_v28  ;;  %v4591_v28 = vld [vmem:[#allocation8 + $0x1f0] sm:$0xff] }
 0x414   :  { %v5744_v19 = vpack.c.bf16 %v5296_v52, %v5292_v10  ;;  %v5579_v53 = vcvt.s32.f32 %v5067_v40  ;;  %v4712_v22 = vunpack.c.1.s8 %v4544_v34  ;;  %v4772_v41 = vunpack.c.0.s8 %v4560_v11  ;;  %v4642_v34 = vld [vmem:[#allocation8 + $0x388] sm:$0xff] }
 0x415   :  { %6225 = vmatmul.bf16.vlgmr.msrb.gmra.mxu0 %v8080_v54  ;;  %v5583_v46 = vcvt.s32.f32 %v5071_v8  ;;  %v5220_v57 = vcvt.s32.f32 %v4708_v38  ;;  %v4776_v25 = vunpack.c.1.s8 %v4560_v11  ;;  %v5122_v37 = vunpack.c.0.s8 %v4646_v36  ;;  %v4627_v11 = vld [vmem:[#allocation8 + $0x310] sm:$0xff] }
 0x416   :  { %6273 = vmatpush.bf16.msra.mxu0 %v5712_v61  ;;  %v5918_v30 = vpack.c.bf16 %v5646_v2, %v5642_v0  ;;  %6239 = vmatmul.bf16.vlgmr.msrb.gmra.mxu1 %v8135_v3  ;;  %v5224_v56 = vcvt.s32.f32 %v4712_v22  ;;  %v5284_v14 = vcvt.s32.f32 %v4772_v41  ;;  %v5126_v50 = vunpack.c.1.s8 %v4646_v36  ;;  %v4576_v41 = vld [vmem:[#allocation8 + $0x178] sm:$0xff] }
 0x417   :  { %6287 = vmatpush.bf16.msra.mxu1 %v5744_v19  ;;  %v5887_v33 = vpack.c.bf16 %v5583_v46, %v5579_v53  ;;  %v5288_v29 = vcvt.s32.f32 %v4776_v25  ;;  %v5634_v18 = vcvt.s32.f32 %v5122_v37  ;;  %v5059_v60 = vunpack.c.0.s8 %v4631_v24 }
 0x418   :  { %6151 = vmatpush.bf16.msrb.mxu3 %v5918_v30  ;;  %v5708_v43 = vpack.c.bf16 %v5224_v56, %v5220_v57  ;;  %v5638_v59 = vcvt.s32.f32 %v5126_v50  ;;  %v5063_v17 = vunpack.c.1.s8 %v4631_v24  ;;  %v4700_v49 = vunpack.c.2.s8 %v4540_v26  ;;  %v4536_v30 = vld [vmem:[#allocation8 + $0x38] sm:$0xff] }
 0x419   :  { %6249 = vmatpush.bf16.msrb.mxu2 %v5887_v33  ;;  %v5740_v4 = vpack.c.bf16 %v5288_v29, %v5284_v14  ;;  %v5571_v51 = vcvt.s32.f32 %v5059_v60  ;;  %v4704_v48 = vunpack.c.3.s8 %v4540_v26  ;;  %v4764_v42 = vunpack.c.2.s8 %v4556_v23  ;;  %v4552_v33 = vld [vmem:[#allocation8 + $0xb8] sm:$0xff] }
 0x41a   :  { %6274 = vmatpush.bf16.msra.mxu0 %v5708_v43  ;;  %v5914_v16 = vpack.c.bf16 %v5638_v59, %v5634_v18  ;;  %v5575_v9 = vcvt.s32.f32 %v5063_v17  ;;  %v5212_v63 = vcvt.s32.f32 %v4700_v49  ;;  %v4768_v62 = vunpack.c.3.s8 %v4556_v23 }
 0x41b   :  { %6288 = vmatpush.bf16.msra.mxu1 %v5740_v4  ;;  %v5216_v32 = vcvt.s32.f32 %v4704_v48  ;;  %v5276_v45 = vcvt.s32.f32 %v4764_v42  ;;  %v5114_v6 = vunpack.c.2.s8 %v4642_v34  ;;  %v5118_v55 = vunpack.c.3.s8 %v4642_v34 }
 0x41c   :  { %6152 = vmatpush.bf16.msrb.mxu3 %v5914_v16  ;;  %v5883_v36 = vpack.c.bf16 %v5575_v9, %v5571_v51  ;;  %v5280_v31 = vcvt.s32.f32 %v4768_v62  ;;  %v5051_v21 = vunpack.c.2.s8 %v4627_v11  ;;  %v5055_v44 = vunpack.c.3.s8 %v4627_v11 }
 0x41d   :  { %v5704_v39 = vpack.c.bf16 %v5216_v32, %v5212_v63  ;;  %v5626_v24 = vcvt.s32.f32 %v5114_v6  ;;  %v5630_v1 = vcvt.s32.f32 %v5118_v55  ;;  %v4692_v10 = vunpack.c.0.s8 %v4540_v26 }
 0x41e   :  { %6250 = vmatpush.bf16.msrb.mxu2 %v5883_v36  ;;  %v5736_v12 = vpack.c.bf16 %v5280_v31, %v5276_v45  ;;  %v5563_v47 = vcvt.s32.f32 %v5051_v21  ;;  %v5567_v58 = vcvt.s32.f32 %v5055_v44  ;;  %v4696_v27 = vunpack.c.1.s8 %v4540_v26 }
 0x41f   :  { %6275 = vmatpush.bf16.msra.mxu0 %v5704_v39  ;;  %v5910_v52 = vpack.c.bf16 %v5630_v1, %v5626_v24  ;;  %v4756_v61 = vunpack.c.0.s8 %v4556_v23  ;;  %v5204_v19 = vcvt.s32.f32 %v4692_v10  ;;  %v4760_v0 = vunpack.c.1.s8 %v4556_v23  ;;  %v4587_v39 = vld [vmem:[#allocation8 + $0x1d0] sm:$0xff] }
 0x420   :  { %6289 = vmatpush.bf16.msra.mxu1 %v5736_v12  ;;  %v5879_v40 = vpack.c.bf16 %v5567_v58, %v5563_v47  ;;  %v5106_v8 = vunpack.c.0.s8 %v4642_v34  ;;  %v5208_v38 = vcvt.s32.f32 %v4696_v27  ;;  %v5110_v53 = vunpack.c.1.s8 %v4642_v34 }
 0x421   :  { %6153 = vmatpush.bf16.msrb.mxu3 %v5910_v52  ;;  %v5268_v2 = vcvt.s32.f32 %v4756_v61  ;;  %v5043_v22 = vunpack.c.0.s8 %v4627_v11  ;;  %v5272_v46 = vcvt.s32.f32 %v4760_v0  ;;  %v5047_v25 = vunpack.c.1.s8 %v4627_v11  ;;  %v4572_v61 = vld [vmem:[#allocation8 + $0x158] sm:$0xff] }
 0x422   :  { %6251 = vmatpush.bf16.msrb.mxu2 %v5879_v40  ;;  %v5618_v57 = vcvt.s32.f32 %v5106_v8  ;;  %v4907_v37 = vunpack.c.2.s8 %v4591_v28  ;;  %v5700_v26 = vpack.c.bf16 %v5208_v38, %v5204_v19  ;;  %v5622_v56 = vcvt.s32.f32 %v5110_v53  ;;  %v4532_v8 = vld [vmem:[#allocation8 + $0x18] sm:$0xff] }
 0x423   :  { %v5555_v14 = vcvt.s32.f32 %v5043_v22  ;;  %v4911_v50 = vunpack.c.3.s8 %v4591_v28  ;;  %v5732_v29 = vpack.c.bf16 %v5272_v46, %v5268_v2  ;;  %v5559_v23 = vcvt.s32.f32 %v5047_v25 }
 0x424   :  { %v5419_v18 = vcvt.s32.f32 %v4907_v37  ;;  %v4844_v60 = vunpack.c.2.s8 %v4576_v41  ;;  %6276 = vmatpush.bf16.msra.mxu0 %v5700_v26  ;;  %v5906_v43 = vpack.c.bf16 %v5622_v56, %v5618_v57  ;;  %v4848_v17 = vunpack.c.3.s8 %v4576_v41 }
 0x425   :  { %v5423_v59 = vcvt.s32.f32 %v4911_v50  ;;  %v4684_v49 = vunpack.c.2.s8 %v4536_v30  ;;  %6290 = vmatpush.bf16.msra.mxu1 %v5732_v29  ;;  %v5875_v34 = vpack.c.bf16 %v5559_v23, %v5555_v14  ;;  %v4688_v51 = vunpack.c.3.s8 %v4536_v30 }
 0x426   :  { %v5356_v4 = vcvt.s32.f32 %v4844_v60  ;;  %v4748_v48 = vunpack.c.2.s8 %v4552_v33  ;;  %6154 = vmatpush.bf16.msrb.mxu3 %v5906_v43  ;;  %v5360_v11 = vcvt.s32.f32 %v4848_v17  ;;  %v4752_v9 = vunpack.c.3.s8 %v4552_v33 }
 0x427   :  { %v5807_v42 = vpack.c.bf16 %v5423_v59, %v5419_v18  ;;  %v5196_v16 = vcvt.s32.f32 %v4684_v49  ;;  %6252 = vmatpush.bf16.msrb.mxu2 %v5875_v34  ;;  %v5200_v63 = vcvt.s32.f32 %v4688_v51  ;;  %v4899_v32 = vunpack.c.0.s8 %v4591_v28 }
 0x428   :  { %v5260_v62 = vcvt.s32.f32 %v4748_v48  ;;  %v5776_v45 = vpack.c.bf16 %v5360_v11, %v5356_v4  ;;  %v5264_v6 = vcvt.s32.f32 %v4752_v9  ;;  %v4903_v55 = vunpack.c.1.s8 %v4591_v28 }
 0x429   :  { %v4836_v36 = vunpack.c.0.s8 %v4576_v41  ;;  %v5696_v31 = vpack.c.bf16 %v5200_v63, %v5196_v16  ;;  %6155 = vmatmul.bf16.vlgmr.msrb.gmra.mxu3 %v8218_v20  ;;  %v5411_v21 = vcvt.s32.f32 %v4899_v32  ;;  %v4840_v44 = vunpack.c.1.s8 %v4576_v41  ;;  %v4548_v41 = vld [vmem:[#allocation8 + $0x98] sm:$0xff] }
 0x42a   :  { %6203 = vmatpush.bf16.msra.mxu3 %v5807_v42  ;;  %v5728_v24 = vpack.c.bf16 %v5264_v6, %v5260_v62  ;;  %v5415_v1 = vcvt.s32.f32 %v4903_v55  ;;  %v4676_v47 = vunpack.c.0.s8 %v4536_v30  ;;  %6253 = vmatmul.bf16.vlgmr.msrb.gmra.mxu2 %v8170_v7  ;;  %v4680_v10 = vunpack.c.1.s8 %v4536_v30  ;;  %v4608_v16 = vld [vmem:[#allocation8 + $0x278] sm:$0xff] }
 0x42b   :  { %6301 = vmatpush.bf16.msra.mxu2 %v5776_v45  ;;  %v5348_v12 = vcvt.s32.f32 %v4836_v36  ;;  %6277 = vmatpush.bf16.msra.mxu0 %v5696_v31  ;;  %v5352_v58 = vcvt.s32.f32 %v4840_v44  ;;  %v4740_v52 = vunpack.c.0.s8 %v4552_v33  ;;  %v4744_v27 = vunpack.c.1.s8 %v4552_v33  ;;  %v4624_v31 = vld [vmem:[#allocation8 + $0x2f8] sm:$0xff] }
 0x42c   :  { %6291 = vmatpush.bf16.msra.mxu1 %v5728_v24  ;;  %v5803_v28 = vpack.c.bf16 %v5415_v1, %v5411_v21  ;;  %v5188_v40 = vcvt.s32.f32 %v4676_v47  ;;  %v4891_v19 = vunpack.c.2.s8 %v4587_v39  ;;  %v4895_v0 = vunpack.c.3.s8 %v4587_v39  ;;  %v4583_v1 = vld [vmem:[#allocation8 + $0x1b0] sm:$0xff] }
 0x42d   :  { %v5772_v38 = vpack.c.bf16 %v5352_v58, %v5348_v12  ;;  %v5192_v2 = vcvt.s32.f32 %v4680_v10  ;;  %v5252_v53 = vcvt.s32.f32 %v4740_v52  ;;  %v5256_v22 = vcvt.s32.f32 %v4744_v27  ;;  %v4568_v52 = vld [vmem:[#allocation8 + $0x138] sm:$0xff] }
 0x42e   :  { %6204 = vmatpush.bf16.msra.mxu3 %v5803_v28  ;;  %v5403_v46 = vcvt.s32.f32 %v4891_v19  ;;  %v5407_v57 = vcvt.s32.f32 %v4895_v0  ;;  %v4828_v25 = vunpack.c.2.s8 %v4572_v61  ;;  %v4832_v37 = vunpack.c.3.s8 %v4572_v61 }
 0x42f   :  { %6302 = vmatpush.bf16.msra.mxu2 %v5772_v38  ;;  %v5692_v30 = vpack.c.bf16 %v5192_v2, %v5188_v40  ;;  %v5724_v26 = vpack.c.bf16 %v5256_v22, %v5252_v53  ;;  %v4668_v56 = vunpack.c.2.s8 %v4532_v8  ;;  %v4672_v14 = vunpack.c.3.s8 %v4532_v8 }
 0x430   :  { %v5799_v50 = vpack.c.bf16 %v5407_v57, %v5403_v46  ;;  %v5340_v33 = vcvt.s32.f32 %v4828_v25  ;;  %v5344_v29 = vcvt.s32.f32 %v4832_v37  ;;  %v4732_v23 = vunpack.c.2.s8 %v4548_v41 }
 0x431   :  { %6278 = vmatpush.bf16.msra.mxu0 %v5692_v30  ;;  %6292 = vmatpush.bf16.msra.mxu1 %v5724_v26  ;;  %v5180_v18 = vcvt.s32.f32 %v4668_v56  ;;  %v5184_v60 = vcvt.s32.f32 %v4672_v14  ;;  %v4736_v43 = vunpack.c.3.s8 %v4548_v41  ;;  %v4883_v59 = vunpack.c.0.s8 %v4587_v39 }
 0x432   :  { %6205 = vmatpush.bf16.msra.mxu3 %v5799_v50  ;;  %v5768_v17 = vpack.c.bf16 %v5344_v29, %v5340_v33  ;;  %v5244_v49 = vcvt.s32.f32 %v4732_v23  ;;  %v4887_v34 = vunpack.c.1.s8 %v4587_v39  ;;  %v4820_v4 = vunpack.c.0.s8 %v4572_v61 }
 0x433   :  { %v5688_v51 = vpack.c.bf16 %v5184_v60, %v5180_v18  ;;  %v5248_v48 = vcvt.s32.f32 %v4736_v43  ;;  %v5395_v42 = vcvt.s32.f32 %v4883_v59  ;;  %v4824_v11 = vunpack.c.1.s8 %v4572_v61  ;;  %v4604_v18 = vld [vmem:[#allocation8 + $0x258] sm:$0xff] }
 0x434   :  { %6303 = vmatpush.bf16.msra.mxu2 %v5768_v17  ;;  %v5399_v9 = vcvt.s32.f32 %v4887_v34  ;;  %v5332_v63 = vcvt.s32.f32 %v4820_v4  ;;  %v4660_v62 = vunpack.c.0.s8 %v4532_v8  ;;  %v4664_v32 = vunpack.c.1.s8 %v4532_v8 }
 0x435   :  { %6279 = vmatpush.bf16.msra.mxu0 %v5688_v51  ;;  %v5720_v45 = vpack.c.bf16 %v5248_v48, %v5244_v49  ;;  %v5336_v6 = vcvt.s32.f32 %v4824_v11  ;;  %v4724_v55 = vunpack.c.0.s8 %v4548_v41  ;;  %v4728_v36 = vunpack.c.1.s8 %v4548_v41  ;;  %v4620_v48 = vld [vmem:[#allocation8 + $0x2d8] sm:$0xff] }
 0x436   :  { %v5795_v21 = vpack.c.bf16 %v5399_v9, %v5395_v42  ;;  %v5172_v44 = vcvt.s32.f32 %v4660_v62  ;;  %v5176_v39 = vcvt.s32.f32 %v4664_v32  ;;  %v4972_v24 = vunpack.c.2.s8 %v4608_v16 }
 0x437   :  { %6293 = vmatpush.bf16.msra.mxu1 %v5720_v45  ;;  %v5764_v12 = vpack.c.bf16 %v5336_v6, %v5332_v63  ;;  %v5236_v47 = vcvt.s32.f32 %v4724_v55  ;;  %v5240_v58 = vcvt.s32.f32 %v4728_v36  ;;  %v4976_v10 = vunpack.c.3.s8 %v4608_v16  ;;  %v4579_v63 = vld [vmem:[#allocation8 + $0x190] sm:$0xff]  ;;  %v4564_v6 = vld [vmem:[#allocation8 + $0x118] sm:$0xff] }
 0x438   :  { %6206 = vmatpush.bf16.msra.mxu3 %v5795_v21  ;;  %v5684_v27 = vpack.c.bf16 %v5176_v39, %v5172_v44  ;;  %v5484_v61 = vcvt.s32.f32 %v4972_v24  ;;  %v5036_v28 = vunpack.c.2.s8 %v4624_v31  ;;  %v5040_v40 = vunpack.c.3.s8 %v4624_v31 }
 0x439   :  { %6304 = vmatpush.bf16.msra.mxu2 %v5764_v12  ;;  %v5716_v19 = vpack.c.bf16 %v5240_v58, %v5236_v47  ;;  %v5488_v0 = vcvt.s32.f32 %v4976_v10  ;;  %v4875_v8 = vunpack.c.2.s8 %v4583_v1  ;;  %v4879_v38 = vunpack.c.3.s8 %v4583_v1 }
 0x43a   :  { %6280 = vmatpush.bf16.msra.mxu0 %v5684_v27  ;;  %v5548_v2 = vcvt.s32.f32 %v5036_v28  ;;  %v5552_v53 = vcvt.s32.f32 %v5040_v40  ;;  %v4812_v22 = vunpack.c.2.s8 %v4568_v52  ;;  %v4816_v41 = vunpack.c.3.s8 %v4568_v52 }
 0x43b   :  { %6294 = vmatpush.bf16.msra.mxu1 %v5716_v19  ;;  %v5840_v46 = vpack.c.bf16 %v5488_v0, %v5484_v61  ;;  %v5387_v57 = vcvt.s32.f32 %v4875_v8  ;;  %v5391_v25 = vcvt.s32.f32 %v4879_v38  ;;  %v4964_v37 = vunpack.c.0.s8 %v4608_v16 }
 0x43c   :  { %v5872_v30 = vpack.c.bf16 %v5552_v53, %v5548_v2  ;;  %v5324_v26 = vcvt.s32.f32 %v4812_v22  ;;  %v5328_v56 = vcvt.s32.f32 %v4816_v41  ;;  %v4968_v14 = vunpack.c.1.s8 %v4608_v16  ;;  %v4655_v53 = vld [vmem:[#allocation8 + $0x3f0] sm:$0xff] }
 0x43d   :  { %v5791_v50 = vpack.c.bf16 %v5391_v25, %v5387_v57  ;;  %v5476_v33 = vcvt.s32.f32 %v4964_v37  ;;  %v5028_v29 = vunpack.c.0.s8 %v4624_v31  ;;  %v5032_v23 = vunpack.c.1.s8 %v4624_v31  ;;  %6281 = vmatmul.bf16.vlgmr.msra.gmra.mxu0 %v7850_v13 }
 0x43e   :  { %6329 = vmatpush.bf16.msrb.mxu0 %v5840_v46  ;;  %v5760_v60 = vpack.c.bf16 %v5328_v56, %v5324_v26  ;;  %v5480_v43 = vcvt.s32.f32 %v4968_v14  ;;  %v4867_v59 = vunpack.c.0.s8 %v4583_v1  ;;  %v4871_v17 = vunpack.c.1.s8 %v4583_v1  ;;  %6295 = vmatmul.bf16.vlgmr.msra.gmra.mxu1 %v7894_v35  ;;  %v4640_v56 = vld [vmem:[#allocation8 + $0x378] sm:$0xff] }
 0x43f   :  { %6343 = vmatpush.bf16.msrb.mxu1 %v5872_v30  ;;  %6207 = vmatpush.bf16.msra.mxu3 %v5791_v50  ;;  %v5540_v49 = vcvt.s32.f32 %v5028_v29  ;;  %v5544_v34 = vcvt.s32.f32 %v5032_v23  ;;  %v4804_v4 = vunpack.c.0.s8 %v4568_v52  ;;  %v4808_v51 = vunpack.c.1.s8 %v4568_v52  ;;  %v4600_v23 = vld [vmem:[#allocation8 + $0x238] sm:$0xff] }
 0x440   :  { %6305 = vmatpush.bf16.msra.mxu2 %v5760_v60  ;;  %v5836_v42 = vpack.c.bf16 %v5480_v43, %v5476_v33  ;;  %v5379_v11 = vcvt.s32.f32 %v4867_v59  ;;  %v5383_v16 = vcvt.s32.f32 %v4871_v17  ;;  %v4956_v9 = vunpack.c.2.s8 %v4604_v18  ;;  %v4616_v17 = vld [vmem:[#allocation8 + $0x2b8] sm:$0xff] }
 0x441   :  { %v5868_v62 = vpack.c.bf16 %v5544_v34, %v5540_v49  ;;  %v5316_v13 = vcvt.s32.f32 %v4804_v4  ;;  %v5320_v32 = vcvt.s32.f32 %v4808_v51  ;;  %v4960_v45 = vunpack.c.3.s8 %v4604_v18 }
 0x442   :  { %6330 = vmatpush.bf16.msrb.mxu0 %v5836_v42  ;;  %v5787_v55 = vpack.c.bf16 %v5383_v16, %v5379_v11  ;;  %v5468_v36 = vcvt.s32.f32 %v4956_v9  ;;  %v5020_v35 = vunpack.c.2.s8 %v4620_v48  ;;  %v5024_v31 = vunpack.c.3.s8 %v4620_v48 }
 0x443   :  { %6344 = vmatpush.bf16.msrb.mxu1 %v5868_v62  ;;  %v5756_v21 = vpack.c.bf16 %v5320_v32, %v5316_v13  ;;  %v5472_v44 = vcvt.s32.f32 %v4960_v45  ;;  %v4859_v39 = vunpack.c.2.s8 %v4579_v63  ;;  %v4863_v24 = vunpack.c.3.s8 %v4579_v63 }
 0x444   :  { %6208 = vmatpush.bf16.msra.mxu3 %v5787_v55  ;;  %v5532_v1 = vcvt.s32.f32 %v5020_v35  ;;  %v5536_v12 = vcvt.s32.f32 %v5024_v31  ;;  %v4796_v47 = vunpack.c.2.s8 %v4564_v6  ;;  %v4800_v58 = vunpack.c.3.s8 %v4564_v6 }
 0x445   :  { %6306 = vmatpush.bf16.msra.mxu2 %v5756_v21  ;;  %v5832_v10 = vpack.c.bf16 %v5472_v44, %v5468_v36  ;;  %v5371_v52 = vcvt.s32.f32 %v4859_v39  ;;  %v5375_v27 = vcvt.s32.f32 %v4863_v24  ;;  %v4948_v19 = vunpack.c.0.s8 %v4604_v18 }
 0x446   :  { %v5864_v61 = vpack.c.bf16 %v5536_v12, %v5532_v1  ;;  %v5308_v28 = vcvt.s32.f32 %v4796_v47  ;;  %v5312_v40 = vcvt.s32.f32 %v4800_v58  ;;  %v4952_v8 = vunpack.c.1.s8 %v4604_v18  ;;  %v4651_v1 = vld [vmem:[#allocation8 + $0x3d0] sm:$0xff] }
 0x447   :  { %6331 = vmatpush.bf16.msrb.mxu0 %v5832_v10  ;;  %v5783_v0 = vpack.c.bf16 %v5375_v27, %v5371_v52  ;;  %v5012_v38 = vunpack.c.0.s8 %v4620_v48  ;;  %v5016_v2 = vunpack.c.1.s8 %v4620_v48  ;;  %v5460_v41 = vcvt.s32.f32 %v4948_v19  ;;  %v8230_v52 = vpop.f32.mrf.mxu0  ;;  %v8232_v27 = vpop.f32.mrf.mxu1 }
 0x448   :  { %6345 = vmatpush.bf16.msrb.mxu1 %v5864_v61  ;;  %v5752_v22 = vpack.c.bf16 %v5312_v40, %v5308_v28  ;;  %v4851_v46 = vunpack.c.0.s8 %v4579_v63  ;;  %v4855_v57 = vunpack.c.1.s8 %v4579_v63  ;;  %v5464_v25 = vcvt.s32.f32 %v4952_v8 }
 0x449   :  { %6209 = vmatpush.bf16.msra.mxu3 %v5783_v0  ;;  %v5524_v37 = vcvt.s32.f32 %v5012_v38  ;;  %v5528_v30 = vcvt.s32.f32 %v5016_v2  ;;  %v4788_v26 = vunpack.c.0.s8 %v4564_v6  ;;  %v4792_v33 = vunpack.c.1.s8 %v4564_v6  ;;  %v4636_v0 = vld [vmem:[#allocation8 + $0x358] sm:$0xff] }
 0x44a   :  { %6307 = vmatpush.bf16.msra.mxu2 %v5752_v22  ;;  %v5363_v14 = vcvt.s32.f32 %v4851_v46  ;;  %v5367_v50 = vcvt.s32.f32 %v4855_v57  ;;  %v5163_v29 = vunpack.c.2.s8 %v4655_v53  ;;  %v5828_v18 = vpack.c.bf16 %v5464_v25, %v5460_v41  ;;  %v4596_v22 = vld [vmem:[#allocation8 + $0x218] sm:$0xff] }
 0x44b   :  { %v5860_v60 = vpack.c.bf16 %v5528_v30, %v5524_v37  ;;  %v5300_v43 = vcvt.s32.f32 %v4788_v26  ;;  %v5167_v59 = vunpack.c.3.s8 %v4655_v53  ;;  %v5304_v34 = vcvt.s32.f32 %v4792_v33  ;;  %v4612_v37 = vld [vmem:[#allocation8 + $0x298] sm:$0xff] }
 0x44c   :  { %v5779_v49 = vpack.c.bf16 %v5367_v50, %v5363_v14  ;;  %v5675_v4 = vcvt.s32.f32 %v5163_v29  ;;  %v5100_v51 = vunpack.c.2.s8 %v4640_v56  ;;  %6332 = vmatpush.bf16.msrb.mxu0 %v5828_v18  ;;  %v5104_v42 = vunpack.c.3.s8 %v4640_v56 }
 0x44d   :  { %6346 = vmatpush.bf16.msrb.mxu1 %v5860_v60  ;;  %v5679_v48 = vcvt.s32.f32 %v5167_v59  ;;  %v4940_v11 = vunpack.c.2.s8 %v4600_v23  ;;  %v4944_v16 = vunpack.c.3.s8 %v4600_v23  ;;  %v5748_v9 = vpack.c.bf16 %v5304_v34, %v5300_v43 }
 0x44e   :  { %6210 = vmatpush.bf16.msra.mxu3 %v5779_v49  ;;  %v5612_v63 = vcvt.s32.f32 %v5100_v51  ;;  %v5004_v62 = vunpack.c.2.s8 %v4616_v17  ;;  %v5008_v13 = vunpack.c.3.s8 %v4616_v17  ;;  %v5616_v45 = vcvt.s32.f32 %v5104_v42 }
 0x44f   :  { %v5935_v32 = vpack.c.bf16 %v5679_v48, %v5675_v4  ;;  %v5452_v6 = vcvt.s32.f32 %v4940_v11  ;;  %v5456_v55 = vcvt.s32.f32 %v4944_v16  ;;  %6308 = vmatpush.bf16.msra.mxu2 %v5748_v9  ;;  %v5155_v31 = vunpack.c.0.s8 %v4655_v53 }
 0x450   :  { %v5516_v36 = vcvt.s32.f32 %v5004_v62  ;;  %v5520_v35 = vcvt.s32.f32 %v5008_v13  ;;  %v5904_v21 = vpack.c.bf16 %v5616_v45, %v5612_v63  ;;  %v5159_v39 = vunpack.c.1.s8 %v4655_v53 }
 0x451   :  { %v5824_v44 = vpack.c.bf16 %v5456_v55, %v5452_v6  ;;  %v5092_v24 = vunpack.c.0.s8 %v4640_v56  ;;  %6211 = vmatmul.bf16.vlgmr.msra.gmra.mxu3 %v8025_v5  ;;  %v5667_v47 = vcvt.s32.f32 %v5155_v31  ;;  %v5096_v58 = vunpack.c.1.s8 %v4640_v56  ;;  %v4647_v6 = vld [vmem:[#allocation8 + $0x3b0] sm:$0xff]  ;;  %v8235_v55 = vpop.f32.mrf.mxu0 }
 0x452   :  { %6259 = vmatpush.bf16.msrb.mxu3 %v5935_v32  ;;  %v5856_v12 = vpack.c.bf16 %v5520_v35, %v5516_v36  ;;  %v4932_v10 = vunpack.c.0.s8 %v4600_v23  ;;  %v5671_v61 = vcvt.s32.f32 %v5159_v39  ;;  %v4936_v40 = vunpack.c.1.s8 %v4600_v23  ;;  %6309 = vmatmul.bf16.vlgmr.msra.gmra.mxu2 %v7964_v15  ;;  %v8237_v36 = vpop.f32.mrf.mxu1  ;;  %v4632_v39 = vld [vmem:[#allocation8 + $0x338] sm:$0xff] }
 0x453   :  { %6357 = vmatpush.bf16.msrb.mxu2 %v5904_v21  ;;  %6333 = vmatpush.bf16.msrb.mxu0 %v5824_v44  ;;  %v5604_v28 = vcvt.s32.f32 %v5092_v24  ;;  %v4996_v19 = vunpack.c.0.s8 %v4616_v17  ;;  %v5608_v8 = vcvt.s32.f32 %v5096_v58  ;;  %v5000_v2 = vunpack.c.1.s8 %v4616_v17 }
 0x454   :  { %6347 = vmatpush.bf16.msrb.mxu1 %v5856_v12  ;;  %v5444_v38 = vcvt.s32.f32 %v4932_v10  ;;  %v5147_v53 = vunpack.c.2.s8 %v4651_v1  ;;  %v5931_v41 = vpack.c.bf16 %v5671_v61, %v5667_v47  ;;  %v5448_v46 = vcvt.s32.f32 %v4936_v40 }
 0x455   :  { %v5508_v57 = vcvt.s32.f32 %v4996_v19  ;;  %v5151_v25 = vunpack.c.3.s8 %v4651_v1  ;;  %v5900_v30 = vpack.c.bf16 %v5608_v8, %v5604_v28  ;;  %v5512_v26 = vcvt.s32.f32 %v5000_v2  ;;  %v8239_v28 = vpop.f32.mrf.mxu2 }
 0x456   :  { %v5659_v56 = vcvt.s32.f32 %v5147_v53  ;;  %v5084_v14 = vunpack.c.2.s8 %v4636_v0  ;;  %6260 = vmatpush.bf16.msrb.mxu3 %v5931_v41  ;;  %v5820_v50 = vpack.c.bf16 %v5448_v46, %v5444_v38  ;;  %v5088_v29 = vunpack.c.3.s8 %v4636_v0  ;;  %v4643_v41 = vld [vmem:[#allocation8 + $0x390] sm:$0xff] }
 0x457   :  { %v5663_v33 = vcvt.s32.f32 %v5151_v25  ;;  %v4924_v23 = vunpack.c.2.s8 %v4596_v22  ;;  %6358 = vmatpush.bf16.msrb.mxu2 %v5900_v30  ;;  %v5852_v15 = vpack.c.bf16 %v5512_v26, %v5508_v57  ;;  %v4928_v60 = vunpack.c.3.s8 %v4596_v22 }
 0x458   :  { %v5596_v18 = vcvt.s32.f32 %v5084_v14  ;;  %v4988_v43 = vunpack.c.2.s8 %v4612_v37  ;;  %6334 = vmatpush.bf16.msrb.mxu0 %v5820_v50  ;;  %v5600_v17 = vcvt.s32.f32 %v5088_v29  ;;  %v4992_v34 = vunpack.c.3.s8 %v4612_v37  ;;  %v4628_v50 = vld [vmem:[#allocation8 + $0x318] sm:$0xff] }
 0x459   :  { %v5927_v59 = vpack.c.bf16 %v5663_v33, %v5659_v56  ;;  %v5436_v49 = vcvt.s32.f32 %v4924_v23  ;;  %6348 = vmatpush.bf16.msrb.mxu1 %v5852_v15  ;;  %v5440_v4 = vcvt.s32.f32 %v4928_v60  ;;  %v5139_v48 = vunpack.c.0.s8 %v4651_v1  ;;  %v8241_v15 = vpop.f32.mrf.mxu0 }
 0x45a   :  { %v5500_v51 = vcvt.s32.f32 %v4988_v43  ;;  %v5143_v42 = vunpack.c.1.s8 %v4651_v1  ;;  %v5896_v11 = vpack.c.bf16 %v5600_v17, %v5596_v18  ;;  %v5504_v16 = vcvt.s32.f32 %v4992_v34  ;;  %v8243_v18 = vpop.f32.mrf.mxu1 }
 0x45b   :  { %6261 = vmatpush.bf16.msrb.mxu3 %v5927_v59  ;;  %v5076_v9 = vunpack.c.0.s8 %v4636_v0  ;;  %v5080_v63 = vunpack.c.1.s8 %v4636_v0  ;;  %v5816_v62 = vpack.c.bf16 %v5440_v4, %v5436_v49  ;;  %v5651_v13 = vcvt.s32.f32 %v5139_v48  ;;  %v5988_v49 = vpop.f32.mrf.mxu3 }
 0x45c   :  { %v5655_v32 = vcvt.s32.f32 %v5143_v42  ;;  %v4916_v45 = vunpack.c.0.s8 %v4596_v22  ;;  %6359 = vmatpush.bf16.msrb.mxu2 %v5896_v11  ;;  %v5848_v35 = vpack.c.bf16 %v5504_v16, %v5500_v51  ;;  %v4920_v44 = vunpack.c.1.s8 %v4596_v22  ;;  %v4592_v42 = vld [vmem:[#allocation8 + $0x1f8] sm:$0xff] }
 0x45d   :  { %v5588_v31 = vcvt.s32.f32 %v5076_v9  ;;  %v5592_v21 = vcvt.s32.f32 %v5080_v63  ;;  %6335 = vmatpush.bf16.msrb.mxu0 %v5816_v62  ;;  %v4980_v12 = vunpack.c.0.s8 %v4612_v37  ;;  %v4984_v47 = vunpack.c.1.s8 %v4612_v37 }
 0x45e   :  { %v5923_v24 = vpack.c.bf16 %v5655_v32, %v5651_v13  ;;  %v5428_v1 = vcvt.s32.f32 %v4916_v45  ;;  %6349 = vmatpush.bf16.msrb.mxu1 %v5848_v35  ;;  %v5432_v10 = vcvt.s32.f32 %v4920_v44  ;;  %v5131_v61 = vunpack.c.2.s8 %v4647_v6 }
 0x45f   :  { %v5892_v58 = vpack.c.bf16 %v5592_v21, %v5588_v31  ;;  %v5492_v40 = vcvt.s32.f32 %v4980_v12  ;;  %v5496_v19 = vcvt.s32.f32 %v4984_v47  ;;  %v5135_v0 = vunpack.c.3.s8 %v4647_v6  ;;  %v5976_v21 = vpop.f32.mrf.mxu2 }
 0x460   :  { %6262 = vmatpush.bf16.msrb.mxu3 %v5923_v24  ;;  %v5068_v8 = vunpack.c.2.s8 %v4632_v39  ;;  %v5812_v38 = vpack.c.bf16 %v5432_v10, %v5428_v1  ;;  %v5643_v2 = vcvt.s32.f32 %v5131_v61  ;;  %v5072_v53 = vunpack.c.3.s8 %v4632_v39  ;;  %v4588_v10 = vld [vmem:[#allocation8 + $0x1d8] sm:$0xff] }
 0x461   :  { %6360 = vmatpush.bf16.msrb.mxu2 %v5892_v58  ;;  %v5123_v22 = vunpack.c.0.s8 %v4647_v6  ;;  %v5844_v46 = vpack.c.bf16 %v5496_v19, %v5492_v40  ;;  %v5647_v57 = vcvt.s32.f32 %v5135_v0  ;;  %v5127_v37 = vunpack.c.1.s8 %v4647_v6  ;;  %v6441_v19 = vld [vmem:[#allocation10 + $0x30] sm:$0xff] }
 0x462   :  { %v5580_v25 = vcvt.s32.f32 %v5068_v8  ;;  %6336 = vmatpush.bf16.msrb.mxu0 %v5812_v38  ;;  %v5584_v30 = vcvt.s32.f32 %v5072_v53  ;;  %v5060_v56 = vunpack.c.0.s8 %v4632_v39  ;;  %v5064_v14 = vunpack.c.1.s8 %v4632_v39  ;;  %v6018_v53 = vpop.f32.mrf.mxu1 }
 0x463   :  { %v5635_v26 = vcvt.s32.f32 %v5123_v22  ;;  %6350 = vmatpush.bf16.msrb.mxu1 %v5844_v46  ;;  %v5919_v33 = vpack.c.bf16 %v5647_v57, %v5643_v2  ;;  %v5639_v29 = vcvt.s32.f32 %v5127_v37  ;;  %v5115_v23 = vunpack.c.2.s8 %v4643_v41  ;;  %v6004_v2 = vpop.f32.mrf.mxu0  ;;  %v5990_v46 = vpop.f32.mrf.mxu3 }
 0x464   :  { %v5888_v60 = vpack.c.bf16 %v5584_v30, %v5580_v25  ;;  %v5572_v43 = vcvt.s32.f32 %v5060_v56  ;;  %v5576_v59 = vcvt.s32.f32 %v5064_v14  ;;  %v5119_v17 = vunpack.c.3.s8 %v4643_v41 }
 0x465   :  { %6263 = vmatpush.bf16.msrb.mxu3 %v5919_v33  ;;  %6337 = vmatmul.bf16.vlgmr.msrb.gmra.mxu0 %v8080_v54  ;;  %v5915_v34 = vpack.c.bf16 %v5639_v29, %v5635_v26  ;;  %v5627_v4 = vcvt.s32.f32 %v5115_v23  ;;  %v5052_v51 = vunpack.c.2.s8 %v4628_v50  ;;  %v5056_v48 = vunpack.c.3.s8 %v4628_v50  ;;  %v6439_v29 = vld [vmem:[#allocation10 + $0x20] sm:$0xff] }
 0x466   :  { %6351 = vmatmul.bf16.vlgmr.msrb.gmra.mxu1 %v8135_v3  ;;  %6361 = vmatpush.bf16.msrb.mxu2 %v5888_v60  ;;  %v5884_v11 = vpack.c.bf16 %v5576_v59, %v5572_v43  ;;  %v5631_v16 = vcvt.s32.f32 %v5119_v17  ;;  %v5107_v9 = vunpack.c.0.s8 %v4643_v41  ;;  %v5111_v63 = vunpack.c.1.s8 %v4643_v41 }
 0x467   :  { %v5564_v62 = vcvt.s32.f32 %v5052_v51  ;;  %v5568_v13 = vcvt.s32.f32 %v5056_v48  ;;  %v5044_v32 = vunpack.c.0.s8 %v4628_v50  ;;  %v5048_v45 = vunpack.c.1.s8 %v4628_v50  ;;  %v6030_v23 = vpop.f32.mrf.mxu2 }
 0x468   :  { %v5961_v6 = vadd.f32 %v8232_v27, %v8230_v52  ;;  %v5911_v54 = vpack.c.bf16 %v5631_v16, %v5627_v4  ;;  %v5619_v35 = vcvt.s32.f32 %v5107_v9  ;;  %v4908_v31 = vunpack.c.2.s8 %v4592_v42 }
 0x469   :  { %6264 = vmatpush.bf16.msrb.mxu3 %v5915_v34  ;;  %v5623_v44 = vcvt.s32.f32 %v5111_v63  ;;  %v5556_v39 = vcvt.s32.f32 %v5044_v32  ;;  %v5560_v3 = vcvt.s32.f32 %v5048_v45  ;;  %v4912_v24 = vunpack.c.3.s8 %v4592_v42 }
 0x46a   :  { %v5963_v1 = vadd.f32 %v8237_v36, %v8235_v55  ;;  %6362 = vmatpush.bf16.msrb.mxu2 %v5884_v11  ;;  %v5880_v12 = vpack.c.bf16 %v5568_v13, %v5564_v62  ;;  %v5420_v47 = vcvt.s32.f32 %v4908_v31  ;;  %v4900_v58 = vunpack.c.0.s8 %v4592_v42  ;;  %v6072_v32 = vpop.f32.mrf.mxu1 }
 0x46b   :  { %v5424_v61 = vcvt.s32.f32 %v4912_v24  ;;  %v4904_v40 = vunpack.c.1.s8 %v4592_v42  ;;  %v5975_v52 = vadd.f32 %v8239_v28, %v5961_v6  ;;  %v5907_v0 = vpack.c.bf16 %v5623_v44, %v5619_v35  ;;  %v8252_v28 = vld [vmem:[#allocation8 + $0x1b8] sm:$0xff]  ;;  %v6058_v13 = vpop.f32.mrf.mxu0 }
 0x46c   :  { %v5977_v27 = vadd.f32 %v5976_v21, %v5963_v1  ;;  %v5876_v8 = vpack.c.bf16 %v5560_v3, %v5556_v39  ;;  %v4892_v38 = vunpack.c.2.s8 %v4588_v10  ;;  %v5412_v55 = vcvt.s32.f32 %v4900_v58  ;;  %v4580_v21 = vld [vmem:[#allocation8 + $0x198] sm:$0xff]  ;;  %v6437_v1 = vld [vmem:[#allocation10 + $0x10] sm:$0xff] }
 0x46d   :  { %6265 = vmatpush.bf16.msrb.mxu3 %v5911_v54  ;;  %v5808_v22 = vpack.c.bf16 %v5424_v61, %v5420_v47  ;;  %v5416_v36 = vcvt.s32.f32 %v4904_v40  ;;  %v4896_v41 = vunpack.c.3.s8 %v4588_v10  ;;  %v6495_v57 = vunpack.c.2.s8 %v6441_v19 }
 0x46e   :  { %6363 = vmatpush.bf16.msrb.mxu2 %v5880_v12  ;;  %v6497_v25 = vunpack.c.3.s8 %v6441_v19  ;;  %v5989_v37 = vadd.f32 %v5988_v49, %v5975_v52  ;;  %v5991_v30 = vadd.f32 %v5990_v46, %v5977_v27  ;;  %v4884_v26 = vunpack.c.0.s8 %v4588_v10 }
 0x46f   :  { %v5404_v56 = vcvt.s32.f32 %v4892_v38  ;;  %v4888_v14 = vunpack.c.1.s8 %v4588_v10  ;;  %v6623_v50 = vcvt.s32.f32 %v6495_v57  ;;  %v5804_v60 = vpack.c.bf16 %v5416_v36, %v5412_v55 }
 0x470   :  { %v6625_v33 = vcvt.s32.f32 %v6497_v25  ;;  %v5408_v43 = vcvt.s32.f32 %v4896_v41  ;;  %v6491_v59 = vunpack.c.0.s8 %v6441_v19  ;;  %v6493_v17 = vunpack.c.1.s8 %v6441_v19 }
 0x471   :  { %6266 = vmatpush.bf16.msrb.mxu3 %v5907_v0  ;;  %v6003_v34 = vadd.f32 %v8241_v15, %v5989_v37  ;;  %v4876_v49 = vunpack.c.2.s8 %v8252_v28  ;;  %v4880_v4 = vunpack.c.3.s8 %v8252_v28  ;;  %v6487_v11 = vunpack.c.2.s8 %v6439_v29  ;;  %v4656_v0 = vld [vmem:[#allocation8 + $0x3f8] sm:$0xff] }
 0x472   :  { %6364 = vmatpush.bf16.msrb.mxu2 %v5876_v8  ;;  %v6737_v51 = vpack.c.bf16 %v6625_v33, %v6623_v50  ;;  %v6619_v48 = vcvt.s32.f32 %v6491_v59  ;;  %v6621_v42 = vcvt.s32.f32 %v6493_v17  ;;  %v6005_v16 = vadd.f32 %v6004_v2, %v5991_v30 }
 0x473   :  { %v5396_v9 = vcvt.s32.f32 %v4884_v26  ;;  %v5400_v63 = vcvt.s32.f32 %v4888_v14  ;;  %v6489_v62 = vunpack.c.3.s8 %v6439_v29  ;;  %v5800_v15 = vpack.c.bf16 %v5408_v43, %v5404_v56  ;;  %v6435_v14 = vld [vmem:[#allocation10] sm:$0xff] }
 0x474   :  { %6267 = vmatmul.bf16.vlgmr.msrb.gmra.mxu3 %v8218_v20  ;;  %6787 = vmatpush.bf16.msra.mxu0 %v6737_v51  ;;  %v6735_v45 = vpack.c.bf16 %v6621_v42, %v6619_v48  ;;  %v6615_v6 = vcvt.s32.f32 %v6487_v11  ;;  %v6017_v54 = vadd.f32 %v8243_v18, %v6003_v34  ;;  %v5388_v35 = vcvt.s32.f32 %v4876_v49  ;;  %v8268_v49 = vld [vmem:[#allocation14 + $0x2] ss:$8 sm:$0xf] }
 0x475   :  { %6315 = vmatpush.bf16.msra.mxu3 %v5808_v22  ;;  %6365 = vmatmul.bf16.vlgmr.msrb.gmra.mxu2 %v8170_v7  ;;  %v5392_v31 = vcvt.s32.f32 %v4880_v4  ;;  %v6617_v44 = vcvt.s32.f32 %v6489_v62  ;;  %v4868_v39 = vunpack.c.0.s8 %v8252_v28  ;;  %v4872_v7 = vunpack.c.1.s8 %v8252_v28  ;;  %v6032_v22 = vpop.f32.mrf.mxu2  ;;  %v6442_v62 = vld [vmem:[#allocation10 + $0x38] sm:$0xff] }
 0x476   :  { %v6483_v3 = vunpack.c.0.s8 %v6439_v29  ;;  %v6485_v24 = vunpack.c.1.s8 %v6439_v29  ;;  %v6019_v12 = vadd.f32 %v6018_v53, %v6005_v16  ;;  %v8262_v47 = vadd.f32 %v6072_v32, %v6058_v13  ;;  %v6044_v41 = vpop.f32.mrf.mxu3 }
 0x477   :  { %v5796_v58 = vpack.c.bf16 %v5400_v63, %v5396_v9  ;;  %v6733_v10 = vpack.c.bf16 %v6617_v44, %v6615_v6  ;;  %v4860_v61 = vunpack.c.2.s8 %v4580_v21  ;;  %v4864_v18 = vunpack.c.3.s8 %v4580_v21 }
 0x478   :  { %6788 = vmatpush.bf16.msra.mxu0 %v6735_v45  ;;  %v6611_v40 = vcvt.s32.f32 %v6483_v3  ;;  %v6613_v52 = vcvt.s32.f32 %v6485_v24  ;;  %v4852_v27 = vunpack.c.0.s8 %v4580_v21  ;;  %v4856_v19 = vunpack.c.1.s8 %v4580_v21  ;;  %v6449_v24 = vld [vmem:[#allocation10 + $0x70] sm:$0xff] }
 0x479   :  { %6316 = vmatpush.bf16.msra.mxu3 %v5804_v60  ;;  %v6479_v8 = vunpack.c.2.s8 %v6437_v1  ;;  %v6481_v38 = vunpack.c.3.s8 %v6437_v1  ;;  %v6031_v2 = vadd.f32 %v6030_v23, %v6017_v54  ;;  %v5792_v55 = vpack.c.bf16 %v5392_v31, %v5388_v35  ;;  %v4652_v60 = vld [vmem:[#allocation8 + $0x3d8] sm:$0xff] }
 0x47a   :  { %v5380_v36 = vcvt.s32.f32 %v4868_v39  ;;  %v5384_v53 = vcvt.s32.f32 %v4872_v7  ;;  %v6731_v46 = vpack.c.bf16 %v6613_v52, %v6611_v40  ;;  %v6475_v37 = vunpack.c.0.s8 %v6437_v1  ;;  %v8279_v35 = vld [vmem:[#allocation14 + $0x40] ss:$8 sm:$0xf] }
 0x47b   :  { %v6607_v57 = vcvt.s32.f32 %v6479_v8  ;;  %v6609_v25 = vcvt.s32.f32 %v6481_v38  ;;  %v5372_v30 = vcvt.s32.f32 %v4860_v61  ;;  %v5376_v26 = vcvt.s32.f32 %v4864_v18 }
 0x47c   :  { %6789 = vmatpush.bf16.msra.mxu0 %v6733_v10  ;;  %v5164_v28 = vunpack.c.2.s8 %v4656_v0  ;;  %v6477_v56 = vunpack.c.1.s8 %v6437_v1  ;;  %v6033_v50 = vadd.f32 %v6032_v22, %v6019_v12  ;;  %v8264_v33 = vcvt.s32.f32 %v4852_v27 }
 0x47d   :  { %6317 = vmatpush.bf16.msra.mxu3 %v5800_v15  ;;  %v8266_v29 = vcvt.s32.f32 %v4856_v19  ;;  %v5168_v23 = vunpack.c.3.s8 %v4656_v0  ;;  %v5788_v43 = vpack.c.bf16 %v5384_v53, %v5380_v36  ;;  %v5156_v59 = vunpack.c.0.s8 %v4656_v0 }
 0x47e   :  { %v5160_v17 = vunpack.c.1.s8 %v4656_v0  ;;  %v6729_v34 = vpack.c.bf16 %v6609_v25, %v6607_v57  ;;  %v6603_v4 = vcvt.s32.f32 %v6475_v37  ;;  %v6605_v51 = vcvt.s32.f32 %v6477_v56  ;;  %v6046_v61 = vpop.f32.mrf.mxu3 }
 0x47f   :  { %v6471_v48 = vunpack.c.2.s8 %v6435_v14  ;;  %v6473_v42 = vunpack.c.3.s8 %v6435_v14  ;;  %v5784_v11 = vpack.c.bf16 %v5376_v26, %v5372_v30  ;;  %v8270_v16 = vcvt.s32.f32 %v5164_v28  ;;  %v6440_v28 = vld [vmem:[#allocation10 + $0x28] sm:$0xff] }
 0x480   :  { %6790 = vmatpush.bf16.msra.mxu0 %v6731_v46  ;;  %v5148_v9 = vunpack.c.2.s8 %v4652_v60  ;;  %v5152_v63 = vunpack.c.3.s8 %v4652_v60  ;;  %v5780_v13 = vpack.c.bf16 %v8266_v29, %v8264_v33  ;;  %v5680_v32 = vcvt.s32.f32 %v5168_v23  ;;  %v4648_v29 = vld [vmem:[#allocation8 + $0x3b8] sm:$0xff] }
 0x481   :  { %6318 = vmatpush.bf16.msra.mxu3 %v5796_v58  ;;  %v6045_v15 = vadd.f32 %v6044_v41, %v6031_v2  ;;  %v6390_v45 = vperm.slane %v8268_v49, 0  ;;  %v8275_v6 = vcvt.s32.f32 %v5156_v59  ;;  %v8277_v54 = vcvt.s32.f32 %v5160_v17 }
 0x482   :  { %v6467_v31 = vunpack.c.0.s8 %v6435_v14  ;;  %v6469_v21 = vunpack.c.1.s8 %v6435_v14  ;;  %v6727_v44 = vpack.c.bf16 %v6605_v51, %v6603_v4  ;;  %v6599_v39 = vcvt.s32.f32 %v6471_v48  ;;  %v6447_v48 = vld [vmem:[#allocation10 + $0x60] sm:$0xff] }
 0x483   :  { %v6601_v7 = vcvt.s32.f32 %v6473_v42  ;;  %v6496_v3 = vunpack.c.2.s8 %v6442_v62  ;;  %v8281_v1 = vcvt.s32.f32 %v5148_v9  ;;  %v8283_v12 = vcvt.s32.f32 %v5152_v63 }
 0x484   :  { %6791 = vmatpush.bf16.msra.mxu0 %v6729_v34  ;;  %v5140_v58 = vunpack.c.0.s8 %v4652_v60  ;;  %v6498_v10 = vunpack.c.3.s8 %v6442_v62  ;;  %v5144_v18 = vunpack.c.1.s8 %v4652_v60  ;;  %v6398_v40 = vmul.f32 %v6390_v45, %v6045_v15 }
 0x485   :  { %6319 = vmatpush.bf16.msra.mxu3 %v5792_v55  ;;  %v6407_v52 = vperm.slane %v8279_v35, 0  ;;  %v6595_v27 = vcvt.s32.f32 %v6467_v31  ;;  %v6597_v19 = vcvt.s32.f32 %v6469_v21  ;;  %v6624_v0 = vcvt.s32.f32 %v6496_v3  ;;  %v6086_v3 = vpop.f32.mrf.mxu2 }
 0x486   :  { %v6626_v8 = vcvt.s32.f32 %v6498_v10  ;;  %v6527_v38 = vunpack.c.2.s8 %v6449_v24  ;;  %v5936_v2 = vpack.c.bf16 %v5680_v32, %v8270_v16  ;;  %v6725_v22 = vpack.c.bf16 %v6601_v7, %v6599_v39  ;;  %v8300_v7 = vld [vmem:[#allocation10 + $0x18] sm:$0xff] }
 0x487   :  { %v6529_v55 = vunpack.c.3.s8 %v6449_v24  ;;  %v6047_v36 = vadd.f32 %v6046_v61, %v6033_v50  ;;  %v5932_v53 = vpack.c.bf16 %v8277_v54, %v8275_v6  ;;  %v6492_v46 = vunpack.c.0.s8 %v6442_v62  ;;  %v6445_v61 = vld [vmem:[#allocation10 + $0x50] sm:$0xff] }
 0x488   :  { %6792 = vmatpush.bf16.msra.mxu0 %v6727_v44  ;;  %v6655_v41 = vcvt.s32.f32 %v6527_v38  ;;  %v6494_v57 = vunpack.c.1.s8 %v6442_v62  ;;  %v5928_v25 = vpack.c.bf16 %v8283_v12, %v8281_v1  ;;  %v6415_v37 = vadd.f32 %v6407_v52, %v6398_v40  ;;  %v6443_v12 = vld [vmem:[#allocation10 + $0x40] sm:$0xff] }
 0x489   :  { %6320 = vmatpush.bf16.msra.mxu3 %v5788_v43  ;;  %v6657_v30 = vcvt.s32.f32 %v6529_v55  ;;  %v6402_v26 = vmul.f32 %v6390_v45, %v6047_v36  ;;  %v8291_v56 = vcvt.s32.f32 %v5140_v58  ;;  %v8293_v14 = vcvt.s32.f32 %v5144_v18 }
 0x48a   :  { %v6723_v33 = vpack.c.bf16 %v6597_v19, %v6595_v27  ;;  %v6738_v50 = vpack.c.bf16 %v6626_v8, %v6624_v0  ;;  %v6523_v43 = vunpack.c.0.s8 %v6449_v24  ;;  %v6525_v59 = vunpack.c.1.s8 %v6449_v24  ;;  %v8303_v19 = vld [vmem:[#allocation8 + $0x398] sm:$0xff] }
 0x48b   :  { %v6753_v23 = vpack.c.bf16 %v6657_v30, %v6655_v41  ;;  %v6419_v60 = vadd.f32 %v6407_v52, %v6402_v26  ;;  %v6620_v17 = vcvt.s32.f32 %v6492_v46  ;;  %v6622_v34 = vcvt.s32.f32 %v6494_v57  ;;  %v6060_v41 = vpop.f32.mrf.mxu0  ;;  %v6100_v30 = vpop.f32.mrf.mxu3 }
 0x48c   :  { %6793 = vmatpush.bf16.msra.mxu0 %v6725_v22  ;;  %v6488_v4 = vunpack.c.2.s8 %v6440_v28  ;;  %v6490_v51 = vunpack.c.3.s8 %v6440_v28  ;;  %v6423_v42 = vmax.f32 %v6415_v37, 0.0  ;;  %v6651_v16 = vcvt.s32.f32 %v6523_v43 }
 0x48d   :  { %6321 = vmatpush.bf16.msra.mxu3 %v5784_v11  ;;  %6801 = vmatpush.bf16.msra.mxu1 %v6753_v23  ;;  %v6427_v11 = vmax.f32 %v6419_v60, 0.0  ;;  %v6653_v9 = vcvt.s32.f32 %v6525_v59  ;;  %v5924_v63 = vpack.c.bf16 %v8293_v14, %v8291_v56  ;;  %v5132_v62 = vunpack.c.2.s8 %v4648_v29  ;;  %v6450_v14 = vld [vmem:[#allocation10 + $0x78] sm:$0xff] }
 0x48e   :  { %v6616_v32 = vcvt.s32.f32 %v6488_v4  ;;  %v6618_v15 = vcvt.s32.f32 %v6490_v51  ;;  %v6519_v54 = vunpack.c.2.s8 %v6447_v48  ;;  %v5124_v31 = vunpack.c.0.s8 %v4648_v29  ;;  %v6436_v51 = vld [vmem:[#allocation10 + $0x8] sm:$0xff] }
 0x48f   :  { %v8298_v45 = vpack.c.bf16 %v6427_v11, %v6423_v42  ;;  %v6751_v6 = vpack.c.bf16 %v6653_v9, %v6651_v16  ;;  %v5128_v21 = vunpack.c.1.s8 %v4648_v29  ;;  %v6736_v44 = vpack.c.bf16 %v6622_v34, %v6620_v17 }
 0x490   :  { %6794 = vmatpush.bf16.msra.mxu0 %v6723_v33  ;;  %v6521_v39 = vunpack.c.3.s8 %v6447_v48  ;;  %v6647_v24 = vcvt.s32.f32 %v6519_v54  ;;  %v6484_v58 = vunpack.c.0.s8 %v6440_v28  ;;  %v6486_v10 = vunpack.c.1.s8 %v6440_v28  ;;  %v6074_v28 = vpop.f32.mrf.mxu1 }
 0x491   :  { %6322 = vmatpush.bf16.msra.mxu3 %v5780_v13  ;;  %v5136_v13 = vunpack.c.3.s8 %v4648_v29  ;;  %6802 = vmatpush.bf16.msra.mxu1 %v6751_v6  ;;  %v5644_v18 = vcvt.s32.f32 %v5132_v62  ;;  %v6734_v40 = vpack.c.bf16 %v6618_v15, %v6616_v32  ;;  %v6517_v27 = vunpack.c.1.s8 %v6447_v48 }
 0x492   :  { %v6649_v52 = vcvt.s32.f32 %v6521_v39  ;;  %v6612_v0 = vcvt.s32.f32 %v6484_v58  ;;  %v6614_v8 = vcvt.s32.f32 %v6486_v10  ;;  %v6482_v36 = vunpack.c.3.s8 %v8300_v7 }
 0x493   :  { %6795 = vmatmul.bf16.vlgmr.msra.gmra.mxu0 %v8298_v45  ;;  %v6645_v55 = vcvt.s32.f32 %v6517_v27  ;;  %v5648_v46 = vcvt.s32.f32 %v5136_v13  ;;  %v8310_v57 = vcvt.s32.f32 %v5124_v31  ;;  %v8312_v37 = vcvt.s32.f32 %v5128_v21  ;;  %v6088_v13 = vpop.f32.mrf.mxu2 }
 0x494   :  { %6323 = vmatmul.bf16.vlgmr.msra.gmra.mxu3 %v8025_v5  ;;  %6843 = vmatpush.bf16.msrb.mxu0 %v6738_v50  ;;  %v6515_v5 = vunpack.c.0.s8 %v6447_v48  ;;  %v6749_v22 = vpack.c.bf16 %v6649_v52, %v6647_v24  ;;  %v6513_v26 = vunpack.c.3.s8 %v6445_v61  ;;  %v5116_v33 = vunpack.c.2.s8 %v8303_v19  ;;  %v6102_v52 = vpop.f32.mrf.mxu3 }
 0x495   :  { %6371 = vmatpush.bf16.msrb.mxu3 %v5936_v2  ;;  %v6480_v2 = vunpack.c.2.s8 %v8300_v7  ;;  %v5120_v50 = vunpack.c.3.s8 %v8303_v19  ;;  %v6732_v60 = vpack.c.bf16 %v6614_v8, %v6612_v0  ;;  %v6507_v1 = vunpack.c.0.s8 %v6445_v61 }
 0x496   :  { %v6643_v38 = vcvt.s32.f32 %v6515_v5  ;;  %6803 = vmatpush.bf16.msra.mxu1 %v6749_v22  ;;  %v6641_v59 = vcvt.s32.f32 %v6513_v26  ;;  %v6476_v17 = vunpack.c.0.s8 %v8300_v7  ;;  %v6478_v34 = vunpack.c.1.s8 %v8300_v7 }
 0x497   :  { %v6608_v43 = vcvt.s32.f32 %v6480_v2  ;;  %v6509_v4 = vunpack.c.1.s8 %v6445_v61  ;;  %v6075_v48 = vadd.f32 %v6074_v28, %v6060_v41  ;;  %v6087_v42 = vadd.f32 %v6086_v3, %v8262_v47 }
 0x498   :  { %6844 = vmatpush.bf16.msrb.mxu0 %v6736_v44  ;;  %v6747_v29 = vpack.c.bf16 %v6645_v55, %v6643_v38  ;;  %v5920_v11 = vpack.c.bf16 %v5648_v46, %v5644_v18  ;;  %v6635_v16 = vcvt.s32.f32 %v6507_v1  ;;  %v6503_v32 = vunpack.c.2.s8 %v6443_v12 }
 0x499   :  { %6372 = vmatpush.bf16.msrb.mxu3 %v5932_v53  ;;  %v6511_v53 = vunpack.c.2.s8 %v6445_v61  ;;  %v6637_v62 = vcvt.s32.f32 %v6509_v4  ;;  %v6505_v15 = vunpack.c.3.s8 %v6443_v12  ;;  %v5916_v6 = vpack.c.bf16 %v8312_v37, %v8310_v57 }
 0x49a   :  { %6804 = vmatpush.bf16.msra.mxu1 %v6747_v29  ;;  %v5628_v54 = vcvt.s32.f32 %v5116_v33  ;;  %v5632_v31 = vcvt.s32.f32 %v5120_v50  ;;  %v6472_v21 = vunpack.c.2.s8 %v6436_v51  ;;  %v6604_v44 = vcvt.s32.f32 %v6476_v17 }
 0x49b   :  { %v6639_v23 = vcvt.s32.f32 %v6511_v53  ;;  %v6606_v39 = vcvt.s32.f32 %v6478_v34  ;;  %v6474_v56 = vunpack.c.3.s8 %v6436_v51  ;;  %v5108_v7 = vunpack.c.0.s8 %v8303_v19  ;;  %v6142_v1 = vpop.f32.mrf.mxu2 }
 0x49c   :  { %6845 = vmatpush.bf16.msrb.mxu0 %v6734_v40  ;;  %v5112_v3 = vunpack.c.1.s8 %v8303_v19  ;;  %v6101_v24 = vadd.f32 %v6100_v30, %v6087_v42  ;;  %v6743_v58 = vpack.c.bf16 %v6637_v62, %v6635_v16  ;;  %v6631_v10 = vcvt.s32.f32 %v6503_v32 }
 0x49d   :  { %6373 = vmatpush.bf16.msrb.mxu3 %v5928_v25  ;;  %v6610_v25 = vcvt.s32.f32 %v6482_v36  ;;  %v6745_v9 = vpack.c.bf16 %v6641_v59, %v6639_v23  ;;  %v6633_v5 = vcvt.s32.f32 %v6505_v15  ;;  %v6499_v61 = vunpack.c.0.s8 %v6443_v12  ;;  %v6128_v36 = vpop.f32.mrf.mxu1  ;;  %v6448_v59 = vld [vmem:[#allocation10 + $0x68] sm:$0xff] }
 0x49e   :  { %v6501_v18 = vunpack.c.1.s8 %v6443_v12  ;;  %v6089_v40 = vadd.f32 %v6088_v13, %v6075_v48  ;;  %v6600_v27 = vcvt.s32.f32 %v6472_v21  ;;  %v6528_v0 = vunpack.c.2.s8 %v6450_v14 }
 0x49f   :  { %v6730_v47 = vpack.c.bf16 %v6610_v25, %v6608_v43  ;;  %6805 = vmatpush.bf16.msra.mxu1 %v6745_v9  ;;  %v6530_v8 = vunpack.c.3.s8 %v6450_v14  ;;  %v6728_v38 = vpack.c.bf16 %v6606_v39, %v6604_v44  ;;  %v6602_v2 = vcvt.s32.f32 %v6474_v56 }
 0x4a0   :  { %6846 = vmatpush.bf16.msrb.mxu0 %v6732_v60  ;;  %v6468_v22 = vunpack.c.0.s8 %v6436_v51  ;;  %v6470_v55 = vunpack.c.1.s8 %v6436_v51  ;;  %v5912_v19 = vpack.c.bf16 %v5632_v31, %v5628_v54  ;;  %v5620_v53 = vcvt.s32.f32 %v5108_v7 }
 0x4a1   :  { %6374 = vmatpush.bf16.msrb.mxu3 %v5924_v63  ;;  %v6114_v63 = vpop.f32.mrf.mxu0  ;;  %v5624_v41 = vcvt.s32.f32 %v5112_v3  ;;  %v6741_v57 = vpack.c.bf16 %v6633_v5, %v6631_v10  ;;  %v6627_v37 = vcvt.s32.f32 %v6499_v61  ;;  %v6629_v30 = vcvt.s32.f32 %v6501_v18 }
 0x4a2   :  { %v6115_v46 = vadd.f32 %v6114_v63, %v6101_v24  ;;  %v6524_v26 = vunpack.c.0.s8 %v6450_v14  ;;  %v6656_v28 = vcvt.s32.f32 %v6528_v0  ;;  %v6658_v33 = vcvt.s32.f32 %v6530_v8 }
 0x4a3   :  { %6806 = vmatpush.bf16.msra.mxu1 %v6743_v58  ;;  %v6526_v50 = vunpack.c.1.s8 %v6450_v14  ;;  %v6103_v29 = vadd.f32 %v6102_v52, %v6089_v40  ;;  %v6726_v23 = vpack.c.bf16 %v6602_v2, %v6600_v27  ;;  %v6596_v60 = vcvt.s32.f32 %v6468_v22  ;;  %v6144_v63 = vpop.f32.mrf.mxu2  ;;  %v6444_v52 = vld [vmem:[#allocation10 + $0x48] sm:$0xff] }
 0x4a4   :  { %6847 = vmatpush.bf16.msrb.mxu0 %v6730_v47  ;;  %v6598_v43 = vcvt.s32.f32 %v6470_v55  ;;  %v5908_v12 = vpack.c.bf16 %v5624_v41, %v5620_v53  ;;  %v6129_v25 = vadd.f32 %v6128_v36, %v6115_v46  ;;  %v6739_v17 = vpack.c.bf16 %v6629_v30, %v6627_v37  ;;  %v6446_v47 = vld [vmem:[#allocation10 + $0x58] sm:$0xff]  ;;  %v6457_v55 = vld [vmem:[#allocation10 + $0xb0] sm:$0xff] }
 0x4a5   :  { %6375 = vmatpush.bf16.msrb.mxu3 %v5920_v11  ;;  %v6652_v34 = vcvt.s32.f32 %v6524_v26  ;;  %v6754_v51 = vpack.c.bf16 %v6658_v33, %v6656_v28  ;;  %v6654_v48 = vcvt.s32.f32 %v6526_v50  ;;  %v6520_v42 = vunpack.c.2.s8 %v6448_v59  ;;  %v6130_v13 = vpop.f32.mrf.mxu1 }
 0x4a6   :  { %v6522_v11 = vunpack.c.3.s8 %v6448_v59  ;;  %v6724_v9 = vpack.c.bf16 %v6598_v43, %v6596_v60  ;;  %v6143_v32 = vadd.f32 %v6142_v1, %v6129_v25  ;;  %v6516_v15 = vunpack.c.0.s8 %v6448_v59 }
 0x4a7   :  { %6807 = vmatpush.bf16.msra.mxu1 %v6741_v57  ;;  %v6648_v54 = vcvt.s32.f32 %v6520_v42  ;;  %v6518_v21 = vunpack.c.1.s8 %v6448_v59  ;;  %v6391_v39 = vperm.slane %v8268_v49, 1  ;;  %v6512_v14 = vunpack.c.2.s8 %v6446_v47 }
 0x4a8   :  { %6848 = vmatpush.bf16.msrb.mxu0 %v6728_v38  ;;  %v6650_v31 = vcvt.s32.f32 %v6522_v11  ;;  %v6644_v3 = vcvt.s32.f32 %v6516_v15  ;;  %v6514_v58 = vunpack.c.3.s8 %v6446_v47  ;;  %v6408_v5 = vperm.slane %v8279_v35, 1 }
 0x4a9   :  { %6376 = vmatpush.bf16.msrb.mxu3 %v5916_v6  ;;  %v6116_v4 = vpop.f32.mrf.mxu0  ;;  %v6752_v6 = vpack.c.bf16 %v6654_v48, %v6652_v34  ;;  %v6646_v24 = vcvt.s32.f32 %v6518_v21  ;;  %v6508_v40 = vunpack.c.0.s8 %v6446_v47  ;;  %v6640_v0 = vcvt.s32.f32 %v6512_v14  ;;  %v6455_v48 = vld [vmem:[#allocation10 + $0xa0] sm:$0xff] }
 0x4aa   :  { %v6117_v16 = vadd.f32 %v6116_v4, %v6103_v29  ;;  %v6750_v7 = vpack.c.bf16 %v6650_v31, %v6648_v54  ;;  %v6642_v8 = vcvt.s32.f32 %v6514_v58  ;;  %v6510_v38 = vunpack.c.1.s8 %v6446_v47  ;;  %v6453_v47 = vld [vmem:[#allocation10 + $0x90] sm:$0xff] }
 0x4ab   :  { %6808 = vmatpush.bf16.msra.mxu1 %v6739_v17  ;;  %v6748_v27 = vpack.c.bf16 %v6646_v24, %v6644_v3  ;;  %v6504_v22 = vunpack.c.2.s8 %v6444_v52  ;;  %v6559_v53 = vunpack.c.2.s8 %v6457_v55  ;;  %v6561_v41 = vunpack.c.3.s8 %v6457_v55  ;;  %v6451_v24 = vld [vmem:[#allocation10 + $0x80] sm:$0xff] }
 0x4ac   :  { %6849 = vmatpush.bf16.msrb.mxu0 %v6726_v23  ;;  %v6156_v62 = vpop.f32.mrf.mxu3  ;;  %v6131_v56 = vadd.f32 %v6130_v13, %v6117_v16  ;;  %v6746_v46 = vpack.c.bf16 %v6642_v8, %v6640_v0  ;;  %v6636_v57 = vcvt.s32.f32 %v6508_v40  ;;  %v6638_v37 = vcvt.s32.f32 %v6510_v38  ;;  %v6458_v38 = vld [vmem:[#allocation10 + $0xb8] sm:$0xff] }
 0x4ad   :  { %6377 = vmatpush.bf16.msrb.mxu3 %v5912_v19  ;;  %v6157_v44 = vadd.f32 %v6156_v62, %v6143_v32  ;;  %v6506_v19 = vunpack.c.3.s8 %v6444_v52  ;;  %v6687_v28 = vcvt.s32.f32 %v6559_v53  ;;  %v6689_v33 = vcvt.s32.f32 %v6561_v41 }
 0x4ae   :  { %v6145_v61 = vadd.f32 %v6144_v63, %v6131_v56  ;;  %v6632_v50 = vcvt.s32.f32 %v6504_v22  ;;  %v6500_v43 = vunpack.c.0.s8 %v6444_v52  ;;  %v6744_v59 = vpack.c.bf16 %v6638_v37, %v6636_v57 }
 0x4af   :  { %6857 = vmatpush.bf16.msrb.mxu1 %v6754_v51  ;;  %v6399_v10 = vmul.f32 %v6391_v39, %v6157_v44  ;;  %v6634_v23 = vcvt.s32.f32 %v6506_v19  ;;  %v6769_v60 = vpack.c.bf16 %v6689_v33, %v6687_v28  ;;  %v6502_v1 = vunpack.c.1.s8 %v6444_v52  ;;  %v6184_v28 = vpop.f32.mrf.mxu1  ;;  %v6456_v33 = vld [vmem:[#allocation10 + $0xa8] sm:$0xff] }
 0x4b0   :  { %6850 = vmatpush.bf16.msrb.mxu0 %v6724_v9  ;;  %v6557_v25 = vunpack.c.1.s8 %v6457_v55  ;;  %v6628_v51 = vcvt.s32.f32 %v6500_v43  ;;  %v6551_v16 = vunpack.c.2.s8 %v6455_v48  ;;  %v6553_v9 = vunpack.c.3.s8 %v6455_v48 }
 0x4b1   :  { %6378 = vmatpush.bf16.msrb.mxu3 %v5908_v12  ;;  %v6416_v2 = vadd.f32 %v6408_v5, %v6399_v10  ;;  %v6555_v12 = vunpack.c.0.s8 %v6457_v55  ;;  %6815 = vmatpush.bf16.msra.mxu2 %v6769_v60  ;;  %v6742_v4 = vpack.c.bf16 %v6634_v23, %v6632_v50  ;;  %v6630_v42 = vcvt.s32.f32 %v6502_v1  ;;  %v6170_v53 = vpop.f32.mrf.mxu0 }
 0x4b2   :  { %v6685_v34 = vcvt.s32.f32 %v6557_v25  ;;  %v6679_v62 = vcvt.s32.f32 %v6551_v16  ;;  %v6681_v32 = vcvt.s32.f32 %v6553_v9  ;;  %v6549_v54 = vunpack.c.1.s8 %v6455_v48 }
 0x4b3   :  { %6851 = vmatmul.bf16.vlgmr.msrb.gmra.mxu0 %v8298_v45  ;;  %6858 = vmatpush.bf16.msrb.mxu1 %v6752_v6  ;;  %v6424_v30 = vmax.f32 %v6416_v2, 0.0  ;;  %v6683_v17 = vcvt.s32.f32 %v6555_v12  ;;  %v6740_v15 = vpack.c.bf16 %v6630_v42, %v6628_v51  ;;  %v6547_v6 = vunpack.c.0.s8 %v6455_v48  ;;  %v6454_v48 = vld [vmem:[#allocation10 + $0x98] sm:$0xff] }
 0x4b4   :  { %6379 = vmatmul.bf16.vlgmr.msrb.gmra.mxu3 %v8218_v20  ;;  %v6158_v18 = vpop.f32.mrf.mxu3  ;;  %v6765_v13 = vpack.c.bf16 %v6681_v32, %v6679_v62  ;;  %v6677_v21 = vcvt.s32.f32 %v6549_v54  ;;  %v6545_v56 = vunpack.c.3.s8 %v6453_v47  ;;  %v6541_v3 = vunpack.c.1.s8 %v6453_v47 }
 0x4b5   :  { %v6159_v20 = vadd.f32 %v6158_v18, %v6145_v61  ;;  %v6767_v11 = vpack.c.bf16 %v6685_v34, %v6683_v17  ;;  %v6675_v31 = vcvt.s32.f32 %v6547_v6  ;;  %v6535_v58 = vunpack.c.2.s8 %v6451_v24 }
 0x4b6   :  { %v6673_v63 = vcvt.s32.f32 %v6545_v56  ;;  %v6537_v10 = vunpack.c.3.s8 %v6451_v24  ;;  %v6669_v18 = vcvt.s32.f32 %v6541_v3  ;;  %v6531_v0 = vunpack.c.0.s8 %v6451_v24 }
 0x4b7   :  { %6859 = vmatpush.bf16.msrb.mxu1 %v6750_v7  ;;  %v6403_v45 = vmul.f32 %v6391_v39, %v6159_v20  ;;  %6816 = vmatpush.bf16.msra.mxu2 %v6767_v11  ;;  %v6763_v44 = vpack.c.bf16 %v6677_v21, %v6675_v31  ;;  %v6543_v39 = vunpack.c.2.s8 %v6453_v47  ;;  %v6539_v7 = vunpack.c.0.s8 %v6453_v47  ;;  %v6186_v9 = vpop.f32.mrf.mxu1  ;;  %v6452_v21 = vld [vmem:[#allocation10 + $0x88] sm:$0xff] }
 0x4b8   :  { %v6663_v40 = vcvt.s32.f32 %v6535_v58  ;;  %v6665_v52 = vcvt.s32.f32 %v6537_v10  ;;  %v6533_v8 = vunpack.c.1.s8 %v6451_v24  ;;  %v6560_v2 = vunpack.c.2.s8 %v6458_v38 }
 0x4b9   :  { %v6420_v36 = vadd.f32 %v6408_v5, %v6403_v45  ;;  %v6671_v14 = vcvt.s32.f32 %v6543_v39  ;;  %v6667_v61 = vcvt.s32.f32 %v6539_v7  ;;  %v6562_v45 = vunpack.c.3.s8 %v6458_v38  ;;  %v6172_v17 = vpop.f32.mrf.mxu0 }
 0x4ba   :  { %v6659_v22 = vcvt.s32.f32 %v6531_v0  ;;  %v6661_v55 = vcvt.s32.f32 %v6533_v8  ;;  %v6556_v57 = vunpack.c.0.s8 %v6458_v38  ;;  %v6558_v37 = vunpack.c.1.s8 %v6458_v38  ;;  %v6465_v8 = vld [vmem:[#allocation10 + $0xf0] sm:$0xff] }
 0x4bb   :  { %6860 = vmatpush.bf16.msrb.mxu1 %v6748_v27  ;;  %v6428_v26 = vmax.f32 %v6420_v36, 0.0  ;;  %6817 = vmatpush.bf16.msra.mxu2 %v6765_v13  ;;  %v6761_v5 = vpack.c.bf16 %v6673_v63, %v6671_v14  ;;  %v6759_v20 = vpack.c.bf16 %v6669_v18, %v6667_v61  ;;  %v6757_v27 = vpack.c.bf16 %v6665_v52, %v6663_v40 }
 0x4bc   :  { %v6688_v36 = vcvt.s32.f32 %v6560_v2  ;;  %v6690_v19 = vcvt.s32.f32 %v6562_v45  ;;  %v6755_v41 = vpack.c.bf16 %v6661_v55, %v6659_v22  ;;  %v6554_v23 = vunpack.c.3.s8 %v6456_v33 }
 0x4bd   :  { %v6432_v29 = vpack.c.bf16 %v6428_v26, %v6424_v30  ;;  %v6684_v30 = vcvt.s32.f32 %v6556_v57  ;;  %v6686_v26 = vcvt.s32.f32 %v6558_v37  ;;  %v6548_v12 = vunpack.c.0.s8 %v6456_v33 }
 0x4be   :  { %v6682_v43 = vcvt.s32.f32 %v6554_v23  ;;  %v6550_v25 = vunpack.c.1.s8 %v6456_v33  ;;  %v6544_v11 = vunpack.c.2.s8 %v6454_v48  ;;  %v6546_v16 = vunpack.c.3.s8 %v6454_v48 }
 0x4bf   :  { %6861 = vmatpush.bf16.msrb.mxu1 %v6746_v46  ;;  %6818 = vmatpush.bf16.msra.mxu2 %v6763_v44  ;;  %v6770_v46 = vpack.c.bf16 %v6690_v19, %v6688_v36  ;;  %v6768_v50 = vpack.c.bf16 %v6686_v26, %v6684_v30  ;;  %v6676_v34 = vcvt.s32.f32 %v6548_v12  ;;  %v6185_v62 = vadd.f32 %v6184_v28, %v6170_v53 }
 0x4c0   :  { %6809 = vmatmul.bf16.vlgmr.msra.gmra.mxu1 %v6432_v29  ;;  %v6672_v32 = vcvt.s32.f32 %v6544_v11  ;;  %v6540_v54 = vunpack.c.0.s8 %v6454_v48  ;;  %v6542_v31 = vunpack.c.1.s8 %v6454_v48  ;;  %v6536_v39 = vunpack.c.2.s8 %v6452_v21 }
 0x4c1   :  { %v6226_v44 = vpop.f32.mrf.mxu0  ;;  %v6538_v56 = vunpack.c.3.s8 %v6452_v21  ;;  %v6187_v58 = vadd.f32 %v6186_v9, %v6172_v17  ;;  %v6534_v0 = vunpack.c.1.s8 %v6452_v21  ;;  %v6591_v2 = vunpack.c.2.s8 %v6465_v8 }
 0x4c2   :  { %v6668_v63 = vcvt.s32.f32 %v6540_v54  ;;  %v6670_v7 = vcvt.s32.f32 %v6542_v31  ;;  %v6664_v3 = vcvt.s32.f32 %v6536_v39  ;;  %v6593_v45 = vunpack.c.3.s8 %v6465_v8 }
 0x4c3   :  { %6862 = vmatpush.bf16.msrb.mxu1 %v6744_v59  ;;  %6819 = vmatpush.bf16.msra.mxu2 %v6761_v5  ;;  %v6198_v59 = vpop.f32.mrf.mxu2  ;;  %v6666_v24 = vcvt.s32.f32 %v6538_v56  ;;  %v6240_v5 = vpop.f32.mrf.mxu1  ;;  %v6662_v36 = vcvt.s32.f32 %v6534_v0  ;;  %v6719_v53 = vcvt.s32.f32 %v6591_v2  ;;  %v6587_v26 = vunpack.c.0.s8 %v6465_v8  ;;  %v6466_v2 = vld [vmem:[#allocation10 + $0xf8] sm:$0xff] }
 0x4c4   :  { %v6199_v13 = vadd.f32 %v6198_v59, %v6185_v62  ;;  %v6760_v10 = vpack.c.bf16 %v6670_v7, %v6668_v63  ;;  %v6589_v28 = vunpack.c.1.s8 %v6465_v8 }
 0x4c5   :  { %v6758_v40 = vpack.c.bf16 %v6666_v24, %v6664_v3 }
 0x4c6   :  { %v6717_v23 = vcvt.s32.f32 %v6589_v28 }
 0x4c7   :  { %6863 = vmatpush.bf16.msrb.mxu1 %v6742_v4  ;;  %6820 = vmatpush.bf16.msra.mxu2 %v6759_v20  ;;  %v6678_v4 = vcvt.s32.f32 %v6550_v25 }
 0x4c9   :  { %v6764_v42 = vpack.c.bf16 %v6678_v4, %v6676_v34  ;;  %v6228_v19 = vpop.f32.mrf.mxu0 }
 0x4cb   :  { %6864 = vmatpush.bf16.msrb.mxu1 %v6740_v15  ;;  %6821 = vmatpush.bf16.msra.mxu2 %v6757_v27  ;;  %v6674_v15 = vcvt.s32.f32 %v6546_v16  ;;  %v6200_v47 = vpop.f32.mrf.mxu2  ;;  %v6532_v27 = vunpack.c.0.s8 %v6452_v21 }
 0x4cc   :  { %v6201_v18 = vadd.f32 %v6200_v47, %v6187_v58 }
 0x4cd   :  { %v6762_v6 = vpack.c.bf16 %v6674_v15, %v6672_v32  ;;  %v6660_v55 = vcvt.s32.f32 %v6532_v27  ;;  %v6461_v15 = vld [vmem:[#allocation10 + $0xd0] sm:$0xff] }
 0x4ce   :  { %v6571_v21 = vunpack.c.0.s8 %v6461_v15  ;;  %v6573_v47 = vunpack.c.1.s8 %v6461_v15 }
 0x4cf   :  { %6822 = vmatpush.bf16.msra.mxu2 %v6755_v41  ;;  %v6721_v41 = vcvt.s32.f32 %v6593_v45  ;;  %v6756_v57 = vpack.c.bf16 %v6662_v36, %v6660_v55  ;;  %v6592_v45 = vunpack.c.2.s8 %v6466_v2 }
 0x4d0   :  { %6865 = vmatmul.bf16.vlgmr.msrb.gmra.mxu1 %v6432_v29  ;;  %v6552_v29 = vunpack.c.2.s8 %v6456_v33  ;;  %v6699_v58 = vcvt.s32.f32 %v6571_v21  ;;  %v6460_v21 = vld [vmem:[#allocation10 + $0xc8] sm:$0xff] }
 0x4d1   :  { %v6785_v30 = vpack.c.bf16 %v6721_v41, %v6719_v53  ;;  %v6282_v41 = vpop.f32.mrf.mxu0 }
 0x4d2   :  { %v6680_v60 = vcvt.s32.f32 %v6552_v29  ;;  %v6715_v29 = vcvt.s32.f32 %v6587_v26 }
 0x4d3   :  { %6871 = vmatpush.bf16.msrb.mxu2 %v6770_v46  ;;  %v6254_v38 = vpop.f32.mrf.mxu2  ;;  %6829 = vmatpush.bf16.msra.mxu3 %v6785_v30  ;;  %v6590_v30 = vunpack.c.1.s8 %v6466_v2 }
 0x4d4   :  { %v6766_v1 = vpack.c.bf16 %v6682_v43, %v6680_v60  ;;  %v6212_v51 = vpop.f32.mrf.mxu3  ;;  %v6392_v43 = vperm.slane %v8268_v49, 2  ;;  %v6783_v12 = vpack.c.bf16 %v6717_v23, %v6715_v29  ;;  %v6575_v49 = vunpack.c.2.s8 %v6461_v15 }
 0x4d5   :  { %v6213_v14 = vadd.f32 %v6212_v51, %v6199_v13  ;;  %v6718_v28 = vcvt.s32.f32 %v6590_v30 }
 0x4d7   :  { %6872 = vmatpush.bf16.msrb.mxu2 %v6768_v50  ;;  %v6227_v20 = vadd.f32 %v6226_v44, %v6213_v14  ;;  %v6242_v50 = vpop.f32.mrf.mxu1  ;;  %6830 = vmatpush.bf16.msra.mxu3 %v6783_v12  ;;  %v6459_v44 = vld [vmem:[#allocation10 + $0xc0] sm:$0xff]  ;;  %v6703_v14 = vcvt.s32.f32 %v6575_v49 }
 0x4d8   :  { %v6567_v3 = vunpack.c.2.s8 %v6459_v44  ;;  %v6563_v8 = vunpack.c.0.s8 %v6459_v44 }
 0x4d9   :  { %v6241_v22 = vadd.f32 %v6240_v5, %v6227_v20  ;;  %v6569_v5 = vunpack.c.3.s8 %v6459_v44 }
 0x4da   :  { %v6691_v55 = vcvt.s32.f32 %v6563_v8 }
 0x4db   :  { %6873 = vmatpush.bf16.msrb.mxu2 %v6766_v1  ;;  %v6255_v33 = vadd.f32 %v6254_v38, %v6241_v22  ;;  %v6463_v1 = vld [vmem:[#allocation10 + $0xe0] sm:$0xff]  ;;  %v6256_v34 = vpop.f32.mrf.mxu2  ;;  %v6697_v27 = vcvt.s32.f32 %v6569_v5  ;;  %v6565_v38 = vunpack.c.1.s8 %v6459_v44  ;;  %v6594_v22 = vunpack.c.3.s8 %v6466_v2 }
 0x4dc   :  { %v6214_v61 = vpop.f32.mrf.mxu3  ;;  %v6583_v25 = vunpack.c.2.s8 %v6463_v1  ;;  %v6585_v17 = vunpack.c.3.s8 %v6463_v1  ;;  %v6579_v62 = vunpack.c.0.s8 %v6463_v1  ;;  %v6581_v32 = vunpack.c.1.s8 %v6463_v1 }
 0x4dd   :  { %v6215_v52 = vadd.f32 %v6214_v61, %v6201_v18  ;;  %v6693_v36 = vcvt.s32.f32 %v6565_v38  ;;  %v6722_v53 = vcvt.s32.f32 %v6594_v22 }
 0x4de   :  { %v6711_v4 = vcvt.s32.f32 %v6583_v25  ;;  %v6713_v51 = vcvt.s32.f32 %v6585_v17  ;;  %v6707_v54 = vcvt.s32.f32 %v6579_v62  ;;  %v6709_v31 = vcvt.s32.f32 %v6581_v32 }
 0x4df   :  { %6874 = vmatpush.bf16.msrb.mxu2 %v6764_v42  ;;  %v6229_v46 = vadd.f32 %v6228_v19, %v6215_v52  ;;  %v6409_v42 = vperm.slane %v8279_v35, 2  ;;  %v6695_v52 = vcvt.s32.f32 %v6567_v3  ;;  %v6720_v19 = vcvt.s32.f32 %v6592_v45 }
 0x4e0   :  { %v6781_v9 = vpack.c.bf16 %v6713_v51, %v6711_v4  ;;  %v6779_v35 = vpack.c.bf16 %v6709_v31, %v6707_v54  ;;  %v6566_v3 = vunpack.c.1.s8 %v6460_v21 }
 0x4e1   :  { %v6243_v59 = vadd.f32 %v6242_v50, %v6229_v46  ;;  %v6773_v0 = vpack.c.bf16 %v6697_v27, %v6695_v52  ;;  %v6771_v46 = vpack.c.bf16 %v6693_v36, %v6691_v55  ;;  %v6464_v50 = vld [vmem:[#allocation10 + $0xe8] sm:$0xff] }
 0x4e2   :  { %6831 = vmatpush.bf16.msra.mxu3 %v6781_v9  ;;  %v6584_v23 = vunpack.c.2.s8 %v6464_v50  ;;  %v6580_v25 = vunpack.c.0.s8 %v6464_v50  ;;  %v6582_v17 = vunpack.c.1.s8 %v6464_v50 }
 0x4e3   :  { %6875 = vmatpush.bf16.msrb.mxu2 %v6762_v6  ;;  %v6257_v11 = vadd.f32 %v6256_v34, %v6243_v59  ;;  %v6577_v6 = vunpack.c.3.s8 %v6461_v15  ;;  %v6310_v1 = vpop.f32.mrf.mxu2  ;;  %v6284_v34 = vpop.f32.mrf.mxu0 }
 0x4e4   :  { %v6708_v4 = vcvt.s32.f32 %v6580_v25  ;;  %v6710_v51 = vcvt.s32.f32 %v6582_v17  ;;  %v6930_v17 = vld [vmem:[#allocation11 + $0x18] sm:$0xff] }
 0x4e5   :  { %v6705_v63 = vcvt.s32.f32 %v6577_v6 }
 0x4e6   :  { %6832 = vmatpush.bf16.msra.mxu3 %v6779_v35 }
 0x4e7   :  { %6876 = vmatpush.bf16.msrb.mxu2 %v6760_v10  ;;  %v6777_v24 = vpack.c.bf16 %v6705_v63, %v6703_v14  ;;  %v6701_v10 = vcvt.s32.f32 %v6573_v47  ;;  %v6570_v14 = vunpack.c.3.s8 %v6460_v21 }
 0x4ea   :  { %6833 = vmatpush.bf16.msra.mxu3 %v6777_v24 }
 0x4eb   :  { %6877 = vmatpush.bf16.msrb.mxu2 %v6758_v40  ;;  %v6775_v40 = vpack.c.bf16 %v6701_v10, %v6699_v58  ;;  %v6312_v47 = vpop.f32.mrf.mxu2  ;;  %v6338_v44 = vpop.f32.mrf.mxu0  ;;  %v6698_v10 = vcvt.s32.f32 %v6570_v14  ;;  %v6934_v14 = vld [vmem:[#allocation11 + $0x38] sm:$0xff] }
 0x4ee   :  { %6834 = vmatpush.bf16.msra.mxu3 %v6775_v40 }
 0x4ef   :  { %6878 = vmatpush.bf16.msrb.mxu2 %v6756_v57  ;;  %v6786_v57 = vpack.c.bf16 %v6722_v53, %v6720_v19 }
 0x4f2   :  { %6835 = vmatpush.bf16.msra.mxu3 %v6773_v0  ;;  %v6694_v0 = vcvt.s32.f32 %v6566_v3  ;;  %v6965_v3 = vunpack.c.2.s8 %v6934_v14 }
 0x4f3   :  { %v6340_v22 = vpop.f32.mrf.mxu0 }
 0x4f6   :  { %6836 = vmatpush.bf16.msra.mxu3 %v6771_v46  ;;  %v7158_v46 = vld [vmem:[#allocation14 + $0x2] ss:$8 sm:$0xf] }
 0x4f7   :  { %v6268_v37 = vpop.f32.mrf.mxu3 }
 0x4f8   :  { %v6269_v60 = vadd.f32 %v6268_v37, %v6255_v33  ;;  %v6588_v37 = vunpack.c.0.s8 %v6466_v2  ;;  %v6296_v33 = vpop.f32.mrf.mxu1  ;;  %v6366_v38 = vpop.f32.mrf.mxu2 }
 0x4f9   :  { %v6297_v62 = vadd.f32 %v6296_v33, %v6282_v41 }
 0x4fa   :  { %v6400_v48 = vmul.f32 %v6392_v43, %v6269_v60  ;;  %6885 = vmatpush.bf16.msrb.mxu3 %v6786_v57  ;;  %v6716_v26 = vcvt.s32.f32 %v6588_v37  ;;  %v6586_v60 = vunpack.c.3.s8 %v6464_v50  ;;  %v6393_v57 = vperm.slane %v7158_v46, 3 }
 0x4fb   :  { %v6311_v49 = vadd.f32 %v6310_v1, %v6297_v62 }
 0x4fc   :  { %v6417_v39 = vadd.f32 %v6409_v42, %v6400_v48  ;;  %v6784_v29 = vpack.c.bf16 %v6718_v28, %v6716_v26  ;;  %v6714_v59 = vcvt.s32.f32 %v6586_v60  ;;  %v7159_v28 = vld [vmem:[#allocation14 + $0x40] ss:$8 sm:$0xf] }
 0x4fd   :  { %v6410_v33 = vperm.slane %v7159_v28, 3 }
 0x4fe   :  { %v6425_v61 = vmax.f32 %v6417_v39, 0.0  ;;  %6886 = vmatpush.bf16.msrb.mxu3 %v6784_v29 }
 0x4ff   :  { %v6270_v16 = vpop.f32.mrf.mxu3 }
 0x500   :  { %v6271_v13 = vadd.f32 %v6270_v16, %v6257_v11  ;;  %v6780_v11 = vpack.c.bf16 %v6710_v51, %v6708_v4  ;;  %v6298_v32 = vpop.f32.mrf.mxu1  ;;  %v6368_v30 = vpop.f32.mrf.mxu2  ;;  %v6949_v4 = vunpack.c.2.s8 %v6930_v17  ;;  %v6950_v51 = vunpack.c.3.s8 %v6930_v17 }
 0x501   :  { %v6299_v24 = vadd.f32 %v6298_v32, %v6284_v34  ;;  %v6929_v34 = vld [vmem:[#allocation11 + $0x10] sm:$0xff] }
 0x502   :  { %v6404_v56 = vmul.f32 %v6392_v43, %v6271_v13  ;;  %v6712_v43 = vcvt.s32.f32 %v6584_v23  ;;  %v6982_v62 = vcvt.s32.f32 %v6950_v51 }
 0x504   :  { %v6421_v7 = vadd.f32 %v6409_v42, %v6404_v56  ;;  %v6782_v12 = vpack.c.bf16 %v6714_v59, %v6712_v43  ;;  %v6462_v42 = vld [vmem:[#allocation10 + $0xd8] sm:$0xff]  ;;  %v6568_v56 = vunpack.c.2.s8 %v6460_v21 }
 0x505   :  { %v6576_v16 = vunpack.c.2.s8 %v6462_v42  ;;  %v6578_v9 = vunpack.c.3.s8 %v6462_v42  ;;  %v6572_v54 = vunpack.c.0.s8 %v6462_v42  ;;  %v6574_v31 = vunpack.c.1.s8 %v6462_v42 }
 0x506   :  { %v6429_v18 = vmax.f32 %v6421_v7, 0.0  ;;  %6887 = vmatpush.bf16.msrb.mxu3 %v6782_v12  ;;  %v6564_v7 = vunpack.c.0.s8 %v6460_v21  ;;  %v6696_v58 = vcvt.s32.f32 %v6568_v56  ;;  %v6948_v42 = vunpack.c.1.s8 %v6930_v17  ;;  %v6928_v56 = vld [vmem:[#allocation11 + $0x8] sm:$0xff] }
 0x507   :  { %v6704_v15 = vcvt.s32.f32 %v6576_v16  ;;  %v6706_v13 = vcvt.s32.f32 %v6578_v9  ;;  %v6700_v63 = vcvt.s32.f32 %v6572_v54  ;;  %v6702_v35 = vcvt.s32.f32 %v6574_v31 }
 0x508   :  { %v6433_v20 = vpack.c.bf16 %v6429_v18, %v6425_v61  ;;  %v6313_v61 = vadd.f32 %v6312_v47, %v6299_v24  ;;  %v6352_v18 = vpop.f32.mrf.mxu1  ;;  %v6774_v52 = vpack.c.bf16 %v6698_v10, %v6696_v58  ;;  %v6692_v27 = vcvt.s32.f32 %v6564_v7 }
 0x509   :  { %v6778_v6 = vpack.c.bf16 %v6706_v13, %v6704_v15  ;;  %v6776_v5 = vpack.c.bf16 %v6702_v35, %v6700_v63  ;;  %v6946_v16 = vunpack.c.3.s8 %v6929_v34  ;;  %v6981_v9 = vcvt.s32.f32 %v6949_v4 }
 0x50a   :  { %6823 = vmatmul.bf16.vlgmr.msra.gmra.mxu2 %v6433_v20  ;;  %6888 = vmatpush.bf16.msrb.mxu3 %v6780_v11  ;;  %v6772_v45 = vpack.c.bf16 %v6694_v0, %v6692_v27  ;;  %v6945_v11 = vunpack.c.2.s8 %v6929_v34  ;;  %v6980_v15 = vcvt.s32.f32 %v6948_v42  ;;  %v6943_v21 = vunpack.c.0.s8 %v6929_v34 }
 0x50b   :  { %v7006_v13 = vpack.c.bf16 %v6982_v62, %v6981_v9  ;;  %v6978_v54 = vcvt.s32.f32 %v6946_v16  ;;  %v6944_v47 = vunpack.c.1.s8 %v6929_v34  ;;  %v6941_v35 = vunpack.c.2.s8 %v6928_v56 }
 0x50c   :  { %v6942_v7 = vunpack.c.3.s8 %v6928_v56  ;;  %v6966_v24 = vunpack.c.3.s8 %v6934_v14  ;;  %v6963_v27 = vunpack.c.0.s8 %v6934_v14  ;;  %v6964_v0 = vunpack.c.1.s8 %v6934_v14 }
 0x50d   :  { %7015 = vmatpush.bf16.msra.mxu0 %v7006_v13  ;;  %v6973_v58 = vcvt.s32.f32 %v6941_v35 }
 0x50e   :  { %6889 = vmatpush.bf16.msrb.mxu3 %v6778_v6  ;;  %v6977_v6 = vcvt.s32.f32 %v6945_v11  ;;  %v6974_v10 = vcvt.s32.f32 %v6942_v7 }
 0x510   :  { %v6354_v53 = vpop.f32.mrf.mxu1  ;;  %v7004_v31 = vpack.c.bf16 %v6978_v54, %v6977_v6  ;;  %v6931_v54 = vld [vmem:[#allocation11 + $0x20] sm:$0xff] }
 0x511   :  { %v6951_v14 = vunpack.c.0.s8 %v6931_v54 }
 0x512   :  { %6890 = vmatpush.bf16.msrb.mxu3 %v6776_v5  ;;  %v6997_v5 = vcvt.s32.f32 %v6965_v3 }
 0x513   :  { %v6983_v35 = vcvt.s32.f32 %v6951_v14 }
 0x516   :  { %6891 = vmatpush.bf16.msrb.mxu3 %v6774_v52 }
 0x517   :  { %v6324_v48 = vpop.f32.mrf.mxu3 }
 0x518   :  { %v6325_v39 = vadd.f32 %v6324_v48, %v6311_v49  ;;  %v6947_v48 = vunpack.c.0.s8 %v6930_v17  ;;  %v6932_v17 = vld [vmem:[#allocation11 + $0x28] sm:$0xff] }
 0x519   :  { %v6957_v4 = vunpack.c.2.s8 %v6932_v17  ;;  %v6958_v51 = vunpack.c.3.s8 %v6932_v17  ;;  %v6955_v9 = vunpack.c.0.s8 %v6932_v17  ;;  %v6956_v62 = vunpack.c.1.s8 %v6932_v17 }
 0x51a   :  { %6879 = vmatmul.bf16.vlgmr.msrb.gmra.mxu2 %v6433_v20  ;;  %v6339_v40 = vadd.f32 %v6338_v44, %v6325_v39  ;;  %6892 = vmatpush.bf16.msrb.mxu3 %v6772_v45  ;;  %v6979_v32 = vcvt.s32.f32 %v6947_v48  ;;  %v6975_v44 = vcvt.s32.f32 %v6943_v21  ;;  %v6976_v39 = vcvt.s32.f32 %v6944_v47 }
 0x51b   :  { %v6996_v45 = vcvt.s32.f32 %v6964_v0  ;;  %v6989_v42 = vcvt.s32.f32 %v6957_v4  ;;  %v6990_v11 = vcvt.s32.f32 %v6958_v51  ;;  %v6987_v13 = vcvt.s32.f32 %v6955_v9  ;;  %v7055_v9 = vld [vmem:[#allocation13 + $0x18] sm:$0xff] }
 0x51c   :  { %v6353_v2 = vadd.f32 %v6352_v18, %v6339_v40  ;;  %v7005_v49 = vpack.c.bf16 %v6980_v15, %v6979_v32  ;;  %v7003_v63 = vpack.c.bf16 %v6976_v39, %v6975_v44  ;;  %v7002_v18 = vpack.c.bf16 %v6974_v10, %v6973_v58  ;;  %v6796_v15 = vpop.f32.mrf.mxu0 }
 0x51d   :  { %v6940_v40 = vunpack.c.1.s8 %v6928_v56  ;;  %v7010_v16 = vpack.c.bf16 %v6990_v11, %v6989_v42  ;;  %v6953_v21 = vunpack.c.2.s8 %v6931_v54  ;;  %v6954_v47 = vunpack.c.3.s8 %v6931_v54 }
 0x51e   :  { %v6367_v19 = vadd.f32 %v6366_v38, %v6353_v2  ;;  %7016 = vmatpush.bf16.msra.mxu0 %v7005_v49  ;;  %v6995_v2 = vcvt.s32.f32 %v6963_v27  ;;  %v6988_v49 = vcvt.s32.f32 %v6956_v62  ;;  %v6902_v27 = vld [vmem:[#allocation14 + $0x41] ss:$8 sm:$0x3]  ;;  %v7070_v62 = vunpack.c.2.s8 %v7055_v9 }
 0x51f   :  { %v6326_v20 = vpop.f32.mrf.mxu3  ;;  %v6972_v38 = vcvt.s32.f32 %v6940_v40  ;;  %v6985_v44 = vcvt.s32.f32 %v6953_v21  ;;  %v6986_v39 = vcvt.s32.f32 %v6954_v47  ;;  %v7054_v47 = vld [vmem:[#allocation13 + $0x10] sm:$0xff] }
 0x520   :  { %v6327_v8 = vadd.f32 %v6326_v20, %v6313_v61  ;;  %v6998_v61 = vcvt.s32.f32 %v6966_v24  ;;  %v6939_v20 = vunpack.c.0.s8 %v6928_v56  ;;  %v7013_v46 = vpack.c.bf16 %v6996_v45, %v6995_v2 }
 0x521   :  { %v7008_v56 = vpack.c.bf16 %v6986_v39, %v6985_v44  ;;  %v6913_v2 = vperm.slane %v6902_v27, 0  ;;  %v7066_v39 = vunpack.c.2.s8 %v7054_v47 }
 0x522   :  { %v6341_v55 = vadd.f32 %v6340_v22, %v6327_v8  ;;  %7017 = vmatpush.bf16.msra.mxu0 %v7004_v31  ;;  %v7014_v52 = vpack.c.bf16 %v6998_v61, %v6997_v5  ;;  %v6971_v8 = vcvt.s32.f32 %v6939_v20  ;;  %v6927_v22 = vld [vmem:[#allocation11] sm:$0xff]  ;;  %v7009_v31 = vpack.c.bf16 %v6988_v49, %v6987_v13 }
 0x523   :  { %v7082_v14 = vcvt.s32.f32 %v7066_v39 }
 0x524   :  { %v6355_v37 = vadd.f32 %v6354_v53, %v6341_v55  ;;  %7029 = vmatpush.bf16.msra.mxu1 %v7014_v52  ;;  %v6933_v55 = vld [vmem:[#allocation11 + $0x30] sm:$0xff]  ;;  %v6938_v53 = vunpack.c.3.s8 %v6927_v22  ;;  %v6798_v24 = vpop.f32.mrf.mxu0 }
 0x526   :  { %v6369_v50 = vadd.f32 %v6368_v30, %v6355_v37  ;;  %7018 = vmatpush.bf16.msra.mxu0 %v7003_v63  ;;  %v6970_v30 = vcvt.s32.f32 %v6938_v53  ;;  %v6952_v63 = vunpack.c.1.s8 %v6931_v54  ;;  %v7069_v54 = vunpack.c.1.s8 %v7055_v9 }
 0x528   :  { %7030 = vmatpush.bf16.msra.mxu1 %v7013_v46  ;;  %v6984_v7 = vcvt.s32.f32 %v6952_v63  ;;  %v7085_v21 = vcvt.s32.f32 %v7069_v54 }
 0x52a   :  { %7019 = vmatpush.bf16.msra.mxu0 %v7002_v18  ;;  %v7007_v10 = vpack.c.bf16 %v6984_v7, %v6983_v35  ;;  %v6900_v18 = vld [vmem:[#allocation14 + $0x3] ss:$8 sm:$0x3]  ;;  %v7064_v7 = vunpack.c.0.s8 %v7054_v47 }
 0x52b   :  { %v6904_v52 = vperm.slane %v6900_v18, 0 }
 0x537   :  { %v6380_v36 = vpop.f32.mrf.mxu3 }
 0x538   :  { %v6381_v41 = vadd.f32 %v6380_v36, %v6367_v19  ;;  %v7001_v36 = vpack.c.bf16 %v6972_v38, %v6971_v8  ;;  %v6937_v19 = vunpack.c.2.s8 %v6927_v22 }
 0x53a   :  { %v6401_v26 = vmul.f32 %v6393_v57, %v6381_v41  ;;  %v6961_v41 = vunpack.c.2.s8 %v6933_v55  ;;  %7020 = vmatpush.bf16.msra.mxu0 %v7001_v36  ;;  %v6969_v37 = vcvt.s32.f32 %v6937_v19  ;;  %v6852_v36 = vpop.f32.mrf.mxu0 }
 0x53c   :  { %v6418_v60 = vadd.f32 %v6410_v33, %v6401_v26  ;;  %v6993_v26 = vcvt.s32.f32 %v6961_v41 }
 0x53d   :  { %v6810_v32 = vpop.f32.mrf.mxu1 }
 0x53e   :  { %v6426_v1 = vmax.f32 %v6418_v60, 0.0  ;;  %v6811_v58 = vadd.f32 %v6810_v32, %v6796_v15  ;;  %v7071_v32 = vunpack.c.3.s8 %v7055_v9  ;;  %v7086_v15 = vcvt.s32.f32 %v7070_v62 }
 0x53f   :  { %v6382_v29 = vpop.f32.mrf.mxu3 }
 0x540   :  { %v6383_v23 = vadd.f32 %v6382_v29, %v6369_v50  ;;  %v6935_v50 = vunpack.c.0.s8 %v6927_v22  ;;  %v6936_v29 = vunpack.c.1.s8 %v6927_v22  ;;  %v7087_v13 = vcvt.s32.f32 %v7071_v32 }
 0x542   :  { %v6405_v43 = vmul.f32 %v6393_v57, %v6383_v23  ;;  %v6962_v57 = vunpack.c.3.s8 %v6933_v55  ;;  %v6959_v23 = vunpack.c.0.s8 %v6933_v55  ;;  %v7095_v49 = vpack.c.bf16 %v7087_v13, %v7086_v15 }
 0x544   :  { %v6422_v59 = vadd.f32 %v6410_v33, %v6405_v43  ;;  %v6994_v28 = vcvt.s32.f32 %v6962_v57  ;;  %v7000_v33 = vpack.c.bf16 %v6970_v30, %v6969_v37  ;;  %v6960_v43 = vunpack.c.1.s8 %v6933_v55  ;;  %7096 = vmatpush.bf16.msra.mxu2 %v7095_v49 }
 0x545   :  { %v6812_v3 = vpop.f32.mrf.mxu1 }
 0x546   :  { %v6430_v12 = vmax.f32 %v6422_v59, 0.0  ;;  %v7012_v60 = vpack.c.bf16 %v6994_v28, %v6993_v26  ;;  %7021 = vmatpush.bf16.msra.mxu0 %v7000_v33  ;;  %v6967_v59 = vcvt.s32.f32 %v6935_v50  ;;  %v6813_v0 = vadd.f32 %v6812_v3, %v6798_v24 }
 0x547   :  { %v7065_v3 = vunpack.c.1.s8 %v7054_v47  ;;  %v7080_v24 = vcvt.s32.f32 %v7064_v7 }
 0x548   :  { %v6434_v25 = vpack.c.bf16 %v6430_v12, %v6426_v1  ;;  %v6968_v1 = vcvt.s32.f32 %v6936_v29  ;;  %v6991_v12 = vcvt.s32.f32 %v6959_v23  ;;  %7031 = vmatpush.bf16.msra.mxu1 %v7012_v60  ;;  %v6905_v23 = vperm.slane %v6900_v18, 1  ;;  %v6854_v60 = vpop.f32.mrf.mxu0 }
 0x54a   :  { %6837 = vmatmul.bf16.vlgmr.msra.gmra.mxu3 %v6434_v25  ;;  %v6999_v34 = vpack.c.bf16 %v6968_v1, %v6967_v59 }
 0x54c   :  { %7022 = vmatpush.bf16.msra.mxu0 %v6999_v34 }
 0x54d   :  { %v6866_v45 = vpop.f32.mrf.mxu1 }
 0x54e   :  { %v6867_v57 = vadd.f32 %v6866_v45, %v6852_v36 }
 0x555   :  { %v6868_v50 = vpop.f32.mrf.mxu1 }
 0x556   :  { %v6869_v59 = vadd.f32 %v6868_v50, %v6854_v60  ;;  %v7043_v50 = vld [vmem:[#allocation14 + $0x4] ss:$0 sm:$0xff]  ;;  %v7044_v60 = vld [vmem:[#allocation14 + $0x42] ss:$0 sm:$0xff] }
 0x55a   :  { %6893 = vmatmul.bf16.vlgmr.msrb.gmra.mxu3 %v6434_v25  ;;  %v6992_v25 = vcvt.s32.f32 %v6960_v43 }
 0x55c   :  { %v7011_v48 = vpack.c.bf16 %v6992_v25, %v6991_v12  ;;  %v6914_v25 = vperm.slane %v6902_v27, 1 }
 0x55e   :  { %7032 = vmatpush.bf16.msra.mxu1 %v7011_v48 }
 0x562   :  { %7033 = vmatpush.bf16.msra.mxu1 %v7010_v16 }
 0x566   :  { %7034 = vmatpush.bf16.msra.mxu1 %v7009_v31 }
 0x56a   :  { %7035 = vmatpush.bf16.msra.mxu1 %v7008_v56  ;;  %v7067_v56 = vunpack.c.3.s8 %v7054_v47 }
 0x56c   :  { %v7083_v63 = vcvt.s32.f32 %v7067_v56 }
 0x56e   :  { %7036 = vmatpush.bf16.msra.mxu1 %v7007_v10  ;;  %v7093_v35 = vpack.c.bf16 %v7083_v63, %v7082_v14  ;;  %v7053_v10 = vld [vmem:[#allocation13 + $0x8] sm:$0xff] }
 0x56f   :  { %v7063_v18 = vunpack.c.3.s8 %v7053_v10  ;;  %v7060_v27 = vunpack.c.0.s8 %v7053_v10 }
 0x58d   :  { %v6824_v6 = vpop.f32.mrf.mxu2 }
 0x58e   :  { %v6825_v20 = vadd.f32 %v6824_v6, %v6811_v58  ;;  %v7068_v6 = vunpack.c.0.s8 %v7055_v9  ;;  %v7081_v58 = vcvt.s32.f32 %v7065_v3 }
 0x590   :  { %v7084_v31 = vcvt.s32.f32 %v7068_v6 }
 0x592   :  { %v7094_v44 = vpack.c.bf16 %v7085_v21, %v7084_v31 }
 0x594   :  { %7097 = vmatpush.bf16.msra.mxu2 %v7094_v44 }
 0x595   :  { %v6826_v5 = vpop.f32.mrf.mxu2 }
 0x596   :  { %v6827_v8 = vadd.f32 %v6826_v5, %v6813_v0  ;;  %v7092_v5 = vpack.c.bf16 %v7081_v58, %v7080_v24  ;;  %v7061_v0 = vunpack.c.1.s8 %v7053_v10 }
 0x598   :  { %7098 = vmatpush.bf16.msra.mxu2 %v7093_v35 }
 0x59c   :  { %7099 = vmatpush.bf16.msra.mxu2 %v7092_v5 }
 0x59d   :  { %v6880_v19 = vpop.f32.mrf.mxu2 }
 0x59e   :  { %v6881_v28 = vadd.f32 %v6880_v19, %v6867_v57 }
 0x5a5   :  { %v6882_v43 = vpop.f32.mrf.mxu2 }
 0x5a6   :  { %v6883_v1 = vadd.f32 %v6882_v43, %v6869_v59 }
 0x5cd   :  { %v6838_v61 = vpop.f32.mrf.mxu3 }
 0x5ce   :  { %v6839_v40 = vadd.f32 %v6838_v61, %v6825_v20  ;;  %v7062_v61 = vunpack.c.2.s8 %v7053_v10 }
 0x5d0   :  { %v6908_v38 = vmul.f32 %v6904_v52, %v6839_v40  ;;  %v7078_v20 = vcvt.s32.f32 %v7062_v61  ;;  %v7079_v40 = vcvt.s32.f32 %v7063_v18 }
 0x5d2   :  { %v6917_v53 = vadd.f32 %v6913_v2, %v6908_v38  ;;  %v7077_v38 = vcvt.s32.f32 %v7061_v0 }
 0x5d4   :  { %v6921_v37 = vmax.f32 %v6917_v53, 0.0 }
 0x5d5   :  { %v6840_v22 = vpop.f32.mrf.mxu3 }
 0x5d6   :  { %v6841_v55 = vadd.f32 %v6840_v22, %v6827_v8  ;;  %v7076_v8 = vcvt.s32.f32 %v7060_v27 }
 0x5d8   :  { %v6910_v41 = vmul.f32 %v6904_v52, %v6841_v55  ;;  %v7091_v52 = vpack.c.bf16 %v7079_v40, %v7078_v20  ;;  %v7090_v45 = vpack.c.bf16 %v7077_v38, %v7076_v8 }
 0x5da   :  { %v6919_v46 = vadd.f32 %v6913_v2, %v6910_v41  ;;  %7100 = vmatpush.bf16.msra.mxu2 %v7091_v52  ;;  %v7052_v2 = vld [vmem:[#allocation13] sm:$0xff] }
 0x5db   :  { %v7058_v22 = vunpack.c.2.s8 %v7052_v2  ;;  %v7059_v55 = vunpack.c.3.s8 %v7052_v2  ;;  %v7056_v41 = vunpack.c.0.s8 %v7052_v2 }
 0x5dc   :  { %v6923_v30 = vmax.f32 %v6919_v46, 0.0  ;;  %v7057_v46 = vunpack.c.1.s8 %v7052_v2 }
 0x5dd   :  { %v6894_v26 = vpop.f32.mrf.mxu3  ;;  %v7074_v36 = vcvt.s32.f32 %v7058_v22  ;;  %v7075_v19 = vcvt.s32.f32 %v7059_v55  ;;  %v7072_v57 = vcvt.s32.f32 %v7056_v41 }
 0x5de   :  { %v6925_v33 = vpack.c.bf16 %v6923_v30, %v6921_v37  ;;  %v6895_v29 = vadd.f32 %v6894_v26, %v6881_v28  ;;  %7101 = vmatpush.bf16.msra.mxu2 %v7090_v45  ;;  %v7073_v37 = vcvt.s32.f32 %v7057_v46 }
 0x5df   :  { %v7089_v53 = vpack.c.bf16 %v7075_v19, %v7074_v36 }
 0x5e0   :  { %7023 = vmatmul.bf16.vlgmr.msra.gmra.mxu0 %v6925_v33  ;;  %v6909_v12 = vmul.f32 %v6905_v23, %v6895_v29  ;;  %v7088_v30 = vpack.c.bf16 %v7073_v37, %v7072_v57 }
 0x5e2   :  { %v6918_v4 = vadd.f32 %v6914_v25, %v6909_v12  ;;  %7102 = vmatpush.bf16.msra.mxu2 %v7089_v53 }
 0x5e4   :  { %v6922_v42 = vmax.f32 %v6918_v4, 0.0 }
 0x5e5   :  { %v6896_v17 = vpop.f32.mrf.mxu3 }
 0x5e6   :  { %v6897_v34 = vadd.f32 %v6896_v17, %v6883_v1  ;;  %7103 = vmatpush.bf16.msra.mxu2 %v7088_v30 }
 0x5e8   :  { %v6911_v51 = vmul.f32 %v6905_v23, %v6897_v34 }
 0x5ea   :  { %v6920_v48 = vadd.f32 %v6914_v25, %v6911_v51  ;;  %v7110_v51 = vld [vmem:[#allocation14 + $0x5] ss:$0 sm:$0xff] }
 0x5ec   :  { %v6924_v11 = vmax.f32 %v6920_v48, 0.0 }
 0x5ee   :  { %v6926_v16 = vpack.c.bf16 %v6924_v11, %v6922_v42  ;;  %v7111_v42 = vld [vmem:[#allocation14 + $0x43] ss:$0 sm:$0xff] }
 0x5f0   :  { %7037 = vmatmul.bf16.vlgmr.msra.gmra.mxu1 %v6926_v16 }
 0x65d   :  { %v7024_v26 = vpop.f32.mrf.mxu0 }
 0x665   :  { %v7026_v23 = vpop.f32.mrf.mxu0 }
 0x66d   :  { %v7038_v28 = vpop.f32.mrf.mxu1 }
 0x66e   :  { %v7039_v33 = vadd.f32 %v7038_v28, %v7024_v26 }
 0x670   :  { %v7045_v29 = vmul.f32 %v7043_v50, %v7039_v33 }
 0x672   :  { %v7047_v1 = vadd.f32 %v7045_v29, %v7044_v60 }
 0x674   :  { %v7049_v17 = vmax.f32 %v7047_v1, 0.0 }
 0x675   :  { %v7040_v43 = vpop.f32.mrf.mxu1 }
 0x676   :  { %v7041_v59 = vadd.f32 %v7040_v43, %v7026_v23 }
 0x678   :  { %v7046_v12 = vmul.f32 %v7043_v50, %v7041_v59 }
 0x67a   :  { %v7048_v25 = vadd.f32 %v7046_v12, %v7044_v60 }
 0x67c   :  { %v7050_v34 = vmax.f32 %v7048_v25, 0.0 }
 0x67e   :  { %v7051_v4 = vpack.c.bf16 %v7050_v34, %v7049_v17 }
 0x680   :  { %7104 = vmatmul.bf16.vlgmr.msra.gmra.mxu2 %v7051_v4 }
 0x703   :  { %v7105_v48 = vpop.f32.mrf.mxu2 }
 0x704   :  { %v7112_v11 = vmul.f32 %v7110_v51, %v7105_v48 }
 0x706   :  { %v7114_v16 = vadd.f32 %v7112_v11, %v7111_v42 }
 0x708   :  { %7116 = vst [vmem:[#allocation16] sm:$0xff] %v7114_v16 }
 0x70b   :  { %v7107_v9 = vpop.f32.mrf.mxu2 }
 0x70c   :  { %v7113_v62 = vmul.f32 %v7110_v51, %v7107_v9 }
 0x70e   :  { %v7115_v32 = vadd.f32 %v7113_v62, %v7111_v42 }
 0x710   :  { %7117 = vst [vmem:[#allocation16 + $0x8] sm:$0xff] %v7115_v32 }
 0x711   :  { %7130 = dma.vmem_to_hbm [thread:$0]  %s7123_s7, 256, %s7125_s27, [#allocation4], %s7395_s25, %s7395_s25, %s7396_s26  }
 0x712   :  { %7386 = dma.done.wait [#allocation4], 256  }
 0x713   :  { %7387 = vsyncadd [#allocation4], 4294967040 }
 0x714   :  { %7135 = vsyncpa [#allocation3], 1 }
 0x715   :  { %7136 = vsyncpa [#allocation6], 1 }
 0x716   :  { %7137 = vsyncpa [#allocation9], 1 }
 0x717   :  { %7138 = vsyncpa [#allocation12], 1 }
 0x718   :  { %7139 = vsyncpa [#allocation15], 1 }
 0x719   :  { %7140 = vsyncpa [#allocation4], 1 }

</bundles_post_ra>
